<compile_context>
chip_gen: v6e
topology: v6e:2x2x1
jax: 0.10.0
libtpu: 0.0.40
codegen_flags: <defaults>
</compile_context>

<pallas_src>
import functools

import jax
import jax.numpy as jnp
from jax import lax
from jax.experimental import pallas as pl
from jax.experimental.pallas import tpu as pltpu


def _round_up(x, m):
    return ((x + m - 1) // m) * m


# Below physical VMEM on all generations (v5e/v6e 128 MiB, v7x 64 MiB per TC),
# above the scoped defaults (16 / 32 / 32 MiB).
_VMEM_LIMIT = 48 * 1024 * 1024


# --------------------------------------------------------------------------
# Fused path (z fits comfortably in VMEM): one HBM read of z, one launch.
# --------------------------------------------------------------------------
def _fused_kernel(z_ref, w1_ref, b1_ref, w2_ref, o_ref, *, num_paths, d, n):
    # z_ref: (N, M*D)   w1: (D, H)   b1/w2: (1, H)   o_ref: (N, D)
    w1 = w1_ref[...].astype(jnp.bfloat16)        # bf16 MXU inputs, f32 accumulate
    b1 = b1_ref[...]
    w2 = w2_ref[...]

    # Per-metapath logits  w[m] = mean_n( tanh(z_m @ W1 + b1) ) @ w2
    logits = []
    for m in range(num_paths):                   # M is small & static -> unrolled
        zm = z_ref[:, m * d:(m + 1) * d].astype(jnp.bfloat16)
        hm = jnp.tanh(jnp.dot(zm, w1, preferred_element_type=jnp.float32) + b1)
        hmean = jnp.sum(hm, axis=0, keepdims=True) * (1.0 / n)        # (1, H)
        logits.append(jnp.sum(hmean * w2, axis=1, keepdims=True))     # (1, 1)

    # softmax over the M metapath logits (tiny, fully unrolled)
    wmax = logits[0]
    for m in range(1, num_paths):
        wmax = jnp.maximum(wmax, logits[m])
    exps = [jnp.exp(l - wmax) for l in logits]
    total = exps[0]
    for m in range(1, num_paths):
        total = total + exps[m]
    inv = 1.0 / total
    betas = [e * inv for e in exps]              # M x (1, 1) f32

    # out = sum_m beta[m] * z_m   (pure VPU multiply-adds, f32 accumulation)
    acc = z_ref[:, 0:d] * betas[0]
    for m in range(1, num_paths):
        acc = acc + z_ref[:, m * d:(m + 1) * d] * betas[m]
    o_ref[...] = acc.astype(o_ref.dtype)


# --------------------------------------------------------------------------
# Pass A (streaming): per-metapath hidden sums  sum_n tanh(z_m @ W1 + b1)
# Output block (1, M, H) is the per-core accumulator (resident across i axis).
# --------------------------------------------------------------------------
def _hidden_sum_kernel(z_ref, w1_ref, b1_ref, o_ref, *, num_paths, d, n_valid,
                       tile_n, tiles_per_core, need_mask):
    i = pl.program_id(1)

    @pl.when(i == 0)
    def _init():
        o_ref[...] = jnp.zeros_like(o_ref)

    w1 = w1_ref[...].astype(jnp.bfloat16)        # bf16 MXU inputs
    b1 = b1_ref[...]

    if need_mask:
        # Unclamped global tile index: duplicated (clamped-DMA) tiles and the
        # partial last tile are fully masked out of the accumulation.
        t = pl.program_id(0) * tiles_per_core + i
        row = lax.broadcasted_iota(jnp.int32, (tile_n, 1), 0) + t * tile_n
        mask = row < n_valid

    rows = []
    for m in range(num_paths):                   # unrolled over metapaths
        zm = z_ref[:, m * d:(m + 1) * d].astype(jnp.bfloat16)   # lane slice
        hm = jnp.tanh(jnp.dot(zm, w1, preferred_element_type=jnp.float32) + b1)
        if need_mask:
            hm = jnp.where(mask, hm, 0.0)
        rows.append(jnp.sum(hm, axis=0, keepdims=True))          # (1, H)
    o_ref[...] += jnp.concatenate(rows, axis=0)[None]            # (1, M, H)


# --------------------------------------------------------------------------
# Pass B (streaming): out[n, :] = sum_m beta[m] * z[n, m, :]
# --------------------------------------------------------------------------
def _apply_kernel(z_ref, beta_ref, o_ref, *, num_paths, d):
    # z_ref: (tile_n, M*D)   beta_ref: (M,) f32 in SMEM (scalar * vector MACs)
    acc = z_ref[:, 0:d] * beta_ref[0]
    for m in range(1, num_paths):
        acc = acc + z_ref[:, m * d:(m + 1) * d] * beta_ref[m]
    o_ref[...] = acc.astype(o_ref.dtype)


def semantic_attention(z, w1, b1, w2, *, tile_n=None, force_two_pass=False):
    """z: (N, M, D) as in the PyTorch module. Returns (N, D)."""
    n, num_paths, d = z.shape
    h = w1.shape[1]
    itemsize = jnp.dtype(z.dtype).itemsize

    z2d = z.reshape(n, num_paths * d)    # contiguous reshape: no HBM transpose
    b1_2d = b1.reshape(1, h)

    # ---- Fused single-kernel path: one HBM read of z, one launch ----------
    if (not force_two_pass) and (n * num_paths * d * itemsize <= 8 * 1024 * 1024):
        w2_row = jnp.reshape(w2, (1, h)).astype(jnp.float32)
        return pl.pallas_call(
            functools.partial(_fused_kernel, num_paths=num_paths, d=d, n=n),
            out_shape=jax.ShapeDtypeStruct((n, d), z.dtype),
            grid=(1,),
            in_specs=[
                pl.BlockSpec((n, num_paths * d), lambda i: (0, 0)),
                pl.BlockSpec((d, h), lambda i: (0, 0)),
                pl.BlockSpec((1, h), lambda i: (0, 0)),
                pl.BlockSpec((1, h), lambda i: (0, 0)),
            ],
            out_specs=pl.BlockSpec((n, d), lambda i: (0, 0)),
            compiler_params=pltpu.CompilerParams(
                dimension_semantics=("arbitrary",),
                vmem_limit_bytes=_VMEM_LIMIT),
        )(z2d, w1, b1_2d, w2_row)

    # ---- Two-pass streaming path -------------------------------------------
    # Tile size: big (>= ~2048 rows when possible) to amortize per-step
    # pipeline overhead; 24 MiB double-buffer budget keeps it v7x-safe.
    if tile_n is None:
        budget = 24 * 1024 * 1024
        row_bytes = (num_paths * d + d) * itemsize
        tile_n = max(8, min(2048, (budget // (2 * row_bytes)) // 8 * 8))
    tile_n = int(max(8, min(_round_up(tile_n, 8), _round_up(n, 8))))
    num_tiles = pl.cdiv(n, tile_n)

    # Pass A: 2-way split along the grid's leading "parallel" axis (uses both
    # TensorCores on v7x; harmless / same total work on v5e & v6e).
    split = 2 if num_tiles >= 2 else 1
    tpc = pl.cdiv(num_tiles, split)
    need_mask = (split * tpc * tile_n) != n
    need_clamp = (split * tpc) != num_tiles
    if need_clamp:
        z_map_a = lambda c, i: (jnp.minimum(c * tpc + i, num_tiles - 1), 0)
    else:
        z_map_a = lambda c, i: (c * tpc + i, 0)

    hsum_parts = pl.pallas_call(
        functools.partial(_hidden_sum_kernel, num_paths=num_paths, d=d,
                          n_valid=n, tile_n=tile_n, tiles_per_core=tpc,
                          need_mask=need_mask),
        out_shape=jax.ShapeDtypeStruct((split, num_paths, h), jnp.float32),
        grid=(split, tpc),
        in_specs=[
            pl.BlockSpec((tile_n, num_paths * d), z_map_a),
            pl.BlockSpec((d, h), lambda c, i: (0, 0)),
            pl.BlockSpec((1, h), lambda c, i: (0, 0)),
        ],
        out_specs=pl.BlockSpec((1, num_paths, h), lambda c, i: (c, 0, 0)),
        compiler_params=pltpu.CompilerParams(
            dimension_semantics=("parallel", "arbitrary"),
            vmem_limit_bytes=_VMEM_LIMIT),
    )(z2d, w1, b1_2d)

    # O(M) epilogue: combine per-core partials, project with w2, softmax.
    hmean = hsum_parts.sum(axis=0) * (1.0 / n)                 # (M, H) f32
    logits = hmean @ w2.astype(jnp.float32)                    # (M,)
    beta = jax.nn.softmax(logits).astype(jnp.float32)          # (M,)

    out = pl.pallas_call(
        functools.partial(_apply_kernel, num_paths=num_paths, d=d),
        out_shape=jax.ShapeDtypeStruct((n, d), z.dtype),
        grid=(num_tiles,),
        in_specs=[
            pl.BlockSpec((tile_n, num_paths * d), lambda i: (i, 0)),
            pl.BlockSpec(memory_space=pltpu.MemorySpace.SMEM),   # beta scalars
        ],
        out_specs=pl.BlockSpec((tile_n, d), lambda i: (i, 0)),
        compiler_params=pltpu.CompilerParams(
            dimension_semantics=("parallel",),
            vmem_limit_bytes=_VMEM_LIMIT),
    )(z2d, beta)

    return out


def reference(z, w1, b1, w2):
    """Pure-JAX (f32) mirror of the PyTorch forward for verification."""
    hidden = jnp.tanh(jnp.einsum("nmd,dh->nmh", z, w1) + b1)   # (N, M, H)
    s = jnp.einsum("nmh,h->nm", hidden, w2)                    # (N, M)
    w = s.mean(axis=0)                                         # (M,)
    beta = jax.nn.softmax(w, axis=0)                           # (M,)
    return (beta[None, :, None] * z).sum(axis=1)               # (N, D)


if __name__ == "__main__":
    key = jax.random.PRNGKey(0)
    # nodes, metapaths, in_size, hidden_size (module default hidden=128)
    N, M, D, H = 1024, 4, 128, 128
    kz, kw1, kb1, kw2 = jax.random.split(key, 4)

    z = jax.random.normal(kz, (N, M, D), dtype=jnp.float32)
    # Deterministic in-script parameter init (xavier-like scaling), no checkpoint.
    w1 = jax.random.normal(kw1, (D, H), dtype=jnp.float32) * (2.0 / (D + H)) ** 0.5
    b1 = jax.random.normal(kb1, (H,), dtype=jnp.float32) * 0.01
    w2 = jax.random.normal(kw2, (H,), dtype=jnp.float32) * (2.0 / (H + 1)) ** 0.5

    ref = reference(z, w1, b1, w2)

    # 1) Fused single-kernel path (z fits in VMEM).
    out_fused = semantic_attention(z, w1, b1, w2)
    jax.block_until_ready(out_fused)
    assert out_fused.shape == (N, D)
    # bf16 MXU inputs (f32 accumulation) -> slightly looser tolerance vs f32 ref.
    assert jnp.allclose(out_fused, ref, atol=1e-2, rtol=1e-2), "fused path mismatch"

    # 2) Two-pass streaming path (aligned N, multi-tile grid, 2-core pass-A split).
    out_stream = semantic_attention(z, w1, b1, w2, tile_n=256, force_two_pass=True)
    jax.block_until_ready(out_stream)
    assert jnp.allclose(out_stream, ref, atol=1e-2, rtol=1e-2), "two-pass mismatch"

    # 3) Two-pass path with ragged N (partial last tile + odd tile count:
    #    exercises the row mask and the clamped index_map).
    n2 = 1000
    z2 = z[:n2]
    ref2 = reference(z2, w1, b1, w2)
    out2 = semantic_attention(z2, w1, b1, w2, tile_n=384, force_two_pass=True)
    jax.block_until_ready(out2)
    assert out2.shape == (n2, D)
    assert jnp.allclose(out2, ref2, atol=1e-2, rtol=1e-2), "ragged two-pass mismatch"

    print("KERNEL_OK")
</pallas_src>

<mosaic_0001>
module attributes {stable_mosaic.version = 11 : i64} {
  func.func @_fused_kernel(%arg0: i32, %arg1: memref<1024x512xf32, #tpu.memory_space<vmem>>, %arg2: memref<128x128xf32, #tpu.memory_space<vmem>>, %arg3: memref<1x128xf32, #tpu.memory_space<vmem>>, %arg4: memref<1x128xf32, #tpu.memory_space<vmem>>, %arg5: memref<1024x128xf32, #tpu.memory_space<vmem>>) attributes {dimension_semantics = [#tpu.dimension_semantics<arbitrary>], iteration_bounds = array<i64: 1>, scalar_prefetch = 0 : i64, scratch_operands = 0 : i64, tpu.core_type = #tpu.core_type<tc>, window_params = [{pipeline_mode = #tpu.pipeline_mode<synchronous>, transform_indices = @transform_0, window_bounds = array<i64: 1024, 512>}, {pipeline_mode = #tpu.pipeline_mode<synchronous>, transform_indices = @transform_1, window_bounds = array<i64: 128, 128>}, {pipeline_mode = #tpu.pipeline_mode<synchronous>, transform_indices = @transform_2, window_bounds = array<i64: 1, 128>}, {pipeline_mode = #tpu.pipeline_mode<synchronous>, transform_indices = @transform_3, window_bounds = array<i64: 1, 128>}, {pipeline_mode = #tpu.pipeline_mode<synchronous>, transform_indices = @transform_4, window_bounds = array<i64: 1024, 128>}]} {
    %c0 = arith.constant 0 : index
    %c0_0 = arith.constant 0 : index
    %0 = vector.load %arg2[%c0, %c0_0] : memref<128x128xf32, #tpu.memory_space<vmem>>, vector<128x128xf32>
    %1 = arith.truncf %0 : vector<128x128xf32> to vector<128x128xbf16>
    %c0_1 = arith.constant 0 : index
    %c0_2 = arith.constant 0 : index
    %2 = vector.load %arg3[%c0_1, %c0_2] : memref<1x128xf32, #tpu.memory_space<vmem>>, vector<1x128xf32>
    %c0_3 = arith.constant 0 : index
    %c0_4 = arith.constant 0 : index
    %3 = vector.load %arg4[%c0_3, %c0_4] : memref<1x128xf32, #tpu.memory_space<vmem>>, vector<1x128xf32>
    %c0_5 = arith.constant 0 : index
    %c0_6 = arith.constant 0 : index
    %4 = vector.load %arg1[%c0_5, %c0_6] : memref<1024x512xf32, #tpu.memory_space<vmem>>, vector<1024x128xf32>
    %5 = arith.truncf %4 : vector<1024x128xf32> to vector<1024x128xbf16>
    %cst = arith.constant dense<0.000000e+00> : vector<1024x128xf32>
    %6 = tpu.matmul %5, %1, %cst {dimension_numbers = #tpu.dot_dimension_numbers<[1], [0], [0], [1], [0, 0, 1, 1], [], []>} : vector<1024x128xbf16>, vector<128x128xbf16>, vector<1024x128xf32> -> vector<1024x128xf32>
    %7 = vector.broadcast %2 : vector<1x128xf32> to vector<1024x128xf32>
    %8 = arith.addf %6, %7 : vector<1024x128xf32>
    %9 = math.tanh %8 : vector<1024x128xf32>
    %cst_7 = arith.constant dense<0.000000e+00> : vector<128xf32>
    %10 = vector.multi_reduction <add>, %9, %cst_7 [0] : vector<1024x128xf32> to vector<128xf32>
    %11 = vector.shape_cast %10 : vector<128xf32> to vector<1x128xf32>
    %cst_8 = arith.constant 9.765625E-4 : f32
    %12 = vector.broadcast %cst_8 : f32 to vector<1x128xf32>
    %13 = arith.mulf %11, %12 : vector<1x128xf32>
    %14 = arith.mulf %13, %3 : vector<1x128xf32>
    %cst_9 = arith.constant dense<0.000000e+00> : vector<1xf32>
    %15 = vector.multi_reduction <add>, %14, %cst_9 [1] : vector<1x128xf32> to vector<1xf32>
    %16 = vector.shape_cast %15 : vector<1xf32> to vector<1x1xf32>
    %c0_10 = arith.constant 0 : index
    %c128 = arith.constant 128 : index
    %17 = vector.load %arg1[%c0_10, %c128] : memref<1024x512xf32, #tpu.memory_space<vmem>>, vector<1024x128xf32>
    %18 = arith.truncf %17 : vector<1024x128xf32> to vector<1024x128xbf16>
    %cst_11 = arith.constant dense<0.000000e+00> : vector<1024x128xf32>
    %19 = tpu.matmul %18, %1, %cst_11 {dimension_numbers = #tpu.dot_dimension_numbers<[1], [0], [0], [1], [0, 0, 1, 1], [], []>} : vector<1024x128xbf16>, vector<128x128xbf16>, vector<1024x128xf32> -> vector<1024x128xf32>
    %20 = vector.broadcast %2 : vector<1x128xf32> to vector<1024x128xf32>
    %21 = arith.addf %19, %20 : vector<1024x128xf32>
    %22 = math.tanh %21 : vector<1024x128xf32>
    %cst_12 = arith.constant dense<0.000000e+00> : vector<128xf32>
    %23 = vector.multi_reduction <add>, %22, %cst_12 [0] : vector<1024x128xf32> to vector<128xf32>
    %24 = vector.shape_cast %23 : vector<128xf32> to vector<1x128xf32>
    %cst_13 = arith.constant 9.765625E-4 : f32
    %25 = vector.broadcast %cst_13 : f32 to vector<1x128xf32>
    %26 = arith.mulf %24, %25 : vector<1x128xf32>
    %27 = arith.mulf %26, %3 : vector<1x128xf32>
    %cst_14 = arith.constant dense<0.000000e+00> : vector<1xf32>
    %28 = vector.multi_reduction <add>, %27, %cst_14 [1] : vector<1x128xf32> to vector<1xf32>
    %29 = vector.shape_cast %28 : vector<1xf32> to vector<1x1xf32>
    %c0_15 = arith.constant 0 : index
    %c256 = arith.constant 256 : index
    %30 = vector.load %arg1[%c0_15, %c256] : memref<1024x512xf32, #tpu.memory_space<vmem>>, vector<1024x128xf32>
    %31 = arith.truncf %30 : vector<1024x128xf32> to vector<1024x128xbf16>
    %cst_16 = arith.constant dense<0.000000e+00> : vector<1024x128xf32>
    %32 = tpu.matmul %31, %1, %cst_16 {dimension_numbers = #tpu.dot_dimension_numbers<[1], [0], [0], [1], [0, 0, 1, 1], [], []>} : vector<1024x128xbf16>, vector<128x128xbf16>, vector<1024x128xf32> -> vector<1024x128xf32>
    %33 = vector.broadcast %2 : vector<1x128xf32> to vector<1024x128xf32>
    %34 = arith.addf %32, %33 : vector<1024x128xf32>
    %35 = math.tanh %34 : vector<1024x128xf32>
    %cst_17 = arith.constant dense<0.000000e+00> : vector<128xf32>
    %36 = vector.multi_reduction <add>, %35, %cst_17 [0] : vector<1024x128xf32> to vector<128xf32>
    %37 = vector.shape_cast %36 : vector<128xf32> to vector<1x128xf32>
    %cst_18 = arith.constant 9.765625E-4 : f32
    %38 = vector.broadcast %cst_18 : f32 to vector<1x128xf32>
    %39 = arith.mulf %37, %38 : vector<1x128xf32>
    %40 = arith.mulf %39, %3 : vector<1x128xf32>
    %cst_19 = arith.constant dense<0.000000e+00> : vector<1xf32>
    %41 = vector.multi_reduction <add>, %40, %cst_19 [1] : vector<1x128xf32> to vector<1xf32>
    %42 = vector.shape_cast %41 : vector<1xf32> to vector<1x1xf32>
    %c0_20 = arith.constant 0 : index
    %c384 = arith.constant 384 : index
    %43 = vector.load %arg1[%c0_20, %c384] : memref<1024x512xf32, #tpu.memory_space<vmem>>, vector<1024x128xf32>
    %44 = arith.truncf %43 : vector<1024x128xf32> to vector<1024x128xbf16>
    %cst_21 = arith.constant dense<0.000000e+00> : vector<1024x128xf32>
    %45 = tpu.matmul %44, %1, %cst_21 {dimension_numbers = #tpu.dot_dimension_numbers<[1], [0], [0], [1], [0, 0, 1, 1], [], []>} : vector<1024x128xbf16>, vector<128x128xbf16>, vector<1024x128xf32> -> vector<1024x128xf32>
    %46 = vector.broadcast %2 : vector<1x128xf32> to vector<1024x128xf32>
    %47 = arith.addf %45, %46 : vector<1024x128xf32>
    %48 = math.tanh %47 : vector<1024x128xf32>
    %cst_22 = arith.constant dense<0.000000e+00> : vector<128xf32>
    %49 = vector.multi_reduction <add>, %48, %cst_22 [0] : vector<1024x128xf32> to vector<128xf32>
    %50 = vector.shape_cast %49 : vector<128xf32> to vector<1x128xf32>
    %cst_23 = arith.constant 9.765625E-4 : f32
    %51 = vector.broadcast %cst_23 : f32 to vector<1x128xf32>
    %52 = arith.mulf %50, %51 : vector<1x128xf32>
    %53 = arith.mulf %52, %3 : vector<1x128xf32>
    %cst_24 = arith.constant dense<0.000000e+00> : vector<1xf32>
    %54 = vector.multi_reduction <add>, %53, %cst_24 [1] : vector<1x128xf32> to vector<1xf32>
    %55 = vector.shape_cast %54 : vector<1xf32> to vector<1x1xf32>
    %56 = arith.maximumf %16, %29 : vector<1x1xf32>
    %57 = arith.maximumf %56, %42 : vector<1x1xf32>
    %58 = arith.maximumf %57, %55 : vector<1x1xf32>
    %59 = arith.subf %16, %58 : vector<1x1xf32>
    %60 = math.exp %59 : vector<1x1xf32>
    %61 = arith.subf %29, %58 : vector<1x1xf32>
    %62 = math.exp %61 : vector<1x1xf32>
    %63 = arith.subf %42, %58 : vector<1x1xf32>
    %64 = math.exp %63 : vector<1x1xf32>
    %65 = arith.subf %55, %58 : vector<1x1xf32>
    %66 = math.exp %65 : vector<1x1xf32>
    %67 = arith.addf %60, %62 : vector<1x1xf32>
    %68 = arith.addf %67, %64 : vector<1x1xf32>
    %69 = arith.addf %68, %66 : vector<1x1xf32>
    %cst_25 = arith.constant 1.000000e+00 : f32
    %70 = vector.broadcast %cst_25 : f32 to vector<1x1xf32>
    %71 = arith.divf %70, %69 : vector<1x1xf32>
    %72 = arith.mulf %60, %71 : vector<1x1xf32>
    %73 = arith.mulf %62, %71 : vector<1x1xf32>
    %74 = arith.mulf %64, %71 : vector<1x1xf32>
    %75 = arith.mulf %66, %71 : vector<1x1xf32>
    %c0_26 = arith.constant 0 : index
    %c0_27 = arith.constant 0 : index
    %76 = vector.load %arg1[%c0_26, %c0_27] : memref<1024x512xf32, #tpu.memory_space<vmem>>, vector<1024x128xf32>
    %77 = vector.broadcast %72 : vector<1x1xf32> to vector<1024x128xf32>
    %78 = arith.mulf %76, %77 : vector<1024x128xf32>
    %c0_28 = arith.constant 0 : index
    %c128_29 = arith.constant 128 : index
    %79 = vector.load %arg1[%c0_28, %c128_29] : memref<1024x512xf32, #tpu.memory_space<vmem>>, vector<1024x128xf32>
    %80 = vector.broadcast %73 : vector<1x1xf32> to vector<1024x128xf32>
    %81 = arith.mulf %79, %80 : vector<1024x128xf32>
    %82 = arith.addf %78, %81 : vector<1024x128xf32>
    %c0_30 = arith.constant 0 : index
    %c256_31 = arith.constant 256 : index
    %83 = vector.load %arg1[%c0_30, %c256_31] : memref<1024x512xf32, #tpu.memory_space<vmem>>, vector<1024x128xf32>
    %84 = vector.broadcast %74 : vector<1x1xf32> to vector<1024x128xf32>
    %85 = arith.mulf %83, %84 : vector<1024x128xf32>
    %86 = arith.addf %82, %85 : vector<1024x128xf32>
    %c0_32 = arith.constant 0 : index
    %c384_33 = arith.constant 384 : index
    %87 = vector.load %arg1[%c0_32, %c384_33] : memref<1024x512xf32, #tpu.memory_space<vmem>>, vector<1024x128xf32>
    %88 = vector.broadcast %75 : vector<1x1xf32> to vector<1024x128xf32>
    %89 = arith.mulf %87, %88 : vector<1024x128xf32>
    %90 = arith.addf %86, %89 : vector<1024x128xf32>
    %c0_34 = arith.constant 0 : index
    %c0_35 = arith.constant 0 : index
    %91 = vector.load %arg5[%c0_34, %c0_35] : memref<1024x128xf32, #tpu.memory_space<vmem>>, vector<1024x128xf32>
    tpu.vector_store %arg5[%c0_34, %c0_35], %90 {strides = array<i32>} : memref<1024x128xf32, #tpu.memory_space<vmem>>, vector<1024x128xf32>,
    return
  }
  func.func @transform_0(%arg0: i32) -> (i32, i32) {
    %c0_i32 = arith.constant 0 : i32
    %c0_i32_0 = arith.constant 0 : i32
    %c0_i32_1 = arith.constant 0 : i32
    return %c0_i32, %c0_i32_0 : i32, i32
  }
  func.func @transform_1(%arg0: i32) -> (i32, i32) {
    %c0_i32 = arith.constant 0 : i32
    %c0_i32_0 = arith.constant 0 : i32
    %c0_i32_1 = arith.constant 0 : i32
    return %c0_i32, %c0_i32_0 : i32, i32
  }
  func.func @transform_2(%arg0: i32) -> (i32, i32) {
    %c0_i32 = arith.constant 0 : i32
    %c0_i32_0 = arith.constant 0 : i32
    %c0_i32_1 = arith.constant 0 : i32
    return %c0_i32, %c0_i32_0 : i32, i32
  }
  func.func @transform_3(%arg0: i32) -> (i32, i32) {
    %c0_i32 = arith.constant 0 : i32
    %c0_i32_0 = arith.constant 0 : i32
    %c0_i32_1 = arith.constant 0 : i32
    return %c0_i32, %c0_i32_0 : i32, i32
  }
  func.func @transform_4(%arg0: i32) -> (i32, i32) {
    %c0_i32 = arith.constant 0 : i32
    %c0_i32_0 = arith.constant 0 : i32
    %c0_i32_1 = arith.constant 0 : i32
    return %c0_i32, %c0_i32_0 : i32, i32
  }
}

</mosaic_0001>

<bundles_post_ra>
// kernel: tpu_custom_call.1
= control target key start
LH: loop header
LB: loop body
LE: loop exit
PB: predicated region body
PF: predicated region fallthrough
CT: control target
= control target key end

     0   :  { %9 = vsyncpa [#allocation3], 0  ;;  %s11870_s0 = inlined_call_operand.hbm [shape: f32[1024,512], index: 0, kind: input, shape index: {}]   ;;  %s11871_s1 = inlined_call_operand.hbm [shape: f32[128,128], index: 1, kind: input, shape index: {}]   ;;  %s11872_s2 = inlined_call_operand.hbm [shape: f32[1,128], index: 2, kind: input, shape index: {}]   ;;  %s11873_s3 = inlined_call_operand.hbm [shape: f32[1,128], index: 3, kind: input, shape index: {}]   ;;  %s11874_s4 = inlined_call_operand.hbm [shape: f32[1024,128], index: 4, kind: output, shape index: {}]  }
   0x1   :  { %10 = vsyncpa [#allocation6], 0 }
   0x2   :  { %11 = vsyncpa [#allocation9], 0 }
   0x3   :  { %12 = vsyncpa [#allocation4], 0  ;;  %s7733_s15 = smov [#allocation5]  }
   0x4   :  { %s30_s16 = sshll.u32 %s7733_s15, 4  ;;  %s31_s16 = int_to_ptr.vmem [resolvable:$true] %s30_s16 }
   0x5   :  { %s7633_s17 = scalar_lea.vmem %s31_s16, 2048  ;;  %p7638_p1 = scmp.lt.s32.totalorder %s31_s16, %s31_s16 }
   0x6   :  { %p7634_p0 = scmp.ne.s32.totalorder %s31_s16, %s7633_s17  ;;  %p7639_p2 = scmp.lt.s32.totalorder %s7633_s17, %s7633_s17 }
   0x8   :  { %p7640_p3 = por %p7639_p2, %p7638_p1 }
   0xa   :  { %p7641_p4 = pnand %p7640_p3, %p7634_p0 }
   0xc   :  { %7644 = shalt.err (!%p7641_p4)
}
   0xd   :  { %s7734_s18 = smov 128   ;;  %s7735_s19 = smov 8  }
   0xe   :  { %36 = dma.hbm_to_vmem [thread:$0]  %s11871_s1, 2048, %s31_s16, [#allocation6], %s7734_s18, %s7734_s18, %s7735_s19  }
   0xf   :  { %s7736_s22 = smov [#allocation2]  }
  0x10   :  { %s18_s23 = sshll.u32 %s7736_s22, 4  ;;  %s19_s23 = int_to_ptr.vmem [resolvable:$true] %s18_s23 }
  0x11   :  { %s7653_s24 = scalar_lea.vmem %s19_s23, 65536  ;;  %p7658_p6 = scmp.lt.s32.totalorder %s19_s23, %s19_s23 }
  0x12   :  { %p7654_p5 = scmp.ne.s32.totalorder %s19_s23, %s7653_s24  ;;  %p7659_p7 = scmp.lt.s32.totalorder %s7653_s24, %s7653_s24 }
  0x14   :  { %p7660_p8 = por %p7659_p7, %p7658_p6 }
  0x16   :  { %p7661_p9 = pnand %p7660_p8, %p7654_p5 }
  0x18   :  { %7664 = shalt.err (!%p7661_p9)
}
  0x19   :  { %s7737_s25 = smov 512   ;;  %s7738_s26 = smov 32  }
  0x1a   :  { %24 = dma.hbm_to_vmem [thread:$0]  %s11870_s0, 65536, %s19_s23, [#allocation3], %s7737_s25, %s7737_s25, %s7738_s26  }
  0x1b   :  { %s7739_s29 = smov [#allocation7]   ;;  %s7740_s5 = smov [#allocation8]  }
  0x1c   :  { %s43_s30 = sshll.u32 %s7739_s29, 4  ;;  %s53_s1 = sshll.u32 %s7740_s5, 4  ;;  %s44_s30 = int_to_ptr.vmem [resolvable:$true] %s43_s30  ;;  %s54_s1 = int_to_ptr.vmem [resolvable:$true] %s53_s1 }
  0x1d   :  { %s7673_s6 = scalar_lea.vmem %s44_s30, 16  ;;  %s7677_s7 = scalar_lea.vmem %s44_s30, 32 }
  0x1e   :  { %p7674_p10 = scmp.ne.s32.totalorder %s44_s30, %s7673_s6  ;;  %p7678_p11 = scmp.lt.s32.totalorder %s44_s30, %s44_s30 }
  0x1f   :  { %p7679_p12 = scmp.lt.s32.totalorder %s7677_s7, %s7673_s6 }
  0x21   :  { %p7680_p13 = por %p7679_p12, %p7678_p11 }
  0x23   :  { %p7681_p0 = pnand %p7680_p13, %p7674_p10 }
  0x25   :  { %7684 = shalt.err (!%p7681_p0)
}
  0x26   :  { %46 = dma.hbm_to_vmem [thread:$0]  %s11872_s2, 16, %s44_s30, [#allocation6]  }
  0x27   :  { %s7693_s10 = scalar_lea.vmem %s54_s1, 16  ;;  %s7697_s0 = scalar_lea.vmem %s54_s1, 32 }
  0x28   :  { %p7694_p1 = scmp.ne.s32.totalorder %s54_s1, %s7693_s10  ;;  %p7698_p2 = scmp.lt.s32.totalorder %s54_s1, %s54_s1 }
  0x29   :  { %p7699_p3 = scmp.lt.s32.totalorder %s7697_s0, %s7693_s10 }
  0x2b   :  { %p7700_p4 = por %p7699_p3, %p7698_p2 }
  0x2d   :  { %p7701_p5 = pnand %p7700_p4, %p7694_p1 }
  0x2f   :  { %7704 = shalt.err (!%p7701_p5)
}
  0x30   :  { %56 = dma.hbm_to_vmem [thread:$0]  %s11873_s3, 16, %s54_s1, [#allocation9]  }
  0x31   :  { %7725 = dma.done.wait [#allocation3], 65536  }
  0x32   :  { %7726 = vsyncadd [#allocation3], 4294901760 }
  0x33   :  { %7727 = dma.done.wait [#allocation6], 2064  }
  0x34   :  { %7728 = vsyncadd [#allocation6], 4294965232 }
  0x35   :  { %7729 = dma.done.wait [#allocation9], 16  }
  0x36   :  { %7730 = vsyncadd [#allocation9], 4294967280  ;;  %v84_v0 = vld [vmem:[#allocation5 + $0x70] sm:$0xff]  ;;  %v85_v1 = vld [vmem:[#allocation5 + $0x78] sm:$0xff]  ;;  %vm1102_vm0 = vcmask 1040384   ;;  %s7741_s2 = smov [#allocation10]  }
  0x37   :  { %v82_v2 = vld [vmem:[#allocation5 + $0x60] sm:$0xff]  ;;  %v7782_v3 = vpack.c.bf16 %v85_v1, %v84_v0  ;;  %v83_v4 = vld [vmem:[#allocation5 + $0x68] sm:$0xff]  ;;  %v80_v6 = vld [vmem:[#allocation5 + $0x50] sm:$0xff]  ;;  %s5184_s3 = sshll.u32 %s7741_s2, 4  ;;  %s5185_s3 = int_to_ptr.vmem [resolvable:$true] %s5184_s3 }
  0x38   :  { %v7784_v5 = vpack.c.bf16 %v83_v4, %v82_v2  ;;  %v81_v7 = vld [vmem:[#allocation5 + $0x58] sm:$0xff]  ;;  %v78_v9 = vld [vmem:[#allocation5 + $0x40] sm:$0xff]  ;;  %v79_v12 = vld [vmem:[#allocation5 + $0x48] sm:$0xff]  ;;  %s7705_s13 = scalar_lea.vmem %s5185_s3, 16384  ;;  %p7710_p7 = scmp.lt.s32.totalorder %s5185_s3, %s5185_s3 }
  0x39   :  { %5487 = vmatprep.subr.bf16.mxu0 %v7782_v3  ;;  %5631 = vmatprep.subr.bf16.mxu1 %v7782_v3  ;;  %v7792_v8 = vpack.c.bf16 %v81_v7, %v80_v6  ;;  %v96_v10 = vld [vmem:[#allocation2] sm:$0xff]  ;;  %v1106_v14 = vld [vmem:[#allocation2 + $0x8] sm:$0xff]  ;;  %v7798_v17 = vpack.c.bf16 %v79_v12, %v78_v9  ;;  %v76_v18 = vld [vmem:[#allocation5 + $0x30] sm:$0xff]  ;;  %p7706_p6 = scmp.ne.s32.totalorder %s5185_s3, %s7705_s13  ;;  %p7711_p8 = scmp.lt.s32.totalorder %s7705_s13, %s7705_s13 }
  0x3a   :  { %5488 = vmatpush3.bf16.msra.mxu0 %v7782_v3  ;;  %5632 = vmatpush3.bf16.msra.mxu1 %v7782_v3  ;;  %v97_v11 = vld [vmem:[#allocation2 + $0x20] sm:$0xff]  ;;  %v1107_v15 = vld [vmem:[#allocation2 + $0x28] sm:$0xff]  ;;  %v77_v19 = vld [vmem:[#allocation5 + $0x38] sm:$0xff] }
  0x3b   :  { %5489 = vmatprep.subr.bf16.mxu0 %v7784_v5  ;;  %5633 = vmatprep.subr.bf16.mxu1 %v7784_v5  ;;  %v224_v13 = vpack.c.bf16 %v97_v11, %v96_v10  ;;  %v1234_v16 = vpack.c.bf16 %v1107_v15, %v1106_v14  ;;  %v7804_v20 = vpack.c.bf16 %v77_v19, %v76_v18  ;;  %v74_v21 = vld [vmem:[#allocation5 + $0x20] sm:$0xff]  ;;  %v75_v22 = vld [vmem:[#allocation5 + $0x28] sm:$0xff]  ;;  %v72_v24 = vld [vmem:[#allocation5 + $0x10] sm:$0xff]  ;;  %p7712_p9 = por %p7711_p8, %p7710_p7 }
  0x3c   :  { %v7810_v23 = vpack.c.bf16 %v75_v22, %v74_v21  ;;  %v73_v25 = vld [vmem:[#allocation5 + $0x18] sm:$0xff]  ;;  %v70_v27 = vld [vmem:[#allocation5] sm:$0xff]  ;;  %v71_v28 = vld [vmem:[#allocation5 + $0x8] sm:$0xff] }
  0x3d   :  { %5503 = vmatprep.mubr.bf16.mxu0 %v224_v13  ;;  %5647 = vmatprep.mubr.bf16.mxu1 %v1234_v16  ;;  %v7816_v26 = vpack.c.bf16 %v73_v25, %v72_v24  ;;  %v7822_v29 = vpack.c.bf16 %v71_v28, %v70_v27  ;;  %v98_v30 = vld [vmem:[#allocation2 + $0x40] sm:$0xff]  ;;  %v1108_v32 = vld [vmem:[#allocation2 + $0x48] sm:$0xff]  ;;  %p7713_p10 = pnand %p7712_p9, %p7706_p6 }
  0x3e   :  { %5490 = vmatpush3.bf16.msra.mxu0 %v7784_v5  ;;  %5634 = vmatpush3.bf16.msra.mxu1 %v7784_v5  ;;  %v99_v31 = vld [vmem:[#allocation2 + $0x60] sm:$0xff]  ;;  %v1109_v33 = vld [vmem:[#allocation2 + $0x68] sm:$0xff] }
  0x3f   :  { %5491 = vmatprep.subr.bf16.mxu0 %v7792_v8  ;;  %5635 = vmatprep.subr.bf16.mxu1 %v7792_v8  ;;  %v100_v34 = vld [vmem:[#allocation2 + $0x80] sm:$0xff]  ;;  %v1110_v36 = vld [vmem:[#allocation2 + $0x88] sm:$0xff]  ;;  %v225_v38 = vpack.c.bf16 %v99_v31, %v98_v30  ;;  %v1235_v39 = vpack.c.bf16 %v1109_v33, %v1108_v32 }
  0x40   :  { %v101_v35 = vld [vmem:[#allocation2 + $0xa0] sm:$0xff]  ;;  %v1111_v37 = vld [vmem:[#allocation2 + $0xa8] sm:$0xff] }
  0x41   :  { %v226_v40 = vpack.c.bf16 %v101_v35, %v100_v34  ;;  %v1236_v41 = vpack.c.bf16 %v1111_v37, %v1110_v36  ;;  %v102_v42 = vld [vmem:[#allocation2 + $0xc0] sm:$0xff]  ;;  %v1112_v44 = vld [vmem:[#allocation2 + $0xc8] sm:$0xff] }
  0x42   :  { %5492 = vmatpush3.bf16.msra.mxu0 %v7792_v8  ;;  %5636 = vmatpush3.bf16.msra.mxu1 %v7792_v8  ;;  %v103_v43 = vld [vmem:[#allocation2 + $0xe0] sm:$0xff]  ;;  %v1113_v45 = vld [vmem:[#allocation2 + $0xe8] sm:$0xff] }
  0x43   :  { %5493 = vmatprep.subr.bf16.mxu0 %v7798_v17  ;;  %5637 = vmatprep.subr.bf16.mxu1 %v7798_v17  ;;  %v104_v46 = vld [vmem:[#allocation2 + $0x100] sm:$0xff]  ;;  %v1114_v48 = vld [vmem:[#allocation2 + $0x108] sm:$0xff]  ;;  %v227_v50 = vpack.c.bf16 %v103_v43, %v102_v42  ;;  %v1237_v51 = vpack.c.bf16 %v1113_v45, %v1112_v44 }
  0x44   :  { %v105_v47 = vld [vmem:[#allocation2 + $0x120] sm:$0xff]  ;;  %v1115_v49 = vld [vmem:[#allocation2 + $0x128] sm:$0xff] }
  0x45   :  { %v228_v52 = vpack.c.bf16 %v105_v47, %v104_v46  ;;  %v1238_v53 = vpack.c.bf16 %v1115_v49, %v1114_v48  ;;  %v106_v54 = vld [vmem:[#allocation2 + $0x140] sm:$0xff]  ;;  %v1116_v56 = vld [vmem:[#allocation2 + $0x148] sm:$0xff] }
  0x46   :  { %5494 = vmatpush3.bf16.msra.mxu0 %v7798_v17  ;;  %5638 = vmatpush3.bf16.msra.mxu1 %v7798_v17  ;;  %v107_v55 = vld [vmem:[#allocation2 + $0x160] sm:$0xff]  ;;  %v1117_v57 = vld [vmem:[#allocation2 + $0x168] sm:$0xff] }
  0x47   :  { %5495 = vmatprep.subr.bf16.mxu0 %v7804_v20  ;;  %5639 = vmatprep.subr.bf16.mxu1 %v7804_v20  ;;  %v108_v58 = vld [vmem:[#allocation2 + $0x180] sm:$0xff]  ;;  %v1118_v60 = vld [vmem:[#allocation2 + $0x188] sm:$0xff]  ;;  %v229_v62 = vpack.c.bf16 %v107_v55, %v106_v54  ;;  %v1239_v63 = vpack.c.bf16 %v1117_v57, %v1116_v56 }
  0x48   :  { %v109_v59 = vld [vmem:[#allocation2 + $0x1a0] sm:$0xff]  ;;  %v1119_v61 = vld [vmem:[#allocation2 + $0x1a8] sm:$0xff] }
  0x49   :  { %v230_v0 = vpack.c.bf16 %v109_v59, %v108_v58  ;;  %v1240_v1 = vpack.c.bf16 %v1119_v61, %v1118_v60  ;;  %v110_v2 = vld [vmem:[#allocation2 + $0x1c0] sm:$0xff]  ;;  %v1120_v4 = vld [vmem:[#allocation2 + $0x1c8] sm:$0xff] }
  0x4a   :  { %5496 = vmatpush3.bf16.msra.mxu0 %v7804_v20  ;;  %5640 = vmatpush3.bf16.msra.mxu1 %v7804_v20  ;;  %v112_v6 = vld [vmem:[#allocation2 + $0x200] sm:$0xff]  ;;  %v1123_v9 = vld [vmem:[#allocation2 + $0x228] sm:$0xff] }
  0x4b   :  { %5497 = vmatprep.subr.bf16.mxu0 %v7810_v23  ;;  %5641 = vmatprep.subr.bf16.mxu1 %v7810_v23  ;;  %v113_v7 = vld [vmem:[#allocation2 + $0x220] sm:$0xff]  ;;  %v1124_v16 = vld [vmem:[#allocation2 + $0x248] sm:$0xff] }
  0x4c   :  { %v232_v12 = vpack.c.bf16 %v113_v7, %v112_v6  ;;  %v114_v14 = vld [vmem:[#allocation2 + $0x240] sm:$0xff]  ;;  %v1127_v21 = vld [vmem:[#allocation2 + $0x2a8] sm:$0xff] }
  0x4d   :  { %v115_v15 = vld [vmem:[#allocation2 + $0x260] sm:$0xff]  ;;  %v1128_v30 = vld [vmem:[#allocation2 + $0x2c8] sm:$0xff] }
  0x4e   :  { %5498 = vmatpush3.bf16.msra.mxu0 %v7810_v23  ;;  %5642 = vmatpush3.bf16.msra.mxu1 %v7810_v23  ;;  %v116_v18 = vld [vmem:[#allocation2 + $0x280] sm:$0xff]  ;;  %v233_v22 = vpack.c.bf16 %v115_v15, %v114_v14  ;;  %v1130_v33 = vld [vmem:[#allocation2 + $0x308] sm:$0xff] }
  0x4f   :  { %5499 = vmatprep.subr.bf16.mxu0 %v7816_v26  ;;  %5643 = vmatprep.subr.bf16.mxu1 %v7816_v26  ;;  %v117_v19 = vld [vmem:[#allocation2 + $0x2a0] sm:$0xff]  ;;  %v1131_v34 = vld [vmem:[#allocation2 + $0x328] sm:$0xff] }
  0x50   :  { %v234_v24 = vpack.c.bf16 %v117_v19, %v116_v18  ;;  %v118_v27 = vld [vmem:[#allocation2 + $0x2c0] sm:$0xff]  ;;  %v1134_v44 = vld [vmem:[#allocation2 + $0x388] sm:$0xff] }
  0x51   :  { %v119_v28 = vld [vmem:[#allocation2 + $0x2e0] sm:$0xff]  ;;  %v1135_v45 = vld [vmem:[#allocation2 + $0x3a8] sm:$0xff] }
  0x52   :  { %5500 = vmatpush3.bf16.msra.mxu0 %v7816_v26  ;;  %5644 = vmatpush3.bf16.msra.mxu1 %v7816_v26  ;;  %v120_v31 = vld [vmem:[#allocation2 + $0x300] sm:$0xff]  ;;  %v235_v35 = vpack.c.bf16 %v119_v28, %v118_v27  ;;  %v1248_v49 = vpack.c.bf16 %v1135_v45, %v1134_v44  ;;  %v1138_v56 = vld [vmem:[#allocation2 + $0x408] sm:$0xff] }
  0x53   :  { %5501 = vmatprep.subr.bf16.mxu0 %v7822_v29  ;;  %5645 = vmatprep.subr.bf16.mxu1 %v7822_v29  ;;  %v121_v32 = vld [vmem:[#allocation2 + $0x320] sm:$0xff]  ;;  %v1139_v57 = vld [vmem:[#allocation2 + $0x428] sm:$0xff] }
  0x54   :  { %v236_v37 = vpack.c.bf16 %v121_v32, %v120_v31  ;;  %v124_v42 = vld [vmem:[#allocation2 + $0x380] sm:$0xff]  ;;  %v1250_v61 = vpack.c.bf16 %v1139_v57, %v1138_v56 }
  0x55   :  { %v125_v43 = vld [vmem:[#allocation2 + $0x3a0] sm:$0xff] }
  0x56   :  { %5502 = vmatpush3.bf16.msra.mxu0 %v7822_v29  ;;  %5646 = vmatpush3.bf16.msra.mxu1 %v7822_v29  ;;  %v238_v48 = vpack.c.bf16 %v125_v43, %v124_v42  ;;  %v128_v54 = vld [vmem:[#allocation2 + $0x400] sm:$0xff] }
  0x57   :  { %5775 = vmatprep.subr.bf16.mxu0 %v7782_v3  ;;  %5919 = vmatprep.subr.bf16.mxu1 %v7782_v3  ;;  %v129_v55 = vld [vmem:[#allocation2 + $0x420] sm:$0xff] }
  0x58   :  { %v240_v60 = vpack.c.bf16 %v129_v55, %v128_v54  ;;  %v136_v14 = vld [vmem:[#allocation2 + $0x500] sm:$0xff] }
  0x59   :  { %5504 = vmatmul.mubr.bf16.vlgmr.msra.gmra.mxu0 %v225_v38  ;;  %5648 = vmatmul.mubr.bf16.vlgmr.msra.gmra.mxu1 %v1235_v39  ;;  %v1246_v38 = vpack.c.bf16 %v1131_v34, %v1130_v33  ;;  %v122_v39 = vld [vmem:[#allocation2 + $0x340] sm:$0xff] }
  0x5a   :  { %5776 = vmatpush3.bf16.msra.mxu0 %v7782_v3  ;;  %5920 = vmatpush3.bf16.msra.mxu1 %v7782_v3  ;;  %v111_v3 = vld [vmem:[#allocation2 + $0x1e0] sm:$0xff] }
  0x5b   :  { %5507 = vmatprep.mubr.bf16.mxu0 %v226_v40  ;;  %5651 = vmatprep.mubr.bf16.mxu1 %v1236_v41  ;;  %v231_v10 = vpack.c.bf16 %v111_v3, %v110_v2  ;;  %v1132_v40 = vld [vmem:[#allocation2 + $0x348] sm:$0xff]  ;;  %v132_v2 = vld [vmem:[#allocation2 + $0x480] sm:$0xff] }
  0x5c   :  { %5777 = vmatprep.subr.bf16.mxu0 %v7784_v5  ;;  %5921 = vmatprep.subr.bf16.mxu1 %v7784_v5  ;;  %v1133_v41 = vld [vmem:[#allocation2 + $0x368] sm:$0xff]  ;;  %v133_v3 = vld [vmem:[#allocation2 + $0x4a0] sm:$0xff] }
  0x5d   :  { %v1247_v47 = vpack.c.bf16 %v1133_v41, %v1132_v40  ;;  %v137_v15 = vld [vmem:[#allocation2 + $0x520] sm:$0xff]  ;;  %v1154_v40 = vld [vmem:[#allocation2 + $0x608] sm:$0xff] }
  0x5e   :  { %5778 = vmatpush3.bf16.msra.mxu0 %v7784_v5  ;;  %5922 = vmatpush3.bf16.msra.mxu1 %v7784_v5  ;;  %v1121_v5 = vld [vmem:[#allocation2 + $0x1e8] sm:$0xff]  ;;  %v140_v27 = vld [vmem:[#allocation2 + $0x580] sm:$0xff] }
  0x5f   :  { %5779 = vmatprep.subr.bf16.mxu0 %v7792_v8  ;;  %5923 = vmatprep.subr.bf16.mxu1 %v7792_v8  ;;  %v1241_v11 = vpack.c.bf16 %v1121_v5, %v1120_v4  ;;  %v1142_v4 = vld [vmem:[#allocation2 + $0x488] sm:$0xff]  ;;  %v141_v28 = vld [vmem:[#allocation2 + $0x5a0] sm:$0xff] }
  0x60   :  { %v1143_v5 = vld [vmem:[#allocation2 + $0x4a8] sm:$0xff]  ;;  %v246_v33 = vpack.c.bf16 %v141_v28, %v140_v27 }
  0x61   :  { %5508 = vmatmul.mubr.bf16.gmra.mxu0 %v227_v50  ;;  %5652 = vmatmul.mubr.bf16.gmra.mxu1 %v1237_v51  ;;  %v126_v50 = vld [vmem:[#allocation2 + $0x3c0] sm:$0xff]  ;;  %v1155_v41 = vld [vmem:[#allocation2 + $0x628] sm:$0xff] }
  0x62   :  { %5511 = vmatprep.mubr.bf16.mxu0 %v228_v52  ;;  %5655 = vmatprep.mubr.bf16.mxu1 %v1238_v53  ;;  %v127_v51 = vld [vmem:[#allocation2 + $0x3e0] sm:$0xff]  ;;  %v1136_v52 = vld [vmem:[#allocation2 + $0x3c8] sm:$0xff]  ;;  %v1258_v45 = vpack.c.bf16 %v1155_v41, %v1154_v40 }
  0x63   :  { %5780 = vmatpush3.bf16.msra.mxu0 %v7792_v8  ;;  %5924 = vmatpush3.bf16.msra.mxu1 %v7792_v8  ;;  %v1122_v8 = vld [vmem:[#allocation2 + $0x208] sm:$0xff]  ;;  %v239_v58 = vpack.c.bf16 %v127_v51, %v126_v50  ;;  %v148_v50 = vld [vmem:[#allocation2 + $0x680] sm:$0xff] }
  0x64   :  { %5781 = vmatprep.subr.bf16.mxu0 %v7798_v17  ;;  %5925 = vmatprep.subr.bf16.mxu1 %v7798_v17  ;;  %v1242_v13 = vpack.c.bf16 %v1123_v9, %v1122_v8  ;;  %v1137_v53 = vld [vmem:[#allocation2 + $0x3e8] sm:$0xff]  ;;  %v242_v8 = vpack.c.bf16 %v133_v3, %v132_v2  ;;  %v1252_v9 = vpack.c.bf16 %v1143_v5, %v1142_v4  ;;  %v149_v51 = vld [vmem:[#allocation2 + $0x6a0] sm:$0xff] }
  0x65   :  { %v1249_v59 = vpack.c.bf16 %v1137_v53, %v1136_v52  ;;  %v1158_v52 = vld [vmem:[#allocation2 + $0x688] sm:$0xff]  ;;  %v250_v56 = vpack.c.bf16 %v149_v51, %v148_v50 }
  0x66   :  { %v1159_v53 = vld [vmem:[#allocation2 + $0x6a8] sm:$0xff] }
  0x67   :  { %5782 = vmatpush3.bf16.msra.mxu0 %v7798_v17  ;;  %5926 = vmatpush3.bf16.msra.mxu1 %v7798_v17  ;;  %v1125_v17 = vld [vmem:[#allocation2 + $0x268] sm:$0xff]  ;;  %v1260_v57 = vpack.c.bf16 %v1159_v53, %v1158_v52 }
  0x68   :  { %5783 = vmatprep.subr.bf16.mxu0 %v7804_v20  ;;  %5927 = vmatprep.subr.bf16.mxu1 %v7804_v20 }
  0x69   :  { %5512 = vmatmul.mubr.bf16.gmra.mxu0 %v229_v62  ;;  %5656 = vmatmul.mubr.bf16.gmra.mxu1 %v1239_v63  ;;  %v130_v62 = vld [vmem:[#allocation2 + $0x440] sm:$0xff] }
  0x6a   :  { %5515 = vmatprep.mubr.bf16.mxu0 %v230_v0  ;;  %5659 = vmatprep.mubr.bf16.mxu1 %v1240_v1  ;;  %v131_v63 = vld [vmem:[#allocation2 + $0x460] sm:$0xff]  ;;  %v1140_v0 = vld [vmem:[#allocation2 + $0x448] sm:$0xff] }
  0x6b   :  { %5784 = vmatpush3.bf16.msra.mxu0 %v7804_v20  ;;  %5928 = vmatpush3.bf16.msra.mxu1 %v7804_v20  ;;  %v1126_v20 = vld [vmem:[#allocation2 + $0x288] sm:$0xff]  ;;  %v241_v6 = vpack.c.bf16 %v131_v63, %v130_v62  ;;  %v152_v62 = vld [vmem:[#allocation2 + $0x700] sm:$0xff] }
  0x6c   :  { %5785 = vmatprep.subr.bf16.mxu0 %v7810_v23  ;;  %5929 = vmatprep.subr.bf16.mxu1 %v7810_v23  ;;  %v1244_v25 = vpack.c.bf16 %v1127_v21, %v1126_v20  ;;  %v1141_v1 = vld [vmem:[#allocation2 + $0x468] sm:$0xff]  ;;  %v244_v20 = vpack.c.bf16 %v137_v15, %v136_v14  ;;  %v153_v63 = vld [vmem:[#allocation2 + $0x720] sm:$0xff] }
  0x6d   :  { %v1251_v7 = vpack.c.bf16 %v1141_v1, %v1140_v0  ;;  %v1162_v0 = vld [vmem:[#allocation2 + $0x708] sm:$0xff]  ;;  %v252_v4 = vpack.c.bf16 %v153_v63, %v152_v62 }
  0x6e   :  { %v1163_v1 = vld [vmem:[#allocation2 + $0x728] sm:$0xff] }
  0x6f   :  { %5786 = vmatpush3.bf16.msra.mxu0 %v7810_v23  ;;  %5930 = vmatpush3.bf16.msra.mxu1 %v7810_v23  ;;  %v1243_v23 = vpack.c.bf16 %v1125_v17, %v1124_v16  ;;  %v1146_v16 = vld [vmem:[#allocation2 + $0x508] sm:$0xff]  ;;  %v1262_v5 = vpack.c.bf16 %v1163_v1, %v1162_v0 }
  0x70   :  { %5787 = vmatprep.subr.bf16.mxu0 %v7816_v26  ;;  %5931 = vmatprep.subr.bf16.mxu1 %v7816_v26  ;;  %v1147_v17 = vld [vmem:[#allocation2 + $0x528] sm:$0xff] }
  0x71   :  { %5516 = vmatmul.mubr.bf16.gmra.mxu0 %v231_v10  ;;  %5660 = vmatmul.mubr.bf16.gmra.mxu1 %v1241_v11  ;;  %v134_v10 = vld [vmem:[#allocation2 + $0x4c0] sm:$0xff]  ;;  %v1254_v21 = vpack.c.bf16 %v1147_v17, %v1146_v16 }
  0x72   :  { %5519 = vmatprep.mubr.bf16.mxu0 %v232_v12  ;;  %5663 = vmatprep.mubr.bf16.mxu1 %v1242_v13  ;;  %v135_v11 = vld [vmem:[#allocation2 + $0x4e0] sm:$0xff]  ;;  %v1144_v12 = vld [vmem:[#allocation2 + $0x4c8] sm:$0xff] }
  0x73   :  { %5788 = vmatpush3.bf16.msra.mxu0 %v7816_v26  ;;  %5932 = vmatpush3.bf16.msra.mxu1 %v7816_v26  ;;  %v1129_v26 = vld [vmem:[#allocation2 + $0x2e8] sm:$0xff]  ;;  %v243_v18 = vpack.c.bf16 %v135_v11, %v134_v10  ;;  %v156_v10 = vld [vmem:[#allocation2 + $0x780] sm:$0xff] }
  0x74   :  { %5789 = vmatprep.subr.bf16.mxu0 %v7822_v29  ;;  %5933 = vmatprep.subr.bf16.mxu1 %v7822_v29  ;;  %v1245_v36 = vpack.c.bf16 %v1129_v26, %v1128_v30  ;;  %v1145_v13 = vld [vmem:[#allocation2 + $0x4e8] sm:$0xff]  ;;  %v157_v11 = vld [vmem:[#allocation2 + $0x7a0] sm:$0xff] }
  0x75   :  { %v1253_v19 = vpack.c.bf16 %v1145_v13, %v1144_v12  ;;  %v1150_v30 = vld [vmem:[#allocation2 + $0x588] sm:$0xff]  ;;  %v254_v16 = vpack.c.bf16 %v157_v11, %v156_v10 }
  0x76   :  { %v1151_v26 = vld [vmem:[#allocation2 + $0x5a8] sm:$0xff] }
  0x77   :  { %5790 = vmatpush3.bf16.msra.mxu0 %v7822_v29  ;;  %5934 = vmatpush3.bf16.msra.mxu1 %v7822_v29  ;;  %v123_v29 = vld [vmem:[#allocation2 + $0x360] sm:$0xff]  ;;  %v1256_v34 = vpack.c.bf16 %v1151_v26, %v1150_v30  ;;  %v1166_v12 = vld [vmem:[#allocation2 + $0x788] sm:$0xff] }
  0x78   :  { %v237_v46 = vpack.c.bf16 %v123_v29, %v122_v39  ;;  %v144_v39 = vld [vmem:[#allocation2 + $0x600] sm:$0xff]  ;;  %v1167_v13 = vld [vmem:[#allocation2 + $0x7a8] sm:$0xff] }
  0x79   :  { %5520 = vmatmul.mubr.bf16.gmra.mxu0 %v233_v22  ;;  %5664 = vmatmul.mubr.bf16.gmra.mxu1 %v1243_v23  ;;  %v138_v22 = vld [vmem:[#allocation2 + $0x540] sm:$0xff]  ;;  %v1264_v17 = vpack.c.bf16 %v1167_v13, %v1166_v12 }
  0x7a   :  { %5523 = vmatprep.mubr.bf16.mxu0 %v234_v24  ;;  %5667 = vmatprep.mubr.bf16.mxu1 %v1244_v25  ;;  %v139_v23 = vld [vmem:[#allocation2 + $0x560] sm:$0xff]  ;;  %v1148_v24 = vld [vmem:[#allocation2 + $0x548] sm:$0xff] }
  0x7b   :  { %v1149_v25 = vld [vmem:[#allocation2 + $0x568] sm:$0xff]  ;;  %v245_v31 = vpack.c.bf16 %v139_v23, %v138_v22  ;;  %v145_v29 = vld [vmem:[#allocation2 + $0x620] sm:$0xff] }
  0x7c   :  { %v1255_v32 = vpack.c.bf16 %v1149_v25, %v1148_v24  ;;  %v248_v44 = vpack.c.bf16 %v145_v29, %v144_v39  ;;  %v160_v22 = vld [vmem:[#allocation2 + $0x800] sm:$0xff]  ;;  %v1170_v24 = vld [vmem:[#allocation2 + $0x808] sm:$0xff] }
  0x7d   :  { %v161_v23 = vld [vmem:[#allocation2 + $0x820] sm:$0xff]  ;;  %v1171_v25 = vld [vmem:[#allocation2 + $0x828] sm:$0xff] }
  0x7e   :  { %v256_v30 = vpack.c.bf16 %v161_v23, %v160_v22  ;;  %v1266_v26 = vpack.c.bf16 %v1171_v25, %v1170_v24 }
  0x81   :  { %5524 = vmatmul.mubr.bf16.gmra.mxu0 %v235_v35  ;;  %5668 = vmatmul.mubr.bf16.gmra.mxu1 %v1245_v36  ;;  %v142_v35 = vld [vmem:[#allocation2 + $0x5c0] sm:$0xff] }
  0x82   :  { %5527 = vmatprep.mubr.bf16.mxu0 %v236_v37  ;;  %5671 = vmatprep.mubr.bf16.mxu1 %v1246_v38  ;;  %v143_v36 = vld [vmem:[#allocation2 + $0x5e0] sm:$0xff]  ;;  %v1152_v37 = vld [vmem:[#allocation2 + $0x5c8] sm:$0xff] }
  0x83   :  { %v1153_v38 = vld [vmem:[#allocation2 + $0x5e8] sm:$0xff]  ;;  %v247_v42 = vpack.c.bf16 %v143_v36, %v142_v35  ;;  %v164_v35 = vld [vmem:[#allocation2 + $0x880] sm:$0xff] }
  0x84   :  { %v1257_v43 = vpack.c.bf16 %v1153_v38, %v1152_v37  ;;  %v165_v36 = vld [vmem:[#allocation2 + $0x8a0] sm:$0xff]  ;;  %v1174_v37 = vld [vmem:[#allocation2 + $0x888] sm:$0xff] }
  0x85   :  { %v1175_v38 = vld [vmem:[#allocation2 + $0x8a8] sm:$0xff]  ;;  %v258_v40 = vpack.c.bf16 %v165_v36, %v164_v35 }
  0x86   :  { %v1268_v41 = vpack.c.bf16 %v1175_v38, %v1174_v37 }
  0x89   :  { %5528 = vmatmul.mubr.bf16.gmra.mxu0 %v237_v46  ;;  %5672 = vmatmul.mubr.bf16.gmra.mxu1 %v1247_v47  ;;  %v146_v46 = vld [vmem:[#allocation2 + $0x640] sm:$0xff] }
  0x8a   :  { %5531 = vmatprep.mubr.bf16.mxu0 %v238_v48  ;;  %5675 = vmatprep.mubr.bf16.mxu1 %v1248_v49  ;;  %v147_v47 = vld [vmem:[#allocation2 + $0x660] sm:$0xff]  ;;  %v1156_v48 = vld [vmem:[#allocation2 + $0x648] sm:$0xff] }
  0x8b   :  { %v1157_v49 = vld [vmem:[#allocation2 + $0x668] sm:$0xff]  ;;  %v249_v54 = vpack.c.bf16 %v147_v47, %v146_v46  ;;  %v168_v46 = vld [vmem:[#allocation2 + $0x900] sm:$0xff] }
  0x8c   :  { %v1259_v55 = vpack.c.bf16 %v1157_v49, %v1156_v48  ;;  %v169_v47 = vld [vmem:[#allocation2 + $0x920] sm:$0xff]  ;;  %v1178_v48 = vld [vmem:[#allocation2 + $0x908] sm:$0xff] }
  0x8d   :  { %v1179_v49 = vld [vmem:[#allocation2 + $0x928] sm:$0xff]  ;;  %v260_v52 = vpack.c.bf16 %v169_v47, %v168_v46 }
  0x8e   :  { %v1270_v53 = vpack.c.bf16 %v1179_v49, %v1178_v48 }
  0x91   :  { %5532 = vmatmul.mubr.bf16.gmra.mxu0 %v239_v58  ;;  %5676 = vmatmul.mubr.bf16.gmra.mxu1 %v1249_v59  ;;  %v150_v58 = vld [vmem:[#allocation2 + $0x6c0] sm:$0xff] }
  0x92   :  { %5535 = vmatprep.mubr.bf16.mxu0 %v240_v60  ;;  %5679 = vmatprep.mubr.bf16.mxu1 %v1250_v61  ;;  %v151_v59 = vld [vmem:[#allocation2 + $0x6e0] sm:$0xff]  ;;  %v1160_v60 = vld [vmem:[#allocation2 + $0x6c8] sm:$0xff] }
  0x93   :  { %v1161_v61 = vld [vmem:[#allocation2 + $0x6e8] sm:$0xff]  ;;  %v251_v2 = vpack.c.bf16 %v151_v59, %v150_v58  ;;  %v172_v58 = vld [vmem:[#allocation2 + $0x980] sm:$0xff] }
  0x94   :  { %v1261_v3 = vpack.c.bf16 %v1161_v61, %v1160_v60  ;;  %v173_v59 = vld [vmem:[#allocation2 + $0x9a0] sm:$0xff]  ;;  %v1182_v60 = vld [vmem:[#allocation2 + $0x988] sm:$0xff] }
  0x95   :  { %v1183_v61 = vld [vmem:[#allocation2 + $0x9a8] sm:$0xff]  ;;  %v262_v0 = vpack.c.bf16 %v173_v59, %v172_v58 }
  0x96   :  { %v1272_v1 = vpack.c.bf16 %v1183_v61, %v1182_v60 }
  0x99   :  { %5536 = vmatmul.mubr.bf16.gmra.mxu0 %v241_v6  ;;  %5680 = vmatmul.mubr.bf16.gmra.mxu1 %v1251_v7  ;;  %v154_v6 = vld [vmem:[#allocation2 + $0x740] sm:$0xff] }
  0x9a   :  { %5539 = vmatprep.mubr.bf16.mxu0 %v242_v8  ;;  %5683 = vmatprep.mubr.bf16.mxu1 %v1252_v9  ;;  %v155_v7 = vld [vmem:[#allocation2 + $0x760] sm:$0xff]  ;;  %v1164_v8 = vld [vmem:[#allocation2 + $0x748] sm:$0xff] }
  0x9b   :  { %v1165_v9 = vld [vmem:[#allocation2 + $0x768] sm:$0xff]  ;;  %v253_v14 = vpack.c.bf16 %v155_v7, %v154_v6  ;;  %v176_v6 = vld [vmem:[#allocation2 + $0xa00] sm:$0xff] }
  0x9c   :  { %v1263_v15 = vpack.c.bf16 %v1165_v9, %v1164_v8  ;;  %v177_v7 = vld [vmem:[#allocation2 + $0xa20] sm:$0xff]  ;;  %v1186_v8 = vld [vmem:[#allocation2 + $0xa08] sm:$0xff] }
  0x9d   :  { %v1187_v9 = vld [vmem:[#allocation2 + $0xa28] sm:$0xff]  ;;  %v264_v12 = vpack.c.bf16 %v177_v7, %v176_v6 }
  0x9e   :  { %v1274_v13 = vpack.c.bf16 %v1187_v9, %v1186_v8 }
  0xa1   :  { %5540 = vmatmul.mubr.bf16.gmra.mxu0 %v243_v18  ;;  %5684 = vmatmul.mubr.bf16.gmra.mxu1 %v1253_v19  ;;  %v158_v18 = vld [vmem:[#allocation2 + $0x7c0] sm:$0xff] }
  0xa2   :  { %5543 = vmatprep.mubr.bf16.mxu0 %v244_v20  ;;  %5687 = vmatprep.mubr.bf16.mxu1 %v1254_v21  ;;  %v159_v19 = vld [vmem:[#allocation2 + $0x7e0] sm:$0xff]  ;;  %v1168_v20 = vld [vmem:[#allocation2 + $0x7c8] sm:$0xff] }
  0xa3   :  { %v1169_v21 = vld [vmem:[#allocation2 + $0x7e8] sm:$0xff]  ;;  %v255_v27 = vpack.c.bf16 %v159_v19, %v158_v18  ;;  %v180_v18 = vld [vmem:[#allocation2 + $0xa80] sm:$0xff] }
  0xa4   :  { %v1265_v28 = vpack.c.bf16 %v1169_v21, %v1168_v20  ;;  %v181_v19 = vld [vmem:[#allocation2 + $0xaa0] sm:$0xff]  ;;  %v1190_v20 = vld [vmem:[#allocation2 + $0xa88] sm:$0xff] }
  0xa5   :  { %v1191_v21 = vld [vmem:[#allocation2 + $0xaa8] sm:$0xff]  ;;  %v266_v24 = vpack.c.bf16 %v181_v19, %v180_v18  ;;  %v200_v19 = vld [vmem:[#allocation2 + $0xd00] sm:$0xff] }
  0xa6   :  { %v1276_v25 = vpack.c.bf16 %v1191_v21, %v1190_v20  ;;  %v1209_v18 = vld [vmem:[#allocation2 + $0xce8] sm:$0xff]  ;;  %v201_v20 = vld [vmem:[#allocation2 + $0xd20] sm:$0xff] }
  0xa9   :  { %5544 = vmatmul.mubr.bf16.gmra.mxu0 %v245_v31  ;;  %5688 = vmatmul.mubr.bf16.gmra.mxu1 %v1255_v32  ;;  %v162_v31 = vld [vmem:[#allocation2 + $0x840] sm:$0xff] }
  0xaa   :  { %5547 = vmatprep.mubr.bf16.mxu0 %v246_v33  ;;  %5691 = vmatprep.mubr.bf16.mxu1 %v1256_v34  ;;  %v163_v32 = vld [vmem:[#allocation2 + $0x860] sm:$0xff]  ;;  %v1172_v33 = vld [vmem:[#allocation2 + $0x848] sm:$0xff] }
  0xab   :  { %v1173_v34 = vld [vmem:[#allocation2 + $0x868] sm:$0xff]  ;;  %v257_v39 = vpack.c.bf16 %v163_v32, %v162_v31  ;;  %v184_v31 = vld [vmem:[#allocation2 + $0xb00] sm:$0xff] }
  0xac   :  { %v1267_v29 = vpack.c.bf16 %v1173_v34, %v1172_v33  ;;  %v185_v32 = vld [vmem:[#allocation2 + $0xb20] sm:$0xff]  ;;  %v1194_v33 = vld [vmem:[#allocation2 + $0xb08] sm:$0xff] }
  0xad   :  { %v1195_v34 = vld [vmem:[#allocation2 + $0xb28] sm:$0xff]  ;;  %v268_v37 = vpack.c.bf16 %v185_v32, %v184_v31  ;;  %v276_v32 = vpack.c.bf16 %v201_v20, %v200_v19 }
  0xae   :  { %v1278_v38 = vpack.c.bf16 %v1195_v34, %v1194_v33  ;;  %v1218_v19 = vld [vmem:[#allocation2 + $0xe08] sm:$0xff] }
  0xaf   :  { %v1219_v20 = vld [vmem:[#allocation2 + $0xe28] sm:$0xff] }
  0xb1   :  { %5548 = vmatmul.mubr.bf16.gmra.mxu0 %v247_v42  ;;  %5692 = vmatmul.mubr.bf16.gmra.mxu1 %v1257_v43  ;;  %v166_v42 = vld [vmem:[#allocation2 + $0x8c0] sm:$0xff] }
  0xb2   :  { %5551 = vmatprep.mubr.bf16.mxu0 %v248_v44  ;;  %5695 = vmatprep.mubr.bf16.mxu1 %v1258_v45  ;;  %v167_v43 = vld [vmem:[#allocation2 + $0x8e0] sm:$0xff]  ;;  %v1176_v44 = vld [vmem:[#allocation2 + $0x8c8] sm:$0xff] }
  0xb3   :  { %v1177_v45 = vld [vmem:[#allocation2 + $0x8e8] sm:$0xff]  ;;  %v259_v50 = vpack.c.bf16 %v167_v43, %v166_v42  ;;  %v188_v42 = vld [vmem:[#allocation2 + $0xb80] sm:$0xff] }
  0xb4   :  { %v1269_v51 = vpack.c.bf16 %v1177_v45, %v1176_v44  ;;  %v189_v43 = vld [vmem:[#allocation2 + $0xba0] sm:$0xff]  ;;  %v1198_v44 = vld [vmem:[#allocation2 + $0xb88] sm:$0xff] }
  0xb5   :  { %v1199_v45 = vld [vmem:[#allocation2 + $0xba8] sm:$0xff]  ;;  %v270_v48 = vpack.c.bf16 %v189_v43, %v188_v42  ;;  %v203_v42 = vld [vmem:[#allocation2 + $0xd60] sm:$0xff] }
  0xb6   :  { %v1280_v49 = vpack.c.bf16 %v1199_v45, %v1198_v44  ;;  %v1212_v43 = vld [vmem:[#allocation2 + $0xd48] sm:$0xff] }
  0xb9   :  { %5552 = vmatmul.mubr.bf16.gmra.mxu0 %v249_v54  ;;  %5696 = vmatmul.mubr.bf16.gmra.mxu1 %v1259_v55  ;;  %v170_v54 = vld [vmem:[#allocation2 + $0x940] sm:$0xff] }
  0xba   :  { %5555 = vmatprep.mubr.bf16.mxu0 %v250_v56  ;;  %5699 = vmatprep.mubr.bf16.mxu1 %v1260_v57  ;;  %v171_v55 = vld [vmem:[#allocation2 + $0x960] sm:$0xff]  ;;  %v1180_v56 = vld [vmem:[#allocation2 + $0x948] sm:$0xff] }
  0xbb   :  { %v1181_v57 = vld [vmem:[#allocation2 + $0x968] sm:$0xff]  ;;  %v261_v62 = vpack.c.bf16 %v171_v55, %v170_v54  ;;  %v192_v54 = vld [vmem:[#allocation2 + $0xc00] sm:$0xff] }
  0xbc   :  { %v1271_v63 = vpack.c.bf16 %v1181_v57, %v1180_v56  ;;  %v193_v55 = vld [vmem:[#allocation2 + $0xc20] sm:$0xff]  ;;  %v1202_v56 = vld [vmem:[#allocation2 + $0xc08] sm:$0xff] }
  0xbd   :  { %v1203_v57 = vld [vmem:[#allocation2 + $0xc28] sm:$0xff]  ;;  %v272_v60 = vpack.c.bf16 %v193_v55, %v192_v54 }
  0xbe   :  { %v1282_v61 = vpack.c.bf16 %v1203_v57, %v1202_v56 }
  0xc1   :  { %5556 = vmatmul.mubr.bf16.gmra.mxu0 %v251_v2  ;;  %5700 = vmatmul.mubr.bf16.gmra.mxu1 %v1261_v3  ;;  %v174_v2 = vld [vmem:[#allocation2 + $0x9c0] sm:$0xff] }
  0xc2   :  { %5559 = vmatprep.mubr.bf16.mxu0 %v252_v4  ;;  %5703 = vmatprep.mubr.bf16.mxu1 %v1262_v5  ;;  %v175_v3 = vld [vmem:[#allocation2 + $0x9e0] sm:$0xff]  ;;  %v1184_v4 = vld [vmem:[#allocation2 + $0x9c8] sm:$0xff] }
  0xc3   :  { %v1185_v5 = vld [vmem:[#allocation2 + $0x9e8] sm:$0xff]  ;;  %v263_v10 = vpack.c.bf16 %v175_v3, %v174_v2  ;;  %v196_v2 = vld [vmem:[#allocation2 + $0xc80] sm:$0xff] }
  0xc4   :  { %v1273_v11 = vpack.c.bf16 %v1185_v5, %v1184_v4  ;;  %v197_v3 = vld [vmem:[#allocation2 + $0xca0] sm:$0xff]  ;;  %v1206_v4 = vld [vmem:[#allocation2 + $0xc88] sm:$0xff] }
  0xc5   :  { %v1207_v5 = vld [vmem:[#allocation2 + $0xca8] sm:$0xff]  ;;  %v274_v8 = vpack.c.bf16 %v197_v3, %v196_v2 }
  0xc6   :  { %v1284_v9 = vpack.c.bf16 %v1207_v5, %v1206_v4 }
  0xc9   :  { %5560 = vmatmul.mubr.bf16.gmra.mxu0 %v253_v14  ;;  %5704 = vmatmul.mubr.bf16.gmra.mxu1 %v1263_v15  ;;  %v178_v14 = vld [vmem:[#allocation2 + $0xa40] sm:$0xff] }
  0xca   :  { %5563 = vmatprep.mubr.bf16.mxu0 %v254_v16  ;;  %5707 = vmatprep.mubr.bf16.mxu1 %v1264_v17  ;;  %v179_v15 = vld [vmem:[#allocation2 + $0xa60] sm:$0xff]  ;;  %v1188_v16 = vld [vmem:[#allocation2 + $0xa48] sm:$0xff] }
  0xcb   :  { %v1189_v17 = vld [vmem:[#allocation2 + $0xa68] sm:$0xff]  ;;  %v265_v22 = vpack.c.bf16 %v179_v15, %v178_v14  ;;  %v199_v14 = vld [vmem:[#allocation2 + $0xce0] sm:$0xff] }
  0xcc   :  { %v1275_v23 = vpack.c.bf16 %v1189_v17, %v1188_v16  ;;  %v1208_v15 = vld [vmem:[#allocation2 + $0xcc8] sm:$0xff] }
  0xcd   :  { %v1285_v31 = vpack.c.bf16 %v1209_v18, %v1208_v15  ;;  %v209_v15 = vld [vmem:[#allocation2 + $0xe20] sm:$0xff] }
  0xd1   :  { %5564 = vmatmul.mubr.bf16.gmra.mxu0 %v255_v27  ;;  %5708 = vmatmul.mubr.bf16.gmra.mxu1 %v1265_v28  ;;  %v182_v27 = vld [vmem:[#allocation2 + $0xac0] sm:$0xff] }
  0xd2   :  { %5567 = vmatprep.mubr.bf16.mxu0 %v256_v30  ;;  %5711 = vmatprep.mubr.bf16.mxu1 %v1266_v26  ;;  %v183_v28 = vld [vmem:[#allocation2 + $0xae0] sm:$0xff]  ;;  %v1192_v30 = vld [vmem:[#allocation2 + $0xac8] sm:$0xff] }
  0xd3   :  { %v1193_v26 = vld [vmem:[#allocation2 + $0xae8] sm:$0xff]  ;;  %v267_v35 = vpack.c.bf16 %v183_v28, %v182_v27 }
  0xd4   :  { %v1277_v36 = vpack.c.bf16 %v1193_v26, %v1192_v30 }
  0xd9   :  { %5568 = vmatmul.mubr.bf16.gmra.mxu0 %v257_v39  ;;  %5712 = vmatmul.mubr.bf16.gmra.mxu1 %v1267_v29  ;;  %v186_v39 = vld [vmem:[#allocation2 + $0xb40] sm:$0xff] }
  0xda   :  { %5571 = vmatprep.mubr.bf16.mxu0 %v258_v40  ;;  %5715 = vmatprep.mubr.bf16.mxu1 %v1268_v41  ;;  %v187_v29 = vld [vmem:[#allocation2 + $0xb60] sm:$0xff]  ;;  %v1196_v40 = vld [vmem:[#allocation2 + $0xb48] sm:$0xff] }
  0xdb   :  { %v1197_v41 = vld [vmem:[#allocation2 + $0xb68] sm:$0xff]  ;;  %v269_v46 = vpack.c.bf16 %v187_v29, %v186_v39 }
  0xdc   :  { %v1279_v47 = vpack.c.bf16 %v1197_v41, %v1196_v40  ;;  %v202_v41 = vld [vmem:[#allocation2 + $0xd40] sm:$0xff] }
  0xdd   :  { %v277_v57 = vpack.c.bf16 %v203_v42, %v202_v41  ;;  %v7892_v42 = vld [vmem:[#allocation2 + $0xe60] sm:$0xff] }
  0xe1   :  { %5572 = vmatmul.mubr.bf16.gmra.mxu0 %v259_v50  ;;  %5716 = vmatmul.mubr.bf16.gmra.mxu1 %v1269_v51  ;;  %v190_v50 = vld [vmem:[#allocation2 + $0xbc0] sm:$0xff] }
  0xe2   :  { %5575 = vmatprep.mubr.bf16.mxu0 %v260_v52  ;;  %5719 = vmatprep.mubr.bf16.mxu1 %v1270_v53  ;;  %v191_v51 = vld [vmem:[#allocation2 + $0xbe0] sm:$0xff]  ;;  %v1200_v52 = vld [vmem:[#allocation2 + $0xbc8] sm:$0xff] }
  0xe3   :  { %v1201_v53 = vld [vmem:[#allocation2 + $0xbe8] sm:$0xff]  ;;  %v271_v58 = vpack.c.bf16 %v191_v51, %v190_v50 }
  0xe4   :  { %v1281_v59 = vpack.c.bf16 %v1201_v53, %v1200_v52  ;;  %v1214_v51 = vld [vmem:[#allocation2 + $0xd88] sm:$0xff] }
  0xe5   :  { %v1215_v52 = vld [vmem:[#allocation2 + $0xda8] sm:$0xff] }
  0xe9   :  { %5576 = vmatmul.mubr.bf16.gmra.mxu0 %v261_v62  ;;  %5720 = vmatmul.mubr.bf16.gmra.mxu1 %v1271_v63  ;;  %v194_v62 = vld [vmem:[#allocation2 + $0xc40] sm:$0xff] }
  0xea   :  { %5579 = vmatprep.mubr.bf16.mxu0 %v262_v0  ;;  %5723 = vmatprep.mubr.bf16.mxu1 %v1272_v1  ;;  %v195_v63 = vld [vmem:[#allocation2 + $0xc60] sm:$0xff]  ;;  %v1204_v0 = vld [vmem:[#allocation2 + $0xc48] sm:$0xff] }
  0xeb   :  { %v1205_v1 = vld [vmem:[#allocation2 + $0xc68] sm:$0xff]  ;;  %v273_v6 = vpack.c.bf16 %v195_v63, %v194_v62  ;;  %v1288_v62 = vpack.c.bf16 %v1215_v52, %v1214_v51 }
  0xec   :  { %v1283_v7 = vpack.c.bf16 %v1205_v1, %v1204_v0 }
  0xf1   :  { %5580 = vmatmul.mubr.bf16.gmra.mxu0 %v263_v10  ;;  %5724 = vmatmul.mubr.bf16.gmra.mxu1 %v1273_v11  ;;  %v7862_v10 = vld [vmem:[#allocation7] ss:$0 sm:$0xff] }
  0xf2   :  { %5583 = vmatprep.mubr.bf16.mxu0 %v264_v12  ;;  %5727 = vmatprep.mubr.bf16.mxu1 %v1274_v13  ;;  %v198_v13 = vld [vmem:[#allocation2 + $0xcc0] sm:$0xff] }
  0xf3   :  { %v275_v26 = vpack.c.bf16 %v199_v14, %v198_v13  ;;  %v1217_v13 = vld [vmem:[#allocation2 + $0xde8] sm:$0xff]  ;;  %v208_v14 = vld [vmem:[#allocation2 + $0xe00] sm:$0xff] }
  0xf9   :  { %5584 = vmatmul.mubr.bf16.gmra.mxu0 %v265_v22  ;;  %5728 = vmatmul.mubr.bf16.gmra.mxu1 %v1275_v23  ;;  %v1210_v23 = vld [vmem:[#allocation2 + $0xd08] sm:$0xff] }
  0xfa   :  { %5587 = vmatprep.mubr.bf16.mxu0 %v266_v24  ;;  %5731 = vmatprep.mubr.bf16.mxu1 %v1276_v25  ;;  %v1211_v24 = vld [vmem:[#allocation2 + $0xd28] sm:$0xff] }
 0x101   :  { %5588 = vmatmul.mubr.bf16.gmra.mxu0 %v267_v35  ;;  %5732 = vmatmul.mubr.bf16.gmra.mxu1 %v1277_v36  ;;  %v1286_v35 = vpack.c.bf16 %v1211_v24, %v1210_v23 }
 0x102   :  { %5591 = vmatprep.mubr.bf16.mxu0 %v268_v37  ;;  %5735 = vmatprep.mubr.bf16.mxu1 %v1278_v38 }
 0x109   :  { %5592 = vmatmul.mubr.bf16.gmra.mxu0 %v269_v46  ;;  %5736 = vmatmul.mubr.bf16.gmra.mxu1 %v1279_v47  ;;  %v1213_v46 = vld [vmem:[#allocation2 + $0xd68] sm:$0xff]  ;;  %v204_v47 = vld [vmem:[#allocation2 + $0xd80] sm:$0xff] }
 0x10a   :  { %5595 = vmatprep.mubr.bf16.mxu0 %v270_v48  ;;  %5739 = vmatprep.mubr.bf16.mxu1 %v1280_v49  ;;  %v205_v48 = vld [vmem:[#allocation2 + $0xda0] sm:$0xff] }
 0x111   :  { %5596 = vmatmul.mubr.bf16.gmra.mxu0 %v271_v58  ;;  %5740 = vmatmul.mubr.bf16.gmra.mxu1 %v1281_v59  ;;  %v1287_v58 = vpack.c.bf16 %v1213_v46, %v1212_v43  ;;  %v278_v59 = vpack.c.bf16 %v205_v48, %v204_v47  ;;  %v7894_v43 = vld [vmem:[#allocation2 + $0xe48] sm:$0xff] }
 0x112   :  { %5599 = vmatprep.mubr.bf16.mxu0 %v272_v60  ;;  %5743 = vmatprep.mubr.bf16.mxu1 %v1282_v61 }
 0x119   :  { %v5505_v11 = vpop.f32.mrf.mxu0  ;;  %5600 = vmatmul.mubr.bf16.gmra.mxu0 %v273_v6  ;;  %v5649_v12 = vpop.f32.mrf.mxu1  ;;  %5744 = vmatmul.mubr.bf16.gmra.mxu1 %v1283_v7  ;;  %v206_v6 = vld [vmem:[#allocation2 + $0xdc0] sm:$0xff] }
 0x11a   :  { %v337_v16 = vadd.f32 %v5505_v11, %v7862_v10  ;;  %v1341_v17 = vadd.f32 %v5649_v12, %v7862_v10  ;;  %5603 = vmatprep.mubr.bf16.mxu0 %v274_v8  ;;  %5747 = vmatprep.mubr.bf16.mxu1 %v1284_v9  ;;  %v207_v7 = vld [vmem:[#allocation2 + $0xde0] sm:$0xff]  ;;  %v1216_v8 = vld [vmem:[#allocation2 + $0xdc8] sm:$0xff] }
 0x11b   :  { %v328_v21 = vpop.f32.mrf.mxu0  ;;  %v1332_v22 = vpop.f32.mrf.mxu1 }
 0x11c   :  { %6072 = vtanh.f32 %v337_v16  ;;  %v329_v25 = vadd.f32 %v7862_v10, %v328_v21  ;;  %v1333_v27 = vadd.f32 %v7862_v10, %v1332_v22 }
 0x11d   :  { %6074 = vtanh.f32 %v1341_v17  ;;  %v5506_v28 = vpop.f32.mrf.mxu0  ;;  %v5650_v30 = vpop.f32.mrf.mxu1 }
 0x11e   :  { %6076 = vtanh.f32 %v329_v25  ;;  %v340_v33 = vadd.f32 %v5506_v28, %v7862_v10  ;;  %v1344_v34 = vadd.f32 %v5650_v30, %v7862_v10  ;;  %v279_v28 = vpack.c.bf16 %v207_v7, %v206_v6 }
 0x11f   :  { %6078 = vtanh.f32 %v1333_v27  ;;  %v331_v36 = vpop.f32.mrf.mxu0  ;;  %v1335_v37 = vpop.f32.mrf.mxu1  ;;  %v1289_v30 = vpack.c.bf16 %v1217_v13, %v1216_v8 }
 0x120   :  { %6080 = vtanh.f32 %v340_v33  ;;  %v332_v38 = vadd.f32 %v7862_v10, %v331_v36  ;;  %v1336_v39 = vadd.f32 %v7862_v10, %v1335_v37 }
 0x121   :  { %6082 = vtanh.f32 %v1344_v34  ;;  %v5509_v29 = vpop.f32.mrf.mxu0  ;;  %5604 = vmatmul.mubr.bf16.gmra.mxu0 %v275_v26  ;;  %v5653_v40 = vpop.f32.mrf.mxu1  ;;  %5748 = vmatmul.mubr.bf16.gmra.mxu1 %v1285_v31  ;;  %v280_v26 = vpack.c.bf16 %v209_v15, %v208_v14  ;;  %v1290_v34 = vpack.c.bf16 %v1219_v20, %v1218_v19 }
 0x122   :  { %6084 = vtanh.f32 %v332_v38  ;;  %v353_v44 = vadd.f32 %v5509_v29, %v7862_v10  ;;  %v1357_v45 = vadd.f32 %v5653_v40, %v7862_v10  ;;  %5607 = vmatprep.mubr.bf16.mxu0 %v276_v32  ;;  %5751 = vmatprep.mubr.bf16.mxu1 %v1286_v35  ;;  %v7888_v38 = vld [vmem:[#allocation2 + $0xe40] sm:$0xff] }
 0x123   :  { %6086 = vtanh.f32 %v1336_v39  ;;  %v344_v49 = vpop.f32.mrf.mxu0  ;;  %v1348_v50 = vpop.f32.mrf.mxu1 }
 0x124   :  { %6088 = vtanh.f32 %v353_v44  ;;  %v345_v53 = vadd.f32 %v7862_v10, %v344_v49  ;;  %v1349_v54 = vadd.f32 %v7862_v10, %v1348_v50  ;;  %v7896_v44 = vld [vmem:[#allocation2 + $0xe68] sm:$0xff]  ;;  %v212_v49 = vld [vmem:[#allocation2 + $0xe80] sm:$0xff] }
 0x125   :  { %6090 = vtanh.f32 %v1357_v45  ;;  %v5510_v55 = vpop.f32.mrf.mxu0  ;;  %v5654_v56 = vpop.f32.mrf.mxu1 }
 0x126   :  { %6092 = vtanh.f32 %v345_v53  ;;  %v356_v60 = vadd.f32 %v5510_v55, %v7862_v10  ;;  %v1360_v61 = vadd.f32 %v5654_v56, %v7862_v10  ;;  %v1222_v55 = vld [vmem:[#allocation2 + $0xe88] sm:$0xff] }
 0x127   :  { %6094 = vtanh.f32 %v1349_v54  ;;  %v347_v63 = vpop.f32.mrf.mxu0  ;;  %v1351_v0 = vpop.f32.mrf.mxu1  ;;  %v213_v54 = vld [vmem:[#allocation2 + $0xea0] sm:$0xff]  ;;  %v1223_v56 = vld [vmem:[#allocation2 + $0xea8] sm:$0xff] }
 0x128   :  { %6096 = vtanh.f32 %v356_v60  ;;  %v348_v1 = vadd.f32 %v7862_v10, %v347_v63  ;;  %v1352_v2 = vadd.f32 %v7862_v10, %v1351_v0  ;;  %v282_v7 = vpack.c.bf16 %v213_v54, %v212_v49 }
 0x129   :  { %v6073_v3 = vpop.eup %6072  ;;  %6098 = vtanh.f32 %v1360_v61  ;;  %v5513_v4 = vpop.f32.mrf.mxu0  ;;  %5608 = vmatmul.mubr.bf16.gmra.mxu0 %v277_v57  ;;  %5752 = vmatmul.mubr.bf16.gmra.mxu1 %v1287_v58  ;;  %v281_v61 = vpack.c.bf16 %v7892_v42, %v7888_v38  ;;  %v1292_v8 = vpack.c.bf16 %v1223_v56, %v1222_v55  ;;  %v1227_v38 = vld [vmem:[#allocation2 + $0xf28] sm:$0xff] }
 0x12a   :  { %v5657_v5 = vpop.f32.mrf.mxu1  ;;  %v7880_v9 = vpop.eup %6074  ;;  %6100 = vtanh.f32 %v348_v1  ;;  %v369_v11 = vadd.f32 %v5513_v4, %v7862_v10  ;;  %5611 = vmatprep.mubr.bf16.mxu0 %v278_v59  ;;  %5755 = vmatprep.mubr.bf16.mxu1 %v1288_v62  ;;  %v1291_v62 = vpack.c.bf16 %v7896_v44, %v7894_v43 }
 0x12b   :  { %v1373_v12 = vadd.f32 %v5657_v5, %v7862_v10  ;;  %v6077_v16 = vpop.eup %6076  ;;  %6102 = vtanh.f32 %v1352_v2  ;;  %v360_v17 = vpop.f32.mrf.mxu0 }
 0x12c   :  { %v1364_v18 = vpop.f32.mrf.mxu1  ;;  %v6079_v21 = vpop.eup %6078  ;;  %6104 = vtanh.f32 %v369_v11  ;;  %v361_v22 = vadd.f32 %v7862_v10, %v360_v17 }
 0x12d   :  { %v1365_v23 = vadd.f32 %v7862_v10, %v1364_v18  ;;  %v6081_v24 = vpop.eup %6080  ;;  %6106 = vtanh.f32 %v1373_v12  ;;  %v5514_v25 = vpop.f32.mrf.mxu0  ;;  %v7913_v18 = vld [vmem:[#allocation2 + $0xec0] sm:$0xff] }
 0x12e   :  { %v5658_v27 = vpop.f32.mrf.mxu1  ;;  %v6083_v31 = vpop.eup %6082  ;;  %6108 = vtanh.f32 %v361_v22  ;;  %v372_v32 = vadd.f32 %v5514_v25, %v7862_v10  ;;  %v7921_v25 = vld [vmem:[#allocation2 + $0xee8] sm:$0xff] }
 0x12f   :  { %v1376_v33 = vadd.f32 %v5658_v27, %v7862_v10  ;;  %v6085_v35 = vpop.eup %6084  ;;  %6110 = vtanh.f32 %v1365_v23  ;;  %v363_v36 = vpop.f32.mrf.mxu0  ;;  %v7917_v23 = vld [vmem:[#allocation2 + $0xee0] sm:$0xff] }
 0x130   :  { %v1367_v37 = vpop.f32.mrf.mxu1  ;;  %v6087_v39 = vpop.eup %6086  ;;  %v967_v29 = vadd.f32 %v6085_v35, %v6077_v16  ;;  %6112 = vtanh.f32 %v372_v32  ;;  %v364_v40 = vadd.f32 %v7862_v10, %v363_v36  ;;  %v217_v36 = vld [vmem:[#allocation2 + $0xf20] sm:$0xff]  ;;  %v283_v42 = vpack.c.bf16 %v7917_v23, %v7913_v18  ;;  %v1231_v18 = vld [vmem:[#allocation2 + $0xfa8] sm:$0xff] }
 0x131   :  { %v1368_v41 = vadd.f32 %v7862_v10, %v1367_v37  ;;  %v7898_v45 = vpop.eup %6088  ;;  %v1971_v46 = vadd.f32 %v6087_v39, %v6079_v21  ;;  %6114 = vtanh.f32 %v1376_v33  ;;  %v5517_v47 = vpop.f32.mrf.mxu0  ;;  %5612 = vmatmul.mubr.bf16.gmra.mxu0 %v279_v28  ;;  %5756 = vmatmul.mubr.bf16.gmra.mxu1 %v1289_v30  ;;  %v1226_v37 = vld [vmem:[#allocation2 + $0xf08] sm:$0xff] }
 0x132   :  { %v5661_v48 = vpop.f32.mrf.mxu1  ;;  %v7900_v50 = vpop.eup %6090  ;;  %v968_v51 = vadd.f32 %v6073_v3, %v967_v29  ;;  %6116 = vtanh.f32 %v364_v40  ;;  %v385_v52 = vadd.f32 %v5517_v47, %v7862_v10  ;;  %5615 = vmatprep.mubr.bf16.mxu0 %v280_v26  ;;  %5759 = vmatprep.mubr.bf16.mxu1 %v1290_v34 }
 0x133   :  { %v1389_v53 = vadd.f32 %v5661_v48, %v7862_v10  ;;  %v6093_v57 = vpop.eup %6092  ;;  %v1972_v58 = vadd.f32 %v7880_v9, %v1971_v46  ;;  %6118 = vtanh.f32 %v1368_v41  ;;  %v376_v59 = vpop.f32.mrf.mxu0 }
 0x134   :  { %v1380_v60 = vpop.f32.mrf.mxu1  ;;  %v6095_v63 = vpop.eup %6094  ;;  %v969_v0 = vadd.f32 %v6081_v24, %v968_v51  ;;  %6120 = vtanh.f32 %v385_v52  ;;  %v377_v1 = vadd.f32 %v7862_v10, %v376_v59  ;;  %v7919_v24 = vld [vmem:[#allocation2 + $0xec8] sm:$0xff] }
 0x135   :  { %v1381_v2 = vadd.f32 %v7862_v10, %v1380_v60  ;;  %v6097_v3 = vpop.eup %6096  ;;  %v1973_v4 = vadd.f32 %v6083_v31, %v1972_v58  ;;  %6122 = vtanh.f32 %v1389_v53  ;;  %v5518_v5 = vpop.f32.mrf.mxu0  ;;  %v216_v31 = vld [vmem:[#allocation2 + $0xf00] sm:$0xff]  ;;  %v1293_v43 = vpack.c.bf16 %v7921_v25, %v7919_v24 }
 0x136   :  { %v5662_v6 = vpop.f32.mrf.mxu1  ;;  %v6099_v9 = vpop.eup %6098  ;;  %v970_v11 = vadd.f32 %v6093_v57, %v969_v0  ;;  %6124 = vtanh.f32 %v377_v1  ;;  %v388_v12 = vadd.f32 %v5518_v5, %v7862_v10  ;;  %v284_v52 = vpack.c.bf16 %v217_v36, %v216_v31  ;;  %v7947_v5 = vld [vmem:[#allocation2 + $0xf68] sm:$0xff] }
 0x137   :  { %v1392_v13 = vadd.f32 %v5662_v6, %v7862_v10  ;;  %v6101_v14 = vpop.eup %6100  ;;  %v1974_v15 = vadd.f32 %v6095_v63, %v1973_v4  ;;  %6126 = vtanh.f32 %v1381_v2  ;;  %v379_v16 = vpop.f32.mrf.mxu0  ;;  %v1294_v53 = vpack.c.bf16 %v1227_v38, %v1226_v37  ;;  %v7945_v4 = vld [vmem:[#allocation2 + $0xf48] sm:$0xff] }
 0x138   :  { %v1383_v17 = vpop.f32.mrf.mxu1  ;;  %v6103_v19 = vpop.eup %6102  ;;  %v971_v20 = vadd.f32 %v6101_v14, %v970_v11  ;;  %6128 = vtanh.f32 %v388_v12  ;;  %v380_v21 = vadd.f32 %v7862_v10, %v379_v16  ;;  %v220_v11 = vld [vmem:[#allocation2 + $0xf80] sm:$0xff]  ;;  %v1295_v24 = vpack.c.bf16 %v7947_v5, %v7945_v4 }
 0x139   :  { %v1384_v22 = vadd.f32 %v7862_v10, %v1383_v17  ;;  %v7923_v27 = vpop.eup %6104  ;;  %v1975_v28 = vadd.f32 %v6103_v19, %v1974_v15  ;;  %6130 = vtanh.f32 %v1392_v13  ;;  %v5521_v30 = vpop.f32.mrf.mxu0  ;;  %5616 = vmatmul.mubr.bf16.gmra.mxu0 %v281_v61  ;;  %5760 = vmatmul.mubr.bf16.gmra.mxu1 %v1291_v62  ;;  %v7939_v62 = vld [vmem:[#allocation2 + $0xf40] sm:$0xff]  ;;  %v1230_v17 = vld [vmem:[#allocation2 + $0xf88] sm:$0xff] }
 0x13a   :  { %v5665_v26 = vpop.f32.mrf.mxu1  ;;  %v7925_v32 = vpop.eup %6106  ;;  %v972_v33 = vadd.f32 %v7898_v45, %v971_v20  ;;  %6132 = vtanh.f32 %v380_v21  ;;  %v401_v34 = vadd.f32 %v5521_v30, %v7862_v10  ;;  %5619 = vmatprep.mubr.bf16.mxu0 %v282_v7  ;;  %5763 = vmatprep.mubr.bf16.mxu1 %v1292_v8  ;;  %v221_v16 = vld [vmem:[#allocation2 + $0xfa0] sm:$0xff] }
 0x13b   :  { %v1405_v35 = vadd.f32 %v5665_v26, %v7862_v10  ;;  %v6109_v39 = vpop.eup %6108  ;;  %v1976_v29 = vadd.f32 %v7900_v50, %v1975_v28  ;;  %6134 = vtanh.f32 %v1384_v22  ;;  %v392_v40 = vpop.f32.mrf.mxu0 }
 0x13c   :  { %v1396_v41 = vpop.f32.mrf.mxu1  ;;  %v6111_v44 = vpop.eup %6110  ;;  %v973_v45 = vadd.f32 %v6097_v3, %v972_v33  ;;  %6136 = vtanh.f32 %v401_v34  ;;  %v393_v46 = vadd.f32 %v7862_v10, %v392_v40  ;;  %v7943_v3 = vld [vmem:[#allocation2 + $0xf60] sm:$0xff]  ;;  %v286_v34 = vpack.c.bf16 %v221_v16, %v220_v11 }
 0x13d   :  { %v1397_v47 = vadd.f32 %v7862_v10, %v1396_v41  ;;  %v6113_v48 = vpop.eup %6112  ;;  %v1977_v49 = vadd.f32 %v6099_v9, %v1976_v29  ;;  %6138 = vtanh.f32 %v1405_v35  ;;  %v5522_v50 = vpop.f32.mrf.mxu0  ;;  %v285_v23 = vpack.c.bf16 %v7943_v3, %v7939_v62  ;;  %v3113_v62 = vld [vmem:[#allocation2 + $0x38] sm:$0xff] }
 0x13e   :  { %v5666_v51 = vpop.f32.mrf.mxu1  ;;  %v6115_v54 = vpop.eup %6114  ;;  %v974_v55 = vadd.f32 %v6109_v39, %v973_v45  ;;  %6140 = vtanh.f32 %v393_v46  ;;  %v404_v56 = vadd.f32 %v5522_v50, %v7862_v10  ;;  %v1296_v35 = vpack.c.bf16 %v1231_v18, %v1230_v17  ;;  %v7973_v50 = vld [vmem:[#allocation2 + $0xfe8] sm:$0xff] }
 0x13f   :  { %v1408_v57 = vadd.f32 %v5666_v51, %v7862_v10  ;;  %v6117_v58 = vpop.eup %6116  ;;  %v1978_v59 = vadd.f32 %v6111_v44, %v1977_v49  ;;  %6142 = vtanh.f32 %v1397_v47  ;;  %v395_v60 = vpop.f32.mrf.mxu0  ;;  %v7971_v49 = vld [vmem:[#allocation2 + $0xfc8] sm:$0xff] }
 0x140   :  { %v1399_v61 = vpop.f32.mrf.mxu1  ;;  %v6119_v63 = vpop.eup %6118  ;;  %v975_v0 = vadd.f32 %v6117_v58, %v974_v55  ;;  %6144 = vtanh.f32 %v404_v56  ;;  %v396_v1 = vadd.f32 %v7862_v10, %v395_v60  ;;  %v2109_v55 = vld [vmem:[#allocation2 + $0x10] sm:$0xff]  ;;  %v1297_v4 = vpack.c.bf16 %v7973_v50, %v7971_v49 }
 0x141   :  { %v1400_v2 = vadd.f32 %v7862_v10, %v1399_v61  ;;  %v7949_v6 = vpop.eup %6120  ;;  %v1979_v7 = vadd.f32 %v6119_v63, %v1978_v59  ;;  %6146 = vtanh.f32 %v1408_v57  ;;  %v5525_v8 = vpop.f32.mrf.mxu0  ;;  %5620 = vmatmul.mubr.bf16.gmra.mxu0 %v283_v42  ;;  %5764 = vmatmul.mubr.bf16.gmra.mxu1 %v1293_v43  ;;  %v7965_v43 = vld [vmem:[#allocation2 + $0xfc0] sm:$0xff]  ;;  %v2110_v60 = vld [vmem:[#allocation2 + $0x30] sm:$0xff]  ;;  %v3112_v61 = vld [vmem:[#allocation2 + $0x18] sm:$0xff] }
 0x142   :  { %v5669_v9 = vpop.f32.mrf.mxu1  ;;  %v7951_v12 = vpop.eup %6122  ;;  %v976_v13 = vadd.f32 %v7923_v27, %v975_v0  ;;  %6148 = vtanh.f32 %v396_v1  ;;  %v417_v14 = vadd.f32 %v5525_v8, %v7862_v10  ;;  %5623 = vmatprep.mubr.bf16.mxu0 %v284_v52  ;;  %5767 = vmatprep.mubr.bf16.mxu1 %v1294_v53 }
 0x143   :  { %v1421_v15 = vadd.f32 %v5669_v9, %v7862_v10  ;;  %v6125_v19 = vpop.eup %6124  ;;  %v1980_v20 = vadd.f32 %v7925_v32, %v1979_v7  ;;  %6150 = vtanh.f32 %v1400_v2  ;;  %v408_v21 = vpop.f32.mrf.mxu0 }
 0x144   :  { %v1412_v22 = vpop.f32.mrf.mxu1  ;;  %v6127_v25 = vpop.eup %6126  ;;  %v977_v27 = vadd.f32 %v6113_v48, %v976_v13  ;;  %6152 = vtanh.f32 %v417_v14  ;;  %v409_v28 = vadd.f32 %v7862_v10, %v408_v21  ;;  %v7969_v48 = vld [vmem:[#allocation2 + $0xfe0] sm:$0xff]  ;;  %v2237_v14 = vpack.c.bf16 %v2110_v60, %v2109_v55  ;;  %v7991_v21 = vld [vmem:[#allocation2 + $0x50] sm:$0xff] }
 0x145   :  { %v1413_v30 = vadd.f32 %v7862_v10, %v1412_v22  ;;  %v6129_v26 = vpop.eup %6128  ;;  %v1981_v31 = vadd.f32 %v6115_v54, %v1980_v20  ;;  %6154 = vtanh.f32 %v1421_v15  ;;  %v5526_v32 = vpop.f32.mrf.mxu0  ;;  %v287_v3 = vpack.c.bf16 %v7969_v48, %v7965_v43  ;;  %v3117_v43 = vld [vmem:[#allocation2 + $0xb8] sm:$0xff] }
 0x146   :  { %v5670_v33 = vpop.f32.mrf.mxu1  ;;  %v6131_v36 = vpop.eup %6130  ;;  %v978_v37 = vadd.f32 %v6125_v19, %v977_v27  ;;  %6156 = vtanh.f32 %v409_v28  ;;  %v420_v38 = vadd.f32 %v5526_v32, %v7862_v10  ;;  %v3240_v15 = vpack.c.bf16 %v3113_v62, %v3112_v61  ;;  %v7993_v27 = vld [vmem:[#allocation2 + $0x70] sm:$0xff]  ;;  %v7995_v28 = vld [vmem:[#allocation2 + $0x58] sm:$0xff] }
 0x147   :  { %v1424_v39 = vadd.f32 %v5670_v33, %v7862_v10  ;;  %v6133_v29 = vpop.eup %6132  ;;  %v1982_v40 = vadd.f32 %v6127_v25, %v1981_v31  ;;  %6158 = vtanh.f32 %v1413_v30  ;;  %v411_v41 = vpop.f32.mrf.mxu0  ;;  %v7997_v30 = vld [vmem:[#allocation2 + $0x78] sm:$0xff] }
 0x148   :  { %v1415_v42 = vpop.f32.mrf.mxu1  ;;  %v6135_v44 = vpop.eup %6134  ;;  %v979_v45 = vadd.f32 %v6133_v29, %v978_v37  ;;  %6160 = vtanh.f32 %v420_v38  ;;  %v412_v46 = vadd.f32 %v7862_v10, %v411_v41  ;;  %v2113_v37 = vld [vmem:[#allocation2 + $0x90] sm:$0xff] }
 0x149   :  { %v1416_v47 = vadd.f32 %v7862_v10, %v1415_v42  ;;  %v7975_v51 = vpop.eup %6136  ;;  %v1983_v52 = vadd.f32 %v6135_v44, %v1982_v40  ;;  %6162 = vtanh.f32 %v1424_v39  ;;  %v5529_v53 = vpop.f32.mrf.mxu0  ;;  %5624 = vmatmul.mubr.bf16.gmra.mxu0 %v285_v23  ;;  %5768 = vmatmul.mubr.bf16.gmra.mxu1 %v1295_v24  ;;  %v2114_v41 = vld [vmem:[#allocation2 + $0xb0] sm:$0xff]  ;;  %v3116_v42 = vld [vmem:[#allocation2 + $0x98] sm:$0xff] }
 0x14a   :  { %v5673_v54 = vpop.f32.mrf.mxu1  ;;  %v7977_v56 = vpop.eup %6138  ;;  %v980_v57 = vadd.f32 %v7949_v6, %v979_v45  ;;  %6164 = vtanh.f32 %v412_v46  ;;  %v433_v58 = vadd.f32 %v5529_v53, %v7862_v10  ;;  %5627 = vmatprep.mubr.bf16.mxu0 %v286_v34  ;;  %5771 = vmatprep.mubr.bf16.mxu1 %v1296_v35  ;;  %v2238_v45 = vpack.c.bf16 %v7993_v27, %v7991_v21 }
 0x14b   :  { %v1437_v59 = vadd.f32 %v5673_v54, %v7862_v10  ;;  %v6141_v63 = vpop.eup %6140  ;;  %v1984_v0 = vadd.f32 %v7951_v12, %v1983_v52  ;;  %6166 = vtanh.f32 %v1416_v47  ;;  %v424_v1 = vpop.f32.mrf.mxu0  ;;  %v3241_v46 = vpack.c.bf16 %v7997_v30, %v7995_v28 }
 0x14c   :  { %v1428_v2 = vpop.f32.mrf.mxu1  ;;  %v6143_v5 = vpop.eup %6142  ;;  %v981_v6 = vadd.f32 %v6129_v26, %v980_v57  ;;  %6168 = vtanh.f32 %v433_v58  ;;  %v425_v7 = vadd.f32 %v7862_v10, %v424_v1  ;;  %v3242_v60 = vpack.c.bf16 %v3117_v43, %v3116_v42 }
 0x14d   :  { %v1429_v8 = vadd.f32 %v7862_v10, %v1428_v2  ;;  %v6145_v9 = vpop.eup %6144  ;;  %v1985_v11 = vadd.f32 %v6131_v36, %v1984_v0  ;;  %6170 = vtanh.f32 %v1437_v59  ;;  %v5530_v12 = vpop.f32.mrf.mxu0  ;;  %v2239_v59 = vpack.c.bf16 %v2114_v41, %v2113_v37 }
 0x14e   :  { %v5674_v13 = vpop.f32.mrf.mxu1  ;;  %v6147_v16 = vpop.eup %6146  ;;  %v982_v17 = vadd.f32 %v6141_v63, %v981_v6  ;;  %6172 = vtanh.f32 %v425_v7  ;;  %v436_v18 = vadd.f32 %v5530_v12, %v7862_v10  ;;  %v8025_v12 = vld [vmem:[#allocation2 + $0xf8] sm:$0xff] }
 0x14f   :  { %v1440_v19 = vadd.f32 %v5674_v13, %v7862_v10  ;;  %v6149_v20 = vpop.eup %6148  ;;  %v1986_v22 = vadd.f32 %v6143_v5, %v1985_v11  ;;  %6174 = vtanh.f32 %v1429_v8  ;;  %v427_v23 = vpop.f32.mrf.mxu0  ;;  %v8023_v11 = vld [vmem:[#allocation2 + $0xd8] sm:$0xff] }
 0x150   :  { %v1431_v24 = vpop.f32.mrf.mxu1  ;;  %v6151_v25 = vpop.eup %6150  ;;  %v983_v26 = vadd.f32 %v6149_v20, %v982_v17  ;;  %6176 = vtanh.f32 %v436_v18  ;;  %v428_v31 = vadd.f32 %v7862_v10, %v427_v23  ;;  %v2117_v17 = vld [vmem:[#allocation2 + $0x110] sm:$0xff]  ;;  %v3120_v23 = vld [vmem:[#allocation2 + $0x118] sm:$0xff] }
 0x151   :  { %v1432_v32 = vadd.f32 %v7862_v10, %v1431_v24  ;;  %v8001_v33 = vpop.eup %6152  ;;  %v1987_v34 = vadd.f32 %v6151_v25, %v1986_v22  ;;  %6178 = vtanh.f32 %v1440_v19  ;;  %v5533_v35 = vpop.f32.mrf.mxu0  ;;  %5628 = vmatmul.mubr.bf16.gmra.mxu0 %v287_v3  ;;  %5772 = vmatmul.mubr.bf16.gmra.mxu1 %v1297_v4  ;;  %v8017_v4 = vld [vmem:[#allocation2 + $0xd0] sm:$0xff]  ;;  %v3121_v24 = vld [vmem:[#allocation2 + $0x138] sm:$0xff] }
 0x152   :  { %v5677_v36 = vpop.f32.mrf.mxu1  ;;  %v8003_v38 = vpop.eup %6154  ;;  %v984_v39 = vadd.f32 %v7975_v51, %v983_v26  ;;  %6180 = vtanh.f32 %v428_v31  ;;  %v449_v29 = vadd.f32 %v5533_v35, %v7862_v10  ;;  %5791 = vmatprep.mubr.bf16.mxu0 %v2237_v14  ;;  %5935 = vmatprep.mubr.bf16.mxu1 %v3240_v15  ;;  %v2118_v22 = vld [vmem:[#allocation2 + $0x130] sm:$0xff]  ;;  %v3243_v31 = vpack.c.bf16 %v8025_v12, %v8023_v11 }
 0x153   :  { %v1453_v40 = vadd.f32 %v5677_v36, %v7862_v10  ;;  %v6157_v44 = vpop.eup %6156  ;;  %v1988_v47 = vadd.f32 %v7977_v56, %v1987_v34  ;;  %6182 = vtanh.f32 %v1432_v32  ;;  %v440_v48 = vpop.f32.mrf.mxu0 }
 0x154   :  { %v1444_v49 = vpop.f32.mrf.mxu1  ;;  %v6159_v50 = vpop.eup %6158  ;;  %v985_v51 = vadd.f32 %v6145_v9, %v984_v39  ;;  %6184 = vtanh.f32 %v449_v29  ;;  %v441_v52 = vadd.f32 %v7862_v10, %v440_v48  ;;  %v8021_v9 = vld [vmem:[#allocation2 + $0xf0] sm:$0xff]  ;;  %v2241_v29 = vpack.c.bf16 %v2118_v22, %v2117_v17 }
 0x155   :  { %v1445_v53 = vadd.f32 %v7862_v10, %v1444_v49  ;;  %v6161_v54 = vpop.eup %6160  ;;  %v1989_v55 = vadd.f32 %v6147_v16, %v1988_v47  ;;  %6186 = vtanh.f32 %v1453_v40  ;;  %v5534_v57 = vpop.f32.mrf.mxu0  ;;  %v2240_v26 = vpack.c.bf16 %v8021_v9, %v8017_v4  ;;  %v8043_v49 = vld [vmem:[#allocation2 + $0x150] sm:$0xff]  ;;  %v3125_v4 = vld [vmem:[#allocation2 + $0x1b8] sm:$0xff] }
 0x156   :  { %v5678_v58 = vpop.f32.mrf.mxu1  ;;  %v6163_v61 = vpop.eup %6162  ;;  %v986_v62 = vadd.f32 %v6157_v44, %v985_v51  ;;  %6188 = vtanh.f32 %v441_v52  ;;  %v452_v56 = vadd.f32 %v5534_v57, %v7862_v10  ;;  %v3244_v40 = vpack.c.bf16 %v3121_v24, %v3120_v23  ;;  %v8051_v57 = vld [vmem:[#allocation2 + $0x178] sm:$0xff] }
 0x157   :  { %v1456_v63 = vadd.f32 %v5678_v58, %v7862_v10  ;;  %v6165_v0 = vpop.eup %6164  ;;  %v1990_v1 = vadd.f32 %v6159_v50, %v1989_v55  ;;  %6190 = vtanh.f32 %v1445_v53  ;;  %v443_v2 = vpop.f32.mrf.mxu0  ;;  %v8049_v55 = vld [vmem:[#allocation2 + $0x158] sm:$0xff] }
 0x158   :  { %v1447_v3 = vpop.f32.mrf.mxu1  ;;  %v6167_v5 = vpop.eup %6166  ;;  %v987_v6 = vadd.f32 %v6165_v0, %v986_v62  ;;  %6192 = vtanh.f32 %v452_v56  ;;  %v444_v7 = vadd.f32 %v7862_v10, %v443_v2  ;;  %v8055_v62 = vld [vmem:[#allocation2 + $0x190] sm:$0xff]  ;;  %v3245_v11 = vpack.c.bf16 %v8051_v57, %v8049_v55 }
 0x159   :  { %v1448_v8 = vadd.f32 %v7862_v10, %v1447_v3  ;;  %v8027_v13 = vpop.eup %6168  ;;  %v1991_v14 = vadd.f32 %v6167_v5, %v1990_v1  ;;  %6194 = vtanh.f32 %v1456_v63  ;;  %v5537_v15 = vpop.f32.mrf.mxu0  ;;  %5792 = vmatmul.mubr.bf16.vlgmr.msra.gmra.mxu0 %v2238_v45  ;;  %5936 = vmatmul.mubr.bf16.vlgmr.msra.gmra.mxu1 %v3241_v46  ;;  %v2122_v2 = vld [vmem:[#allocation2 + $0x1b0] sm:$0xff]  ;;  %v3124_v3 = vld [vmem:[#allocation2 + $0x198] sm:$0xff] }
 0x15a   :  { %v5681_v16 = vpop.f32.mrf.mxu1  ;;  %v8029_v18 = vpop.eup %6170  ;;  %v988_v19 = vadd.f32 %v8001_v33, %v987_v6  ;;  %6196 = vtanh.f32 %v444_v7  ;;  %v465_v20 = vadd.f32 %v5537_v15, %v7862_v10  ;;  %5795 = vmatprep.mubr.bf16.mxu0 %v2239_v59  ;;  %5939 = vmatprep.mubr.bf16.mxu1 %v3242_v60 }
 0x15b   :  { %v1469_v21 = vadd.f32 %v5681_v16, %v7862_v10  ;;  %v6173_v25 = vpop.eup %6172  ;;  %v1992_v27 = vadd.f32 %v8003_v38, %v1991_v14  ;;  %6198 = vtanh.f32 %v1448_v8  ;;  %v456_v28 = vpop.f32.mrf.mxu0 }
 0x15c   :  { %v1460_v30 = vpop.f32.mrf.mxu1  ;;  %v6175_v32 = vpop.eup %6174  ;;  %v989_v33 = vadd.f32 %v6161_v54, %v988_v19  ;;  %6200 = vtanh.f32 %v465_v20  ;;  %v457_v34 = vadd.f32 %v7862_v10, %v456_v28  ;;  %v8047_v54 = vld [vmem:[#allocation2 + $0x170] sm:$0xff]  ;;  %v2243_v20 = vpack.c.bf16 %v2122_v2, %v8055_v62 }
 0x15d   :  { %v1461_v35 = vadd.f32 %v7862_v10, %v1460_v30  ;;  %v6177_v36 = vpop.eup %6176  ;;  %v1993_v37 = vadd.f32 %v6163_v61, %v1992_v27  ;;  %6202 = vtanh.f32 %v1469_v21  ;;  %v5538_v38 = vpop.f32.mrf.mxu0  ;;  %v2242_v9 = vpack.c.bf16 %v8047_v54, %v8043_v49  ;;  %v3129_v49 = vld [vmem:[#allocation2 + $0x238] sm:$0xff] }
 0x15e   :  { %v5682_v39 = vpop.f32.mrf.mxu1  ;;  %v6179_v41 = vpop.eup %6178  ;;  %v990_v42 = vadd.f32 %v6173_v25, %v989_v33  ;;  %6204 = vtanh.f32 %v457_v34  ;;  %v468_v43 = vadd.f32 %v5538_v38, %v7862_v10  ;;  %v3246_v21 = vpack.c.bf16 %v3125_v4, %v3124_v3  ;;  %v8074_v34 = vld [vmem:[#allocation7] ss:$0 sm:$0xff]  ;;  %v8080_v38 = vld [vmem:[#allocation2 + $0x1d8] sm:$0xff] }
 0x15f   :  { %v1472_v44 = vadd.f32 %v5682_v39, %v7862_v10  ;;  %v6181_v45 = vpop.eup %6180  ;;  %v1994_v46 = vadd.f32 %v6175_v32, %v1993_v37  ;;  %6206 = vtanh.f32 %v1461_v35  ;;  %v459_v47 = vpop.f32.mrf.mxu0  ;;  %v8078_v37 = vld [vmem:[#allocation2 + $0x1f0] sm:$0xff] }
 0x160   :  { %v1463_v48 = vpop.f32.mrf.mxu1  ;;  %v6183_v50 = vpop.eup %6182  ;;  %v991_v51 = vadd.f32 %v6181_v45, %v990_v42  ;;  %6208 = vtanh.f32 %v468_v43  ;;  %v460_v52 = vadd.f32 %v7862_v10, %v459_v47  ;;  %v2125_v42 = vld [vmem:[#allocation2 + $0x210] sm:$0xff] }
 0x161   :  { %v1464_v53 = vadd.f32 %v7862_v10, %v1463_v48  ;;  %v8053_v58 = vpop.eup %6184  ;;  %v1995_v59 = vadd.f32 %v6183_v50, %v1994_v46  ;;  %6210 = vtanh.f32 %v1472_v44  ;;  %v5541_v60 = vpop.f32.mrf.mxu0  ;;  %5796 = vmatmul.mubr.bf16.gmra.mxu0 %v2240_v26  ;;  %5940 = vmatmul.mubr.bf16.gmra.mxu1 %v3243_v31  ;;  %v8072_v31 = vld [vmem:[#allocation2 + $0x1d0] sm:$0xff]  ;;  %v3128_v48 = vld [vmem:[#allocation2 + $0x218] sm:$0xff] }
 0x162   :  { %v5685_v61 = vpop.f32.mrf.mxu1  ;;  %v8057_v56 = vpop.eup %6186  ;;  %v992_v63 = vadd.f32 %v8027_v13, %v991_v51  ;;  %6212 = vtanh.f32 %v460_v52  ;;  %v481_v0 = vadd.f32 %v5541_v60, %v7862_v10  ;;  %5799 = vmatprep.mubr.bf16.mxu0 %v2241_v29  ;;  %5943 = vmatprep.mubr.bf16.mxu1 %v3244_v40  ;;  %v2126_v47 = vld [vmem:[#allocation2 + $0x230] sm:$0xff]  ;;  %v2244_v54 = vpack.c.bf16 %v8078_v37, %v8072_v31  ;;  %v3133_v31 = vld [vmem:[#allocation2 + $0x2b8] sm:$0xff] }
 0x163   :  { %v1485_v1 = vadd.f32 %v5685_v61, %v7862_v10  ;;  %v6189_v5 = vpop.eup %6188  ;;  %v1996_v6 = vadd.f32 %v8029_v18, %v1995_v59  ;;  %6214 = vtanh.f32 %v1464_v53  ;;  %v472_v7 = vpop.f32.mrf.mxu0 }
 0x164   :  { %v1476_v8 = vpop.f32.mrf.mxu1  ;;  %v6191_v12 = vpop.eup %6190  ;;  %v993_v13 = vadd.f32 %v6177_v36, %v992_v63  ;;  %6216 = vtanh.f32 %v481_v0  ;;  %v473_v14 = vadd.f32 %v7862_v10, %v472_v7  ;;  %v2245_v0 = vpack.c.bf16 %v2126_v47, %v2125_v42 }
 0x165   :  { %v1477_v15 = vadd.f32 %v7862_v10, %v1476_v8  ;;  %v6193_v16 = vpop.eup %6192  ;;  %v1997_v17 = vadd.f32 %v6179_v41, %v1996_v6  ;;  %6218 = vtanh.f32 %v1485_v1  ;;  %v5542_v18 = vpop.f32.mrf.mxu0  ;;  %v3248_v1 = vpack.c.bf16 %v3129_v49, %v3128_v48 }
 0x166   :  { %v5686_v19 = vpop.f32.mrf.mxu1  ;;  %v6195_v22 = vpop.eup %6194  ;;  %v994_v23 = vadd.f32 %v6189_v5, %v993_v13  ;;  %6220 = vtanh.f32 %v473_v14  ;;  %v484_v24 = vadd.f32 %v5542_v18, %v7862_v10  ;;  %v8108_v18 = vld [vmem:[#allocation2 + $0x278] sm:$0xff] }
 0x167   :  { %v1488_v25 = vadd.f32 %v5686_v19, %v7862_v10  ;;  %v6197_v27 = vpop.eup %6196  ;;  %v1998_v28 = vadd.f32 %v6191_v12, %v1997_v17  ;;  %6222 = vtanh.f32 %v1477_v15  ;;  %v475_v30 = vpop.f32.mrf.mxu0  ;;  %v8082_v10 = vld [vmem:[#allocation2 + $0x1f8] sm:$0xff] }
 0x168   :  { %v1479_v26 = vpop.f32.mrf.mxu1  ;;  %v6199_v32 = vpop.eup %6198  ;;  %v995_v33 = vadd.f32 %v6197_v27, %v994_v23  ;;  %6224 = vtanh.f32 %v484_v24  ;;  %v476_v35 = vadd.f32 %v8074_v34, %v475_v30  ;;  %v3247_v55 = vpack.c.bf16 %v8082_v10, %v8080_v38  ;;  %v8106_v17 = vld [vmem:[#allocation2 + $0x258] sm:$0xff]  ;;  %v2129_v23 = vld [vmem:[#allocation2 + $0x290] sm:$0xff] }
 0x169   :  { %v1480_v36 = vadd.f32 %v8074_v34, %v1479_v26  ;;  %v8084_v39 = vpop.eup %6200  ;;  %v1999_v29 = vadd.f32 %v6199_v32, %v1998_v28  ;;  %6226 = vtanh.f32 %v1488_v25  ;;  %v5545_v40 = vpop.f32.mrf.mxu0  ;;  %5800 = vmatmul.mubr.bf16.gmra.mxu0 %v2242_v9  ;;  %5944 = vmatmul.mubr.bf16.gmra.mxu1 %v3245_v11  ;;  %v8100_v11 = vld [vmem:[#allocation2 + $0x250] sm:$0xff]  ;;  %v3132_v26 = vld [vmem:[#allocation2 + $0x298] sm:$0xff]  ;;  %v3249_v38 = vpack.c.bf16 %v8108_v18, %v8106_v17 }
 0x16a   :  { %v5689_v41 = vpop.f32.mrf.mxu1  ;;  %v8086_v43 = vpop.eup %6202  ;;  %v996_v44 = vadd.f32 %v8053_v58, %v995_v33  ;;  %6228 = vtanh.f32 %v476_v35  ;;  %v497_v45 = vadd.f32 %v8074_v34, %v5545_v40  ;;  %5803 = vmatprep.mubr.bf16.mxu0 %v2243_v20  ;;  %5947 = vmatprep.mubr.bf16.mxu1 %v3246_v21  ;;  %v2130_v30 = vld [vmem:[#allocation2 + $0x2b0] sm:$0xff] }
 0x16b   :  { %v1501_v46 = vadd.f32 %v8074_v34, %v5689_v41  ;;  %v6205_v50 = vpop.eup %6204  ;;  %v2000_v51 = vadd.f32 %v8057_v56, %v1999_v29  ;;  %6230 = vtanh.f32 %v1480_v36  ;;  %v488_v52 = vpop.f32.mrf.mxu0 }
 0x16c   :  { %v1492_v53 = vpop.f32.mrf.mxu1  ;;  %v6207_v57 = vpop.eup %6206  ;;  %v997_v58 = vadd.f32 %v6193_v16, %v996_v44  ;;  %6232 = vtanh.f32 %v497_v45  ;;  %v489_v59 = vadd.f32 %v8074_v34, %v488_v52  ;;  %v8104_v16 = vld [vmem:[#allocation2 + $0x270] sm:$0xff]  ;;  %v2247_v45 = vpack.c.bf16 %v2130_v30, %v2129_v23 }
 0x16d   :  { %v1493_v60 = vadd.f32 %v8074_v34, %v1492_v53  ;;  %v6209_v61 = vpop.eup %6208  ;;  %v2001_v62 = vadd.f32 %v6195_v22, %v2000_v51  ;;  %6234 = vtanh.f32 %v1501_v46  ;;  %v5546_v56 = vpop.f32.mrf.mxu0  ;;  %v2246_v37 = vpack.c.bf16 %v8104_v16, %v8100_v11  ;;  %v3137_v11 = vld [vmem:[#allocation2 + $0x338] sm:$0xff] }
 0x16e   :  { %v5690_v63 = vpop.f32.mrf.mxu1  ;;  %v6211_v2 = vpop.eup %6210  ;;  %v998_v3 = vadd.f32 %v6205_v50, %v997_v58  ;;  %6236 = vtanh.f32 %v489_v59  ;;  %v500_v4 = vadd.f32 %v8074_v34, %v5546_v56  ;;  %v3250_v46 = vpack.c.bf16 %v3133_v31, %v3132_v26  ;;  %v8134_v56 = vld [vmem:[#allocation2 + $0x2f8] sm:$0xff] }
 0x16f   :  { %v1504_v5 = vadd.f32 %v8074_v34, %v5690_v63  ;;  %v6213_v6 = vpop.eup %6212  ;;  %v2002_v7 = vadd.f32 %v6207_v57, %v2001_v62  ;;  %6238 = vtanh.f32 %v1493_v60  ;;  %v491_v8 = vpop.f32.mrf.mxu0  ;;  %v8132_v62 = vld [vmem:[#allocation2 + $0x2d8] sm:$0xff] }
 0x170   :  { %v1495_v9 = vpop.f32.mrf.mxu1  ;;  %v6215_v12 = vpop.eup %6214  ;;  %v999_v13 = vadd.f32 %v6213_v6, %v998_v3  ;;  %6240 = vtanh.f32 %v500_v4  ;;  %v492_v14 = vadd.f32 %v8074_v34, %v491_v8  ;;  %v2133_v3 = vld [vmem:[#allocation2 + $0x310] sm:$0xff]  ;;  %v3251_v17 = vpack.c.bf16 %v8134_v56, %v8132_v62 }
 0x171   :  { %v1496_v15 = vadd.f32 %v8074_v34, %v1495_v9  ;;  %v8110_v19 = vpop.eup %6216  ;;  %v2003_v20 = vadd.f32 %v6215_v12, %v2002_v7  ;;  %6242 = vtanh.f32 %v1504_v5  ;;  %v5549_v21 = vpop.f32.mrf.mxu0  ;;  %5804 = vmatmul.mubr.bf16.gmra.mxu0 %v2244_v54  ;;  %5948 = vmatmul.mubr.bf16.gmra.mxu1 %v3247_v55  ;;  %v8126_v55 = vld [vmem:[#allocation2 + $0x2d0] sm:$0xff]  ;;  %v3136_v9 = vld [vmem:[#allocation2 + $0x318] sm:$0xff] }
 0x172   :  { %v5693_v22 = vpop.f32.mrf.mxu1  ;;  %v8112_v24 = vpop.eup %6218  ;;  %v1000_v25 = vadd.f32 %v8084_v39, %v999_v13  ;;  %6244 = vtanh.f32 %v492_v14  ;;  %v513_v27 = vadd.f32 %v8074_v34, %v5549_v21  ;;  %5807 = vmatprep.mubr.bf16.mxu0 %v2245_v0  ;;  %5951 = vmatprep.mubr.bf16.mxu1 %v3248_v1  ;;  %v2134_v8 = vld [vmem:[#allocation2 + $0x330] sm:$0xff] }
 0x173   :  { %v1517_v28 = vadd.f32 %v8074_v34, %v5693_v22  ;;  %v6221_v32 = vpop.eup %6220  ;;  %v2004_v33 = vadd.f32 %v8086_v43, %v2003_v20  ;;  %6246 = vtanh.f32 %v1496_v15  ;;  %v504_v35 = vpop.f32.mrf.mxu0 }
 0x174   :  { %v1508_v36 = vpop.f32.mrf.mxu1  ;;  %v6223_v10 = vpop.eup %6222  ;;  %v1001_v39 = vadd.f32 %v6209_v61, %v1000_v25  ;;  %6248 = vtanh.f32 %v513_v27  ;;  %v505_v29 = vadd.f32 %v8074_v34, %v504_v35  ;;  %v8130_v61 = vld [vmem:[#allocation2 + $0x2f0] sm:$0xff]  ;;  %v2249_v27 = vpack.c.bf16 %v2134_v8, %v2133_v3 }
 0x175   :  { %v1509_v40 = vadd.f32 %v8074_v34, %v1508_v36  ;;  %v6225_v41 = vpop.eup %6224  ;;  %v2005_v42 = vadd.f32 %v6211_v2, %v2004_v33  ;;  %6250 = vtanh.f32 %v1517_v28  ;;  %v5550_v43 = vpop.f32.mrf.mxu0  ;;  %v2248_v16 = vpack.c.bf16 %v8130_v61, %v8126_v55  ;;  %v3141_v55 = vld [vmem:[#allocation2 + $0x3b8] sm:$0xff] }
 0x176   :  { %v5694_v44 = vpop.f32.mrf.mxu1  ;;  %v6227_v47 = vpop.eup %6226  ;;  %v1002_v48 = vadd.f32 %v6221_v32, %v1001_v39  ;;  %6252 = vtanh.f32 %v505_v29  ;;  %v516_v49 = vadd.f32 %v8074_v34, %v5550_v43  ;;  %v3252_v28 = vpack.c.bf16 %v3137_v11, %v3136_v9  ;;  %v8160_v43 = vld [vmem:[#allocation2 + $0x378] sm:$0xff] }
 0x177   :  { %v1520_v50 = vadd.f32 %v8074_v34, %v5694_v44  ;;  %v6229_v51 = vpop.eup %6228  ;;  %v2006_v52 = vadd.f32 %v6223_v10, %v2005_v42  ;;  %6254 = vtanh.f32 %v1509_v40  ;;  %v507_v53 = vpop.f32.mrf.mxu0  ;;  %v8158_v42 = vld [vmem:[#allocation2 + $0x358] sm:$0xff] }
 0x178   :  { %v1511_v54 = vpop.f32.mrf.mxu1  ;;  %v6231_v57 = vpop.eup %6230  ;;  %v1003_v58 = vadd.f32 %v6229_v51, %v1002_v48  ;;  %6256 = vtanh.f32 %v516_v49  ;;  %v508_v59 = vadd.f32 %v8074_v34, %v507_v53  ;;  %v2137_v48 = vld [vmem:[#allocation2 + $0x390] sm:$0xff]  ;;  %v3253_v62 = vpack.c.bf16 %v8160_v43, %v8158_v42 }
 0x179   :  { %v1512_v60 = vadd.f32 %v8074_v34, %v1511_v54  ;;  %v8136_v63 = vpop.eup %6232  ;;  %v2007_v0 = vadd.f32 %v6231_v57, %v2006_v52  ;;  %6258 = vtanh.f32 %v1520_v50  ;;  %v5553_v1 = vpop.f32.mrf.mxu0  ;;  %5808 = vmatmul.mubr.bf16.gmra.mxu0 %v2246_v37  ;;  %5952 = vmatmul.mubr.bf16.gmra.mxu1 %v3249_v38  ;;  %v8152_v38 = vld [vmem:[#allocation2 + $0x350] sm:$0xff]  ;;  %v3140_v54 = vld [vmem:[#allocation2 + $0x398] sm:$0xff] }
 0x17a   :  { %v5697_v2 = vpop.f32.mrf.mxu1  ;;  %v8138_v4 = vpop.eup %6234  ;;  %v1004_v5 = vadd.f32 %v8110_v19, %v1003_v58  ;;  %6260 = vtanh.f32 %v508_v59  ;;  %v529_v6 = vadd.f32 %v8074_v34, %v5553_v1  ;;  %5811 = vmatprep.mubr.bf16.mxu0 %v2247_v45  ;;  %5955 = vmatprep.mubr.bf16.mxu1 %v3250_v46  ;;  %v2138_v53 = vld [vmem:[#allocation2 + $0x3b0] sm:$0xff] }
 0x17b   :  { %v1533_v7 = vadd.f32 %v8074_v34, %v5697_v2  ;;  %v6237_v12 = vpop.eup %6236  ;;  %v2008_v13 = vadd.f32 %v8112_v24, %v2007_v0  ;;  %6262 = vtanh.f32 %v1512_v60  ;;  %v520_v14 = vpop.f32.mrf.mxu0 }
 0x17c   :  { %v1524_v15 = vpop.f32.mrf.mxu1  ;;  %v6239_v18 = vpop.eup %6238  ;;  %v1005_v19 = vadd.f32 %v6225_v41, %v1004_v5  ;;  %6264 = vtanh.f32 %v529_v6  ;;  %v521_v20 = vadd.f32 %v8074_v34, %v520_v14  ;;  %v8156_v41 = vld [vmem:[#allocation2 + $0x370] sm:$0xff]  ;;  %v2251_v6 = vpack.c.bf16 %v2138_v53, %v2137_v48 }
 0x17d   :  { %v1525_v21 = vadd.f32 %v8074_v34, %v1524_v15  ;;  %v6241_v22 = vpop.eup %6240  ;;  %v2009_v23 = vadd.f32 %v6227_v47, %v2008_v13  ;;  %6266 = vtanh.f32 %v1533_v7  ;;  %v5554_v24 = vpop.f32.mrf.mxu0  ;;  %v2250_v61 = vpack.c.bf16 %v8156_v41, %v8152_v38  ;;  %v3145_v38 = vld [vmem:[#allocation2 + $0x438] sm:$0xff] }
 0x17e   :  { %v5698_v25 = vpop.f32.mrf.mxu1  ;;  %v6243_v30 = vpop.eup %6242  ;;  %v1006_v26 = vadd.f32 %v6237_v12, %v1005_v19  ;;  %6268 = vtanh.f32 %v521_v20  ;;  %v532_v31 = vadd.f32 %v8074_v34, %v5554_v24  ;;  %v3254_v7 = vpack.c.bf16 %v3141_v55, %v3140_v54  ;;  %v8186_v24 = vld [vmem:[#allocation2 + $0x3f8] sm:$0xff] }
 0x17f   :  { %v1536_v32 = vadd.f32 %v8074_v34, %v5698_v25  ;;  %v6245_v33 = vpop.eup %6244  ;;  %v2010_v35 = vadd.f32 %v6239_v18, %v2009_v23  ;;  %6270 = vtanh.f32 %v1525_v21  ;;  %v523_v36 = vpop.f32.mrf.mxu0  ;;  %v8184_v23 = vld [vmem:[#allocation2 + $0x3d8] sm:$0xff] }
 0x180   :  { %v1527_v37 = vpop.f32.mrf.mxu1  ;;  %v6247_v10 = vpop.eup %6246  ;;  %v1007_v39 = vadd.f32 %v6245_v33, %v1006_v26  ;;  %6272 = vtanh.f32 %v532_v31  ;;  %v524_v29 = vadd.f32 %v8074_v34, %v523_v36  ;;  %v2141_v26 = vld [vmem:[#allocation2 + $0x410] sm:$0xff]  ;;  %v3255_v42 = vpack.c.bf16 %v8186_v24, %v8184_v23 }
 0x181   :  { %v1528_v40 = vadd.f32 %v8074_v34, %v1527_v37  ;;  %v8162_v44 = vpop.eup %6248  ;;  %v2011_v45 = vadd.f32 %v6247_v10, %v2010_v35  ;;  %6274 = vtanh.f32 %v1536_v32  ;;  %v5557_v46 = vpop.f32.mrf.mxu0  ;;  %5812 = vmatmul.mubr.bf16.gmra.mxu0 %v2248_v16  ;;  %5956 = vmatmul.mubr.bf16.gmra.mxu1 %v3251_v17  ;;  %v8178_v17 = vld [vmem:[#allocation2 + $0x3d0] sm:$0xff]  ;;  %v3144_v37 = vld [vmem:[#allocation2 + $0x418] sm:$0xff] }
 0x182   :  { %v5701_v47 = vpop.f32.mrf.mxu1  ;;  %v8164_v49 = vpop.eup %6250  ;;  %v1008_v50 = vadd.f32 %v8136_v63, %v1007_v39  ;;  %6276 = vtanh.f32 %v524_v29  ;;  %v545_v51 = vadd.f32 %v8074_v34, %v5557_v46  ;;  %5815 = vmatprep.mubr.bf16.mxu0 %v2249_v27  ;;  %5959 = vmatprep.mubr.bf16.mxu1 %v3252_v28  ;;  %v2142_v36 = vld [vmem:[#allocation2 + $0x430] sm:$0xff] }
 0x183   :  { %v1549_v52 = vadd.f32 %v8074_v34, %v5701_v47  ;;  %v6253_v57 = vpop.eup %6252  ;;  %v2012_v58 = vadd.f32 %v8138_v4, %v2011_v45  ;;  %6278 = vtanh.f32 %v1528_v40  ;;  %v536_v59 = vpop.f32.mrf.mxu0 }
 0x184   :  { %v1540_v60 = vpop.f32.mrf.mxu1  ;;  %v6255_v56 = vpop.eup %6254  ;;  %v1009_v63 = vadd.f32 %v6241_v22, %v1008_v50  ;;  %6280 = vtanh.f32 %v545_v51  ;;  %v537_v0 = vadd.f32 %v8074_v34, %v536_v59  ;;  %v8182_v22 = vld [vmem:[#allocation2 + $0x3f0] sm:$0xff]  ;;  %v2253_v51 = vpack.c.bf16 %v2142_v36, %v2141_v26 }
 0x185   :  { %v1541_v1 = vadd.f32 %v8074_v34, %v1540_v60  ;;  %v6257_v2 = vpop.eup %6256  ;;  %v2013_v3 = vadd.f32 %v6243_v30, %v2012_v58  ;;  %6282 = vtanh.f32 %v1549_v52  ;;  %v5558_v4 = vpop.f32.mrf.mxu0  ;;  %v2252_v41 = vpack.c.bf16 %v8182_v22, %v8178_v17  ;;  %v3149_v17 = vld [vmem:[#allocation2 + $0x4b8] sm:$0xff] }
 0x186   :  { %v5702_v5 = vpop.f32.mrf.mxu1  ;;  %v6259_v8 = vpop.eup %6258  ;;  %v1010_v9 = vadd.f32 %v6253_v57, %v1009_v63  ;;  %6284 = vtanh.f32 %v537_v0  ;;  %v548_v11 = vadd.f32 %v8074_v34, %v5558_v4  ;;  %v3256_v52 = vpack.c.bf16 %v3145_v38, %v3144_v37  ;;  %v8212_v4 = vld [vmem:[#allocation2 + $0x478] sm:$0xff] }
 0x187   :  { %v1552_v12 = vadd.f32 %v8074_v34, %v5702_v5  ;;  %v6261_v13 = vpop.eup %6260  ;;  %v2014_v14 = vadd.f32 %v6255_v56, %v2013_v3  ;;  %6286 = vtanh.f32 %v1541_v1  ;;  %v539_v15 = vpop.f32.mrf.mxu0  ;;  %v8210_v3 = vld [vmem:[#allocation2 + $0x458] sm:$0xff] }
 0x188   :  { %v1543_v16 = vpop.f32.mrf.mxu1  ;;  %v6263_v18 = vpop.eup %6262  ;;  %v1011_v19 = vadd.f32 %v6261_v13, %v1010_v9  ;;  %6288 = vtanh.f32 %v548_v11  ;;  %v540_v20 = vadd.f32 %v8074_v34, %v539_v15  ;;  %v2145_v9 = vld [vmem:[#allocation2 + $0x490] sm:$0xff]  ;;  %v3257_v23 = vpack.c.bf16 %v8212_v4, %v8210_v3 }
 0x189   :  { %v1544_v21 = vadd.f32 %v8074_v34, %v1543_v16  ;;  %v8188_v25 = vpop.eup %6264  ;;  %v2015_v27 = vadd.f32 %v6263_v18, %v2014_v14  ;;  %6290 = vtanh.f32 %v1552_v12  ;;  %v5561_v28 = vpop.f32.mrf.mxu0  ;;  %5816 = vmatmul.mubr.bf16.gmra.mxu0 %v2250_v61  ;;  %5960 = vmatmul.mubr.bf16.gmra.mxu1 %v3253_v62  ;;  %v8204_v62 = vld [vmem:[#allocation2 + $0x450] sm:$0xff]  ;;  %v3148_v16 = vld [vmem:[#allocation2 + $0x498] sm:$0xff] }
 0x18a   :  { %v5705_v30 = vpop.f32.mrf.mxu1  ;;  %v8190_v31 = vpop.eup %6266  ;;  %v1012_v32 = vadd.f32 %v8162_v44, %v1011_v19  ;;  %6292 = vtanh.f32 %v540_v20  ;;  %v561_v33 = vadd.f32 %v8074_v34, %v5561_v28  ;;  %5819 = vmatprep.mubr.bf16.mxu0 %v2251_v6  ;;  %5963 = vmatprep.mubr.bf16.mxu1 %v3254_v7  ;;  %v2146_v15 = vld [vmem:[#allocation2 + $0x4b0] sm:$0xff] }
 0x18b   :  { %v1565_v35 = vadd.f32 %v8074_v34, %v5705_v30  ;;  %v6269_v10 = vpop.eup %6268  ;;  %v2016_v39 = vadd.f32 %v8164_v49, %v2015_v27  ;;  %6294 = vtanh.f32 %v1544_v21  ;;  %v552_v29 = vpop.f32.mrf.mxu0 }
 0x18c   :  { %v1556_v40 = vpop.f32.mrf.mxu1  ;;  %v6271_v43 = vpop.eup %6270  ;;  %v1013_v44 = vadd.f32 %v6257_v2, %v1012_v32  ;;  %6296 = vtanh.f32 %v561_v33  ;;  %v553_v45 = vadd.f32 %v8074_v34, %v552_v29  ;;  %v8208_v2 = vld [vmem:[#allocation2 + $0x470] sm:$0xff]  ;;  %v2255_v33 = vpack.c.bf16 %v2146_v15, %v2145_v9 }
 0x18d   :  { %v1557_v46 = vadd.f32 %v8074_v34, %v1556_v40  ;;  %v6273_v47 = vpop.eup %6272  ;;  %v2017_v48 = vadd.f32 %v6259_v8, %v2016_v39  ;;  %6298 = vtanh.f32 %v1565_v35  ;;  %v5562_v49 = vpop.f32.mrf.mxu0  ;;  %v2254_v22 = vpack.c.bf16 %v8208_v2, %v8204_v62  ;;  %v3153_v62 = vld [vmem:[#allocation2 + $0x538] sm:$0xff] }
 0x18e   :  { %v5706_v50 = vpop.f32.mrf.mxu1  ;;  %v6275_v53 = vpop.eup %6274  ;;  %v1014_v54 = vadd.f32 %v6269_v10, %v1013_v44  ;;  %6300 = vtanh.f32 %v553_v45  ;;  %v564_v55 = vadd.f32 %v8074_v34, %v5562_v49  ;;  %v3258_v35 = vpack.c.bf16 %v3149_v17, %v3148_v16  ;;  %v8238_v49 = vld [vmem:[#allocation2 + $0x4f8] sm:$0xff] }
 0x18f   :  { %v1568_v57 = vadd.f32 %v8074_v34, %v5706_v50  ;;  %v6277_v58 = vpop.eup %6276  ;;  %v2018_v59 = vadd.f32 %v6271_v43, %v2017_v48  ;;  %6302 = vtanh.f32 %v1557_v46  ;;  %v555_v60 = vpop.f32.mrf.mxu0  ;;  %v8236_v48 = vld [vmem:[#allocation2 + $0x4d8] sm:$0xff] }
 0x190   :  { %v1559_v61 = vpop.f32.mrf.mxu1  ;;  %v6279_v56 = vpop.eup %6278  ;;  %v1015_v63 = vadd.f32 %v6277_v58, %v1014_v54  ;;  %6304 = vtanh.f32 %v564_v55  ;;  %v556_v0 = vadd.f32 %v8074_v34, %v555_v60  ;;  %v2149_v54 = vld [vmem:[#allocation2 + $0x510] sm:$0xff]  ;;  %v3259_v3 = vpack.c.bf16 %v8238_v49, %v8236_v48 }
 0x191   :  { %v1560_v1 = vadd.f32 %v8074_v34, %v1559_v61  ;;  %v8214_v5 = vpop.eup %6280  ;;  %v2019_v6 = vadd.f32 %v6279_v56, %v2018_v59  ;;  %6306 = vtanh.f32 %v1568_v57  ;;  %v5565_v7 = vpop.f32.mrf.mxu0  ;;  %5820 = vmatmul.mubr.bf16.gmra.mxu0 %v2252_v41  ;;  %5964 = vmatmul.mubr.bf16.gmra.mxu1 %v3255_v42  ;;  %v8230_v42 = vld [vmem:[#allocation2 + $0x4d0] sm:$0xff]  ;;  %v3152_v61 = vld [vmem:[#allocation2 + $0x518] sm:$0xff] }
 0x192   :  { %v5709_v8 = vpop.f32.mrf.mxu1  ;;  %v8216_v11 = vpop.eup %6282  ;;  %v1016_v12 = vadd.f32 %v8188_v25, %v1015_v63  ;;  %6308 = vtanh.f32 %v556_v0  ;;  %v577_v13 = vadd.f32 %v8074_v34, %v5565_v7  ;;  %5823 = vmatprep.mubr.bf16.mxu0 %v2253_v51  ;;  %5967 = vmatprep.mubr.bf16.mxu1 %v3256_v52  ;;  %v2150_v60 = vld [vmem:[#allocation2 + $0x530] sm:$0xff] }
 0x193   :  { %v1581_v14 = vadd.f32 %v8074_v34, %v5709_v8  ;;  %v6285_v18 = vpop.eup %6284  ;;  %v2020_v19 = vadd.f32 %v8190_v31, %v2019_v6  ;;  %6310 = vtanh.f32 %v1560_v1  ;;  %v568_v20 = vpop.f32.mrf.mxu0 }
 0x194   :  { %v1572_v21 = vpop.f32.mrf.mxu1  ;;  %v6287_v24 = vpop.eup %6286  ;;  %v1017_v25 = vadd.f32 %v6273_v47, %v1016_v12  ;;  %6312 = vtanh.f32 %v577_v13  ;;  %v569_v27 = vadd.f32 %v8074_v34, %v568_v20  ;;  %v8234_v47 = vld [vmem:[#allocation2 + $0x4f0] sm:$0xff]  ;;  %v2257_v13 = vpack.c.bf16 %v2150_v60, %v2149_v54 }
 0x195   :  { %v1573_v28 = vadd.f32 %v8074_v34, %v1572_v21  ;;  %v6289_v30 = vpop.eup %6288  ;;  %v2021_v26 = vadd.f32 %v6275_v53, %v2020_v19  ;;  %6314 = vtanh.f32 %v1581_v14  ;;  %v5566_v31 = vpop.f32.mrf.mxu0  ;;  %v2256_v2 = vpack.c.bf16 %v8234_v47, %v8230_v42  ;;  %v3157_v42 = vld [vmem:[#allocation2 + $0x5b8] sm:$0xff] }
 0x196   :  { %v5710_v32 = vpop.f32.mrf.mxu1  ;;  %v6291_v36 = vpop.eup %6290  ;;  %v1018_v37 = vadd.f32 %v6285_v18, %v1017_v25  ;;  %6316 = vtanh.f32 %v569_v27  ;;  %v580_v38 = vadd.f32 %v8074_v34, %v5566_v31  ;;  %v3260_v14 = vpack.c.bf16 %v3153_v62, %v3152_v61  ;;  %v8264_v31 = vld [vmem:[#allocation2 + $0x578] sm:$0xff] }
 0x197   :  { %v1584_v10 = vadd.f32 %v8074_v34, %v5710_v32  ;;  %v6293_v39 = vpop.eup %6292  ;;  %v2022_v29 = vadd.f32 %v6287_v24, %v2021_v26  ;;  %6318 = vtanh.f32 %v1573_v28  ;;  %v571_v40 = vpop.f32.mrf.mxu0  ;;  %v8262_v26 = vld [vmem:[#allocation2 + $0x558] sm:$0xff] }
 0x198   :  { %v1575_v41 = vpop.f32.mrf.mxu1  ;;  %v6295_v43 = vpop.eup %6294  ;;  %v1019_v44 = vadd.f32 %v6293_v39, %v1018_v37  ;;  %6320 = vtanh.f32 %v580_v38  ;;  %v572_v45 = vadd.f32 %v8074_v34, %v571_v40  ;;  %v2153_v37 = vld [vmem:[#allocation2 + $0x590] sm:$0xff]  ;;  %v3261_v48 = vpack.c.bf16 %v8264_v31, %v8262_v26 }
 0x199   :  { %v1576_v46 = vadd.f32 %v8074_v34, %v1575_v41  ;;  %v8240_v50 = vpop.eup %6296  ;;  %v2023_v51 = vadd.f32 %v6295_v43, %v2022_v29  ;;  %6322 = vtanh.f32 %v1584_v10  ;;  %v5569_v52 = vpop.f32.mrf.mxu0  ;;  %5824 = vmatmul.mubr.bf16.gmra.mxu0 %v2254_v22  ;;  %5968 = vmatmul.mubr.bf16.gmra.mxu1 %v3257_v23  ;;  %v8256_v23 = vld [vmem:[#allocation2 + $0x550] sm:$0xff]  ;;  %v3156_v41 = vld [vmem:[#allocation2 + $0x598] sm:$0xff] }
 0x19a   :  { %v5713_v53 = vpop.f32.mrf.mxu1  ;;  %v8242_v55 = vpop.eup %6298  ;;  %v1020_v57 = vadd.f32 %v8214_v5, %v1019_v44  ;;  %6324 = vtanh.f32 %v572_v45  ;;  %v593_v58 = vadd.f32 %v8074_v34, %v5569_v52  ;;  %5827 = vmatprep.mubr.bf16.mxu0 %v2255_v33  ;;  %5971 = vmatprep.mubr.bf16.mxu1 %v3258_v35  ;;  %v2154_v40 = vld [vmem:[#allocation2 + $0x5b0] sm:$0xff] }
 0x19b   :  { %v1597_v59 = vadd.f32 %v8074_v34, %v5713_v53  ;;  %v6301_v56 = vpop.eup %6300  ;;  %v2024_v63 = vadd.f32 %v8216_v11, %v2023_v51  ;;  %6326 = vtanh.f32 %v1576_v46  ;;  %v584_v0 = vpop.f32.mrf.mxu0 }
 0x19c   :  { %v1588_v1 = vpop.f32.mrf.mxu1  ;;  %v6303_v4 = vpop.eup %6302  ;;  %v1021_v5 = vadd.f32 %v6289_v30, %v1020_v57  ;;  %6328 = vtanh.f32 %v593_v58  ;;  %v585_v6 = vadd.f32 %v8074_v34, %v584_v0  ;;  %v8260_v30 = vld [vmem:[#allocation2 + $0x570] sm:$0xff]  ;;  %v2259_v58 = vpack.c.bf16 %v2154_v40, %v2153_v37 }
 0x19d   :  { %v1589_v7 = vadd.f32 %v8074_v34, %v1588_v1  ;;  %v6305_v8 = vpop.eup %6304  ;;  %v2025_v9 = vadd.f32 %v6291_v36, %v2024_v63  ;;  %6330 = vtanh.f32 %v1597_v59  ;;  %v5570_v11 = vpop.f32.mrf.mxu0  ;;  %v2258_v47 = vpack.c.bf16 %v8260_v30, %v8256_v23  ;;  %v3161_v23 = vld [vmem:[#allocation2 + $0x638] sm:$0xff] }
 0x19e   :  { %v5714_v12 = vpop.f32.mrf.mxu1  ;;  %v6307_v15 = vpop.eup %6306  ;;  %v1022_v16 = vadd.f32 %v6301_v56, %v1021_v5  ;;  %6332 = vtanh.f32 %v585_v6  ;;  %v596_v17 = vadd.f32 %v8074_v34, %v5570_v11  ;;  %v3262_v59 = vpack.c.bf16 %v3157_v42, %v3156_v41  ;;  %v8290_v11 = vld [vmem:[#allocation2 + $0x5f8] sm:$0xff] }
 0x19f   :  { %v1600_v18 = vadd.f32 %v8074_v34, %v5714_v12  ;;  %v6309_v19 = vpop.eup %6308  ;;  %v2026_v20 = vadd.f32 %v6303_v4, %v2025_v9  ;;  %6334 = vtanh.f32 %v1589_v7  ;;  %v587_v21 = vpop.f32.mrf.mxu0  ;;  %v8288_v9 = vld [vmem:[#allocation2 + $0x5d8] sm:$0xff] }
 0x1a0   :  { %v1591_v22 = vpop.f32.mrf.mxu1  ;;  %v6311_v24 = vpop.eup %6310  ;;  %v1023_v25 = vadd.f32 %v6309_v19, %v1022_v16  ;;  %6336 = vtanh.f32 %v596_v17  ;;  %v588_v27 = vadd.f32 %v8074_v34, %v587_v21  ;;  %v8294_v16 = vld [vmem:[#allocation2 + $0x610] sm:$0xff]  ;;  %v3263_v26 = vpack.c.bf16 %v8290_v11, %v8288_v9 }
 0x1a1   :  { %v1592_v28 = vadd.f32 %v8074_v34, %v1591_v22  ;;  %v8266_v32 = vpop.eup %6312  ;;  %v2027_v33 = vadd.f32 %v6311_v24, %v2026_v20  ;;  %6338 = vtanh.f32 %v1600_v18  ;;  %v5573_v35 = vpop.f32.mrf.mxu0  ;;  %5828 = vmatmul.mubr.bf16.gmra.mxu0 %v2256_v2  ;;  %5972 = vmatmul.mubr.bf16.gmra.mxu1 %v3259_v3  ;;  %v8282_v3 = vld [vmem:[#allocation2 + $0x5d0] sm:$0xff]  ;;  %v3160_v22 = vld [vmem:[#allocation2 + $0x618] sm:$0xff] }
 0x1a2   :  { %v5717_v36 = vpop.f32.mrf.mxu1  ;;  %v8268_v38 = vpop.eup %6314  ;;  %v1024_v10 = vadd.f32 %v8240_v50, %v1023_v25  ;;  %6340 = vtanh.f32 %v588_v27  ;;  %v609_v39 = vadd.f32 %v8074_v34, %v5573_v35  ;;  %5831 = vmatprep.mubr.bf16.mxu0 %v2257_v13  ;;  %5975 = vmatprep.mubr.bf16.mxu1 %v3260_v14  ;;  %v2158_v21 = vld [vmem:[#allocation2 + $0x630] sm:$0xff] }
 0x1a3   :  { %v1613_v29 = vadd.f32 %v8074_v34, %v5717_v36  ;;  %v6317_v43 = vpop.eup %6316  ;;  %v2028_v44 = vadd.f32 %v8242_v55, %v2027_v33  ;;  %6342 = vtanh.f32 %v1592_v28  ;;  %v600_v45 = vpop.f32.mrf.mxu0 }
 0x1a4   :  { %v1604_v46 = vpop.f32.mrf.mxu1  ;;  %v6319_v49 = vpop.eup %6318  ;;  %v1025_v50 = vadd.f32 %v6305_v8, %v1024_v10  ;;  %6344 = vtanh.f32 %v609_v39  ;;  %v601_v51 = vadd.f32 %v8074_v34, %v600_v45  ;;  %v8286_v8 = vld [vmem:[#allocation2 + $0x5f0] sm:$0xff]  ;;  %v2261_v39 = vpack.c.bf16 %v2158_v21, %v8294_v16 }
 0x1a5   :  { %v1605_v52 = vadd.f32 %v8074_v34, %v1604_v46  ;;  %v6321_v53 = vpop.eup %6320  ;;  %v2029_v54 = vadd.f32 %v6307_v15, %v2028_v44  ;;  %6346 = vtanh.f32 %v1613_v29  ;;  %v5574_v55 = vpop.f32.mrf.mxu0  ;;  %v2260_v30 = vpack.c.bf16 %v8286_v8, %v8282_v3  ;;  %v3165_v3 = vld [vmem:[#allocation2 + $0x6b8] sm:$0xff] }
 0x1a6   :  { %v5718_v57 = vpop.f32.mrf.mxu1  ;;  %v6323_v60 = vpop.eup %6322  ;;  %v1026_v61 = vadd.f32 %v6317_v43, %v1025_v50  ;;  %6348 = vtanh.f32 %v601_v51  ;;  %v612_v62 = vadd.f32 %v8074_v34, %v5574_v55  ;;  %v3264_v29 = vpack.c.bf16 %v3161_v23, %v3160_v22  ;;  %v8319_v55 = vld [vmem:[#allocation2 + $0x678] sm:$0xff] }
 0x1a7   :  { %v1616_v56 = vadd.f32 %v8074_v34, %v5718_v57  ;;  %v6325_v63 = vpop.eup %6324  ;;  %v2030_v0 = vadd.f32 %v6319_v49, %v2029_v54  ;;  %6350 = vtanh.f32 %v1605_v52  ;;  %v603_v1 = vpop.f32.mrf.mxu0  ;;  %v8317_v54 = vld [vmem:[#allocation2 + $0x658] sm:$0xff] }
 0x1a8   :  { %v1607_v2 = vpop.f32.mrf.mxu1  ;;  %v6327_v4 = vpop.eup %6326  ;;  %v1027_v5 = vadd.f32 %v6325_v63, %v1026_v61  ;;  %6352 = vtanh.f32 %v612_v62  ;;  %v604_v6 = vadd.f32 %v8074_v34, %v603_v1  ;;  %v8323_v61 = vld [vmem:[#allocation2 + $0x690] sm:$0xff]  ;;  %v3265_v9 = vpack.c.bf16 %v8319_v55, %v8317_v54 }
 0x1a9   :  { %v1608_v7 = vadd.f32 %v8074_v34, %v1607_v2  ;;  %v8292_v12 = vpop.eup %6328  ;;  %v2031_v13 = vadd.f32 %v6327_v4, %v2030_v0  ;;  %6354 = vtanh.f32 %v1616_v56  ;;  %v5577_v14 = vpop.f32.mrf.mxu0  ;;  %5832 = vmatmul.mubr.bf16.gmra.mxu0 %v2258_v47  ;;  %5976 = vmatmul.mubr.bf16.gmra.mxu1 %v3261_v48  ;;  %v8311_v48 = vld [vmem:[#allocation2 + $0x650] sm:$0xff]  ;;  %v8328_v56 = vld [vmem:[#allocation7] ss:$0 sm:$0xff]  ;;  %v3164_v2 = vld [vmem:[#allocation2 + $0x698] sm:$0xff] }
 0x1aa   :  { %v5721_v15 = vpop.f32.mrf.mxu1  ;;  %v8296_v17 = vpop.eup %6330  ;;  %v1028_v18 = vadd.f32 %v8266_v32, %v1027_v5  ;;  %6356 = vtanh.f32 %v604_v6  ;;  %v625_v19 = vadd.f32 %v8074_v34, %v5577_v14  ;;  %5835 = vmatprep.mubr.bf16.mxu0 %v2259_v58  ;;  %5979 = vmatprep.mubr.bf16.mxu1 %v3262_v59  ;;  %v2162_v1 = vld [vmem:[#allocation2 + $0x6b0] sm:$0xff] }
 0x1ab   :  { %v1629_v20 = vadd.f32 %v8074_v34, %v5721_v15  ;;  %v6333_v24 = vpop.eup %6332  ;;  %v2032_v25 = vadd.f32 %v8268_v38, %v2031_v13  ;;  %6358 = vtanh.f32 %v1608_v7  ;;  %v616_v27 = vpop.f32.mrf.mxu0 }
 0x1ac   :  { %v1620_v28 = vpop.f32.mrf.mxu1  ;;  %v6335_v31 = vpop.eup %6334  ;;  %v1029_v32 = vadd.f32 %v6321_v53, %v1028_v18  ;;  %6360 = vtanh.f32 %v625_v19  ;;  %v617_v33 = vadd.f32 %v8074_v34, %v616_v27  ;;  %v8315_v53 = vld [vmem:[#allocation2 + $0x670] sm:$0xff]  ;;  %v2263_v19 = vpack.c.bf16 %v2162_v1, %v8323_v61 }
 0x1ad   :  { %v1621_v35 = vadd.f32 %v8074_v34, %v1620_v28  ;;  %v6337_v36 = vpop.eup %6336  ;;  %v2033_v37 = vadd.f32 %v6323_v60, %v2032_v25  ;;  %6362 = vtanh.f32 %v1629_v20  ;;  %v5578_v38 = vpop.f32.mrf.mxu0  ;;  %v2262_v8 = vpack.c.bf16 %v8315_v53, %v8311_v48  ;;  %v3169_v48 = vld [vmem:[#allocation2 + $0x738] sm:$0xff] }
 0x1ae   :  { %v5722_v10 = vpop.f32.mrf.mxu1  ;;  %v6339_v40 = vpop.eup %6338  ;;  %v1030_v41 = vadd.f32 %v6333_v24, %v1029_v32  ;;  %6364 = vtanh.f32 %v617_v33  ;;  %v628_v42 = vadd.f32 %v8074_v34, %v5578_v38  ;;  %v3266_v20 = vpack.c.bf16 %v3165_v3, %v3164_v2  ;;  %v8350_v38 = vld [vmem:[#allocation2 + $0x6f8] sm:$0xff] }
 0x1af   :  { %v1632_v43 = vadd.f32 %v8074_v34, %v5722_v10  ;;  %v6341_v44 = vpop.eup %6340  ;;  %v2034_v45 = vadd.f32 %v6335_v31, %v2033_v37  ;;  %6366 = vtanh.f32 %v1621_v35  ;;  %v619_v46 = vpop.f32.mrf.mxu0  ;;  %v8348_v37 = vld [vmem:[#allocation2 + $0x6d8] sm:$0xff] }
 0x1b0   :  { %v1623_v47 = vpop.f32.mrf.mxu1  ;;  %v6343_v49 = vpop.eup %6342  ;;  %v1031_v50 = vadd.f32 %v6341_v44, %v1030_v41  ;;  %6368 = vtanh.f32 %v628_v42  ;;  %v620_v51 = vadd.f32 %v8074_v34, %v619_v46  ;;  %v2165_v41 = vld [vmem:[#allocation2 + $0x710] sm:$0xff]  ;;  %v3267_v54 = vpack.c.bf16 %v8350_v38, %v8348_v37 }
 0x1b1   :  { %v1624_v52 = vadd.f32 %v8074_v34, %v1623_v47  ;;  %v8321_v57 = vpop.eup %6344  ;;  %v2035_v58 = vadd.f32 %v6343_v49, %v2034_v45  ;;  %6370 = vtanh.f32 %v1632_v43  ;;  %v5581_v59 = vpop.f32.mrf.mxu0  ;;  %5836 = vmatmul.mubr.bf16.gmra.mxu0 %v2260_v30  ;;  %5980 = vmatmul.mubr.bf16.gmra.mxu1 %v3263_v26  ;;  %v8342_v26 = vld [vmem:[#allocation2 + $0x6d0] sm:$0xff]  ;;  %v3168_v47 = vld [vmem:[#allocation2 + $0x718] sm:$0xff] }
 0x1b2   :  { %v5725_v60 = vpop.f32.mrf.mxu1  ;;  %v8325_v62 = vpop.eup %6346  ;;  %v1032_v34 = vadd.f32 %v8292_v12, %v1031_v50  ;;  %6372 = vtanh.f32 %v620_v51  ;;  %v641_v63 = vadd.f32 %v8328_v56, %v5581_v59  ;;  %5839 = vmatprep.mubr.bf16.mxu0 %v2261_v39  ;;  %5983 = vmatprep.mubr.bf16.mxu1 %v3264_v29  ;;  %v2166_v46 = vld [vmem:[#allocation2 + $0x730] sm:$0xff] }
 0x1b3   :  { %v1645_v0 = vadd.f32 %v8328_v56, %v5725_v60  ;;  %v6349_v4 = vpop.eup %6348  ;;  %v2036_v5 = vadd.f32 %v8296_v17, %v2035_v58  ;;  %6374 = vtanh.f32 %v1624_v52  ;;  %v632_v6 = vpop.f32.mrf.mxu0 }
 0x1b4   :  { %v1636_v7 = vpop.f32.mrf.mxu1  ;;  %v6351_v11 = vpop.eup %6350  ;;  %v1033_v12 = vadd.f32 %v6337_v36, %v1032_v34  ;;  %6376 = vtanh.f32 %v641_v63  ;;  %v633_v13 = vadd.f32 %v8328_v56, %v632_v6  ;;  %v8346_v36 = vld [vmem:[#allocation2 + $0x6f0] sm:$0xff]  ;;  %v2265_v63 = vpack.c.bf16 %v2166_v46, %v2165_v41 }
 0x1b5   :  { %v1637_v14 = vadd.f32 %v8328_v56, %v1636_v7  ;;  %v6353_v15 = vpop.eup %6352  ;;  %v2037_v16 = vadd.f32 %v6339_v40, %v2036_v5  ;;  %6378 = vtanh.f32 %v1645_v0  ;;  %v5582_v17 = vpop.f32.mrf.mxu0  ;;  %v2264_v53 = vpack.c.bf16 %v8346_v36, %v8342_v26  ;;  %v3173_v26 = vld [vmem:[#allocation2 + $0x7b8] sm:$0xff] }
 0x1b6   :  { %v5726_v18 = vpop.f32.mrf.mxu1  ;;  %v6355_v21 = vpop.eup %6354  ;;  %v1034_v22 = vadd.f32 %v6349_v4, %v1033_v12  ;;  %6380 = vtanh.f32 %v633_v13  ;;  %v644_v23 = vadd.f32 %v8328_v56, %v5582_v17  ;;  %v3268_v0 = vpack.c.bf16 %v3169_v48, %v3168_v47  ;;  %v8376_v17 = vld [vmem:[#allocation2 + $0x778] sm:$0xff] }
 0x1b7   :  { %v1648_v24 = vadd.f32 %v8328_v56, %v5726_v18  ;;  %v6357_v25 = vpop.eup %6356  ;;  %v2038_v27 = vadd.f32 %v6351_v11, %v2037_v16  ;;  %6382 = vtanh.f32 %v1637_v14  ;;  %v635_v28 = vpop.f32.mrf.mxu0  ;;  %v8374_v16 = vld [vmem:[#allocation2 + $0x758] sm:$0xff] }
 0x1b8   :  { %v1639_v30 = vpop.f32.mrf.mxu1  ;;  %v6359_v31 = vpop.eup %6358  ;;  %v1035_v32 = vadd.f32 %v6357_v25, %v1034_v22  ;;  %6384 = vtanh.f32 %v644_v23  ;;  %v636_v33 = vadd.f32 %v8328_v56, %v635_v28  ;;  %v2169_v22 = vld [vmem:[#allocation2 + $0x790] sm:$0xff]  ;;  %v3269_v37 = vpack.c.bf16 %v8376_v17, %v8374_v16 }
 0x1b9   :  { %v1640_v35 = vadd.f32 %v8328_v56, %v1639_v30  ;;  %v8352_v10 = vpop.eup %6360  ;;  %v2039_v39 = vadd.f32 %v6359_v31, %v2038_v27  ;;  %6386 = vtanh.f32 %v1648_v24  ;;  %v5585_v29 = vpop.f32.mrf.mxu0  ;;  %5840 = vmatmul.mubr.bf16.gmra.mxu0 %v2262_v8  ;;  %5984 = vmatmul.mubr.bf16.gmra.mxu1 %v3265_v9  ;;  %v8368_v9 = vld [vmem:[#allocation2 + $0x750] sm:$0xff]  ;;  %v3172_v30 = vld [vmem:[#allocation2 + $0x798] sm:$0xff] }
 0x1ba   :  { %v5729_v40 = vpop.f32.mrf.mxu1  ;;  %v8354_v42 = vpop.eup %6362  ;;  %v1036_v43 = vadd.f32 %v8321_v57, %v1035_v32  ;;  %6388 = vtanh.f32 %v636_v33  ;;  %v657_v44 = vadd.f32 %v8328_v56, %v5585_v29  ;;  %5843 = vmatprep.mubr.bf16.mxu0 %v2263_v19  ;;  %5987 = vmatprep.mubr.bf16.mxu1 %v3266_v20  ;;  %v2170_v28 = vld [vmem:[#allocation2 + $0x7b0] sm:$0xff] }
 0x1bb   :  { %v1661_v45 = vadd.f32 %v8328_v56, %v5729_v40  ;;  %v6365_v49 = vpop.eup %6364  ;;  %v2040_v50 = vadd.f32 %v8325_v62, %v2039_v39  ;;  %6390 = vtanh.f32 %v1640_v35  ;;  %v648_v51 = vpop.f32.mrf.mxu0 }
 0x1bc   :  { %v1652_v52 = vpop.f32.mrf.mxu1  ;;  %v6367_v55 = vpop.eup %6366  ;;  %v1037_v57 = vadd.f32 %v6353_v15, %v1036_v43  ;;  %6392 = vtanh.f32 %v657_v44  ;;  %v649_v58 = vadd.f32 %v8328_v56, %v648_v51  ;;  %v8372_v15 = vld [vmem:[#allocation2 + $0x770] sm:$0xff]  ;;  %v2267_v44 = vpack.c.bf16 %v2170_v28, %v2169_v22 }
 0x1bd   :  { %v1653_v59 = vadd.f32 %v8328_v56, %v1652_v52  ;;  %v6369_v60 = vpop.eup %6368  ;;  %v2041_v61 = vadd.f32 %v6355_v21, %v2040_v50  ;;  %6394 = vtanh.f32 %v1661_v45  ;;  %v5586_v62 = vpop.f32.mrf.mxu0  ;;  %v2266_v36 = vpack.c.bf16 %v8372_v15, %v8368_v9  ;;  %v3177_v9 = vld [vmem:[#allocation2 + $0x838] sm:$0xff] }
 0x1be   :  { %v5730_v34 = vpop.f32.mrf.mxu1  ;;  %v6371_v1 = vpop.eup %6370  ;;  %v1038_v2 = vadd.f32 %v6365_v49, %v1037_v57  ;;  %6396 = vtanh.f32 %v649_v58  ;;  %v660_v3 = vadd.f32 %v8328_v56, %v5586_v62  ;;  %v3270_v45 = vpack.c.bf16 %v3173_v26, %v3172_v30  ;;  %v8402_v62 = vld [vmem:[#allocation2 + $0x7f8] sm:$0xff] }
 0x1bf   :  { %v1664_v4 = vadd.f32 %v8328_v56, %v5730_v34  ;;  %v6373_v5 = vpop.eup %6372  ;;  %v2042_v6 = vadd.f32 %v6367_v55, %v2041_v61  ;;  %6398 = vtanh.f32 %v1653_v59  ;;  %v651_v7 = vpop.f32.mrf.mxu0  ;;  %v8400_v61 = vld [vmem:[#allocation2 + $0x7d8] sm:$0xff] }
 0x1c0   :  { %v1655_v8 = vpop.f32.mrf.mxu1  ;;  %v6375_v11 = vpop.eup %6374  ;;  %v1039_v12 = vadd.f32 %v6373_v5, %v1038_v2  ;;  %6400 = vtanh.f32 %v660_v3  ;;  %v652_v13 = vadd.f32 %v8328_v56, %v651_v7  ;;  %v2173_v2 = vld [vmem:[#allocation2 + $0x810] sm:$0xff]  ;;  %v3271_v16 = vpack.c.bf16 %v8402_v62, %v8400_v61 }
 0x1c1   :  { %v1656_v14 = vadd.f32 %v8328_v56, %v1655_v8  ;;  %v8378_v18 = vpop.eup %6376  ;;  %v2043_v19 = vadd.f32 %v6375_v11, %v2042_v6  ;;  %6402 = vtanh.f32 %v1664_v4  ;;  %v5589_v20 = vpop.f32.mrf.mxu0  ;;  %5844 = vmatmul.mubr.bf16.gmra.mxu0 %v2264_v53  ;;  %5988 = vmatmul.mubr.bf16.gmra.mxu1 %v3267_v54  ;;  %v8394_v54 = vld [vmem:[#allocation2 + $0x7d0] sm:$0xff]  ;;  %v3176_v8 = vld [vmem:[#allocation2 + $0x818] sm:$0xff] }
 0x1c2   :  { %v5733_v21 = vpop.f32.mrf.mxu1  ;;  %v8380_v23 = vpop.eup %6378  ;;  %v1040_v24 = vadd.f32 %v8352_v10, %v1039_v12  ;;  %6404 = vtanh.f32 %v652_v13  ;;  %v673_v25 = vadd.f32 %v8328_v56, %v5589_v20  ;;  %5847 = vmatprep.mubr.bf16.mxu0 %v2265_v63  ;;  %5991 = vmatprep.mubr.bf16.mxu1 %v3268_v0  ;;  %v2174_v7 = vld [vmem:[#allocation2 + $0x830] sm:$0xff] }
 0x1c3   :  { %v1677_v27 = vadd.f32 %v8328_v56, %v5733_v21  ;;  %v6381_v31 = vpop.eup %6380  ;;  %v2044_v32 = vadd.f32 %v8354_v42, %v2043_v19  ;;  %6406 = vtanh.f32 %v1656_v14  ;;  %v664_v33 = vpop.f32.mrf.mxu0 }
 0x1c4   :  { %v1668_v35 = vpop.f32.mrf.mxu1  ;;  %v6383_v38 = vpop.eup %6382  ;;  %v1041_v10 = vadd.f32 %v6369_v60, %v1040_v24  ;;  %6408 = vtanh.f32 %v673_v25  ;;  %v665_v39 = vadd.f32 %v8328_v56, %v664_v33  ;;  %v8398_v60 = vld [vmem:[#allocation2 + $0x7f0] sm:$0xff]  ;;  %v2269_v25 = vpack.c.bf16 %v2174_v7, %v2173_v2 }
 0x1c5   :  { %v1669_v29 = vadd.f32 %v8328_v56, %v1668_v35  ;;  %v6385_v40 = vpop.eup %6384  ;;  %v2045_v41 = vadd.f32 %v6371_v1, %v2044_v32  ;;  %6410 = vtanh.f32 %v1677_v27  ;;  %v5590_v42 = vpop.f32.mrf.mxu0  ;;  %v2268_v15 = vpack.c.bf16 %v8398_v60, %v8394_v54  ;;  %v3181_v54 = vld [vmem:[#allocation2 + $0x8b8] sm:$0xff] }
 0x1c6   :  { %v5734_v43 = vpop.f32.mrf.mxu1  ;;  %v6387_v46 = vpop.eup %6386  ;;  %v1042_v47 = vadd.f32 %v6381_v31, %v1041_v10  ;;  %6412 = vtanh.f32 %v665_v39  ;;  %v676_v48 = vadd.f32 %v8328_v56, %v5590_v42  ;;  %v3272_v27 = vpack.c.bf16 %v3177_v9, %v3176_v8  ;;  %v8428_v42 = vld [vmem:[#allocation2 + $0x878] sm:$0xff] }
 0x1c7   :  { %v1680_v49 = vadd.f32 %v8328_v56, %v5734_v43  ;;  %v6389_v50 = vpop.eup %6388  ;;  %v2046_v51 = vadd.f32 %v6383_v38, %v2045_v41  ;;  %6414 = vtanh.f32 %v1669_v29  ;;  %v667_v52 = vpop.f32.mrf.mxu0  ;;  %v8426_v41 = vld [vmem:[#allocation2 + $0x858] sm:$0xff] }
 0x1c8   :  { %v1671_v53 = vpop.f32.mrf.mxu1  ;;  %v6391_v55 = vpop.eup %6390  ;;  %v1043_v57 = vadd.f32 %v6389_v50, %v1042_v47  ;;  %6416 = vtanh.f32 %v676_v48  ;;  %v668_v58 = vadd.f32 %v8328_v56, %v667_v52  ;;  %v2177_v47 = vld [vmem:[#allocation2 + $0x890] sm:$0xff]  ;;  %v3273_v61 = vpack.c.bf16 %v8428_v42, %v8426_v41 }
 0x1c9   :  { %v1672_v59 = vadd.f32 %v8328_v56, %v1671_v53  ;;  %v8404_v34 = vpop.eup %6392  ;;  %v2047_v63 = vadd.f32 %v6391_v55, %v2046_v51  ;;  %6418 = vtanh.f32 %v1680_v49  ;;  %v5593_v0 = vpop.f32.mrf.mxu0  ;;  %5848 = vmatmul.mubr.bf16.gmra.mxu0 %v2266_v36  ;;  %5992 = vmatmul.mubr.bf16.gmra.mxu1 %v3269_v37  ;;  %v8420_v37 = vld [vmem:[#allocation2 + $0x850] sm:$0xff]  ;;  %v3180_v53 = vld [vmem:[#allocation2 + $0x898] sm:$0xff] }
 0x1ca   :  { %v5737_v1 = vpop.f32.mrf.mxu1  ;;  %v8406_v3 = vpop.eup %6394  ;;  %v1044_v4 = vadd.f32 %v8378_v18, %v1043_v57  ;;  %6420 = vtanh.f32 %v668_v58  ;;  %v689_v5 = vadd.f32 %v8328_v56, %v5593_v0  ;;  %5851 = vmatprep.mubr.bf16.mxu0 %v2267_v44  ;;  %5995 = vmatprep.mubr.bf16.mxu1 %v3270_v45  ;;  %v2178_v52 = vld [vmem:[#allocation2 + $0x8b0] sm:$0xff] }
 0x1cb   :  { %v1693_v6 = vadd.f32 %v8328_v56, %v5737_v1  ;;  %v6397_v11 = vpop.eup %6396  ;;  %v2048_v12 = vadd.f32 %v8380_v23, %v2047_v63  ;;  %6422 = vtanh.f32 %v1672_v59  ;;  %v680_v13 = vpop.f32.mrf.mxu0 }
 0x1cc   :  { %v1684_v14 = vpop.f32.mrf.mxu1  ;;  %v6399_v17 = vpop.eup %6398  ;;  %v1045_v18 = vadd.f32 %v6385_v40, %v1044_v4  ;;  %6424 = vtanh.f32 %v689_v5  ;;  %v681_v19 = vadd.f32 %v8328_v56, %v680_v13  ;;  %v8424_v40 = vld [vmem:[#allocation2 + $0x870] sm:$0xff]  ;;  %v2271_v5 = vpack.c.bf16 %v2178_v52, %v2177_v47 }
 0x1cd   :  { %v1685_v20 = vadd.f32 %v8328_v56, %v1684_v14  ;;  %v6401_v21 = vpop.eup %6400  ;;  %v2049_v22 = vadd.f32 %v6387_v46, %v2048_v12  ;;  %6426 = vtanh.f32 %v1693_v6  ;;  %v5594_v23 = vpop.f32.mrf.mxu0  ;;  %v2270_v60 = vpack.c.bf16 %v8424_v40, %v8420_v37  ;;  %v3185_v37 = vld [vmem:[#allocation2 + $0x938] sm:$0xff] }
 0x1ce   :  { %v5738_v24 = vpop.f32.mrf.mxu1  ;;  %v6403_v28 = vpop.eup %6402  ;;  %v1046_v30 = vadd.f32 %v6397_v11, %v1045_v18  ;;  %6428 = vtanh.f32 %v681_v19  ;;  %v692_v26 = vadd.f32 %v8328_v56, %v5594_v23  ;;  %v3274_v6 = vpack.c.bf16 %v3181_v54, %v3180_v53  ;;  %v8454_v23 = vld [vmem:[#allocation2 + $0x8f8] sm:$0xff] }
 0x1cf   :  { %v1696_v31 = vadd.f32 %v8328_v56, %v5738_v24  ;;  %v6405_v32 = vpop.eup %6404  ;;  %v2050_v33 = vadd.f32 %v6399_v17, %v2049_v22  ;;  %6430 = vtanh.f32 %v1685_v20  ;;  %v683_v35 = vpop.f32.mrf.mxu0  ;;  %v8452_v22 = vld [vmem:[#allocation2 + $0x8d8] sm:$0xff] }
 0x1d0   :  { %v1687_v36 = vpop.f32.mrf.mxu1  ;;  %v6407_v38 = vpop.eup %6406  ;;  %v1047_v10 = vadd.f32 %v6405_v32, %v1046_v30  ;;  %6432 = vtanh.f32 %v692_v26  ;;  %v684_v39 = vadd.f32 %v8328_v56, %v683_v35  ;;  %v2181_v30 = vld [vmem:[#allocation2 + $0x910] sm:$0xff]  ;;  %v3275_v41 = vpack.c.bf16 %v8454_v23, %v8452_v22 }
 0x1d1   :  { %v1688_v29 = vadd.f32 %v8328_v56, %v1687_v36  ;;  %v8430_v43 = vpop.eup %6408  ;;  %v2051_v44 = vadd.f32 %v6407_v38, %v2050_v33  ;;  %6434 = vtanh.f32 %v1696_v31  ;;  %v5597_v45 = vpop.f32.mrf.mxu0  ;;  %5852 = vmatmul.mubr.bf16.gmra.mxu0 %v2268_v15  ;;  %5996 = vmatmul.mubr.bf16.gmra.mxu1 %v3271_v16  ;;  %v8446_v16 = vld [vmem:[#allocation2 + $0x8d0] sm:$0xff]  ;;  %v3184_v36 = vld [vmem:[#allocation2 + $0x918] sm:$0xff] }
 0x1d2   :  { %v5741_v46 = vpop.f32.mrf.mxu1  ;;  %v8432_v48 = vpop.eup %6410  ;;  %v1048_v49 = vadd.f32 %v8404_v34, %v1047_v10  ;;  %6436 = vtanh.f32 %v684_v39  ;;  %v705_v50 = vadd.f32 %v8328_v56, %v5597_v45  ;;  %5855 = vmatprep.mubr.bf16.mxu0 %v2269_v25  ;;  %5999 = vmatprep.mubr.bf16.mxu1 %v3272_v27  ;;  %v2182_v35 = vld [vmem:[#allocation2 + $0x930] sm:$0xff] }
 0x1d3   :  { %v1709_v51 = vadd.f32 %v8328_v56, %v5741_v46  ;;  %v6413_v55 = vpop.eup %6412  ;;  %v2052_v57 = vadd.f32 %v8406_v3, %v2051_v44  ;;  %6438 = vtanh.f32 %v1688_v29  ;;  %v696_v58 = vpop.f32.mrf.mxu0 }
 0x1d4   :  { %v1700_v59 = vpop.f32.mrf.mxu1  ;;  %v6415_v62 = vpop.eup %6414  ;;  %v1049_v34 = vadd.f32 %v6401_v21, %v1048_v49  ;;  %6440 = vtanh.f32 %v705_v50  ;;  %v697_v63 = vadd.f32 %v8328_v56, %v696_v58  ;;  %v8450_v21 = vld [vmem:[#allocation2 + $0x8f0] sm:$0xff]  ;;  %v2273_v50 = vpack.c.bf16 %v2182_v35, %v2181_v30 }
 0x1d5   :  { %v1701_v0 = vadd.f32 %v8328_v56, %v1700_v59  ;;  %v6417_v1 = vpop.eup %6416  ;;  %v2053_v2 = vadd.f32 %v6403_v28, %v2052_v57  ;;  %6442 = vtanh.f32 %v1709_v51  ;;  %v5598_v3 = vpop.f32.mrf.mxu0  ;;  %v2272_v40 = vpack.c.bf16 %v8450_v21, %v8446_v16  ;;  %v3189_v16 = vld [vmem:[#allocation2 + $0x9b8] sm:$0xff] }
 0x1d6   :  { %v5742_v4 = vpop.f32.mrf.mxu1  ;;  %v6419_v7 = vpop.eup %6418  ;;  %v1050_v8 = vadd.f32 %v6413_v55, %v1049_v34  ;;  %6444 = vtanh.f32 %v697_v63  ;;  %v708_v9 = vadd.f32 %v8328_v56, %v5598_v3  ;;  %v3276_v51 = vpack.c.bf16 %v3185_v37, %v3184_v36  ;;  %v8480_v3 = vld [vmem:[#allocation2 + $0x978] sm:$0xff] }
 0x1d7   :  { %v1712_v11 = vadd.f32 %v8328_v56, %v5742_v4  ;;  %v6421_v12 = vpop.eup %6420  ;;  %v2054_v13 = vadd.f32 %v6415_v62, %v2053_v2  ;;  %6446 = vtanh.f32 %v1701_v0  ;;  %v699_v14 = vpop.f32.mrf.mxu0  ;;  %v8478_v2 = vld [vmem:[#allocation2 + $0x958] sm:$0xff] }
 0x1d8   :  { %v1703_v15 = vpop.f32.mrf.mxu1  ;;  %v6423_v17 = vpop.eup %6422  ;;  %v1051_v18 = vadd.f32 %v6421_v12, %v1050_v8  ;;  %6448 = vtanh.f32 %v708_v9  ;;  %v700_v19 = vadd.f32 %v8328_v56, %v699_v14  ;;  %v2185_v8 = vld [vmem:[#allocation2 + $0x990] sm:$0xff]  ;;  %v3277_v22 = vpack.c.bf16 %v8480_v3, %v8478_v2 }
 0x1d9   :  { %v1704_v20 = vadd.f32 %v8328_v56, %v1703_v15  ;;  %v8456_v24 = vpop.eup %6424  ;;  %v2055_v25 = vadd.f32 %v6423_v17, %v2054_v13  ;;  %6450 = vtanh.f32 %v1712_v11  ;;  %v5601_v27 = vpop.f32.mrf.mxu0  ;;  %5856 = vmatmul.mubr.bf16.gmra.mxu0 %v2270_v60  ;;  %6000 = vmatmul.mubr.bf16.gmra.mxu1 %v3273_v61  ;;  %v8472_v61 = vld [vmem:[#allocation2 + $0x950] sm:$0xff]  ;;  %v3188_v15 = vld [vmem:[#allocation2 + $0x998] sm:$0xff] }
 0x1da   :  { %v5745_v28 = vpop.f32.mrf.mxu1  ;;  %v8458_v26 = vpop.eup %6426  ;;  %v1052_v31 = vadd.f32 %v8430_v43, %v1051_v18  ;;  %6452 = vtanh.f32 %v700_v19  ;;  %v721_v32 = vadd.f32 %v8328_v56, %v5601_v27  ;;  %5859 = vmatprep.mubr.bf16.mxu0 %v2271_v5  ;;  %6003 = vmatprep.mubr.bf16.mxu1 %v3274_v6  ;;  %v2186_v14 = vld [vmem:[#allocation2 + $0x9b0] sm:$0xff] }
 0x1db   :  { %v1725_v33 = vadd.f32 %v8328_v56, %v5745_v28  ;;  %v6429_v38 = vpop.eup %6428  ;;  %v2056_v10 = vadd.f32 %v8432_v48, %v2055_v25  ;;  %6454 = vtanh.f32 %v1704_v20  ;;  %v712_v39 = vpop.f32.mrf.mxu0 }
 0x1dc   :  { %v1716_v29 = vpop.f32.mrf.mxu1  ;;  %v6431_v42 = vpop.eup %6430  ;;  %v1053_v43 = vadd.f32 %v6417_v1, %v1052_v31  ;;  %6456 = vtanh.f32 %v721_v32  ;;  %v713_v44 = vadd.f32 %v8328_v56, %v712_v39  ;;  %v8476_v1 = vld [vmem:[#allocation2 + $0x970] sm:$0xff]  ;;  %v2275_v32 = vpack.c.bf16 %v2186_v14, %v2185_v8 }
 0x1dd   :  { %v1717_v45 = vadd.f32 %v8328_v56, %v1716_v29  ;;  %v6433_v46 = vpop.eup %6432  ;;  %v2057_v47 = vadd.f32 %v6419_v7, %v2056_v10  ;;  %6458 = vtanh.f32 %v1725_v33  ;;  %v5602_v48 = vpop.f32.mrf.mxu0  ;;  %v2274_v21 = vpack.c.bf16 %v8476_v1, %v8472_v61  ;;  %v3193_v61 = vld [vmem:[#allocation2 + $0xa38] sm:$0xff] }
 0x1de   :  { %v5746_v49 = vpop.f32.mrf.mxu1  ;;  %v6435_v52 = vpop.eup %6434  ;;  %v1054_v53 = vadd.f32 %v6429_v38, %v1053_v43  ;;  %6460 = vtanh.f32 %v713_v44  ;;  %v724_v54 = vadd.f32 %v8328_v56, %v5602_v48  ;;  %v3278_v33 = vpack.c.bf16 %v3189_v16, %v3188_v15  ;;  %v8506_v48 = vld [vmem:[#allocation2 + $0x9f8] sm:$0xff] }
 0x1df   :  { %v1728_v55 = vadd.f32 %v8328_v56, %v5746_v49  ;;  %v6437_v57 = vpop.eup %6436  ;;  %v2058_v58 = vadd.f32 %v6431_v42, %v2057_v47  ;;  %6462 = vtanh.f32 %v1717_v45  ;;  %v715_v59 = vpop.f32.mrf.mxu0  ;;  %v8504_v47 = vld [vmem:[#allocation2 + $0x9d8] sm:$0xff] }
 0x1e0   :  { %v1719_v60 = vpop.f32.mrf.mxu1  ;;  %v6439_v62 = vpop.eup %6438  ;;  %v1055_v34 = vadd.f32 %v6437_v57, %v1054_v53  ;;  %6464 = vtanh.f32 %v724_v54  ;;  %v716_v63 = vadd.f32 %v8328_v56, %v715_v59  ;;  %v2189_v53 = vld [vmem:[#allocation2 + $0xa10] sm:$0xff]  ;;  %v3279_v2 = vpack.c.bf16 %v8506_v48, %v8504_v47 }
 0x1e1   :  { %v1720_v0 = vadd.f32 %v8328_v56, %v1719_v60  ;;  %v8482_v4 = vpop.eup %6440  ;;  %v2059_v5 = vadd.f32 %v6439_v62, %v2058_v58  ;;  %6466 = vtanh.f32 %v1728_v55  ;;  %v5605_v6 = vpop.f32.mrf.mxu0  ;;  %5860 = vmatmul.mubr.bf16.gmra.mxu0 %v2272_v40  ;;  %6004 = vmatmul.mubr.bf16.gmra.mxu1 %v3275_v41  ;;  %v8498_v41 = vld [vmem:[#allocation2 + $0x9d0] sm:$0xff]  ;;  %v3192_v60 = vld [vmem:[#allocation2 + $0xa18] sm:$0xff] }
 0x1e2   :  { %v5749_v7 = vpop.f32.mrf.mxu1  ;;  %v8484_v9 = vpop.eup %6442  ;;  %v1056_v11 = vadd.f32 %v8456_v24, %v1055_v34  ;;  %6468 = vtanh.f32 %v716_v63  ;;  %v737_v12 = vadd.f32 %v8328_v56, %v5605_v6  ;;  %5863 = vmatprep.mubr.bf16.mxu0 %v2273_v50  ;;  %6007 = vmatprep.mubr.bf16.mxu1 %v3276_v51  ;;  %v2190_v59 = vld [vmem:[#allocation2 + $0xa30] sm:$0xff] }
 0x1e3   :  { %v1741_v13 = vadd.f32 %v8328_v56, %v5749_v7  ;;  %v6445_v17 = vpop.eup %6444  ;;  %v2060_v18 = vadd.f32 %v8458_v26, %v2059_v5  ;;  %6470 = vtanh.f32 %v1720_v0  ;;  %v728_v19 = vpop.f32.mrf.mxu0 }
 0x1e4   :  { %v1732_v20 = vpop.f32.mrf.mxu1  ;;  %v6447_v23 = vpop.eup %6446  ;;  %v1057_v24 = vadd.f32 %v6433_v46, %v1056_v11  ;;  %6472 = vtanh.f32 %v737_v12  ;;  %v729_v25 = vadd.f32 %v8328_v56, %v728_v19  ;;  %v8502_v46 = vld [vmem:[#allocation2 + $0x9f0] sm:$0xff]  ;;  %v2277_v12 = vpack.c.bf16 %v2190_v59, %v2189_v53 }
 0x1e5   :  { %v1733_v27 = vadd.f32 %v8328_v56, %v1732_v20  ;;  %v6449_v28 = vpop.eup %6448  ;;  %v2061_v30 = vadd.f32 %v6435_v52, %v2060_v18  ;;  %6474 = vtanh.f32 %v1741_v13  ;;  %v5606_v26 = vpop.f32.mrf.mxu0  ;;  %v2276_v1 = vpack.c.bf16 %v8502_v46, %v8498_v41  ;;  %v3197_v41 = vld [vmem:[#allocation2 + $0xab8] sm:$0xff] }
 0x1e6   :  { %v5750_v31 = vpop.f32.mrf.mxu1  ;;  %v6451_v35 = vpop.eup %6450  ;;  %v1058_v36 = vadd.f32 %v6445_v17, %v1057_v24  ;;  %6476 = vtanh.f32 %v729_v25  ;;  %v740_v37 = vadd.f32 %v8328_v56, %v5606_v26  ;;  %v3280_v13 = vpack.c.bf16 %v3193_v61, %v3192_v60  ;;  %v8532_v26 = vld [vmem:[#allocation2 + $0xa78] sm:$0xff] }
 0x1e7   :  { %v1744_v38 = vadd.f32 %v8328_v56, %v5750_v31  ;;  %v6453_v10 = vpop.eup %6452  ;;  %v2062_v39 = vadd.f32 %v6447_v23, %v2061_v30  ;;  %6478 = vtanh.f32 %v1733_v27  ;;  %v731_v29 = vpop.f32.mrf.mxu0  ;;  %v8530_v30 = vld [vmem:[#allocation2 + $0xa58] sm:$0xff] }
 0x1e8   :  { %v1735_v40 = vpop.f32.mrf.mxu1  ;;  %v6455_v42 = vpop.eup %6454  ;;  %v1059_v43 = vadd.f32 %v6453_v10, %v1058_v36  ;;  %6480 = vtanh.f32 %v740_v37  ;;  %v732_v44 = vadd.f32 %v8328_v56, %v731_v29  ;;  %v2193_v36 = vld [vmem:[#allocation2 + $0xa90] sm:$0xff]  ;;  %v3281_v47 = vpack.c.bf16 %v8532_v26, %v8530_v30 }
 0x1e9   :  { %v1736_v45 = vadd.f32 %v8328_v56, %v1735_v40  ;;  %v8508_v49 = vpop.eup %6456  ;;  %v2063_v50 = vadd.f32 %v6455_v42, %v2062_v39  ;;  %6482 = vtanh.f32 %v1744_v38  ;;  %v5609_v51 = vpop.f32.mrf.mxu0  ;;  %5864 = vmatmul.mubr.bf16.gmra.mxu0 %v2274_v21  ;;  %6008 = vmatmul.mubr.bf16.gmra.mxu1 %v3277_v22  ;;  %v8524_v22 = vld [vmem:[#allocation2 + $0xa50] sm:$0xff]  ;;  %v3196_v40 = vld [vmem:[#allocation2 + $0xa98] sm:$0xff] }
 0x1ea   :  { %v5753_v52 = vpop.f32.mrf.mxu1  ;;  %v8510_v54 = vpop.eup %6458  ;;  %v1060_v55 = vadd.f32 %v8482_v4, %v1059_v43  ;;  %6484 = vtanh.f32 %v732_v44  ;;  %v753_v57 = vadd.f32 %v8328_v56, %v5609_v51  ;;  %5867 = vmatprep.mubr.bf16.mxu0 %v2275_v32  ;;  %6011 = vmatprep.mubr.bf16.mxu1 %v3278_v33  ;;  %v2194_v29 = vld [vmem:[#allocation2 + $0xab0] sm:$0xff] }
 0x1eb   :  { %v1757_v58 = vadd.f32 %v8328_v56, %v5753_v52  ;;  %v6461_v62 = vpop.eup %6460  ;;  %v2064_v34 = vadd.f32 %v8484_v9, %v2063_v50  ;;  %6486 = vtanh.f32 %v1736_v45  ;;  %v744_v63 = vpop.f32.mrf.mxu0 }
 0x1ec   :  { %v1748_v0 = vpop.f32.mrf.mxu1  ;;  %v6463_v3 = vpop.eup %6462  ;;  %v1061_v4 = vadd.f32 %v6449_v28, %v1060_v55  ;;  %6488 = vtanh.f32 %v753_v57  ;;  %v745_v5 = vadd.f32 %v8328_v56, %v744_v63  ;;  %v8528_v28 = vld [vmem:[#allocation2 + $0xa70] sm:$0xff]  ;;  %v2279_v57 = vpack.c.bf16 %v2194_v29, %v2193_v36 }
 0x1ed   :  { %v1749_v6 = vadd.f32 %v8328_v56, %v1748_v0  ;;  %v6465_v7 = vpop.eup %6464  ;;  %v2065_v8 = vadd.f32 %v6451_v35, %v2064_v34  ;;  %6490 = vtanh.f32 %v1757_v58  ;;  %v5610_v9 = vpop.f32.mrf.mxu0  ;;  %v2278_v46 = vpack.c.bf16 %v8528_v28, %v8524_v22  ;;  %v3201_v22 = vld [vmem:[#allocation2 + $0xb38] sm:$0xff] }
 0x1ee   :  { %v5754_v11 = vpop.f32.mrf.mxu1  ;;  %v6467_v14 = vpop.eup %6466  ;;  %v1062_v15 = vadd.f32 %v6461_v62, %v1061_v4  ;;  %6492 = vtanh.f32 %v745_v5  ;;  %v756_v16 = vadd.f32 %v8328_v56, %v5610_v9  ;;  %v3282_v58 = vpack.c.bf16 %v3197_v41, %v3196_v40  ;;  %v8558_v9 = vld [vmem:[#allocation2 + $0xaf8] sm:$0xff] }
 0x1ef   :  { %v1760_v17 = vadd.f32 %v8328_v56, %v5754_v11  ;;  %v6469_v18 = vpop.eup %6468  ;;  %v2066_v19 = vadd.f32 %v6463_v3, %v2065_v8  ;;  %6494 = vtanh.f32 %v1749_v6  ;;  %v747_v20 = vpop.f32.mrf.mxu0  ;;  %v8556_v8 = vld [vmem:[#allocation2 + $0xad8] sm:$0xff] }
 0x1f0   :  { %v1751_v21 = vpop.f32.mrf.mxu1  ;;  %v6471_v23 = vpop.eup %6470  ;;  %v1063_v24 = vadd.f32 %v6469_v18, %v1062_v15  ;;  %6496 = vtanh.f32 %v756_v16  ;;  %v748_v25 = vadd.f32 %v8328_v56, %v747_v20  ;;  %v8562_v15 = vld [vmem:[#allocation2 + $0xb10] sm:$0xff]  ;;  %v3283_v30 = vpack.c.bf16 %v8558_v9, %v8556_v8 }
 0x1f1   :  { %v1752_v27 = vadd.f32 %v8328_v56, %v1751_v21  ;;  %v8534_v31 = vpop.eup %6472  ;;  %v2067_v32 = vadd.f32 %v6471_v23, %v2066_v19  ;;  %6498 = vtanh.f32 %v1760_v17  ;;  %v5613_v33 = vpop.f32.mrf.mxu0  ;;  %5868 = vmatmul.mubr.bf16.gmra.mxu0 %v2276_v1  ;;  %6012 = vmatmul.mubr.bf16.gmra.mxu1 %v3279_v2  ;;  %v8550_v2 = vld [vmem:[#allocation2 + $0xad0] sm:$0xff]  ;;  %v3200_v21 = vld [vmem:[#allocation2 + $0xb18] sm:$0xff] }
 0x1f2   :  { %v5757_v35 = vpop.f32.mrf.mxu1  ;;  %v8536_v37 = vpop.eup %6474  ;;  %v1064_v38 = vadd.f32 %v8508_v49, %v1063_v24  ;;  %6500 = vtanh.f32 %v748_v25  ;;  %v769_v10 = vadd.f32 %v8328_v56, %v5613_v33  ;;  %5871 = vmatprep.mubr.bf16.mxu0 %v2277_v12  ;;  %6015 = vmatprep.mubr.bf16.mxu1 %v3280_v13  ;;  %v2198_v20 = vld [vmem:[#allocation2 + $0xb30] sm:$0xff] }
 0x1f3   :  { %v1773_v39 = vadd.f32 %v8328_v56, %v5757_v35  ;;  %v6477_v42 = vpop.eup %6476  ;;  %v2068_v43 = vadd.f32 %v8510_v54, %v2067_v32  ;;  %6502 = vtanh.f32 %v1752_v27  ;;  %v760_v44 = vpop.f32.mrf.mxu0 }
 0x1f4   :  { %v1764_v45 = vpop.f32.mrf.mxu1  ;;  %v6479_v48 = vpop.eup %6478  ;;  %v1065_v49 = vadd.f32 %v6465_v7, %v1064_v38  ;;  %6504 = vtanh.f32 %v769_v10  ;;  %v761_v50 = vadd.f32 %v8328_v56, %v760_v44  ;;  %v8554_v7 = vld [vmem:[#allocation2 + $0xaf0] sm:$0xff]  ;;  %v2281_v10 = vpack.c.bf16 %v2198_v20, %v8562_v15 }
 0x1f5   :  { %v1765_v51 = vadd.f32 %v8328_v56, %v1764_v45  ;;  %v6481_v52 = vpop.eup %6480  ;;  %v2069_v53 = vadd.f32 %v6467_v14, %v2068_v43  ;;  %6506 = vtanh.f32 %v1773_v39  ;;  %v5614_v54 = vpop.f32.mrf.mxu0  ;;  %v2280_v28 = vpack.c.bf16 %v8554_v7, %v8550_v2  ;;  %v3205_v2 = vld [vmem:[#allocation2 + $0xbb8] sm:$0xff] }
 0x1f6   :  { %v5758_v55 = vpop.f32.mrf.mxu1  ;;  %v6483_v59 = vpop.eup %6482  ;;  %v1066_v60 = vadd.f32 %v6477_v42, %v1065_v49  ;;  %6508 = vtanh.f32 %v761_v50  ;;  %v772_v61 = vadd.f32 %v8328_v56, %v5614_v54  ;;  %v3284_v39 = vpack.c.bf16 %v3201_v22, %v3200_v21  ;;  %v8589_v54 = vld [vmem:[#allocation2 + $0xb78] sm:$0xff] }
 0x1f7   :  { %v1776_v62 = vadd.f32 %v8328_v56, %v5758_v55  ;;  %v6485_v34 = vpop.eup %6484  ;;  %v2070_v63 = vadd.f32 %v6479_v48, %v2069_v53  ;;  %6510 = vtanh.f32 %v1765_v51  ;;  %v763_v0 = vpop.f32.mrf.mxu0  ;;  %v8587_v53 = vld [vmem:[#allocation2 + $0xb58] sm:$0xff] }
 0x1f8   :  { %v1767_v1 = vpop.f32.mrf.mxu1  ;;  %v6487_v3 = vpop.eup %6486  ;;  %v1067_v4 = vadd.f32 %v6485_v34, %v1066_v60  ;;  %6512 = vtanh.f32 %v772_v61  ;;  %v764_v5 = vadd.f32 %v8328_v56, %v763_v0  ;;  %v2201_v60 = vld [vmem:[#allocation2 + $0xb90] sm:$0xff]  ;;  %v3285_v8 = vpack.c.bf16 %v8589_v54, %v8587_v53 }
 0x1f9   :  { %v1768_v6 = vadd.f32 %v8328_v56, %v1767_v1  ;;  %v8560_v11 = vpop.eup %6488  ;;  %v2071_v12 = vadd.f32 %v6487_v3, %v2070_v63  ;;  %6514 = vtanh.f32 %v1776_v62  ;;  %v5617_v13 = vpop.f32.mrf.mxu0  ;;  %5872 = vmatmul.mubr.bf16.gmra.mxu0 %v2278_v46  ;;  %6016 = vmatmul.mubr.bf16.gmra.mxu1 %v3281_v47  ;;  %v8581_v47 = vld [vmem:[#allocation2 + $0xb50] sm:$0xff]  ;;  %v3204_v1 = vld [vmem:[#allocation2 + $0xb98] sm:$0xff] }
 0x1fa   :  { %v5761_v14 = vpop.f32.mrf.mxu1  ;;  %v8564_v16 = vpop.eup %6490  ;;  %v1068_v17 = vadd.f32 %v8534_v31, %v1067_v4  ;;  %6516 = vtanh.f32 %v764_v5  ;;  %v785_v18 = vadd.f32 %v8328_v56, %v5617_v13  ;;  %5875 = vmatprep.mubr.bf16.mxu0 %v2279_v57  ;;  %6019 = vmatprep.mubr.bf16.mxu1 %v3282_v58  ;;  %v2202_v0 = vld [vmem:[#allocation2 + $0xbb0] sm:$0xff] }
 0x1fb   :  { %v1789_v19 = vadd.f32 %v8328_v56, %v5761_v14  ;;  %v6493_v23 = vpop.eup %6492  ;;  %v2072_v24 = vadd.f32 %v8536_v37, %v2071_v12  ;;  %6518 = vtanh.f32 %v1768_v6  ;;  %v776_v25 = vpop.f32.mrf.mxu0  ;;  %v8574_v56 = vld [vmem:[#allocation7] ss:$0 sm:$0xff] }
 0x1fc   :  { %v1780_v27 = vpop.f32.mrf.mxu1  ;;  %v6495_v26 = vpop.eup %6494  ;;  %v1069_v31 = vadd.f32 %v6481_v52, %v1068_v17  ;;  %6520 = vtanh.f32 %v785_v18  ;;  %v777_v32 = vadd.f32 %v8574_v56, %v776_v25  ;;  %v8585_v52 = vld [vmem:[#allocation2 + $0xb70] sm:$0xff]  ;;  %v2283_v18 = vpack.c.bf16 %v2202_v0, %v2201_v60 }
 0x1fd   :  { %v1781_v33 = vadd.f32 %v8574_v56, %v1780_v27  ;;  %v6497_v35 = vpop.eup %6496  ;;  %v2073_v36 = vadd.f32 %v6483_v59, %v2072_v24  ;;  %6522 = vtanh.f32 %v1789_v19  ;;  %v5618_v37 = vpop.f32.mrf.mxu0  ;;  %v2282_v7 = vpack.c.bf16 %v8585_v52, %v8581_v47  ;;  %v3209_v47 = vld [vmem:[#allocation2 + $0xc38] sm:$0xff] }
 0x1fe   :  { %v5762_v38 = vpop.f32.mrf.mxu1  ;;  %v6499_v29 = vpop.eup %6498  ;;  %v1070_v40 = vadd.f32 %v6493_v23, %v1069_v31  ;;  %6524 = vtanh.f32 %v777_v32  ;;  %v788_v41 = vadd.f32 %v8574_v56, %v5618_v37  ;;  %v3286_v19 = vpack.c.bf16 %v3205_v2, %v3204_v1  ;;  %v8615_v37 = vld [vmem:[#allocation2 + $0xbf8] sm:$0xff] }
 0x1ff   :  { %v1792_v42 = vadd.f32 %v8574_v56, %v5762_v38  ;;  %v6501_v43 = vpop.eup %6500  ;;  %v2074_v44 = vadd.f32 %v6495_v26, %v2073_v36  ;;  %6526 = vtanh.f32 %v1781_v33  ;;  %v779_v45 = vpop.f32.mrf.mxu0  ;;  %v8613_v36 = vld [vmem:[#allocation2 + $0xbd8] sm:$0xff] }
 0x200   :  { %v1783_v46 = vpop.f32.mrf.mxu1  ;;  %v6503_v48 = vpop.eup %6502  ;;  %v1071_v49 = vadd.f32 %v6501_v43, %v1070_v40  ;;  %6528 = vtanh.f32 %v788_v41  ;;  %v780_v50 = vadd.f32 %v8574_v56, %v779_v45  ;;  %v2205_v40 = vld [vmem:[#allocation2 + $0xc10] sm:$0xff]  ;;  %v3287_v53 = vpack.c.bf16 %v8615_v37, %v8613_v36 }
 0x201   :  { %v1784_v51 = vadd.f32 %v8574_v56, %v1783_v46  ;;  %v8591_v55 = vpop.eup %6504  ;;  %v2075_v57 = vadd.f32 %v6503_v48, %v2074_v44  ;;  %6530 = vtanh.f32 %v1792_v42  ;;  %v5621_v58 = vpop.f32.mrf.mxu0  ;;  %5876 = vmatmul.mubr.bf16.gmra.mxu0 %v2280_v28  ;;  %6020 = vmatmul.mubr.bf16.gmra.mxu1 %v3283_v30  ;;  %v8607_v30 = vld [vmem:[#allocation2 + $0xbd0] sm:$0xff]  ;;  %v3208_v46 = vld [vmem:[#allocation2 + $0xc18] sm:$0xff] }
 0x202   :  { %v5765_v59 = vpop.f32.mrf.mxu1  ;;  %v8593_v61 = vpop.eup %6506  ;;  %v1072_v62 = vadd.f32 %v8560_v11, %v1071_v49  ;;  %6532 = vtanh.f32 %v780_v50  ;;  %v801_v34 = vadd.f32 %v8574_v56, %v5621_v58  ;;  %5879 = vmatprep.mubr.bf16.mxu0 %v2281_v10  ;;  %6023 = vmatprep.mubr.bf16.mxu1 %v3284_v39  ;;  %v2206_v45 = vld [vmem:[#allocation2 + $0xc30] sm:$0xff] }
 0x203   :  { %v1805_v63 = vadd.f32 %v8574_v56, %v5765_v59  ;;  %v6509_v3 = vpop.eup %6508  ;;  %v2076_v4 = vadd.f32 %v8564_v16, %v2075_v57  ;;  %6534 = vtanh.f32 %v1784_v51  ;;  %v792_v5 = vpop.f32.mrf.mxu0 }
 0x204   :  { %v1796_v6 = vpop.f32.mrf.mxu1  ;;  %v6511_v9 = vpop.eup %6510  ;;  %v1073_v11 = vadd.f32 %v6497_v35, %v1072_v62  ;;  %6536 = vtanh.f32 %v801_v34  ;;  %v793_v12 = vadd.f32 %v8574_v56, %v792_v5  ;;  %v8611_v35 = vld [vmem:[#allocation2 + $0xbf0] sm:$0xff]  ;;  %v2285_v34 = vpack.c.bf16 %v2206_v45, %v2205_v40 }
 0x205   :  { %v1797_v13 = vadd.f32 %v8574_v56, %v1796_v6  ;;  %v6513_v14 = vpop.eup %6512  ;;  %v2077_v15 = vadd.f32 %v6499_v29, %v2076_v4  ;;  %6538 = vtanh.f32 %v1805_v63  ;;  %v5622_v16 = vpop.f32.mrf.mxu0  ;;  %v2284_v52 = vpack.c.bf16 %v8611_v35, %v8607_v30  ;;  %v3213_v30 = vld [vmem:[#allocation2 + $0xcb8] sm:$0xff] }
 0x206   :  { %v5766_v17 = vpop.f32.mrf.mxu1  ;;  %v6515_v20 = vpop.eup %6514  ;;  %v1074_v21 = vadd.f32 %v6509_v3, %v1073_v11  ;;  %6540 = vtanh.f32 %v793_v12  ;;  %v804_v22 = vadd.f32 %v8574_v56, %v5622_v16  ;;  %v3288_v63 = vpack.c.bf16 %v3209_v47, %v3208_v46  ;;  %v8641_v16 = vld [vmem:[#allocation2 + $0xc78] sm:$0xff] }
 0x207   :  { %v1808_v23 = vadd.f32 %v8574_v56, %v5766_v17  ;;  %v6517_v24 = vpop.eup %6516  ;;  %v2078_v25 = vadd.f32 %v6511_v9, %v2077_v15  ;;  %6542 = vtanh.f32 %v1797_v13  ;;  %v795_v27 = vpop.f32.mrf.mxu0  ;;  %v8639_v15 = vld [vmem:[#allocation2 + $0xc58] sm:$0xff] }
 0x208   :  { %v1799_v28 = vpop.f32.mrf.mxu1  ;;  %v6519_v26 = vpop.eup %6518  ;;  %v1075_v31 = vadd.f32 %v6517_v24, %v1074_v21  ;;  %6544 = vtanh.f32 %v804_v22  ;;  %v796_v32 = vadd.f32 %v8574_v56, %v795_v27  ;;  %v2209_v21 = vld [vmem:[#allocation2 + $0xc90] sm:$0xff]  ;;  %v3289_v36 = vpack.c.bf16 %v8641_v16, %v8639_v15 }
 0x209   :  { %v1800_v33 = vadd.f32 %v8574_v56, %v1799_v28  ;;  %v8617_v38 = vpop.eup %6520  ;;  %v2079_v10 = vadd.f32 %v6519_v26, %v2078_v25  ;;  %6546 = vtanh.f32 %v1808_v23  ;;  %v5625_v39 = vpop.f32.mrf.mxu0  ;;  %5880 = vmatmul.mubr.bf16.gmra.mxu0 %v2282_v7  ;;  %6024 = vmatmul.mubr.bf16.gmra.mxu1 %v3285_v8  ;;  %v8633_v8 = vld [vmem:[#allocation2 + $0xc50] sm:$0xff]  ;;  %v3212_v28 = vld [vmem:[#allocation2 + $0xc98] sm:$0xff] }
 0x20a   :  { %v5769_v29 = vpop.f32.mrf.mxu1  ;;  %v8619_v41 = vpop.eup %6522  ;;  %v1076_v42 = vadd.f32 %v8591_v55, %v1075_v31  ;;  %6548 = vtanh.f32 %v796_v32  ;;  %v817_v43 = vadd.f32 %v8574_v56, %v5625_v39  ;;  %5883 = vmatprep.mubr.bf16.mxu0 %v2283_v18  ;;  %6027 = vmatprep.mubr.bf16.mxu1 %v3286_v19  ;;  %v2210_v27 = vld [vmem:[#allocation2 + $0xcb0] sm:$0xff] }
 0x20b   :  { %v1821_v44 = vadd.f32 %v8574_v56, %v5769_v29  ;;  %v6525_v48 = vpop.eup %6524  ;;  %v2080_v49 = vadd.f32 %v8593_v61, %v2079_v10  ;;  %6550 = vtanh.f32 %v1800_v33  ;;  %v808_v50 = vpop.f32.mrf.mxu0 }
 0x20c   :  { %v1812_v51 = vpop.f32.mrf.mxu1  ;;  %v6527_v54 = vpop.eup %6526  ;;  %v1077_v55 = vadd.f32 %v6513_v14, %v1076_v42  ;;  %6552 = vtanh.f32 %v817_v43  ;;  %v809_v57 = vadd.f32 %v8574_v56, %v808_v50  ;;  %v8637_v14 = vld [vmem:[#allocation2 + $0xc70] sm:$0xff]  ;;  %v2287_v43 = vpack.c.bf16 %v2210_v27, %v2209_v21 }
 0x20d   :  { %v1813_v58 = vadd.f32 %v8574_v56, %v1812_v51  ;;  %v6529_v59 = vpop.eup %6528  ;;  %v2081_v60 = vadd.f32 %v6515_v20, %v2080_v49  ;;  %6554 = vtanh.f32 %v1821_v44  ;;  %v5626_v61 = vpop.f32.mrf.mxu0  ;;  %v2286_v35 = vpack.c.bf16 %v8637_v14, %v8633_v8  ;;  %v3217_v8 = vld [vmem:[#allocation2 + $0xd38] sm:$0xff] }
 0x20e   :  { %v5770_v62 = vpop.f32.mrf.mxu1  ;;  %v6531_v0 = vpop.eup %6530  ;;  %v1078_v1 = vadd.f32 %v6525_v48, %v1077_v55  ;;  %6556 = vtanh.f32 %v809_v57  ;;  %v820_v2 = vadd.f32 %v8574_v56, %v5626_v61  ;;  %v3290_v44 = vpack.c.bf16 %v3213_v30, %v3212_v28  ;;  %v8667_v61 = vld [vmem:[#allocation2 + $0xcf8] sm:$0xff] }
 0x20f   :  { %v1824_v3 = vadd.f32 %v8574_v56, %v5770_v62  ;;  %v6533_v4 = vpop.eup %6532  ;;  %v2082_v5 = vadd.f32 %v6527_v54, %v2081_v60  ;;  %6558 = vtanh.f32 %v1813_v58  ;;  %v811_v6 = vpop.f32.mrf.mxu0  ;;  %v8665_v60 = vld [vmem:[#allocation2 + $0xcd8] sm:$0xff] }
 0x210   :  { %v1815_v7 = vpop.f32.mrf.mxu1  ;;  %v6535_v9 = vpop.eup %6534  ;;  %v1079_v11 = vadd.f32 %v6533_v4, %v1078_v1  ;;  %6560 = vtanh.f32 %v820_v2  ;;  %v812_v12 = vadd.f32 %v8574_v56, %v811_v6  ;;  %v2213_v1 = vld [vmem:[#allocation2 + $0xd10] sm:$0xff]  ;;  %v3291_v15 = vpack.c.bf16 %v8667_v61, %v8665_v60 }
 0x211   :  { %v1816_v13 = vadd.f32 %v8574_v56, %v1815_v7  ;;  %v8643_v17 = vpop.eup %6536  ;;  %v2083_v18 = vadd.f32 %v6535_v9, %v2082_v5  ;;  %6562 = vtanh.f32 %v1824_v3  ;;  %v5629_v19 = vpop.f32.mrf.mxu0  ;;  %5884 = vmatmul.mubr.bf16.gmra.mxu0 %v2284_v52  ;;  %6028 = vmatmul.mubr.bf16.gmra.mxu1 %v3287_v53  ;;  %v8659_v53 = vld [vmem:[#allocation2 + $0xcd0] sm:$0xff]  ;;  %v3216_v7 = vld [vmem:[#allocation2 + $0xd18] sm:$0xff] }
 0x212   :  { %v5773_v20 = vpop.f32.mrf.mxu1  ;;  %v8645_v22 = vpop.eup %6538  ;;  %v1080_v23 = vadd.f32 %v8617_v38, %v1079_v11  ;;  %6564 = vtanh.f32 %v812_v12  ;;  %v833_v24 = vadd.f32 %v8574_v56, %v5629_v19  ;;  %5887 = vmatprep.mubr.bf16.mxu0 %v2285_v34  ;;  %6031 = vmatprep.mubr.bf16.mxu1 %v3288_v63  ;;  %v2214_v6 = vld [vmem:[#allocation2 + $0xd30] sm:$0xff] }
 0x213   :  { %v1837_v25 = vadd.f32 %v8574_v56, %v5773_v20  ;;  %v6541_v26 = vpop.eup %6540  ;;  %v2084_v31 = vadd.f32 %v8619_v41, %v2083_v18  ;;  %6566 = vtanh.f32 %v1816_v13  ;;  %v824_v32 = vpop.f32.mrf.mxu0 }
 0x214   :  { %v1828_v33 = vpop.f32.mrf.mxu1  ;;  %v6543_v37 = vpop.eup %6542  ;;  %v1081_v38 = vadd.f32 %v6529_v59, %v1080_v23  ;;  %6568 = vtanh.f32 %v833_v24  ;;  %v825_v10 = vadd.f32 %v8574_v56, %v824_v32  ;;  %v8663_v59 = vld [vmem:[#allocation2 + $0xcf0] sm:$0xff]  ;;  %v2289_v24 = vpack.c.bf16 %v2214_v6, %v2213_v1 }
 0x215   :  { %v1829_v39 = vadd.f32 %v8574_v56, %v1828_v33  ;;  %v6545_v29 = vpop.eup %6544  ;;  %v2085_v40 = vadd.f32 %v6531_v0, %v2084_v31  ;;  %6570 = vtanh.f32 %v1837_v25  ;;  %v5630_v41 = vpop.f32.mrf.mxu0  ;;  %v2288_v14 = vpack.c.bf16 %v8663_v59, %v8659_v53  ;;  %v3221_v53 = vld [vmem:[#allocation2 + $0xdb8] sm:$0xff] }
 0x216   :  { %v5774_v42 = vpop.f32.mrf.mxu1  ;;  %v6547_v45 = vpop.eup %6546  ;;  %v1082_v46 = vadd.f32 %v6541_v26, %v1081_v38  ;;  %6572 = vtanh.f32 %v825_v10  ;;  %v836_v47 = vadd.f32 %v8574_v56, %v5630_v41  ;;  %v3292_v25 = vpack.c.bf16 %v3217_v8, %v3216_v7  ;;  %v3219_v41 = vld [vmem:[#allocation2 + $0xd78] sm:$0xff] }
 0x217   :  { %v1840_v48 = vadd.f32 %v8574_v56, %v5774_v42  ;;  %v6549_v49 = vpop.eup %6548  ;;  %v2086_v50 = vadd.f32 %v6543_v37, %v2085_v40  ;;  %6574 = vtanh.f32 %v1829_v39  ;;  %v827_v51 = vpop.f32.mrf.mxu0  ;;  %v8689_v40 = vld [vmem:[#allocation2 + $0xd58] sm:$0xff] }
 0x218   :  { %v1831_v52 = vpop.f32.mrf.mxu1  ;;  %v6551_v54 = vpop.eup %6550  ;;  %v1083_v55 = vadd.f32 %v6549_v49, %v1082_v46  ;;  %6576 = vtanh.f32 %v836_v47  ;;  %v828_v57 = vadd.f32 %v8574_v56, %v827_v51  ;;  %v2217_v46 = vld [vmem:[#allocation2 + $0xd90] sm:$0xff]  ;;  %v3293_v60 = vpack.c.bf16 %v3219_v41, %v8689_v40 }
 0x219   :  { %v1832_v58 = vadd.f32 %v8574_v56, %v1831_v52  ;;  %v8669_v62 = vpop.eup %6552  ;;  %v2087_v34 = vadd.f32 %v6551_v54, %v2086_v50  ;;  %6578 = vtanh.f32 %v1840_v48  ;;  %v5793_v63 = vpop.f32.mrf.mxu0  ;;  %5888 = vmatmul.mubr.bf16.gmra.mxu0 %v2286_v35  ;;  %6032 = vmatmul.mubr.bf16.gmra.mxu1 %v3289_v36  ;;  %v8685_v36 = vld [vmem:[#allocation2 + $0xd50] sm:$0xff]  ;;  %v3220_v52 = vld [vmem:[#allocation2 + $0xd98] sm:$0xff] }
 0x21a   :  { %v5937_v0 = vpop.f32.mrf.mxu1  ;;  %v8671_v2 = vpop.eup %6554  ;;  %v1084_v3 = vadd.f32 %v8643_v17, %v1083_v55  ;;  %6580 = vtanh.f32 %v828_v57  ;;  %v2344_v4 = vadd.f32 %v8574_v56, %v5793_v63  ;;  %5891 = vmatprep.mubr.bf16.mxu0 %v2287_v43  ;;  %6035 = vmatprep.mubr.bf16.mxu1 %v3290_v44  ;;  %v2218_v51 = vld [vmem:[#allocation2 + $0xdb0] sm:$0xff] }
 0x21b   :  { %v3347_v5 = vadd.f32 %v8574_v56, %v5937_v0  ;;  %v6557_v9 = vpop.eup %6556  ;;  %v2088_v11 = vadd.f32 %v8645_v22, %v2087_v34  ;;  %6582 = vtanh.f32 %v1832_v58  ;;  %v2335_v12 = vpop.f32.mrf.mxu0  ;;  %v8728_v40 = vld [vmem:[#allocation2 + $0xe50] sm:$0xff] }
 0x21c   :  { %v3338_v13 = vpop.f32.mrf.mxu1  ;;  %v6559_v16 = vpop.eup %6558  ;;  %v1085_v17 = vadd.f32 %v6545_v29, %v1084_v3  ;;  %6584 = vtanh.f32 %v2344_v4  ;;  %v2336_v18 = vadd.f32 %v8574_v56, %v2335_v12  ;;  %v2216_v29 = vld [vmem:[#allocation2 + $0xd70] sm:$0xff] }
 0x21d   :  { %v3339_v19 = vadd.f32 %v8574_v56, %v3338_v13  ;;  %v6561_v20 = vpop.eup %6560  ;;  %v2089_v21 = vadd.f32 %v6547_v45, %v2088_v11  ;;  %6586 = vtanh.f32 %v3347_v5  ;;  %v5794_v22 = vpop.f32.mrf.mxu0  ;;  %v2290_v59 = vpack.c.bf16 %v2216_v29, %v8685_v36  ;;  %v8730_v41 = vld [vmem:[#allocation2 + $0xe70] sm:$0xff] }
 0x21e   :  { %v5938_v23 = vpop.f32.mrf.mxu1  ;;  %v6563_v27 = vpop.eup %6562  ;;  %v1086_v28 = vadd.f32 %v6557_v9, %v1085_v17  ;;  %6588 = vtanh.f32 %v2336_v18  ;;  %v2347_v30 = vadd.f32 %v8574_v56, %v5794_v22  ;;  %v3294_v5 = vpack.c.bf16 %v3221_v53, %v3220_v52 }
 0x21f   :  { %v3350_v26 = vadd.f32 %v8574_v56, %v5938_v23  ;;  %v6565_v31 = vpop.eup %6564  ;;  %v2090_v32 = vadd.f32 %v6559_v16, %v2089_v21  ;;  %6590 = vtanh.f32 %v3339_v19  ;;  %v2338_v33 = vpop.f32.mrf.mxu0  ;;  %v8709_v19 = vld [vmem:[#allocation2 + $0xdf0] sm:$0xff]  ;;  %v8713_v21 = vld [vmem:[#allocation2 + $0xdf8] sm:$0xff] }
 0x220   :  { %v3341_v35 = vpop.f32.mrf.mxu1  ;;  %v6567_v37 = vpop.eup %6566  ;;  %v1087_v38 = vadd.f32 %v6565_v31, %v1086_v28  ;;  %6592 = vtanh.f32 %v2347_v30  ;;  %v2339_v10 = vadd.f32 %v8574_v56, %v2338_v33  ;;  %v3224_v33 = vld [vmem:[#allocation2 + $0xe18] sm:$0xff] }
 0x221   :  { %v3342_v39 = vadd.f32 %v8574_v56, %v3341_v35  ;;  %v8691_v42 = vpop.eup %6568  ;;  %v2091_v43 = vadd.f32 %v6567_v37, %v2090_v32  ;;  %6594 = vtanh.f32 %v3350_v26  ;;  %v5797_v44 = vpop.f32.mrf.mxu0  ;;  %5892 = vmatmul.mubr.bf16.gmra.mxu0 %v2288_v14  ;;  %6036 = vmatmul.mubr.bf16.gmra.mxu1 %v3291_v15  ;;  %v8705_v15 = vld [vmem:[#allocation2 + $0xdd0] sm:$0xff]  ;;  %v3225_v35 = vld [vmem:[#allocation2 + $0xe38] sm:$0xff] }
 0x222   :  { %v5941_v45 = vpop.f32.mrf.mxu1  ;;  %v8693_v47 = vpop.eup %6570  ;;  %v1088_v48 = vadd.f32 %v8669_v62, %v1087_v38  ;;  %6596 = vtanh.f32 %v2339_v10  ;;  %v2360_v49 = vadd.f32 %v8574_v56, %v5797_v44  ;;  %5895 = vmatprep.mubr.bf16.mxu0 %v2289_v24  ;;  %6039 = vmatprep.mubr.bf16.mxu1 %v3292_v25  ;;  %v2222_v32 = vld [vmem:[#allocation2 + $0xe30] sm:$0xff] }
 0x223   :  { %v3363_v50 = vadd.f32 %v8574_v56, %v5941_v45  ;;  %v6573_v54 = vpop.eup %6572  ;;  %v2092_v55 = vadd.f32 %v8671_v2, %v2091_v43  ;;  %6598 = vtanh.f32 %v3342_v39  ;;  %v2351_v57 = vpop.f32.mrf.mxu0  ;;  %v2291_v2 = vpack.c.bf16 %v2218_v51, %v2217_v46  ;;  %v8732_v43 = vld [vmem:[#allocation2 + $0xe58] sm:$0xff]  ;;  %v8741_v51 = vld [vmem:[#allocation2 + $0xeb0] sm:$0xff] }
 0x224   :  { %v3354_v58 = vpop.f32.mrf.mxu1  ;;  %v6575_v61 = vpop.eup %6574  ;;  %v1089_v62 = vadd.f32 %v6561_v20, %v1088_v48  ;;  %6600 = vtanh.f32 %v2360_v49  ;;  %v2352_v34 = vadd.f32 %v8574_v56, %v2351_v57  ;;  %v8711_v20 = vld [vmem:[#allocation2 + $0xdd8] sm:$0xff]  ;;  %v2292_v39 = vpack.c.bf16 %v8709_v19, %v8705_v15 }
 0x225   :  { %v3355_v63 = vadd.f32 %v8574_v56, %v3354_v58  ;;  %v6577_v0 = vpop.eup %6576  ;;  %v2093_v1 = vadd.f32 %v6563_v27, %v2092_v55  ;;  %6602 = vtanh.f32 %v3363_v50  ;;  %v5798_v3 = vpop.f32.mrf.mxu0  ;;  %v8717_v27 = vld [vmem:[#allocation2 + $0xe10] sm:$0xff]  ;;  %v3295_v29 = vpack.c.bf16 %v8713_v21, %v8711_v20  ;;  %v8737_v48 = vld [vmem:[#allocation2 + $0xe78] sm:$0xff] }
 0x226   :  { %v5942_v4 = vpop.f32.mrf.mxu1  ;;  %v6579_v6 = vpop.eup %6578  ;;  %v1090_v7 = vadd.f32 %v6573_v54, %v1089_v62  ;;  %6604 = vtanh.f32 %v2352_v34  ;;  %v2363_v8 = vadd.f32 %v8574_v56, %v5798_v3  ;;  %v8739_v50 = vld [vmem:[#allocation2 + $0xe90] sm:$0xff]  ;;  %v2293_v55 = vpack.c.bf16 %v2222_v32, %v8717_v27  ;;  %v8747_v62 = vld [vmem:[#allocation2 + $0xe98] sm:$0xff] }
 0x227   :  { %v3366_v9 = vadd.f32 %v8574_v56, %v5942_v4  ;;  %v6581_v11 = vpop.eup %6580  ;;  %v2094_v12 = vadd.f32 %v6575_v61, %v2093_v1  ;;  %6606 = vtanh.f32 %v3355_v63  ;;  %v2354_v13 = vpop.f32.mrf.mxu0  ;;  %v3297_v1 = vpack.c.bf16 %v8737_v48, %v8732_v43  ;;  %v8753_v4 = vld [vmem:[#allocation2 + $0xeb8] sm:$0xff] }
 0x228   :  { %v3357_v14 = vpop.f32.mrf.mxu1  ;;  %v6583_v16 = vpop.eup %6582  ;;  %6608 = vtanh.f32 %v2363_v8  ;;  %v2355_v17 = vadd.f32 %v8574_v56, %v2354_v13  ;;  %v1091_v22 = vadd.f32 %v6581_v11, %v1090_v7  ;;  %v2295_v3 = vpack.c.bf16 %v8741_v51, %v8739_v50  ;;  %v8774_v32 = vld [vmem:[#allocation2 + $0xef8] sm:$0xff] }
 0x229   :  { %v3358_v18 = vadd.f32 %v8574_v56, %v3357_v14  ;;  %v8715_v23 = vpop.eup %6584  ;;  %6610 = vtanh.f32 %v3366_v9  ;;  %v5801_v24 = vpop.f32.mrf.mxu0  ;;  %5896 = vmatmul.mubr.bf16.gmra.mxu0 %v2290_v59  ;;  %6040 = vmatmul.mubr.bf16.gmra.mxu1 %v3293_v60  ;;  %v2095_v28 = vadd.f32 %v6583_v16, %v2094_v12  ;;  %v2294_v60 = vpack.c.bf16 %v8730_v41, %v8728_v40 }
 0x22a   :  { %v5945_v25 = vpop.f32.mrf.mxu1  ;;  %v8719_v30 = vpop.eup %6586  ;;  %6612 = vtanh.f32 %v2355_v17  ;;  %v2376_v26 = vadd.f32 %v8574_v56, %v5801_v24  ;;  %5899 = vmatprep.mubr.bf16.mxu0 %v2291_v2  ;;  %6043 = vmatprep.mubr.bf16.mxu1 %v3294_v5  ;;  %v1092_v36 = vadd.f32 %v8691_v42, %v1091_v22  ;;  %v8755_v2 = vld [vmem:[#allocation2 + $0xed0] sm:$0xff]  ;;  %v3298_v21 = vpack.c.bf16 %v8753_v4, %v8747_v62 }
 0x22b   :  { %v3379_v31 = vadd.f32 %v8574_v56, %v5945_v25  ;;  %v6589_v37 = vpop.eup %6588  ;;  %6614 = vtanh.f32 %v3358_v18  ;;  %v2367_v38 = vpop.f32.mrf.mxu0  ;;  %v2096_v44 = vadd.f32 %v8693_v47, %v2095_v28  ;;  %v3296_v47 = vpack.c.bf16 %v3225_v35, %v3224_v33  ;;  %v8757_v5 = vld [vmem:[#allocation2 + $0xef0] sm:$0xff] }
 0x22c   :  { %v3370_v10 = vpop.f32.mrf.mxu1  ;;  %v6591_v45 = vpop.eup %6590  ;;  %6616 = vtanh.f32 %v2376_v26  ;;  %v2368_v42 = vadd.f32 %v8574_v56, %v2367_v38  ;;  %v1093_v49 = vadd.f32 %v6577_v0, %v1092_v36  ;;  %v2296_v22 = vpack.c.bf16 %v8757_v5, %v8755_v2 }
 0x22d   :  { %v3371_v46 = vadd.f32 %v8574_v56, %v3370_v10  ;;  %v6593_v52 = vpop.eup %6592  ;;  %6618 = vtanh.f32 %v3379_v31  ;;  %v5802_v53 = vpop.f32.mrf.mxu0  ;;  %v2097_v57 = vadd.f32 %v6579_v6, %v2096_v44  ;;  %v8772_v31 = vld [vmem:[#allocation2 + $0xed8] sm:$0xff] }
 0x22e   :  { %v5946_v54 = vpop.f32.mrf.mxu1  ;;  %v6595_v58 = vpop.eup %6594  ;;  %6620 = vtanh.f32 %v2368_v42  ;;  %v2379_v59 = vadd.f32 %v8574_v56, %v5802_v53  ;;  %v1094_v61 = vrot.slane %v1093_v49, 4 }
 0x22f   :  { %v6597_v34 = vpop.eup %6596  ;;  %6622 = vtanh.f32 %v3371_v46  ;;  %v2370_v63 = vpop.f32.mrf.mxu0  ;;  %v2098_v6 = vrot.slane %v2097_v57, 4  ;;  %v3382_v9 = vadd.f32 %v8574_v56, %v5946_v54 }
 0x230   :  { %v3373_v0 = vpop.f32.mrf.mxu1  ;;  %v6599_v7 = vpop.eup %6598  ;;  %v2974_v8 = vadd.f32 %v6597_v34, %v6589_v37  ;;  %v2371_v11 = vadd.f32 %v8574_v56, %v2370_v63  ;;  %6624 = vtanh.f32 %v2379_v59  ;;  %v1095_v17 = vadd.f32 %v1094_v61, %v1093_v49  ;;  %v8782_v59 = vld [vmem:[#allocation2 + $0xf10] sm:$0xff] }
 0x231   :  { %v3374_v12 = vadd.f32 %v8574_v56, %v3373_v0  ;;  %v8762_v13 = vpop.eup %6600  ;;  %v3977_v14 = vadd.f32 %v6599_v7, %v6591_v45  ;;  %v5805_v15 = vpop.f32.mrf.mxu0  ;;  %5900 = vmatmul.mubr.bf16.gmra.mxu0 %v2292_v39  ;;  %6044 = vmatmul.mubr.bf16.gmra.mxu1 %v3295_v29  ;;  %v2099_v18 = vadd.f32 %v2098_v6, %v2097_v57  ;;  %v8784_v61 = vld [vmem:[#allocation2 + $0xf30] sm:$0xff] }
 0x232   :  { %v5949_v16 = vpop.f32.mrf.mxu1  ;;  %v8764_v19 = vpop.eup %6602  ;;  %v2975_v20 = vadd.f32 %v8715_v23, %v2974_v8  ;;  %6626 = vtanh.f32 %v2371_v11  ;;  %5903 = vmatprep.mubr.bf16.mxu0 %v2293_v55  ;;  %6047 = vmatprep.mubr.bf16.mxu1 %v3296_v47  ;;  %v1096_v26 = vrot.slane %v1095_v17, 2  ;;  %v2297_v40 = vpack.c.bf16 %v8784_v61, %v8782_v59  ;;  %v3234_v61 = vld [vmem:[#allocation2 + $0xf58] sm:$0xff] }
 0x233   :  { %v6605_v24 = vpop.eup %6604  ;;  %v3978_v25 = vadd.f32 %v8719_v30, %v3977_v14  ;;  %6628 = vtanh.f32 %v3374_v12  ;;  %v2383_v27 = vpop.f32.mrf.mxu0  ;;  %v2100_v23 = vrot.slane %v2099_v18, 2  ;;  %v2392_v30 = vadd.f32 %v8574_v56, %v5805_v15 }
 0x234   :  { %v3386_v28 = vpop.f32.mrf.mxu1  ;;  %v6607_v33 = vpop.eup %6606  ;;  %v2976_v35 = vadd.f32 %v6593_v52, %v2975_v20  ;;  %6630 = vtanh.f32 %v3382_v9  ;;  %v2384_v36 = vadd.f32 %v8574_v56, %v2383_v27  ;;  %v1097_v44 = vadd.f32 %v1096_v26, %v1095_v17  ;;  %v95_v17 = vld [vmem:[#allocation8] sm:$0x1]  ;;  %v3233_v20 = vld [vmem:[#allocation2 + $0xf38] sm:$0xff] }
 0x235   :  { %v3387_v37 = vadd.f32 %v8574_v56, %v3386_v28  ;;  %v6609_v38 = vpop.eup %6608  ;;  %v3979_v10 = vadd.f32 %v6595_v58, %v3978_v25  ;;  %v5806_v39 = vpop.f32.mrf.mxu0  ;;  %v2101_v45 = vadd.f32 %v2100_v23, %v2099_v18  ;;  %v3395_v49 = vadd.f32 %v8574_v56, %v5949_v16  ;;  %v3232_v18 = vld [vmem:[#allocation2 + $0xf18] sm:$0xff] }
 0x236   :  { %v5950_v29 = vpop.f32.mrf.mxu1  ;;  %v6611_v42 = vpop.eup %6610  ;;  %v2977_v46 = vadd.f32 %v6605_v24, %v2976_v35  ;;  %6632 = vtanh.f32 %v2384_v36  ;;  %v3299_v52 = vpack.c.bf16 %v8774_v32, %v8772_v31  ;;  %v1098_v57 = vrot.slane %v1097_v44, 1  ;;  %v2234_v32 = vld [vmem:[#allocation2 + $0xfb0] sm:$0xff] }
 0x237   :  { %v6613_v53 = vpop.eup %6612  ;;  %v3980_v54 = vadd.f32 %v6607_v33, %v3979_v10  ;;  %6634 = vtanh.f32 %v3387_v37  ;;  %v2386_v55 = vpop.f32.mrf.mxu0  ;;  %v2102_v58 = vrot.slane %v2101_v45, 1  ;;  %v2395_v63 = vadd.f32 %v8574_v56, %v5806_v39 }
 0x238   :  { %v3389_v47 = vpop.f32.mrf.mxu1  ;;  %v6615_v62 = vpop.eup %6614  ;;  %v2978_v34 = vadd.f32 %v6613_v53, %v2977_v46  ;;  %v2387_v0 = vadd.f32 %v8574_v56, %v2386_v55  ;;  %6636 = vtanh.f32 %v2392_v30  ;;  %v1099_v11 = vadd.f32 %v1098_v57, %v1097_v44  ;;  %v8814_v46 = vld [vmem:[#allocation2 + $0xf50] sm:$0xff] }
 0x239   :  { %v3390_v4 = vadd.f32 %v8574_v56, %v3389_v47  ;;  %v8789_v6 = vpop.eup %6616  ;;  %v3981_v7 = vadd.f32 %v6615_v62, %v3980_v54  ;;  %v5809_v8 = vpop.f32.mrf.mxu0  ;;  %5904 = vmatmul.mubr.bf16.gmra.mxu0 %v2294_v60  ;;  %6048 = vmatmul.mubr.bf16.gmra.mxu1 %v3297_v1  ;;  %v2103_v12 = vadd.f32 %v2102_v58, %v2101_v45  ;;  %v3235_v62 = vld [vmem:[#allocation2 + $0xf78] sm:$0xff] }
 0x23a   :  { %v5953_v9 = vpop.f32.mrf.mxu1  ;;  %v8797_v14 = vpop.eup %6618  ;;  %v2979_v15 = vadd.f32 %v8762_v13, %v2978_v34  ;;  %v3398_v16 = vadd.f32 %v8574_v56, %v5950_v29  ;;  %6638 = vtanh.f32 %v2387_v0  ;;  %5907 = vmatprep.mubr.bf16.mxu0 %v2295_v3  ;;  %6051 = vmatprep.mubr.bf16.mxu1 %v3298_v21  ;;  %v1100_v1 = vmul.f32 0.0009765625, %v1099_v11  ;;  %v2233_v34 = vld [vmem:[#allocation2 + $0xf90] sm:$0xff] }
 0x23b   :  { %v6621_v41 = vpop.eup %6620  ;;  %v3982_v43 = vadd.f32 %v8764_v19, %v3981_v7  ;;  %6640 = vtanh.f32 %v3390_v4  ;;  %v2399_v48 = vpop.f32.mrf.mxu0  ;;  %v2104_v13 = vmul.f32 0.0009765625, %v2103_v12  ;;  %v2408_v21 = vadd.f32 %v8574_v56, %v5809_v8  ;;  %v8831_v7 = vld [vmem:[#allocation7] ss:$0 sm:$0xff] }
 0x23c   :  { %v3402_v60 = vpop.f32.mrf.mxu1  ;;  %v6623_v24 = vpop.eup %6622  ;;  %v2980_v25 = vadd.f32 %v6609_v38, %v2979_v15  ;;  %6642 = vtanh.f32 %v3395_v49  ;;  %v2400_v50 = vadd.f32 %v8574_v56, %v2399_v48  ;;  %v1101_v28 = vmul.f32 %v1100_v1, %v95_v17  ;;  %v8816_v49 = vld [vmem:[#allocation2 + $0xf70] sm:$0xff] }
 0x23d   :  { %v3403_v51 = vadd.f32 %v8574_v56, %v3402_v60  ;;  %v3983_v3 = vadd.f32 %v6611_v42, %v3982_v43  ;;  %6644 = vtanh.f32 %v2395_v63  ;;  %v5810_v27 = vpop.f32.mrf.mxu0  ;;  %v6625_v26 = vpop.eup %6624  ;;  %v3411_v33 = vadd.f32 %v8574_v56, %v5953_v9 }
 0x23e   :  { %v5954_v19 = vpop.f32.mrf.mxu1  ;;  %v2981_v23 = vadd.f32 %v6621_v41, %v2980_v25  ;;  %6646 = vtanh.f32 %v3398_v16  ;;  %v3300_v35 = vpack.c.bf16 %v3233_v20, %v3232_v18  ;;  %v1103_v30 = vsel %vm1102_vm0, %v1101_v28, 0.0 }
 0x23f   :  { %v6627_v36 = vpop.eup %6626  ;;  %v3984_v37 = vadd.f32 %v6623_v24, %v3983_v3  ;;  %6648 = vtanh.f32 %v3403_v51  ;;  %v2402_v38 = vpop.f32.mrf.mxu0  ;;  %v2105_v39 = vmul.f32 %v2104_v13, %v95_v17  ;;  %1104 = vadd.xlane.f32.xlu0 %v1103_v30  ;;  %v2411_v55 = vadd.f32 %v8574_v56, %v5810_v27  ;;  %v2235_v51 = vld [vmem:[#allocation2 + $0xfd0] sm:$0xff] }
 0x240   :  { %v3405_v10 = vpop.f32.mrf.mxu1  ;;  %v6629_v29 = vpop.eup %6628  ;;  %v2982_v44 = vadd.f32 %v6627_v36, %v2981_v23  ;;  %6650 = vtanh.f32 %v2400_v50  ;;  %v2403_v45 = vadd.f32 %v8574_v56, %v2402_v38  ;;  %v3414_v59 = vadd.f32 %v8574_v56, %v5954_v19  ;;  %v2236_v3 = vld [vmem:[#allocation2 + $0xff0] sm:$0xff]  ;;  %v3238_v36 = vld [vmem:[#allocation2 + $0xfd8] sm:$0xff] }
 0x241   :  { %v3406_v42 = vadd.f32 %v8574_v56, %v3405_v10  ;;  %v6631_v53 = vpop.eup %6630  ;;  %v3985_v54 = vadd.f32 %v6629_v29, %v3984_v37  ;;  %6652 = vtanh.f32 %v2408_v21  ;;  %v5813_v47 = vpop.f32.mrf.mxu0  ;;  %5908 = vmatmul.mubr.bf16.gmra.mxu0 %v2296_v22  ;;  %6052 = vmatmul.mubr.bf16.gmra.mxu1 %v3299_v52  ;;  %v2106_v22 = vsel %vm1102_vm0, %v2105_v39, 0.0  ;;  %v3236_v52 = vld [vmem:[#allocation2 + $0xf98] sm:$0xff] }
 0x242   :  { %v5957_v57 = vpop.f32.mrf.mxu1  ;;  %v2983_v58 = vadd.f32 %v8789_v6, %v2982_v44  ;;  %6654 = vtanh.f32 %v2403_v45  ;;  %5911 = vmatprep.mubr.bf16.mxu0 %v2297_v40  ;;  %6055 = vmatprep.mubr.bf16.mxu1 %v3300_v35  ;;  %v2298_v31 = vpack.c.bf16 %v8816_v49, %v8814_v46  ;;  %v3237_v56 = vld [vmem:[#allocation2 + $0xfb8] sm:$0xff]  ;;  %v2424_v12 = vadd.f32 %v8831_v7, %v5813_v47 }
 0x243   :  { %v6633_v63 = vpop.eup %6632  ;;  %v3986_v0 = vadd.f32 %v8797_v14, %v3985_v54  ;;  %6656 = vtanh.f32 %v3406_v42  ;;  %v2415_v2 = vpop.f32.mrf.mxu0  ;;  %2107 = vadd.xlane.f32.xlu0 %v2106_v22  ;;  %v3301_v16 = vpack.c.bf16 %v3235_v62, %v3234_v61  ;;  %v2299_v41 = vpack.c.bf16 %v2234_v32, %v2233_v34  ;;  %v3239_v37 = vld [vmem:[#allocation2 + $0xff8] sm:$0xff] }
 0x244   :  { %v3418_v5 = vpop.f32.mrf.mxu1  ;;  %v6635_v4 = vpop.eup %6634  ;;  %v2984_v6 = vadd.f32 %v6625_v26, %v2983_v58  ;;  %6658 = vtanh.f32 %v3411_v33  ;;  %v2416_v8 = vadd.f32 %v8831_v7, %v2415_v2  ;;  %v3302_v43 = vpack.c.bf16 %v3237_v56, %v3236_v52 }
 0x245   :  { %v3419_v9 = vadd.f32 %v8831_v7, %v3418_v5  ;;  %v3987_v11 = vadd.f32 %v6631_v53, %v3986_v0  ;;  %6660 = vtanh.f32 %v2411_v55  ;;  %v5814_v14 = vpop.f32.mrf.mxu0  ;;  %v6637_v17 = vpop.eup %6636  ;;  %v3427_v1 = vadd.f32 %v8831_v7, %v5957_v57 }
 0x246   :  { %v5958_v15 = vpop.f32.mrf.mxu1  ;;  %v2985_v40 = vadd.f32 %v6633_v63, %v2984_v6  ;;  %6662 = vtanh.f32 %v3414_v59  ;;  %v2427_v19 = vadd.f32 %v8831_v7, %v5814_v14  ;;  %v2300_v29 = vpack.c.bf16 %v2236_v3, %v2235_v51 }
 0x247   :  { %v6639_v48 = vpop.eup %6638  ;;  %v3988_v60 = vadd.f32 %v6635_v4, %v3987_v11  ;;  %6664 = vtanh.f32 %v3419_v9  ;;  %v2418_v13 = vpop.f32.mrf.mxu0  ;;  %v3430_v35 = vadd.f32 %v8831_v7, %v5958_v15  ;;  %v3303_v57 = vpack.c.bf16 %v3239_v37, %v3238_v36 }
 0x248   :  { %v3421_v18 = vpop.f32.mrf.mxu1  ;;  %v6641_v20 = vpop.eup %6640  ;;  %v2986_v24 = vadd.f32 %v6639_v48, %v2985_v40  ;;  %6666 = vtanh.f32 %v2416_v8  ;;  %v2419_v25 = vadd.f32 %v8831_v7, %v2418_v13 }
 0x249   :  { %v3422_v50 = vadd.f32 %v8831_v7, %v3421_v18  ;;  %v6643_v21 = vpop.eup %6642  ;;  %v3989_v27 = vadd.f32 %v6641_v20, %v3988_v60  ;;  %6668 = vtanh.f32 %v2424_v12  ;;  %v5817_v28 = vpop.f32.mrf.mxu0  ;;  %5912 = vmatmul.mubr.bf16.gmra.mxu0 %v2298_v31  ;;  %6056 = vmatmul.mubr.bf16.gmra.mxu1 %v3301_v16 }
 0x24a   :  { %v5961_v26 = vpop.f32.mrf.mxu1  ;;  %v6645_v23 = vpop.eup %6644  ;;  %v2987_v33 = vadd.f32 %v6637_v17, %v2986_v24  ;;  %6670 = vtanh.f32 %v2419_v25  ;;  %5915 = vmatprep.mubr.bf16.mxu0 %v2299_v41  ;;  %6059 = vmatprep.mubr.bf16.mxu1 %v3302_v43  ;;  %v2440_v54 = vadd.f32 %v8831_v7, %v5817_v28 }
 0x24b   :  { %v6647_v38 = vpop.eup %6646  ;;  %v3990_v10 = vadd.f32 %v6643_v21, %v3989_v27  ;;  %6672 = vtanh.f32 %v3422_v50  ;;  %v2431_v30 = vpop.f32.mrf.mxu0  ;;  %v3443_v34 = vadd.f32 %v8831_v7, %v5961_v26 }
 0x24c   :  { %v3434_v39 = vpop.f32.mrf.mxu1  ;;  %v6649_v44 = vpop.eup %6648  ;;  %v2988_v45 = vadd.f32 %v6645_v23, %v2987_v33  ;;  %6674 = vtanh.f32 %v3427_v1  ;;  %v2432_v42 = vadd.f32 %v8831_v7, %v2431_v30 }
 0x24d   :  { %v3435_v46 = vadd.f32 %v8831_v7, %v3434_v39  ;;  %v6651_v49 = vpop.eup %6650  ;;  %v3991_v53 = vadd.f32 %v6647_v38, %v3990_v10  ;;  %6676 = vtanh.f32 %v2427_v19  ;;  %v5818_v55 = vpop.f32.mrf.mxu0 }
 0x24e   :  { %v5962_v47 = vpop.f32.mrf.mxu1  ;;  %v6653_v58 = vpop.eup %6652  ;;  %v2989_v59 = vadd.f32 %v6651_v49, %v2988_v45  ;;  %6678 = vtanh.f32 %v3430_v35  ;;  %v2443_v56 = vadd.f32 %v8831_v7, %v5818_v55 }
 0x24f   :  { %v6655_v61 = vpop.eup %6654  ;;  %v3992_v62 = vadd.f32 %v6649_v44, %v3991_v53  ;;  %6680 = vtanh.f32 %v3435_v46  ;;  %v2434_v63 = vpop.f32.mrf.mxu0  ;;  %v3446_v11 = vadd.f32 %v8831_v7, %v5962_v47 }
 0x250   :  { %v3437_v0 = vpop.f32.mrf.mxu1  ;;  %v6657_v2 = vpop.eup %6656  ;;  %v2990_v5 = vadd.f32 %v6655_v61, %v2989_v59  ;;  %6682 = vtanh.f32 %v2432_v42  ;;  %v2435_v22 = vadd.f32 %v8831_v7, %v2434_v63 }
 0x251   :  { %v3438_v31 = vadd.f32 %v8831_v7, %v3437_v0  ;;  %v6659_v32 = vpop.eup %6658  ;;  %v3993_v52 = vadd.f32 %v6657_v2, %v3992_v62  ;;  %6684 = vtanh.f32 %v2440_v54  ;;  %v5821_v4 = vpop.f32.mrf.mxu0  ;;  %5916 = vmatmul.mubr.bf16.gmra.mxu0 %v2300_v29  ;;  %6060 = vmatmul.mubr.bf16.gmra.mxu1 %v3303_v57 }
 0x252   :  { %v5965_v6 = vpop.f32.mrf.mxu1  ;;  %v6661_v8 = vpop.eup %6660  ;;  %v2991_v9 = vadd.f32 %v6653_v58, %v2990_v5  ;;  %6686 = vtanh.f32 %v2435_v22  ;;  %v2456_v1 = vadd.f32 %v8831_v7, %v5821_v4 }
 0x253   :  { %v6663_v12 = vpop.eup %6662  ;;  %v3994_v14 = vadd.f32 %v6659_v32, %v3993_v52  ;;  %6688 = vtanh.f32 %v3438_v31  ;;  %v2447_v15 = vpop.f32.mrf.mxu0  ;;  %v3459_v51 = vadd.f32 %v8831_v7, %v5965_v6 }
 0x254   :  { %v3450_v16 = vpop.f32.mrf.mxu1  ;;  %v6665_v17 = vpop.eup %6664  ;;  %v2992_v40 = vadd.f32 %v6661_v8, %v2991_v9  ;;  %6690 = vtanh.f32 %v3443_v34  ;;  %v2448_v41 = vadd.f32 %v8831_v7, %v2447_v15 }
 0x255   :  { %v3451_v43 = vadd.f32 %v8831_v7, %v3450_v16  ;;  %v6667_v48 = vpop.eup %6666  ;;  %v3995_v60 = vadd.f32 %v6663_v12, %v3994_v14  ;;  %6692 = vtanh.f32 %v2443_v56  ;;  %v5822_v13 = vpop.f32.mrf.mxu0 }
 0x256   :  { %v5966_v18 = vpop.f32.mrf.mxu1  ;;  %v6669_v20 = vpop.eup %6668  ;;  %v2993_v24 = vadd.f32 %v6667_v48, %v2992_v40  ;;  %6694 = vtanh.f32 %v3446_v11  ;;  %v2459_v35 = vadd.f32 %v8831_v7, %v5822_v13 }
 0x257   :  { %v6671_v25 = vpop.eup %6670  ;;  %v3996_v50 = vadd.f32 %v6665_v17, %v3995_v60  ;;  %6696 = vtanh.f32 %v3451_v43  ;;  %v2450_v3 = vpop.f32.mrf.mxu0  ;;  %v3462_v30 = vadd.f32 %v8831_v7, %v5966_v18 }
 0x258   :  { %v3453_v21 = vpop.f32.mrf.mxu1  ;;  %v6673_v27 = vpop.eup %6672  ;;  %v2994_v19 = vadd.f32 %v6671_v25, %v2993_v24  ;;  %6698 = vtanh.f32 %v2448_v41  ;;  %v2451_v28 = vadd.f32 %v8831_v7, %v2450_v3 }
 0x259   :  { %v3454_v26 = vadd.f32 %v8831_v7, %v3453_v21  ;;  %v6675_v23 = vpop.eup %6674  ;;  %v3997_v33 = vadd.f32 %v6673_v27, %v3996_v50  ;;  %6700 = vtanh.f32 %v2456_v1  ;;  %v5825_v36 = vpop.f32.mrf.mxu0 }
 0x25a   :  { %v5969_v37 = vpop.f32.mrf.mxu1  ;;  %v6677_v38 = vpop.eup %6676  ;;  %v2995_v10 = vadd.f32 %v6669_v20, %v2994_v19  ;;  %6702 = vtanh.f32 %v2451_v28  ;;  %v2472_v47 = vadd.f32 %v8831_v7, %v5825_v36 }
 0x25b   :  { %v6679_v39 = vpop.eup %6678  ;;  %v3998_v29 = vadd.f32 %v6675_v23, %v3997_v33  ;;  %6704 = vtanh.f32 %v3454_v26  ;;  %v2463_v44 = vpop.f32.mrf.mxu0  ;;  %v3475_v63 = vadd.f32 %v8831_v7, %v5969_v37 }
 0x25c   :  { %v3466_v45 = vpop.f32.mrf.mxu1  ;;  %v6681_v42 = vpop.eup %6680  ;;  %v2996_v46 = vadd.f32 %v6677_v38, %v2995_v10  ;;  %6706 = vtanh.f32 %v3459_v51  ;;  %v2464_v49 = vadd.f32 %v8831_v7, %v2463_v44 }
 0x25d   :  { %v3467_v53 = vadd.f32 %v8831_v7, %v3466_v45  ;;  %v6683_v54 = vpop.eup %6682  ;;  %v3999_v55 = vadd.f32 %v6679_v39, %v3998_v29  ;;  %6708 = vtanh.f32 %v2459_v35  ;;  %v5826_v57 = vpop.f32.mrf.mxu0 }
 0x25e   :  { %v5970_v58 = vpop.f32.mrf.mxu1  ;;  %v6685_v59 = vpop.eup %6684  ;;  %v2997_v61 = vadd.f32 %v6683_v54, %v2996_v46  ;;  %6710 = vtanh.f32 %v3462_v30  ;;  %v2475_v4 = vadd.f32 %v8831_v7, %v5826_v57 }
 0x25f   :  { %v6687_v62 = vpop.eup %6686  ;;  %v4000_v34 = vadd.f32 %v6681_v42, %v3999_v55  ;;  %6712 = vtanh.f32 %v3467_v53  ;;  %v2466_v0 = vpop.f32.mrf.mxu0  ;;  %v3478_v12 = vadd.f32 %v8831_v7, %v5970_v58 }
 0x260   :  { %v3469_v2 = vpop.f32.mrf.mxu1  ;;  %v6689_v5 = vpop.eup %6688  ;;  %v2998_v22 = vadd.f32 %v6687_v62, %v2997_v61  ;;  %6714 = vtanh.f32 %v2464_v49  ;;  %v2467_v31 = vadd.f32 %v8831_v7, %v2466_v0 }
 0x261   :  { %v3470_v32 = vadd.f32 %v8831_v7, %v3469_v2  ;;  %v6691_v52 = vpop.eup %6690  ;;  %v4001_v56 = vadd.f32 %v6689_v5, %v4000_v34  ;;  %6716 = vtanh.f32 %v2472_v47  ;;  %v5829_v6 = vpop.f32.mrf.mxu0 }
 0x262   :  { %v5973_v8 = vpop.f32.mrf.mxu1  ;;  %v6693_v9 = vpop.eup %6692  ;;  %v2999_v11 = vadd.f32 %v6685_v59, %v2998_v22  ;;  %6718 = vtanh.f32 %v2467_v31  ;;  %v2488_v13 = vadd.f32 %v8831_v7, %v5829_v6 }
 0x263   :  { %v6695_v14 = vpop.eup %6694  ;;  %v4002_v15 = vadd.f32 %v6691_v52, %v4001_v56  ;;  %6720 = vtanh.f32 %v3470_v32  ;;  %v2479_v16 = vpop.f32.mrf.mxu0  ;;  %v3491_v3 = vadd.f32 %v8831_v7, %v5973_v8 }
 0x264   :  { %v3482_v17 = vpop.f32.mrf.mxu1  ;;  %v6697_v40 = vpop.eup %6696  ;;  %v3000_v41 = vadd.f32 %v6693_v9, %v2999_v11  ;;  %6722 = vtanh.f32 %v3475_v63  ;;  %v2480_v43 = vadd.f32 %v8831_v7, %v2479_v16 }
 0x265   :  { %v3483_v48 = vadd.f32 %v8831_v7, %v3482_v17  ;;  %v6699_v60 = vpop.eup %6698  ;;  %v4003_v1 = vadd.f32 %v6695_v14, %v4002_v15  ;;  %6724 = vtanh.f32 %v2475_v4  ;;  %v5830_v18 = vpop.f32.mrf.mxu0 }
 0x266   :  { %v5974_v20 = vpop.f32.mrf.mxu1  ;;  %v6701_v24 = vpop.eup %6700  ;;  %v3001_v25 = vadd.f32 %v6699_v60, %v3000_v41  ;;  %6726 = vtanh.f32 %v3478_v12  ;;  %v2491_v36 = vadd.f32 %v8831_v7, %v5830_v18 }
 0x267   :  { %v6703_v50 = vpop.eup %6702  ;;  %v4004_v51 = vadd.f32 %v6697_v40, %v4003_v1  ;;  %6728 = vtanh.f32 %v3483_v48  ;;  %v2482_v21 = vpop.f32.mrf.mxu0  ;;  %v3494_v39 = vadd.f32 %v8831_v7, %v5974_v20 }
 0x268   :  { %v3485_v27 = vpop.f32.mrf.mxu1  ;;  %v6705_v19 = vpop.eup %6704  ;;  %v3002_v28 = vadd.f32 %v6703_v50, %v3001_v25  ;;  %6730 = vtanh.f32 %v2480_v43  ;;  %v2483_v26 = vadd.f32 %v8831_v7, %v2482_v21 }
 0x269   :  { %v3486_v23 = vadd.f32 %v8831_v7, %v3485_v27  ;;  %v6707_v33 = vpop.eup %6706  ;;  %v4005_v35 = vadd.f32 %v6705_v19, %v4004_v51  ;;  %6732 = vtanh.f32 %v2488_v13  ;;  %v5833_v37 = vpop.f32.mrf.mxu0 }
 0x26a   :  { %v5977_v38 = vpop.f32.mrf.mxu1  ;;  %v6709_v10 = vpop.eup %6708  ;;  %v3003_v30 = vadd.f32 %v6701_v24, %v3002_v28  ;;  %6734 = vtanh.f32 %v2483_v26  ;;  %v2504_v57 = vadd.f32 %v8831_v7, %v5833_v37 }
 0x26b   :  { %v6711_v29 = vpop.eup %6710  ;;  %v4006_v44 = vadd.f32 %v6707_v33, %v4005_v35  ;;  %6736 = vtanh.f32 %v3486_v23  ;;  %v2495_v45 = vpop.f32.mrf.mxu0  ;;  %v3507_v0 = vadd.f32 %v8831_v7, %v5977_v38 }
 0x26c   :  { %v3498_v42 = vpop.f32.mrf.mxu1  ;;  %v6713_v46 = vpop.eup %6712  ;;  %v3004_v49 = vadd.f32 %v6709_v10, %v3003_v30  ;;  %6738 = vtanh.f32 %v3491_v3  ;;  %v2496_v53 = vadd.f32 %v8831_v7, %v2495_v45 }
 0x26d   :  { %v3499_v54 = vadd.f32 %v8831_v7, %v3498_v42  ;;  %v6715_v55 = vpop.eup %6714  ;;  %v4007_v47 = vadd.f32 %v6711_v29, %v4006_v44  ;;  %6740 = vtanh.f32 %v2491_v36  ;;  %v5834_v58 = vpop.f32.mrf.mxu0 }
 0x26e   :  { %v5978_v59 = vpop.f32.mrf.mxu1  ;;  %v6717_v61 = vpop.eup %6716  ;;  %v3005_v62 = vadd.f32 %v6715_v55, %v3004_v49  ;;  %6742 = vtanh.f32 %v3494_v39  ;;  %v2507_v6 = vadd.f32 %v8831_v7, %v5834_v58 }
 0x26f   :  { %v6719_v34 = vpop.eup %6718  ;;  %v4008_v63 = vadd.f32 %v6713_v46, %v4007_v47  ;;  %6744 = vtanh.f32 %v3499_v54  ;;  %v2498_v2 = vpop.f32.mrf.mxu0  ;;  %v3510_v14 = vadd.f32 %v8831_v7, %v5978_v59 }
 0x270   :  { %v3501_v5 = vpop.f32.mrf.mxu1  ;;  %v6721_v22 = vpop.eup %6720  ;;  %v3006_v31 = vadd.f32 %v6719_v34, %v3005_v62  ;;  %6746 = vtanh.f32 %v2496_v53  ;;  %v2499_v32 = vadd.f32 %v8831_v7, %v2498_v2 }
 0x271   :  { %v3502_v52 = vadd.f32 %v8831_v7, %v3501_v5  ;;  %v6723_v56 = vpop.eup %6722  ;;  %v4009_v4 = vadd.f32 %v6721_v22, %v4008_v63  ;;  %6748 = vtanh.f32 %v2504_v57  ;;  %v5837_v8 = vpop.f32.mrf.mxu0 }
 0x272   :  { %v5981_v9 = vpop.f32.mrf.mxu1  ;;  %v6725_v11 = vpop.eup %6724  ;;  %v3007_v12 = vadd.f32 %v6717_v61, %v3006_v31  ;;  %6750 = vtanh.f32 %v2499_v32  ;;  %v2520_v18 = vadd.f32 %v8831_v7, %v5837_v8 }
 0x273   :  { %v6727_v15 = vpop.eup %6726  ;;  %v4010_v16 = vadd.f32 %v6723_v56, %v4009_v4  ;;  %6752 = vtanh.f32 %v3502_v52  ;;  %v2511_v17 = vpop.f32.mrf.mxu0  ;;  %v3523_v21 = vadd.f32 %v8831_v7, %v5981_v9 }
 0x274   :  { %v3514_v40 = vpop.f32.mrf.mxu1  ;;  %v6729_v41 = vpop.eup %6728  ;;  %v3008_v43 = vadd.f32 %v6725_v11, %v3007_v12  ;;  %6754 = vtanh.f32 %v3507_v0  ;;  %v2512_v48 = vadd.f32 %v8831_v7, %v2511_v17 }
 0x275   :  { %v3515_v60 = vadd.f32 %v8831_v7, %v3514_v40  ;;  %v6731_v1 = vpop.eup %6730  ;;  %v4011_v13 = vadd.f32 %v6727_v15, %v4010_v16  ;;  %6756 = vtanh.f32 %v2507_v6  ;;  %v5838_v20 = vpop.f32.mrf.mxu0 }
 0x276   :  { %v5982_v24 = vpop.f32.mrf.mxu1  ;;  %v6733_v25 = vpop.eup %6732  ;;  %v3009_v50 = vadd.f32 %v6731_v1, %v3008_v43  ;;  %6758 = vtanh.f32 %v3510_v14  ;;  %v2523_v37 = vadd.f32 %v8831_v7, %v5838_v20 }
 0x277   :  { %v6735_v51 = vpop.eup %6734  ;;  %v4012_v3 = vadd.f32 %v6729_v41, %v4011_v13  ;;  %6760 = vtanh.f32 %v3515_v60  ;;  %v2514_v27 = vpop.f32.mrf.mxu0  ;;  %v3526_v29 = vadd.f32 %v8831_v7, %v5982_v24 }
 0x278   :  { %v3517_v19 = vpop.f32.mrf.mxu1  ;;  %v6737_v28 = vpop.eup %6736  ;;  %v3010_v26 = vadd.f32 %v6735_v51, %v3009_v50  ;;  %6762 = vtanh.f32 %v2512_v48  ;;  %v2515_v23 = vadd.f32 %v8831_v7, %v2514_v27 }
 0x279   :  { %v3518_v33 = vadd.f32 %v8831_v7, %v3517_v19  ;;  %v6739_v35 = vpop.eup %6738  ;;  %v4013_v36 = vadd.f32 %v6737_v28, %v4012_v3  ;;  %6764 = vtanh.f32 %v2520_v18  ;;  %v5841_v38 = vpop.f32.mrf.mxu0 }
 0x27a   :  { %v5985_v10 = vpop.f32.mrf.mxu1  ;;  %v6741_v30 = vpop.eup %6740  ;;  %v3011_v39 = vadd.f32 %v6733_v25, %v3010_v26  ;;  %6766 = vtanh.f32 %v2515_v23  ;;  %v2536_v58 = vadd.f32 %v8831_v7, %v5841_v38 }
 0x27b   :  { %v6743_v44 = vpop.eup %6742  ;;  %v4014_v45 = vadd.f32 %v6739_v35, %v4013_v36  ;;  %6768 = vtanh.f32 %v3518_v33  ;;  %v2527_v42 = vpop.f32.mrf.mxu0  ;;  %v3539_v2 = vadd.f32 %v8831_v7, %v5985_v10 }
 0x27c   :  { %v3530_v46 = vpop.f32.mrf.mxu1  ;;  %v6745_v49 = vpop.eup %6744  ;;  %v3012_v53 = vadd.f32 %v6741_v30, %v3011_v39  ;;  %6770 = vtanh.f32 %v3523_v21  ;;  %v2528_v54 = vadd.f32 %v8831_v7, %v2527_v42 }
 0x27d   :  { %v3531_v55 = vadd.f32 %v8831_v7, %v3530_v46  ;;  %v6747_v47 = vpop.eup %6746  ;;  %v4015_v57 = vadd.f32 %v6743_v44, %v4014_v45  ;;  %6772 = vtanh.f32 %v2523_v37  ;;  %v5842_v59 = vpop.f32.mrf.mxu0 }
 0x27e   :  { %v5986_v61 = vpop.f32.mrf.mxu1  ;;  %v6749_v62 = vpop.eup %6748  ;;  %v3013_v34 = vadd.f32 %v6747_v47, %v3012_v53  ;;  %6774 = vtanh.f32 %v3526_v29  ;;  %v2539_v8 = vadd.f32 %v8831_v7, %v5842_v59 }
 0x27f   :  { %v6751_v63 = vpop.eup %6750  ;;  %v4016_v0 = vadd.f32 %v6745_v49, %v4015_v57  ;;  %6776 = vtanh.f32 %v3531_v55  ;;  %v2530_v5 = vpop.f32.mrf.mxu0  ;;  %v3542_v15 = vadd.f32 %v8831_v7, %v5986_v61 }
 0x280   :  { %v3533_v22 = vpop.f32.mrf.mxu1  ;;  %v6753_v31 = vpop.eup %6752  ;;  %v3014_v32 = vadd.f32 %v6751_v63, %v3013_v34  ;;  %6778 = vtanh.f32 %v2528_v54  ;;  %v2531_v52 = vadd.f32 %v8831_v7, %v2530_v5 }
 0x281   :  { %v3534_v56 = vadd.f32 %v8831_v7, %v3533_v22  ;;  %v6755_v4 = vpop.eup %6754  ;;  %v4017_v6 = vadd.f32 %v6753_v31, %v4016_v0  ;;  %6780 = vtanh.f32 %v2536_v58  ;;  %v5845_v9 = vpop.f32.mrf.mxu0 }
 0x282   :  { %v5989_v11 = vpop.f32.mrf.mxu1  ;;  %v6757_v12 = vpop.eup %6756  ;;  %v3015_v14 = vadd.f32 %v6749_v62, %v3014_v32  ;;  %6782 = vtanh.f32 %v2531_v52  ;;  %v2552_v20 = vadd.f32 %v8831_v7, %v5845_v9 }
 0x283   :  { %v6759_v16 = vpop.eup %6758  ;;  %v4018_v17 = vadd.f32 %v6755_v4, %v4017_v6  ;;  %6784 = vtanh.f32 %v3534_v56  ;;  %v2543_v40 = vpop.f32.mrf.mxu0  ;;  %v3555_v27 = vadd.f32 %v8831_v7, %v5989_v11 }
 0x284   :  { %v3546_v41 = vpop.f32.mrf.mxu1  ;;  %v6761_v43 = vpop.eup %6760  ;;  %v3016_v48 = vadd.f32 %v6757_v12, %v3015_v14  ;;  %6786 = vtanh.f32 %v3539_v2  ;;  %v2544_v60 = vadd.f32 %v8831_v7, %v2543_v40 }
 0x285   :  { %v3547_v1 = vadd.f32 %v8831_v7, %v3546_v41  ;;  %v6763_v13 = vpop.eup %6762  ;;  %v4019_v18 = vadd.f32 %v6759_v16, %v4018_v17  ;;  %6788 = vtanh.f32 %v2539_v8  ;;  %v5846_v24 = vpop.f32.mrf.mxu0 }
 0x286   :  { %v5990_v25 = vpop.f32.mrf.mxu1  ;;  %v6765_v50 = vpop.eup %6764  ;;  %v3017_v51 = vadd.f32 %v6763_v13, %v3016_v48  ;;  %6790 = vtanh.f32 %v3542_v15  ;;  %v2555_v38 = vadd.f32 %v8831_v7, %v5846_v24 }
 0x287   :  { %v6767_v3 = vpop.eup %6766  ;;  %v4020_v21 = vadd.f32 %v6761_v43, %v4019_v18  ;;  %6792 = vtanh.f32 %v3547_v1  ;;  %v2546_v19 = vpop.f32.mrf.mxu0  ;;  %v3558_v44 = vadd.f32 %v8831_v7, %v5990_v25 }
 0x288   :  { %v3549_v28 = vpop.f32.mrf.mxu1  ;;  %v6769_v26 = vpop.eup %6768  ;;  %v3018_v23 = vadd.f32 %v6767_v3, %v3017_v51  ;;  %6794 = vtanh.f32 %v2544_v60  ;;  %v2547_v33 = vadd.f32 %v8831_v7, %v2546_v19 }
 0x289   :  { %v3550_v35 = vadd.f32 %v8831_v7, %v3549_v28  ;;  %v6771_v36 = vpop.eup %6770  ;;  %v4021_v37 = vadd.f32 %v6769_v26, %v4020_v21  ;;  %6796 = vtanh.f32 %v2552_v20  ;;  %v5849_v10 = vpop.f32.mrf.mxu0 }
 0x28a   :  { %v5993_v30 = vpop.f32.mrf.mxu1  ;;  %v6773_v39 = vpop.eup %6772  ;;  %v3019_v29 = vadd.f32 %v6765_v50, %v3018_v23  ;;  %6798 = vtanh.f32 %v2547_v33  ;;  %v2568_v59 = vadd.f32 %v8831_v7, %v5849_v10 }
 0x28b   :  { %v6775_v45 = vpop.eup %6774  ;;  %v4022_v42 = vadd.f32 %v6771_v36, %v4021_v37  ;;  %6800 = vtanh.f32 %v3550_v35  ;;  %v2559_v46 = vpop.f32.mrf.mxu0  ;;  %v3571_v5 = vadd.f32 %v8831_v7, %v5993_v30 }
 0x28c   :  { %v3562_v49 = vpop.f32.mrf.mxu1  ;;  %v6777_v53 = vpop.eup %6776  ;;  %v3020_v54 = vadd.f32 %v6773_v39, %v3019_v29  ;;  %6802 = vtanh.f32 %v3555_v27  ;;  %v2560_v55 = vadd.f32 %v8831_v7, %v2559_v46 }
 0x28d   :  { %v3563_v47 = vadd.f32 %v8831_v7, %v3562_v49  ;;  %v6779_v57 = vpop.eup %6778  ;;  %v4023_v58 = vadd.f32 %v6775_v45, %v4022_v42  ;;  %6804 = vtanh.f32 %v2555_v38  ;;  %v5850_v61 = vpop.f32.mrf.mxu0 }
 0x28e   :  { %v5994_v62 = vpop.f32.mrf.mxu1  ;;  %v6781_v34 = vpop.eup %6780  ;;  %v3021_v63 = vadd.f32 %v6779_v57, %v3020_v54  ;;  %6806 = vtanh.f32 %v3558_v44  ;;  %v2571_v9 = vadd.f32 %v8831_v7, %v5850_v61 }
 0x28f   :  { %v6783_v0 = vpop.eup %6782  ;;  %v4024_v2 = vadd.f32 %v6777_v53, %v4023_v58  ;;  %6808 = vtanh.f32 %v3563_v47  ;;  %v2562_v22 = vpop.f32.mrf.mxu0  ;;  %v3574_v16 = vadd.f32 %v8831_v7, %v5994_v62 }
 0x290   :  { %v3565_v31 = vpop.f32.mrf.mxu1  ;;  %v6785_v32 = vpop.eup %6784  ;;  %v3022_v52 = vadd.f32 %v6783_v0, %v3021_v63  ;;  %6810 = vtanh.f32 %v2560_v55  ;;  %v2563_v56 = vadd.f32 %v8831_v7, %v2562_v22 }
 0x291   :  { %v3566_v4 = vadd.f32 %v8831_v7, %v3565_v31  ;;  %v6787_v6 = vpop.eup %6786  ;;  %v4025_v8 = vadd.f32 %v6785_v32, %v4024_v2  ;;  %6812 = vtanh.f32 %v2568_v59  ;;  %v5853_v11 = vpop.f32.mrf.mxu0 }
 0x292   :  { %v5997_v12 = vpop.f32.mrf.mxu1  ;;  %v6789_v14 = vpop.eup %6788  ;;  %v3023_v15 = vadd.f32 %v6781_v34, %v3022_v52  ;;  %6814 = vtanh.f32 %v2563_v56  ;;  %v2584_v24 = vadd.f32 %v8831_v7, %v5853_v11 }
 0x293   :  { %v6791_v17 = vpop.eup %6790  ;;  %v4026_v40 = vadd.f32 %v6787_v6, %v4025_v8  ;;  %6816 = vtanh.f32 %v3566_v4  ;;  %v2575_v41 = vpop.f32.mrf.mxu0  ;;  %v3587_v19 = vadd.f32 %v8831_v7, %v5997_v12 }
 0x294   :  { %v3578_v43 = vpop.f32.mrf.mxu1  ;;  %v6793_v48 = vpop.eup %6792  ;;  %v3024_v60 = vadd.f32 %v6789_v14, %v3023_v15  ;;  %6818 = vtanh.f32 %v3571_v5  ;;  %v2576_v1 = vadd.f32 %v8831_v7, %v2575_v41 }
 0x295   :  { %v3579_v13 = vadd.f32 %v8831_v7, %v3578_v43  ;;  %v6795_v18 = vpop.eup %6794  ;;  %v4027_v20 = vadd.f32 %v6791_v17, %v4026_v40  ;;  %6820 = vtanh.f32 %v2571_v9  ;;  %v5854_v25 = vpop.f32.mrf.mxu0 }
 0x296   :  { %v5998_v50 = vpop.f32.mrf.mxu1  ;;  %v6797_v51 = vpop.eup %6796  ;;  %v3025_v3 = vadd.f32 %v6795_v18, %v3024_v60  ;;  %6822 = vtanh.f32 %v3574_v16  ;;  %v2587_v10 = vadd.f32 %v8831_v7, %v5854_v25 }
 0x297   :  { %v6799_v21 = vpop.eup %6798  ;;  %v4028_v27 = vadd.f32 %v6793_v48, %v4027_v20  ;;  %6824 = vtanh.f32 %v3579_v13  ;;  %v2578_v28 = vpop.f32.mrf.mxu0  ;;  %v3590_v45 = vadd.f32 %v8831_v7, %v5998_v50 }
 0x298   :  { %v3581_v26 = vpop.f32.mrf.mxu1  ;;  %v6801_v23 = vpop.eup %6800  ;;  %v3026_v33 = vadd.f32 %v6799_v21, %v3025_v3  ;;  %6826 = vtanh.f32 %v2576_v1  ;;  %v2579_v35 = vadd.f32 %v8831_v7, %v2578_v28 }
 0x299   :  { %v3582_v36 = vadd.f32 %v8831_v7, %v3581_v26  ;;  %v6803_v37 = vpop.eup %6802  ;;  %v4029_v38 = vadd.f32 %v6801_v23, %v4028_v27  ;;  %6828 = vtanh.f32 %v2584_v24  ;;  %v5857_v30 = vpop.f32.mrf.mxu0 }
 0x29a   :  { %v6001_v39 = vpop.f32.mrf.mxu1  ;;  %v6805_v29 = vpop.eup %6804  ;;  %v3027_v44 = vadd.f32 %v6797_v51, %v3026_v33  ;;  %6830 = vtanh.f32 %v2579_v35  ;;  %v2600_v61 = vadd.f32 %v8831_v7, %v5857_v30 }
 0x29b   :  { %v6807_v42 = vpop.eup %6806  ;;  %v4030_v46 = vadd.f32 %v6803_v37, %v4029_v38  ;;  %6832 = vtanh.f32 %v3582_v36  ;;  %v2591_v49 = vpop.f32.mrf.mxu0  ;;  %v3603_v22 = vadd.f32 %v8831_v7, %v6001_v39  ;;  %v8933_v36 = vld [vmem:[#allocation7] ss:$0 sm:$0xff] }
 0x29c   :  { %v3594_v53 = vpop.f32.mrf.mxu1  ;;  %v6809_v54 = vpop.eup %6808  ;;  %v3028_v55 = vadd.f32 %v6805_v29, %v3027_v44  ;;  %6834 = vtanh.f32 %v3587_v19  ;;  %v2592_v47 = vadd.f32 %v8831_v7, %v2591_v49 }
 0x29d   :  { %v3595_v57 = vadd.f32 %v8831_v7, %v3594_v53  ;;  %v6811_v58 = vpop.eup %6810  ;;  %v4031_v59 = vadd.f32 %v6807_v42, %v4030_v46  ;;  %6836 = vtanh.f32 %v2587_v10  ;;  %v5858_v62 = vpop.f32.mrf.mxu0 }
 0x29e   :  { %v6002_v34 = vpop.f32.mrf.mxu1  ;;  %v6813_v63 = vpop.eup %6812  ;;  %v3029_v0 = vadd.f32 %v6811_v58, %v3028_v55  ;;  %6838 = vtanh.f32 %v3590_v45  ;;  %v2603_v11 = vadd.f32 %v8831_v7, %v5858_v62 }
 0x29f   :  { %v6815_v2 = vpop.eup %6814  ;;  %v4032_v5 = vadd.f32 %v6809_v54, %v4031_v59  ;;  %6840 = vtanh.f32 %v3595_v57  ;;  %v2594_v31 = vpop.f32.mrf.mxu0  ;;  %v3606_v17 = vadd.f32 %v8831_v7, %v6002_v34 }
 0x2a0   :  { %v3597_v32 = vpop.f32.mrf.mxu1  ;;  %v6817_v52 = vpop.eup %6816  ;;  %v3030_v56 = vadd.f32 %v6815_v2, %v3029_v0  ;;  %6842 = vtanh.f32 %v2592_v47  ;;  %v2595_v4 = vadd.f32 %v8831_v7, %v2594_v31 }
 0x2a1   :  { %v3598_v6 = vadd.f32 %v8831_v7, %v3597_v32  ;;  %v6819_v8 = vpop.eup %6818  ;;  %v4033_v9 = vadd.f32 %v6817_v52, %v4032_v5  ;;  %6844 = vtanh.f32 %v2600_v61  ;;  %v5861_v12 = vpop.f32.mrf.mxu0 }
 0x2a2   :  { %v6005_v14 = vpop.f32.mrf.mxu1  ;;  %v6821_v15 = vpop.eup %6820  ;;  %v3031_v16 = vadd.f32 %v6813_v63, %v3030_v56  ;;  %6846 = vtanh.f32 %v2595_v4  ;;  %v2616_v25 = vadd.f32 %v8831_v7, %v5861_v12 }
 0x2a3   :  { %v6823_v40 = vpop.eup %6822  ;;  %v4034_v41 = vadd.f32 %v6819_v8, %v4033_v9  ;;  %6848 = vtanh.f32 %v3598_v6  ;;  %v2607_v43 = vpop.f32.mrf.mxu0  ;;  %v3619_v28 = vadd.f32 %v8831_v7, %v6005_v14 }
 0x2a4   :  { %v3610_v48 = vpop.f32.mrf.mxu1  ;;  %v6825_v60 = vpop.eup %6824  ;;  %v3032_v1 = vadd.f32 %v6821_v15, %v3031_v16  ;;  %6850 = vtanh.f32 %v3603_v22  ;;  %v2608_v13 = vadd.f32 %v8831_v7, %v2607_v43 }
 0x2a5   :  { %v3611_v18 = vadd.f32 %v8831_v7, %v3610_v48  ;;  %v6827_v20 = vpop.eup %6826  ;;  %v4035_v24 = vadd.f32 %v6823_v40, %v4034_v41  ;;  %6852 = vtanh.f32 %v2603_v11  ;;  %v5862_v50 = vpop.f32.mrf.mxu0 }
 0x2a6   :  { %v6006_v51 = vpop.f32.mrf.mxu1  ;;  %v6829_v3 = vpop.eup %6828  ;;  %v3033_v21 = vadd.f32 %v6827_v20, %v3032_v1  ;;  %6854 = vtanh.f32 %v3606_v17  ;;  %v2619_v39 = vadd.f32 %v8933_v36, %v5862_v50 }
 0x2a7   :  { %v6831_v27 = vpop.eup %6830  ;;  %v4036_v19 = vadd.f32 %v6825_v60, %v4035_v24  ;;  %6856 = vtanh.f32 %v3611_v18  ;;  %v2610_v26 = vpop.f32.mrf.mxu0  ;;  %v3622_v42 = vadd.f32 %v8933_v36, %v6006_v51 }
 0x2a8   :  { %v3613_v23 = vpop.f32.mrf.mxu1  ;;  %v6833_v33 = vpop.eup %6832  ;;  %v3034_v35 = vadd.f32 %v6831_v27, %v3033_v21  ;;  %6858 = vtanh.f32 %v2608_v13  ;;  %v2611_v37 = vadd.f32 %v8933_v36, %v2610_v26 }
 0x2a9   :  { %v3614_v38 = vadd.f32 %v8933_v36, %v3613_v23  ;;  %v6835_v10 = vpop.eup %6834  ;;  %v4037_v30 = vadd.f32 %v6833_v33, %v4036_v19  ;;  %6860 = vtanh.f32 %v2616_v25  ;;  %v5865_v29 = vpop.f32.mrf.mxu0 }
 0x2aa   :  { %v6009_v44 = vpop.f32.mrf.mxu1  ;;  %v6837_v7 = vpop.eup %6836  ;;  %v3035_v45 = vadd.f32 %v6829_v3, %v3034_v35  ;;  %6862 = vtanh.f32 %v2611_v37  ;;  %v2632_v62 = vadd.f32 %v8933_v36, %v5865_v29 }
 0x2ab   :  { %v6839_v46 = vpop.eup %6838  ;;  %v4038_v49 = vadd.f32 %v6835_v10, %v4037_v30  ;;  %6864 = vtanh.f32 %v3614_v38  ;;  %v2623_v53 = vpop.f32.mrf.mxu0  ;;  %v3635_v31 = vadd.f32 %v8933_v36, %v6009_v44 }
 0x2ac   :  { %v3626_v54 = vpop.f32.mrf.mxu1  ;;  %v6841_v55 = vpop.eup %6840  ;;  %v3036_v47 = vadd.f32 %v6837_v7, %v3035_v45  ;;  %6866 = vtanh.f32 %v3619_v28  ;;  %v2624_v57 = vadd.f32 %v8933_v36, %v2623_v53 }
 0x2ad   :  { %v3627_v58 = vadd.f32 %v8933_v36, %v3626_v54  ;;  %v6843_v59 = vpop.eup %6842  ;;  %v4039_v61 = vadd.f32 %v6839_v46, %v4038_v49  ;;  %6868 = vtanh.f32 %v2619_v39  ;;  %v5866_v34 = vpop.f32.mrf.mxu0 }
 0x2ae   :  { %v6010_v63 = vpop.f32.mrf.mxu1  ;;  %v6845_v0 = vpop.eup %6844  ;;  %v3037_v2 = vadd.f32 %v6843_v59, %v3036_v47  ;;  %6870 = vtanh.f32 %v3622_v42  ;;  %v2635_v12 = vadd.f32 %v8933_v36, %v5866_v34 }
 0x2af   :  { %v6847_v5 = vpop.eup %6846  ;;  %v4040_v22 = vadd.f32 %v6841_v55, %v4039_v61  ;;  %6872 = vtanh.f32 %v3627_v58  ;;  %v2626_v32 = vpop.f32.mrf.mxu0  ;;  %v3638_v40 = vadd.f32 %v8933_v36, %v6010_v63 }
 0x2b0   :  { %v3629_v52 = vpop.f32.mrf.mxu1  ;;  %v6849_v56 = vpop.eup %6848  ;;  %v3038_v4 = vadd.f32 %v6847_v5, %v3037_v2  ;;  %6874 = vtanh.f32 %v2624_v57  ;;  %v2627_v6 = vadd.f32 %v8933_v36, %v2626_v32 }
 0x2b1   :  { %v3630_v8 = vadd.f32 %v8933_v36, %v3629_v52  ;;  %v6851_v9 = vpop.eup %6850  ;;  %v4041_v11 = vadd.f32 %v6849_v56, %v4040_v22  ;;  %6876 = vtanh.f32 %v2632_v62  ;;  %v5869_v14 = vpop.f32.mrf.mxu0 }
 0x2b2   :  { %v6013_v15 = vpop.f32.mrf.mxu1  ;;  %v6853_v16 = vpop.eup %6852  ;;  %v3039_v17 = vadd.f32 %v6845_v0, %v3038_v4  ;;  %6878 = vtanh.f32 %v2627_v6  ;;  %v2648_v50 = vadd.f32 %v8933_v36, %v5869_v14 }
 0x2b3   :  { %v6855_v41 = vpop.eup %6854  ;;  %v4042_v43 = vadd.f32 %v6851_v9, %v4041_v11  ;;  %6880 = vtanh.f32 %v3630_v8  ;;  %v2639_v48 = vpop.f32.mrf.mxu0  ;;  %v3651_v26 = vadd.f32 %v8933_v36, %v6013_v15 }
 0x2b4   :  { %v3642_v60 = vpop.f32.mrf.mxu1  ;;  %v6857_v1 = vpop.eup %6856  ;;  %v3040_v13 = vadd.f32 %v6853_v16, %v3039_v17  ;;  %6882 = vtanh.f32 %v3635_v31  ;;  %v2640_v18 = vadd.f32 %v8933_v36, %v2639_v48 }
 0x2b5   :  { %v3643_v20 = vadd.f32 %v8933_v36, %v3642_v60  ;;  %v6859_v24 = vpop.eup %6858  ;;  %v4043_v25 = vadd.f32 %v6855_v41, %v4042_v43  ;;  %6884 = vtanh.f32 %v2635_v12  ;;  %v5870_v51 = vpop.f32.mrf.mxu0 }
 0x2b6   :  { %v6014_v3 = vpop.f32.mrf.mxu1  ;;  %v6861_v21 = vpop.eup %6860  ;;  %v3041_v27 = vadd.f32 %v6859_v24, %v3040_v13  ;;  %6886 = vtanh.f32 %v3638_v40  ;;  %v2651_v29 = vadd.f32 %v8933_v36, %v5870_v51 }
 0x2b7   :  { %v6863_v19 = vpop.eup %6862  ;;  %v4044_v28 = vadd.f32 %v6857_v1, %v4043_v25  ;;  %6888 = vtanh.f32 %v3643_v20  ;;  %v2642_v23 = vpop.f32.mrf.mxu0  ;;  %v3654_v46 = vadd.f32 %v8933_v36, %v6014_v3 }
 0x2b8   :  { %v3645_v33 = vpop.f32.mrf.mxu1  ;;  %v6865_v35 = vpop.eup %6864  ;;  %v3042_v37 = vadd.f32 %v6863_v19, %v3041_v27  ;;  %6890 = vtanh.f32 %v2640_v18  ;;  %v2643_v38 = vadd.f32 %v8933_v36, %v2642_v23 }
 0x2b9   :  { %v3646_v10 = vadd.f32 %v8933_v36, %v3645_v33  ;;  %v6867_v30 = vpop.eup %6866  ;;  %v4045_v39 = vadd.f32 %v6865_v35, %v4044_v28  ;;  %6892 = vtanh.f32 %v2648_v50  ;;  %v5873_v44 = vpop.f32.mrf.mxu0 }
 0x2ba   :  { %v6017_v7 = vpop.f32.mrf.mxu1  ;;  %v6869_v45 = vpop.eup %6868  ;;  %v3043_v42 = vadd.f32 %v6861_v21, %v3042_v37  ;;  %6894 = vtanh.f32 %v2643_v38  ;;  %v2664_v34 = vadd.f32 %v8933_v36, %v5873_v44 }
 0x2bb   :  { %v6871_v49 = vpop.eup %6870  ;;  %v4046_v53 = vadd.f32 %v6867_v30, %v4045_v39  ;;  %6896 = vtanh.f32 %v3646_v10  ;;  %v2655_v54 = vpop.f32.mrf.mxu0  ;;  %v3667_v32 = vadd.f32 %v8933_v36, %v6017_v7 }
 0x2bc   :  { %v3658_v55 = vpop.f32.mrf.mxu1  ;;  %v6873_v47 = vpop.eup %6872  ;;  %v3044_v57 = vadd.f32 %v6869_v45, %v3043_v42  ;;  %6898 = vtanh.f32 %v3651_v26  ;;  %v2656_v58 = vadd.f32 %v8933_v36, %v2655_v54 }
 0x2bd   :  { %v3659_v59 = vadd.f32 %v8933_v36, %v3658_v55  ;;  %v6875_v61 = vpop.eup %6874  ;;  %v4047_v62 = vadd.f32 %v6871_v49, %v4046_v53  ;;  %6900 = vtanh.f32 %v2651_v29  ;;  %v5874_v63 = vpop.f32.mrf.mxu0 }
 0x2be   :  { %v6018_v0 = vpop.f32.mrf.mxu1  ;;  %v6877_v2 = vpop.eup %6876  ;;  %v3045_v5 = vadd.f32 %v6875_v61, %v3044_v57  ;;  %6902 = vtanh.f32 %v3654_v46  ;;  %v2667_v14 = vadd.f32 %v8933_v36, %v5874_v63 }
 0x2bf   :  { %v6879_v22 = vpop.eup %6878  ;;  %v4048_v31 = vadd.f32 %v6873_v47, %v4047_v62  ;;  %6904 = vtanh.f32 %v3659_v59  ;;  %v2658_v52 = vpop.f32.mrf.mxu0  ;;  %v3670_v41 = vadd.f32 %v8933_v36, %v6018_v0 }
 0x2c0   :  { %v3661_v56 = vpop.f32.mrf.mxu1  ;;  %v6881_v4 = vpop.eup %6880  ;;  %v3046_v6 = vadd.f32 %v6879_v22, %v3045_v5  ;;  %6906 = vtanh.f32 %v2656_v58  ;;  %v2659_v8 = vadd.f32 %v8933_v36, %v2658_v52 }
 0x2c1   :  { %v3662_v9 = vadd.f32 %v8933_v36, %v3661_v56  ;;  %v6883_v11 = vpop.eup %6882  ;;  %v4049_v12 = vadd.f32 %v6881_v4, %v4048_v31  ;;  %6908 = vtanh.f32 %v2664_v34  ;;  %v5877_v15 = vpop.f32.mrf.mxu0 }
 0x2c2   :  { %v6021_v16 = vpop.f32.mrf.mxu1  ;;  %v6885_v17 = vpop.eup %6884  ;;  %v3047_v40 = vadd.f32 %v6877_v2, %v3046_v6  ;;  %6910 = vtanh.f32 %v2659_v8  ;;  %v2680_v51 = vadd.f32 %v8933_v36, %v5877_v15 }
 0x2c3   :  { %v6887_v43 = vpop.eup %6886  ;;  %v4050_v48 = vadd.f32 %v6883_v11, %v4049_v12  ;;  %6912 = vtanh.f32 %v3662_v9  ;;  %v2671_v60 = vpop.f32.mrf.mxu0  ;;  %v3683_v23 = vadd.f32 %v8933_v36, %v6021_v16 }
 0x2c4   :  { %v3674_v1 = vpop.f32.mrf.mxu1  ;;  %v6889_v13 = vpop.eup %6888  ;;  %v3048_v18 = vadd.f32 %v6885_v17, %v3047_v40  ;;  %6914 = vtanh.f32 %v3667_v32  ;;  %v2672_v20 = vadd.f32 %v8933_v36, %v2671_v60 }
 0x2c5   :  { %v3675_v24 = vadd.f32 %v8933_v36, %v3674_v1  ;;  %v6891_v25 = vpop.eup %6890  ;;  %v4051_v50 = vadd.f32 %v6887_v43, %v4050_v48  ;;  %6916 = vtanh.f32 %v2667_v14  ;;  %v5878_v3 = vpop.f32.mrf.mxu0 }
 0x2c6   :  { %v6022_v21 = vpop.f32.mrf.mxu1  ;;  %v6893_v27 = vpop.eup %6892  ;;  %v3049_v19 = vadd.f32 %v6891_v25, %v3048_v18  ;;  %6918 = vtanh.f32 %v3670_v41  ;;  %v2683_v44 = vadd.f32 %v8933_v36, %v5878_v3 }
 0x2c7   :  { %v6895_v28 = vpop.eup %6894  ;;  %v4052_v26 = vadd.f32 %v6889_v13, %v4051_v50  ;;  %6920 = vtanh.f32 %v3675_v24  ;;  %v2674_v33 = vpop.f32.mrf.mxu0  ;;  %v3686_v46 = vadd.f32 %v8933_v36, %v6022_v21 }
 0x2c8   :  { %v3677_v35 = vpop.f32.mrf.mxu1  ;;  %v6897_v37 = vpop.eup %6896  ;;  %v3050_v38 = vadd.f32 %v6895_v28, %v3049_v19  ;;  %6922 = vtanh.f32 %v2672_v20  ;;  %v2675_v10 = vadd.f32 %v8933_v36, %v2674_v33 }
 0x2c9   :  { %v3678_v30 = vadd.f32 %v8933_v36, %v3677_v35  ;;  %v6899_v39 = vpop.eup %6898  ;;  %v4053_v29 = vadd.f32 %v6897_v37, %v4052_v26  ;;  %6924 = vtanh.f32 %v2680_v51  ;;  %v5881_v7 = vpop.f32.mrf.mxu0 }
 0x2ca   :  { %v6901_v45 = vpop.eup %6900  ;;  %v3051_v42 = vadd.f32 %v6893_v27, %v3050_v38  ;;  %6926 = vtanh.f32 %v2675_v10  ;;  %v6025_v49 = vpop.f32.mrf.mxu1  ;;  %v2696_v34 = vadd.f32 %v8933_v36, %v5881_v7 }
 0x2cb   :  { %v6903_v53 = vpop.eup %6902  ;;  %v4054_v54 = vadd.f32 %v6899_v39, %v4053_v29  ;;  %6928 = vtanh.f32 %v3678_v30  ;;  %v2687_v55 = vpop.f32.mrf.mxu0  ;;  %v3699_v6 = vadd.f32 %v8933_v36, %v6025_v49 }
 0x2cc   :  { %v6905_v47 = vpop.eup %6904  ;;  %v3052_v57 = vadd.f32 %v6901_v45, %v3051_v42  ;;  %6930 = vtanh.f32 %v3683_v23  ;;  %v2688_v58 = vadd.f32 %v8933_v36, %v2687_v55  ;;  %v3690_v59 = vpop.f32.mrf.mxu1 }
 0x2cd   :  { %v6907_v61 = vpop.eup %6906  ;;  %v4055_v62 = vadd.f32 %v6903_v53, %v4054_v54  ;;  %6932 = vtanh.f32 %v2683_v44  ;;  %v3691_v63 = vadd.f32 %v8933_v36, %v3690_v59  ;;  %v5882_v0 = vpop.f32.mrf.mxu0 }
 0x2ce   :  { %v6909_v2 = vpop.eup %6908  ;;  %v3053_v5 = vadd.f32 %v6907_v61, %v3052_v57  ;;  %6934 = vtanh.f32 %v3686_v46  ;;  %v6026_v22 = vpop.f32.mrf.mxu1  ;;  %v2699_v14 = vadd.f32 %v8933_v36, %v5882_v0 }
 0x2cf   :  { %v6911_v31 = vpop.eup %6910  ;;  %v4056_v32 = vadd.f32 %v6905_v47, %v4055_v62  ;;  %6936 = vtanh.f32 %v3691_v63  ;;  %v2690_v52 = vpop.f32.mrf.mxu0  ;;  %v3702_v41 = vadd.f32 %v8933_v36, %v6026_v22 }
 0x2d0   :  { %v6913_v56 = vpop.eup %6912  ;;  %v3054_v4 = vadd.f32 %v6911_v31, %v3053_v5  ;;  %6938 = vtanh.f32 %v2688_v58  ;;  %v2691_v8 = vadd.f32 %v8933_v36, %v2690_v52  ;;  %v3693_v9 = vpop.f32.mrf.mxu1 }
 0x2d1   :  { %v6915_v11 = vpop.eup %6914  ;;  %v4057_v12 = vadd.f32 %v6913_v56, %v4056_v32  ;;  %6940 = vtanh.f32 %v2696_v34  ;;  %v3694_v15 = vadd.f32 %v8933_v36, %v3693_v9  ;;  %v5885_v16 = vpop.f32.mrf.mxu0 }
 0x2d2   :  { %v6917_v17 = vpop.eup %6916  ;;  %v3055_v40 = vadd.f32 %v6909_v2, %v3054_v4  ;;  %6942 = vtanh.f32 %v2691_v8  ;;  %v6029_v43 = vpop.f32.mrf.mxu1  ;;  %v2712_v51 = vadd.f32 %v8933_v36, %v5885_v16 }
 0x2d3   :  { %v6919_v48 = vpop.eup %6918  ;;  %v4058_v60 = vadd.f32 %v6915_v11, %v4057_v12  ;;  %6944 = vtanh.f32 %v3694_v15  ;;  %v2703_v1 = vpop.f32.mrf.mxu0  ;;  %v3715_v38 = vadd.f32 %v8933_v36, %v6029_v43 }
 0x2d4   :  { %v6921_v13 = vpop.eup %6920  ;;  %v3056_v18 = vadd.f32 %v6917_v17, %v3055_v40  ;;  %6946 = vtanh.f32 %v3699_v6  ;;  %v2704_v20 = vadd.f32 %v8933_v36, %v2703_v1  ;;  %v3706_v24 = vpop.f32.mrf.mxu1 }
 0x2d5   :  { %v6923_v25 = vpop.eup %6922  ;;  %v4059_v50 = vadd.f32 %v6919_v48, %v4058_v60  ;;  %6948 = vtanh.f32 %v2699_v14  ;;  %v3707_v3 = vadd.f32 %v8933_v36, %v3706_v24  ;;  %v5886_v21 = vpop.f32.mrf.mxu0 }
 0x2d6   :  { %v6925_v27 = vpop.eup %6924  ;;  %v3057_v19 = vadd.f32 %v6923_v25, %v3056_v18  ;;  %6950 = vtanh.f32 %v3702_v41  ;;  %v6030_v28 = vpop.f32.mrf.mxu1  ;;  %v2715_v44 = vadd.f32 %v8933_v36, %v5886_v21 }
 0x2d7   :  { %v6927_v26 = vpop.eup %6926  ;;  %v4060_v23 = vadd.f32 %v6921_v13, %v4059_v50  ;;  %6952 = vtanh.f32 %v3707_v3  ;;  %v2706_v33 = vpop.f32.mrf.mxu0  ;;  %v3718_v49 = vadd.f32 %v8933_v36, %v6030_v28 }
 0x2d8   :  { %v6929_v35 = vpop.eup %6928  ;;  %v3058_v37 = vadd.f32 %v6927_v26, %v3057_v19  ;;  %6954 = vtanh.f32 %v2704_v20  ;;  %v2707_v10 = vadd.f32 %v8933_v36, %v2706_v33  ;;  %v3709_v30 = vpop.f32.mrf.mxu1 }
 0x2d9   :  { %v6931_v39 = vpop.eup %6930  ;;  %v4061_v29 = vadd.f32 %v6929_v35, %v4060_v23  ;;  %6956 = vtanh.f32 %v2712_v51  ;;  %v3710_v7 = vadd.f32 %v8933_v36, %v3709_v30  ;;  %v5889_v45 = vpop.f32.mrf.mxu0 }
 0x2da   :  { %v6933_v42 = vpop.eup %6932  ;;  %v3059_v46 = vadd.f32 %v6925_v27, %v3058_v37  ;;  %6958 = vtanh.f32 %v2707_v10  ;;  %v6033_v53 = vpop.f32.mrf.mxu1  ;;  %v2728_v63 = vadd.f32 %v8933_v36, %v5889_v45 }
 0x2db   :  { %v6935_v54 = vpop.eup %6934  ;;  %v4062_v55 = vadd.f32 %v6931_v39, %v4061_v29  ;;  %6960 = vtanh.f32 %v3710_v7  ;;  %v2719_v47 = vpop.f32.mrf.mxu0  ;;  %v3731_v8 = vadd.f32 %v8933_v36, %v6033_v53 }
 0x2dc   :  { %v6937_v57 = vpop.eup %6936  ;;  %v3060_v58 = vadd.f32 %v6933_v42, %v3059_v46  ;;  %6962 = vtanh.f32 %v3715_v38  ;;  %v2720_v59 = vadd.f32 %v8933_v36, %v2719_v47  ;;  %v3722_v61 = vpop.f32.mrf.mxu1 }
 0x2dd   :  { %v6939_v62 = vpop.eup %6938  ;;  %v4063_v34 = vadd.f32 %v6935_v54, %v4062_v55  ;;  %6964 = vtanh.f32 %v2715_v44  ;;  %v3723_v0 = vadd.f32 %v8933_v36, %v3722_v61  ;;  %v5890_v2 = vpop.f32.mrf.mxu0 }
 0x2de   :  { %v6941_v5 = vpop.eup %6940  ;;  %v3061_v22 = vadd.f32 %v6939_v62, %v3060_v58  ;;  %6966 = vtanh.f32 %v3718_v49  ;;  %v6034_v31 = vpop.f32.mrf.mxu1  ;;  %v2731_v15 = vadd.f32 %v8933_v36, %v5890_v2 }
 0x2df   :  { %v6943_v32 = vpop.eup %6942  ;;  %v4064_v52 = vadd.f32 %v6937_v57, %v4063_v34  ;;  %6968 = vtanh.f32 %v3723_v0  ;;  %v2722_v56 = vpop.f32.mrf.mxu0  ;;  %v3734_v43 = vadd.f32 %v8933_v36, %v6034_v31 }
 0x2e0   :  { %v6945_v4 = vpop.eup %6944  ;;  %v3062_v6 = vadd.f32 %v6943_v32, %v3061_v22  ;;  %6970 = vtanh.f32 %v2720_v59  ;;  %v2723_v9 = vadd.f32 %v8933_v36, %v2722_v56  ;;  %v3725_v11 = vpop.f32.mrf.mxu1 }
 0x2e1   :  { %v6947_v12 = vpop.eup %6946  ;;  %v4065_v14 = vadd.f32 %v6945_v4, %v4064_v52  ;;  %6972 = vtanh.f32 %v2728_v63  ;;  %v3726_v16 = vadd.f32 %v8933_v36, %v3725_v11  ;;  %v5893_v17 = vpop.f32.mrf.mxu0 }
 0x2e2   :  { %v6949_v40 = vpop.eup %6948  ;;  %v3063_v41 = vadd.f32 %v6941_v5, %v3062_v6  ;;  %6974 = vtanh.f32 %v2723_v9  ;;  %v6037_v48 = vpop.f32.mrf.mxu1  ;;  %v2744_v3 = vadd.f32 %v8933_v36, %v5893_v17 }
 0x2e3   :  { %v6951_v60 = vpop.eup %6950  ;;  %v4066_v1 = vadd.f32 %v6947_v12, %v4065_v14  ;;  %6976 = vtanh.f32 %v3726_v16  ;;  %v2735_v13 = vpop.f32.mrf.mxu0  ;;  %v3747_v10 = vadd.f32 %v8933_v36, %v6037_v48 }
 0x2e4   :  { %v6953_v18 = vpop.eup %6952  ;;  %v3064_v20 = vadd.f32 %v6949_v40, %v3063_v41  ;;  %6978 = vtanh.f32 %v3731_v8  ;;  %v2736_v24 = vadd.f32 %v8933_v36, %v2735_v13  ;;  %v3738_v25 = vpop.f32.mrf.mxu1 }
 0x2e5   :  { %v6955_v50 = vpop.eup %6954  ;;  %v4067_v51 = vadd.f32 %v6951_v60, %v4066_v1  ;;  %6980 = vtanh.f32 %v2731_v15  ;;  %v3739_v21 = vadd.f32 %v8933_v36, %v3738_v25  ;;  %v5894_v27 = vpop.f32.mrf.mxu0 }
 0x2e6   :  { %v6957_v19 = vpop.eup %6956  ;;  %v3065_v28 = vadd.f32 %v6955_v50, %v3064_v20  ;;  %6982 = vtanh.f32 %v3734_v43  ;;  %v6038_v26 = vpop.f32.mrf.mxu1  ;;  %v2747_v7 = vadd.f32 %v8933_v36, %v5894_v27 }
 0x2e7   :  { %v6959_v23 = vpop.eup %6958  ;;  %v4068_v33 = vadd.f32 %v6953_v18, %v4067_v51  ;;  %6984 = vtanh.f32 %v3739_v21  ;;  %v2738_v35 = vpop.f32.mrf.mxu0  ;;  %v3750_v53 = vadd.f32 %v8933_v36, %v6038_v26 }
 0x2e8   :  { %v6961_v37 = vpop.eup %6960  ;;  %v3066_v38 = vadd.f32 %v6959_v23, %v3065_v28  ;;  %6986 = vtanh.f32 %v2736_v24  ;;  %v2739_v30 = vadd.f32 %v8933_v36, %v2738_v35  ;;  %v3741_v39 = vpop.f32.mrf.mxu1 }
 0x2e9   :  { %v6963_v29 = vpop.eup %6962  ;;  %v4069_v44 = vadd.f32 %v6961_v37, %v4068_v33  ;;  %6988 = vtanh.f32 %v2744_v3  ;;  %v3742_v45 = vadd.f32 %v8933_v36, %v3741_v39  ;;  %v5897_v42 = vpop.f32.mrf.mxu0 }
 0x2ea   :  { %v6965_v46 = vpop.eup %6964  ;;  %v3067_v49 = vadd.f32 %v6957_v19, %v3066_v38  ;;  %6990 = vtanh.f32 %v2739_v30  ;;  %v6041_v54 = vpop.f32.mrf.mxu1  ;;  %v2760_v0 = vadd.f32 %v8933_v36, %v5897_v42 }
 0x2eb   :  { %v6967_v55 = vpop.eup %6966  ;;  %v4070_v47 = vadd.f32 %v6963_v29, %v4069_v44  ;;  %6992 = vtanh.f32 %v3742_v45  ;;  %v2751_v57 = vpop.f32.mrf.mxu0  ;;  %v3763_v9 = vadd.f32 %v8933_v36, %v6041_v54 }
 0x2ec   :  { %v6969_v58 = vpop.eup %6968  ;;  %v3068_v59 = vadd.f32 %v6965_v46, %v3067_v49  ;;  %6994 = vtanh.f32 %v3747_v10  ;;  %v2752_v61 = vadd.f32 %v8933_v36, %v2751_v57  ;;  %v3754_v62 = vpop.f32.mrf.mxu1 }
 0x2ed   :  { %v6971_v34 = vpop.eup %6970  ;;  %v4071_v63 = vadd.f32 %v6967_v55, %v4070_v47  ;;  %6996 = vtanh.f32 %v2747_v7  ;;  %v3755_v2 = vadd.f32 %v8933_v36, %v3754_v62  ;;  %v5898_v5 = vpop.f32.mrf.mxu0 }
 0x2ee   :  { %v6973_v22 = vpop.eup %6972  ;;  %v3069_v31 = vadd.f32 %v6971_v34, %v3068_v59  ;;  %6998 = vtanh.f32 %v3750_v53  ;;  %v6042_v32 = vpop.f32.mrf.mxu1  ;;  %v2763_v16 = vadd.f32 %v8933_v36, %v5898_v5 }
 0x2ef   :  { %v6975_v52 = vpop.eup %6974  ;;  %v4072_v56 = vadd.f32 %v6969_v58, %v4071_v63  ;;  %7000 = vtanh.f32 %v3755_v2  ;;  %v2754_v4 = vpop.f32.mrf.mxu0  ;;  %v3766_v48 = vadd.f32 %v8933_v36, %v6042_v32 }
 0x2f0   :  { %v6977_v6 = vpop.eup %6976  ;;  %v3070_v8 = vadd.f32 %v6975_v52, %v3069_v31  ;;  %7002 = vtanh.f32 %v2752_v61  ;;  %v2755_v11 = vadd.f32 %v8933_v36, %v2754_v4  ;;  %v3757_v12 = vpop.f32.mrf.mxu1 }
 0x2f1   :  { %v6979_v14 = vpop.eup %6978  ;;  %v4073_v15 = vadd.f32 %v6977_v6, %v4072_v56  ;;  %7004 = vtanh.f32 %v2760_v0  ;;  %v3758_v17 = vadd.f32 %v8933_v36, %v3757_v12  ;;  %v5901_v40 = vpop.f32.mrf.mxu0 }
 0x2f2   :  { %v6981_v41 = vpop.eup %6980  ;;  %v3071_v43 = vadd.f32 %v6973_v22, %v3070_v8  ;;  %7006 = vtanh.f32 %v2755_v11  ;;  %v6045_v60 = vpop.f32.mrf.mxu1  ;;  %v2776_v21 = vadd.f32 %v8933_v36, %v5901_v40 }
 0x2f3   :  { %v6983_v1 = vpop.eup %6982  ;;  %v4074_v13 = vadd.f32 %v6979_v14, %v4073_v15  ;;  %7008 = vtanh.f32 %v3758_v17  ;;  %v2767_v18 = vpop.f32.mrf.mxu0  ;;  %v3779_v30 = vadd.f32 %v8933_v36, %v6045_v60 }
 0x2f4   :  { %v6985_v20 = vpop.eup %6984  ;;  %v3072_v24 = vadd.f32 %v6981_v41, %v3071_v43  ;;  %7010 = vtanh.f32 %v3763_v9  ;;  %v2768_v25 = vadd.f32 %v8933_v36, %v2767_v18  ;;  %v3770_v50 = vpop.f32.mrf.mxu1 }
 0x2f5   :  { %v6987_v51 = vpop.eup %6986  ;;  %v4075_v3 = vadd.f32 %v6983_v1, %v4074_v13  ;;  %7012 = vtanh.f32 %v2763_v16  ;;  %v3771_v27 = vadd.f32 %v8933_v36, %v3770_v50  ;;  %v5902_v19 = vpop.f32.mrf.mxu0 }
 0x2f6   :  { %v6989_v28 = vpop.eup %6988  ;;  %v3073_v26 = vadd.f32 %v6987_v51, %v3072_v24  ;;  %7014 = vtanh.f32 %v3766_v48  ;;  %v6046_v23 = vpop.f32.mrf.mxu1  ;;  %v2779_v45 = vadd.f32 %v8933_v36, %v5902_v19 }
 0x2f7   :  { %v6991_v33 = vpop.eup %6990  ;;  %v4076_v35 = vadd.f32 %v6985_v20, %v4075_v3  ;;  %7016 = vtanh.f32 %v3771_v27  ;;  %v2770_v37 = vpop.f32.mrf.mxu0  ;;  %v3782_v54 = vadd.f32 %v8933_v36, %v6046_v23 }
 0x2f8   :  { %v6993_v38 = vpop.eup %6992  ;;  %v3074_v10 = vadd.f32 %v6991_v33, %v3073_v26  ;;  %7018 = vtanh.f32 %v2768_v25  ;;  %v2771_v39 = vadd.f32 %v8933_v36, %v2770_v37  ;;  %v3773_v29 = vpop.f32.mrf.mxu1 }
 0x2f9   :  { %v6995_v44 = vpop.eup %6994  ;;  %v4077_v7 = vadd.f32 %v6993_v38, %v4076_v35  ;;  %7020 = vtanh.f32 %v2776_v21  ;;  %v3774_v42 = vadd.f32 %v8933_v36, %v3773_v29  ;;  %v5905_v46 = vpop.f32.mrf.mxu0 }
 0x2fa   :  { %v6997_v49 = vpop.eup %6996  ;;  %v3075_v53 = vadd.f32 %v6989_v28, %v3074_v10  ;;  %7022 = vtanh.f32 %v2771_v39  ;;  %v6049_v55 = vpop.f32.mrf.mxu1  ;;  %v2792_v2 = vadd.f32 %v8933_v36, %v5905_v46 }
 0x2fb   :  { %v6999_v47 = vpop.eup %6998  ;;  %v4078_v57 = vadd.f32 %v6995_v44, %v4077_v7  ;;  %7024 = vtanh.f32 %v3774_v42  ;;  %v2783_v58 = vpop.f32.mrf.mxu0  ;;  %v3795_v11 = vadd.f32 %v8933_v36, %v6049_v55 }
 0x2fc   :  { %v7001_v59 = vpop.eup %7000  ;;  %v3076_v61 = vadd.f32 %v6997_v49, %v3075_v53  ;;  %7026 = vtanh.f32 %v3779_v30  ;;  %v2784_v62 = vadd.f32 %v8933_v36, %v2783_v58  ;;  %v3786_v34 = vpop.f32.mrf.mxu1 }
 0x2fd   :  { %v7003_v63 = vpop.eup %7002  ;;  %v4079_v0 = vadd.f32 %v6999_v47, %v4078_v57  ;;  %7028 = vtanh.f32 %v2779_v45  ;;  %v3787_v5 = vadd.f32 %v8933_v36, %v3786_v34  ;;  %v5906_v22 = vpop.f32.mrf.mxu0 }
 0x2fe   :  { %v7005_v31 = vpop.eup %7004  ;;  %v3077_v32 = vadd.f32 %v7003_v63, %v3076_v61  ;;  %7030 = vtanh.f32 %v3782_v54  ;;  %v6050_v52 = vpop.f32.mrf.mxu1  ;;  %v2795_v17 = vadd.f32 %v8933_v36, %v5906_v22 }
 0x2ff   :  { %v7007_v56 = vpop.eup %7006  ;;  %v4080_v4 = vadd.f32 %v7001_v59, %v4079_v0  ;;  %7032 = vtanh.f32 %v3787_v5  ;;  %v2786_v6 = vpop.f32.mrf.mxu0  ;;  %v3798_v60 = vadd.f32 %v8933_v36, %v6050_v52 }
 0x300   :  { %v7009_v8 = vpop.eup %7008  ;;  %v3078_v9 = vadd.f32 %v7007_v56, %v3077_v32  ;;  %7034 = vtanh.f32 %v2784_v62  ;;  %v2787_v12 = vadd.f32 %v8933_v36, %v2786_v6  ;;  %v3789_v14 = vpop.f32.mrf.mxu1 }
 0x301   :  { %v7011_v15 = vpop.eup %7010  ;;  %v4081_v16 = vadd.f32 %v7009_v8, %v4080_v4  ;;  %7036 = vtanh.f32 %v2792_v2  ;;  %v3790_v40 = vadd.f32 %v8933_v36, %v3789_v14  ;;  %v5909_v41 = vpop.f32.mrf.mxu0 }
 0x302   :  { %v7013_v43 = vpop.eup %7012  ;;  %v3079_v48 = vadd.f32 %v7005_v31, %v3078_v9  ;;  %7038 = vtanh.f32 %v2787_v12  ;;  %v6053_v1 = vpop.f32.mrf.mxu1  ;;  %v2808_v27 = vadd.f32 %v8933_v36, %v5909_v41  ;;  %v7111_v12 = vld [vmem:[#allocation7] ss:$0 sm:$0xff] }
 0x303   :  { %v7015_v13 = vpop.eup %7014  ;;  %v4082_v18 = vadd.f32 %v7011_v15, %v4081_v16  ;;  %7040 = vtanh.f32 %v3790_v40  ;;  %v2799_v20 = vpop.f32.mrf.mxu0  ;;  %v3811_v39 = vadd.f32 %v8933_v36, %v6053_v1 }
 0x304   :  { %v7017_v24 = vpop.eup %7016  ;;  %v3080_v25 = vadd.f32 %v7013_v43, %v3079_v48  ;;  %7042 = vtanh.f32 %v3795_v11  ;;  %v2800_v50 = vadd.f32 %v8933_v36, %v2799_v20  ;;  %v3802_v51 = vpop.f32.mrf.mxu1 }
 0x305   :  { %v7019_v3 = vpop.eup %7018  ;;  %v4083_v21 = vadd.f32 %v7015_v13, %v4082_v18  ;;  %7044 = vtanh.f32 %v2795_v17  ;;  %v3803_v19 = vadd.f32 %v8933_v36, %v3802_v51  ;;  %v5910_v28 = vpop.f32.mrf.mxu0 }
 0x306   :  { %v7021_v26 = vpop.eup %7020  ;;  %v3081_v23 = vadd.f32 %v7019_v3, %v3080_v25  ;;  %7046 = vtanh.f32 %v3798_v60  ;;  %v6054_v33 = vpop.f32.mrf.mxu1  ;;  %v2811_v42 = vadd.f32 %v8933_v36, %v5910_v28 }
 0x307   :  { %v7023_v35 = vpop.eup %7022  ;;  %v4084_v37 = vadd.f32 %v7017_v24, %v4083_v21  ;;  %7048 = vtanh.f32 %v3803_v19  ;;  %v2802_v38 = vpop.f32.mrf.mxu0  ;;  %v3814_v55 = vadd.f32 %v8933_v36, %v6054_v33 }
 0x308   :  { %v7025_v10 = vpop.eup %7024  ;;  %v3082_v30 = vadd.f32 %v7023_v35, %v3081_v23  ;;  %7050 = vtanh.f32 %v2800_v50  ;;  %v2803_v29 = vadd.f32 %v8933_v36, %v2802_v38  ;;  %v3805_v44 = vpop.f32.mrf.mxu1 }
 0x309   :  { %v7027_v7 = vpop.eup %7026  ;;  %v4085_v45 = vadd.f32 %v7025_v10, %v4084_v37  ;;  %7052 = vtanh.f32 %v2808_v27  ;;  %v3806_v46 = vadd.f32 %v8933_v36, %v3805_v44  ;;  %v5913_v49 = vpop.f32.mrf.mxu0 }
 0x30a   :  { %v7029_v53 = vpop.eup %7028  ;;  %v3083_v54 = vadd.f32 %v7021_v26, %v3082_v30  ;;  %7054 = vtanh.f32 %v2803_v29  ;;  %v6057_v47 = vpop.f32.mrf.mxu1  ;;  %v2824_v5 = vadd.f32 %v8933_v36, %v5913_v49 }
 0x30b   :  { %v7031_v57 = vpop.eup %7030  ;;  %v4086_v58 = vadd.f32 %v7027_v7, %v4085_v45  ;;  %7056 = vtanh.f32 %v3806_v46  ;;  %v2815_v59 = vpop.f32.mrf.mxu0  ;;  %v3827_v14 = vadd.f32 %v7111_v12, %v6057_v47 }
 0x30c   :  { %v7033_v61 = vpop.eup %7032  ;;  %v3084_v62 = vadd.f32 %v7029_v53, %v3083_v54  ;;  %7058 = vtanh.f32 %v3811_v39  ;;  %v2816_v34 = vadd.f32 %v8933_v36, %v2815_v59  ;;  %v3818_v63 = vpop.f32.mrf.mxu1 }
 0x30d   :  { %v7035_v0 = vpop.eup %7034  ;;  %v4087_v2 = vadd.f32 %v7031_v57, %v4086_v58  ;;  %7060 = vtanh.f32 %v2811_v42  ;;  %v3819_v22 = vadd.f32 %v8933_v36, %v3818_v63  ;;  %v5914_v31 = vpop.f32.mrf.mxu0 }
 0x30e   :  { %v7037_v32 = vpop.eup %7036  ;;  %v3085_v52 = vadd.f32 %v7035_v0, %v3084_v62  ;;  %7062 = vtanh.f32 %v3814_v55  ;;  %v6058_v56 = vpop.f32.mrf.mxu1  ;;  %v2827_v36 = vadd.f32 %v7111_v12, %v5914_v31 }
 0x30f   :  { %v7039_v4 = vpop.eup %7038  ;;  %v4088_v6 = vadd.f32 %v7033_v61, %v4087_v2  ;;  %7064 = vtanh.f32 %v3819_v22  ;;  %v2818_v8 = vpop.f32.mrf.mxu0  ;;  %v3830_v1 = vadd.f32 %v7111_v12, %v6058_v56 }
 0x310   :  { %v7041_v9 = vpop.eup %7040  ;;  %v3086_v11 = vadd.f32 %v7039_v4, %v3085_v52  ;;  %7066 = vtanh.f32 %v2816_v34  ;;  %v2819_v15 = vadd.f32 %v7111_v12, %v2818_v8  ;;  %v3821_v16 = vpop.f32.mrf.mxu1 }
 0x311   :  { %v7043_v17 = vpop.eup %7042  ;;  %v4089_v40 = vadd.f32 %v7041_v9, %v4088_v6  ;;  %7068 = vtanh.f32 %v2824_v5  ;;  %v3822_v41 = vadd.f32 %v7111_v12, %v3821_v16  ;;  %v5917_v43 = vpop.f32.mrf.mxu0 }
 0x312   :  { %v7045_v48 = vpop.eup %7044  ;;  %v3087_v60 = vadd.f32 %v7037_v32, %v3086_v11  ;;  %7070 = vtanh.f32 %v2819_v15  ;;  %v6061_v13 = vpop.f32.mrf.mxu1  ;;  %v2840_v39 = vadd.f32 %v7111_v12, %v5917_v43 }
 0x313   :  { %v7047_v18 = vpop.eup %7046  ;;  %v4090_v20 = vadd.f32 %v7043_v17, %v4089_v40  ;;  %7072 = vtanh.f32 %v3822_v41  ;;  %v2831_v24 = vpop.f32.mrf.mxu0  ;;  %v3843_v42 = vadd.f32 %v7111_v12, %v6061_v13 }
 0x314   :  { %v7049_v25 = vpop.eup %7048  ;;  %v3088_v50 = vadd.f32 %v7045_v48, %v3087_v60  ;;  %7074 = vtanh.f32 %v3827_v14  ;;  %v2832_v51 = vadd.f32 %v7111_v12, %v2831_v24  ;;  %v3834_v3 = vpop.f32.mrf.mxu1 }
 0x315   :  { %v7051_v21 = vpop.eup %7050  ;;  %v4091_v27 = vadd.f32 %v7047_v18, %v4090_v20  ;;  %7076 = vtanh.f32 %v2827_v36  ;;  %v3835_v19 = vadd.f32 %v7111_v12, %v3834_v3  ;;  %v5918_v28 = vpop.f32.mrf.mxu0 }
 0x316   :  { %v7053_v26 = vpop.eup %7052  ;;  %v3089_v23 = vadd.f32 %v7051_v21, %v3088_v50  ;;  %7078 = vtanh.f32 %v3830_v1  ;;  %v6062_v33 = vpop.f32.mrf.mxu1  ;;  %v2843_v54 = vadd.f32 %v7111_v12, %v5918_v28 }
 0x317   :  { %v7055_v35 = vpop.eup %7054  ;;  %v4092_v37 = vadd.f32 %v7049_v25, %v4091_v27  ;;  %7080 = vtanh.f32 %v3835_v19  ;;  %v2834_v38 = vpop.f32.mrf.mxu0  ;;  %v3846_v57 = vadd.f32 %v7111_v12, %v6062_v33 }
 0x318   :  { %v7057_v10 = vpop.eup %7056  ;;  %v3090_v30 = vadd.f32 %v7055_v35, %v3089_v23  ;;  %7082 = vtanh.f32 %v2832_v51  ;;  %v2835_v29 = vadd.f32 %v7111_v12, %v2834_v38  ;;  %v3837_v44 = vpop.f32.mrf.mxu1  ;;  %v7112_v38 = vld [vmem:[#allocation8] sm:$0x1] }
 0x319   :  { %v7059_v7 = vpop.eup %7058  ;;  %v4093_v45 = vadd.f32 %v7057_v10, %v4092_v37  ;;  %v3838_v46 = vadd.f32 %v7111_v12, %v3837_v44  ;;  %v1105_v44 = vpop.xlane.xlu0 %1104 }
 0x31a   :  { %v7061_v49 = vpop.eup %7060  ;;  %v3091_v53 = vadd.f32 %v7053_v26, %v3090_v30  ;;  %7084 = vtanh.f32 %v2835_v29 }
 0x31b   :  { %v7063_v55 = vpop.eup %7062  ;;  %v4094_v47 = vadd.f32 %v7059_v7, %v4093_v45  ;;  %7086 = vtanh.f32 %v3838_v46 }
 0x31c   :  { %v7065_v58 = vpop.eup %7064  ;;  %v3092_v59 = vadd.f32 %v7061_v49, %v3091_v53  ;;  %7088 = vtanh.f32 %v2840_v39 }
 0x31d   :  { %v7067_v61 = vpop.eup %7066  ;;  %v4095_v62 = vadd.f32 %v7063_v55, %v4094_v47  ;;  %7090 = vtanh.f32 %v3843_v42  ;;  %v2108_v7 = vpop.xlane.xlu0 %2107 }
 0x31e   :  { %v7069_v34 = vpop.eup %7068  ;;  %v3093_v63 = vadd.f32 %v7067_v61, %v3092_v59  ;;  %7092 = vtanh.f32 %v2843_v54  ;;  %v4115_v42 = vmax.f32 %v1105_v44, %v2108_v7 }
 0x31f   :  { %v7071_v0 = vpop.eup %7070  ;;  %v4096_v2 = vadd.f32 %v7065_v58, %v4095_v62  ;;  %7094 = vtanh.f32 %v3846_v57 }
 0x320   :  { %v7073_v5 = vpop.eup %7072  ;;  %v3094_v22 = vadd.f32 %v7071_v0, %v3093_v63 }
 0x321   :  { %v7075_v31 = vpop.eup %7074  ;;  %v4097_v32 = vadd.f32 %v7073_v5, %v4096_v2 }
 0x322   :  { %v7077_v52 = vpop.eup %7076  ;;  %v3095_v56 = vadd.f32 %v7069_v34, %v3094_v22 }
 0x323   :  { %v7079_v4 = vpop.eup %7078  ;;  %v4098_v6 = vadd.f32 %v7075_v31, %v4097_v32  ;;  %v4139_v32 = vlaneseq }
 0x324   :  { %v7081_v8 = vpop.eup %7080  ;;  %v3096_v9 = vadd.f32 %v7077_v52, %v3095_v56 }
 0x325   :  { %v7083_v11 = vpop.eup %7082  ;;  %v4099_v12 = vadd.f32 %v7079_v4, %v4098_v6  ;;  %v4140_v52 = vshrl.u32 %v4139_v32, 7  ;;  %v7139_v32 = vld [vmem:[#allocation2 + $0x340] sm:$0xff] }
 0x326   :  { %v3097_v14 = vadd.f32 %v7083_v11, %v3096_v9 }
 0x327   :  { %v7085_v15 = vpop.eup %7084  ;;  %v4100_v16 = vadd.f32 %v7081_v8, %v4099_v12  ;;  %v4141_v56 = vsub.s32 0, %v4140_v52 }
 0x328   :  { %v7087_v17 = vpop.eup %7086  ;;  %v3098_v40 = vadd.f32 %v7085_v15, %v3097_v14 }
 0x329   :  { %v7089_v36 = vpop.eup %7088  ;;  %v4101_v41 = vadd.f32 %v7087_v17, %v4100_v16  ;;  %v7113_v17 = vld [vmem:[#allocation2] sm:$0xff] }
 0x32a   :  { %v7091_v43 = vpop.eup %7090  ;;  %v3099_v48 = vadd.f32 %v7089_v36, %v3098_v40  ;;  %v7114_v36 = vld [vmem:[#allocation2 + $0x20] sm:$0xff] }
 0x32b   :  { %v7093_v60 = vpop.eup %7092  ;;  %v4102_v1 = vadd.f32 %v7091_v43, %v4101_v41  ;;  %v7115_v43 = vld [vmem:[#allocation2 + $0x40] sm:$0xff] }
 0x32c   :  { %v7095_v13 = vpop.eup %7094  ;;  %v3100_v18 = vadd.f32 %v7093_v60, %v3099_v48  ;;  %v7116_v60 = vld [vmem:[#allocation2 + $0x60] sm:$0xff] }
 0x32d   :  { %v4103_v20 = vadd.f32 %v7095_v13, %v4102_v1  ;;  %v7117_v13 = vld [vmem:[#allocation2 + $0x80] sm:$0xff] }
 0x32e   :  { %v3101_v24 = vrot.slane %v3100_v18, 4 }
 0x32f   :  { %v4104_v25 = vrot.slane %v4103_v20, 4 }
 0x330   :  { %v3102_v50 = vadd.f32 %v3101_v24, %v3100_v18 }
 0x331   :  { %v4105_v51 = vadd.f32 %v4104_v25, %v4103_v20  ;;  %v7118_v20 = vld [vmem:[#allocation2 + $0xa0] sm:$0xff] }
 0x332   :  { %v3103_v3 = vrot.slane %v3102_v50, 2  ;;  %v7119_v25 = vld [vmem:[#allocation2 + $0xc0] sm:$0xff] }
 0x333   :  { %v4106_v21 = vrot.slane %v4105_v51, 2 }
 0x334   :  { %v3104_v27 = vadd.f32 %v3103_v3, %v3102_v50 }
 0x335   :  { %v4107_v19 = vadd.f32 %v4106_v21, %v4105_v51  ;;  %v7120_v51 = vld [vmem:[#allocation2 + $0xe0] sm:$0xff] }
 0x336   :  { %v3105_v28 = vrot.slane %v3104_v27, 1  ;;  %v7121_v21 = vld [vmem:[#allocation2 + $0x100] sm:$0xff] }
 0x337   :  { %v4108_v26 = vrot.slane %v4107_v19, 1 }
 0x338   :  { %v3106_v23 = vadd.f32 %v3105_v28, %v3104_v27 }
 0x339   :  { %v4109_v33 = vadd.f32 %v4108_v26, %v4107_v19  ;;  %v7122_v19 = vld [vmem:[#allocation2 + $0x120] sm:$0xff] }
 0x33a   :  { %v3107_v35 = vmul.f32 0.0009765625, %v3106_v23  ;;  %v7123_v26 = vld [vmem:[#allocation2 + $0x140] sm:$0xff] }
 0x33b   :  { %v4110_v37 = vmul.f32 0.0009765625, %v4109_v33  ;;  %v7124_v33 = vld [vmem:[#allocation2 + $0x160] sm:$0xff] }
 0x33c   :  { %v3108_v10 = vmul.f32 %v7112_v38, %v3107_v35 }
 0x33d   :  { %v4111_v39 = vmul.f32 %v7112_v38, %v4110_v37  ;;  %v7125_v37 = vld [vmem:[#allocation2 + $0x180] sm:$0xff] }
 0x33e   :  { %v3109_v30 = vsel %vm1102_vm0, %v3108_v10, 0.0  ;;  %v7126_v10 = vld [vmem:[#allocation2 + $0x1a0] sm:$0xff] }
 0x33f   :  { %3110 = vadd.xlane.f32.xlu1 %v3109_v30  ;;  %v4112_v29 = vsel %vm1102_vm0, %v4111_v39, 0.0  ;;  %v7127_v39 = vld [vmem:[#allocation2 + $0x1c0] sm:$0xff] }
 0x343   :  { %4113 = vadd.xlane.f32.xlu1 %v4112_v29 }
 0x3c8   :  { %v3111_v45 = vpop.xlane.xlu1 %3110 }
 0x3c9   :  { %v4116_v46 = vmax.f32 %v4115_v42, %v3111_v45 }
 0x3cc   :  { %v4114_v49 = vpop.xlane.xlu1 %4113 }
 0x3cd   :  { %v4117_v53 = vmax.f32 %v4116_v46, %v4114_v49  ;;  %v7130_v46 = vld [vmem:[#allocation2 + $0x220] sm:$0xff] }
 0x3cf   :  { %v4118_v54 = vsub.f32 %v1105_v44, %v4117_v53  ;;  %v4121_v55 = vsub.f32 %v2108_v7, %v4117_v53  ;;  %v4124_v47 = vsub.f32 %v3111_v45, %v4117_v53  ;;  %v4127_v57 = vsub.f32 %v4114_v49, %v4117_v53  ;;  %v7128_v44 = vld [vmem:[#allocation2 + $0x1e0] sm:$0xff] }
 0x3d0   :  { %v7129_v45 = vld [vmem:[#allocation2 + $0x200] sm:$0xff] }
 0x3d1   :  { %v4119_v58 = vmul.f32 1.442695, %v4118_v54  ;;  %v4122_v59 = vmul.f32 1.442695, %v4121_v55  ;;  %v4125_v61 = vmul.f32 1.442695, %v4124_v47 }
 0x3d2   :  { %v4128_v62 = vmul.f32 1.442695, %v4127_v57  ;;  %v7131_v53 = vld [vmem:[#allocation2 + $0x240] sm:$0xff] }
 0x3d3   :  { %7096 = vpow2.f32 %v4119_v58  ;;  %v7132_v55 = vld [vmem:[#allocation2 + $0x260] sm:$0xff] }
 0x3d4   :  { %7098 = vpow2.f32 %v4122_v59  ;;  %v7133_v57 = vld [vmem:[#allocation2 + $0x280] sm:$0xff] }
 0x3d5   :  { %7100 = vpow2.f32 %v4125_v61  ;;  %v7134_v59 = vld [vmem:[#allocation2 + $0x2a0] sm:$0xff] }
 0x3d6   :  { %7102 = vpow2.f32 %v4128_v62  ;;  %v7135_v62 = vld [vmem:[#allocation2 + $0x2c0] sm:$0xff] }
 0x3e0   :  { %v7097_v34 = vpop.eup %7096 }
 0x3e1   :  { %v7099_v63 = vpop.eup %7098 }
 0x3e2   :  { %v4130_v0 = vadd.f32 %v7099_v63, %v7097_v34  ;;  %v7101_v2 = vpop.eup %7100 }
 0x3e3   :  { %v7103_v22 = vpop.eup %7102 }
 0x3e4   :  { %v4131_v5 = vadd.f32 %v7101_v2, %v4130_v0 }
 0x3e6   :  { %v4132_v31 = vadd.f32 %v7103_v22, %v4131_v5 }
 0x3e8   :  { %7104 = vrcp.f32 %v4132_v31 }
 0x3f5   :  { %v7105_v4 = vpop.eup %7104 }
 0x3f6   :  { %v4135_v6 = vmul.f32 %v7105_v4, %v7097_v34  ;;  %v4136_v8 = vmul.f32 %v7105_v4, %v7099_v63  ;;  %v4137_v9 = vmul.f32 %v7105_v4, %v7101_v2  ;;  %v4138_v11 = vmul.f32 %v7105_v4, %v7103_v22  ;;  %v7136_v63 = vld [vmem:[#allocation2 + $0x2e0] sm:$0xff] }
 0x3f7   :  { %v7137_v2 = vld [vmem:[#allocation2 + $0x300] sm:$0xff] }
 0x3f8   :  { %v9040_v12 = vrot.slane %v4135_v6, %v4141_v56  ;;  %v9042_v14 = vrot.slane %v4136_v8, %v4141_v56  ;;  %v9044_v15 = vrot.slane %v4137_v9, %v4141_v56  ;;  %v9046_v16 = vrot.slane %v4138_v11, %v4141_v56  ;;  %v7138_v22 = vld [vmem:[#allocation2 + $0x320] sm:$0xff] }
 0x3f9   :  { %v7140_v56 = vld [vmem:[#allocation2 + $0x360] sm:$0xff] }
 0x3fa   :  { %v9049_v40 = vmul.f32 %v7113_v17, %v9040_v12  ;;  %v9052_v41 = vmul.f32 %v7114_v36, %v9040_v12  ;;  %v9055_v48 = vmul.f32 %v7115_v43, %v9040_v12  ;;  %v9058_v1 = vmul.f32 %v7116_v60, %v9040_v12  ;;  %v7141_v6 = vld [vmem:[#allocation2 + $0x380] sm:$0xff] }
 0x3fb   :  { %v9061_v18 = vmul.f32 %v7117_v13, %v9040_v12  ;;  %v9064_v24 = vmul.f32 %v7118_v20, %v9040_v12  ;;  %v9067_v50 = vmul.f32 %v7119_v25, %v9040_v12  ;;  %v9070_v3 = vmul.f32 %v7120_v51, %v9040_v12  ;;  %v7142_v9 = vld [vmem:[#allocation2 + $0x3a0] sm:$0xff] }
 0x3fc   :  { %v9073_v27 = vmul.f32 %v7121_v21, %v9040_v12  ;;  %v9076_v28 = vmul.f32 %v7122_v19, %v9040_v12  ;;  %v9079_v23 = vmul.f32 %v7123_v26, %v9040_v12  ;;  %v9082_v35 = vmul.f32 %v7124_v33, %v9040_v12  ;;  %v7143_v17 = vld [vmem:[#allocation2 + $0x3c0] sm:$0xff] }
 0x3fd   :  { %v9085_v38 = vmul.f32 %v7125_v37, %v9040_v12  ;;  %v9088_v30 = vmul.f32 %v7126_v10, %v9040_v12  ;;  %v9091_v29 = vmul.f32 %v7127_v39, %v9040_v12  ;;  %v9094_v7 = vmul.f32 %v7128_v44, %v9040_v12  ;;  %v7144_v43 = vld [vmem:[#allocation2 + $0x3e0] sm:$0xff] }
 0x3fe   :  { %v9097_v42 = vmul.f32 %v7129_v45, %v9040_v12  ;;  %v9100_v49 = vmul.f32 %v7130_v46, %v9040_v12  ;;  %v9103_v54 = vmul.f32 %v7131_v53, %v9040_v12  ;;  %v9106_v47 = vmul.f32 %v7132_v55, %v9040_v12  ;;  %v7145_v13 = vld [vmem:[#allocation2 + $0x400] sm:$0xff] }
 0x3ff   :  { %v9109_v58 = vmul.f32 %v7133_v57, %v9040_v12  ;;  %v9112_v61 = vmul.f32 %v7134_v59, %v9040_v12  ;;  %v9115_v34 = vmul.f32 %v7135_v62, %v9040_v12  ;;  %v9118_v0 = vmul.f32 %v7136_v63, %v9040_v12  ;;  %v7146_v25 = vld [vmem:[#allocation2 + $0x420] sm:$0xff] }
 0x400   :  { %v9121_v5 = vmul.f32 %v7137_v2, %v9040_v12  ;;  %v9124_v31 = vmul.f32 %v7138_v22, %v9040_v12  ;;  %v9127_v52 = vmul.f32 %v7139_v32, %v9040_v12  ;;  %v9130_v4 = vmul.f32 %v7140_v56, %v9040_v12  ;;  %v7147_v21 = vld [vmem:[#allocation2 + $0x440] sm:$0xff] }
 0x401   :  { %v9133_v8 = vmul.f32 %v7141_v6, %v9040_v12  ;;  %v9136_v11 = vmul.f32 %v7142_v9, %v9040_v12  ;;  %v9139_v36 = vmul.f32 %v7143_v17, %v9040_v12  ;;  %v9142_v60 = vmul.f32 %v7144_v43, %v9040_v12  ;;  %v7148_v26 = vld [vmem:[#allocation2 + $0x460] sm:$0xff] }
 0x402   :  { %11875 = vst [vmem:[#allocation15_spill] sm:$0xff] %v9124_v31  ;;  %11876 = vst [vmem:[#allocation16_spill] sm:$0xff] %v9127_v52  ;;  %v9145_v20 = vmul.f32 %v7145_v13, %v9040_v12  ;;  %v9148_v51 = vmul.f32 %v7146_v25, %v9040_v12  ;;  %v9151_v19 = vmul.f32 %v7147_v21, %v9040_v12  ;;  %v7149_v37 = vld [vmem:[#allocation2 + $0x480] sm:$0xff]  ;;  %v7270_v52 = vld [vmem:[#allocation2 + $0x3a8] sm:$0xff] }
 0x403   :  { %11877 = vst [vmem:[#allocation17_spill] sm:$0xff] %v9130_v4  ;;  %11878 = vst [vmem:[#allocation18_spill] sm:$0xff] %v9133_v8  ;;  %v9154_v33 = vmul.f32 %v7148_v26, %v9040_v12  ;;  %v9157_v10 = vmul.f32 %v7149_v37, %v9040_v12  ;;  %v7150_v39 = vld [vmem:[#allocation2 + $0x4a0] sm:$0xff]  ;;  %v7268_v8 = vld [vmem:[#allocation2 + $0x368] sm:$0xff] }
 0x404   :  { %11879 = vst [vmem:[#allocation19_spill] sm:$0xff] %v9136_v11  ;;  %11880 = vst [vmem:[#allocation20_spill] sm:$0xff] %v9139_v36  ;;  %v9160_v44 = vmul.f32 %v7150_v39, %v9040_v12  ;;  %v7151_v45 = vld [vmem:[#allocation2 + $0x4c0] sm:$0xff]  ;;  %v7266_v36 = vld [vmem:[#allocation2 + $0x328] sm:$0xff] }
 0x405   :  { %11881 = vst [vmem:[#allocation21_spill] sm:$0xff] %v9142_v60  ;;  %11882 = vst [vmem:[#allocation22_spill] sm:$0xff] %v9145_v20  ;;  %v9163_v46 = vmul.f32 %v7151_v45, %v9040_v12  ;;  %v7152_v53 = vld [vmem:[#allocation2 + $0x4e0] sm:$0xff]  ;;  %v7264_v20 = vld [vmem:[#allocation2 + $0x2e8] sm:$0xff] }
 0x406   :  { %11883 = vst [vmem:[#allocation23_spill] sm:$0xff] %v9148_v51  ;;  %11884 = vst [vmem:[#allocation24_spill] sm:$0xff] %v9151_v19  ;;  %v9166_v55 = vmul.f32 %v7152_v53, %v9040_v12  ;;  %v7153_v57 = vld [vmem:[#allocation2 + $0x500] sm:$0xff]  ;;  %v7262_v19 = vld [vmem:[#allocation2 + $0x2a8] sm:$0xff] }
 0x407   :  { %11885 = vst [vmem:[#allocation25_spill] sm:$0xff] %v9154_v33  ;;  %11886 = vst [vmem:[#allocation26_spill] sm:$0xff] %v9157_v10  ;;  %v9169_v59 = vmul.f32 %v7153_v57, %v9040_v12  ;;  %v7154_v62 = vld [vmem:[#allocation2 + $0x520] sm:$0xff]  ;;  %v7260_v10 = vld [vmem:[#allocation2 + $0x268] sm:$0xff] }
 0x408   :  { %11887 = vst [vmem:[#allocation27_spill] sm:$0xff] %v9160_v44  ;;  %11888 = vst [vmem:[#allocation28_spill] sm:$0xff] %v9163_v46  ;;  %v9172_v63 = vmul.f32 %v7154_v62, %v9040_v12  ;;  %v7155_v2 = vld [vmem:[#allocation2 + $0x540] sm:$0xff]  ;;  %v7258_v46 = vld [vmem:[#allocation2 + $0x228] sm:$0xff] }
 0x409   :  { %11889 = vst [vmem:[#allocation29_spill] sm:$0xff] %v9166_v55  ;;  %11890 = vst [vmem:[#allocation30_spill] sm:$0xff] %v9169_v59  ;;  %v9175_v22 = vmul.f32 %v7155_v2, %v9040_v12  ;;  %v7156_v32 = vld [vmem:[#allocation2 + $0x560] sm:$0xff]  ;;  %v7256_v59 = vld [vmem:[#allocation2 + $0x1e8] sm:$0xff] }
 0x40a   :  { %11891 = vst [vmem:[#allocation31_spill] sm:$0xff] %v9172_v63  ;;  %v9178_v56 = vmul.f32 %v7156_v32, %v9040_v12  ;;  %v7157_v6 = vld [vmem:[#allocation2 + $0x580] sm:$0xff]  ;;  %v7255_v63 = vld [vmem:[#allocation2 + $0x1c8] sm:$0xff] }
 0x40b   :  { %11892 = vst [vmem:[#allocation32_spill] sm:$0xff] %v9175_v22  ;;  %v9181_v9 = vmul.f32 %v7157_v6, %v9040_v12  ;;  %v7158_v17 = vld [vmem:[#allocation2 + $0x5a0] sm:$0xff]  ;;  %v7254_v22 = vld [vmem:[#allocation2 + $0x1a8] sm:$0xff] }
 0x40c   :  { %11893 = vst [vmem:[#allocation33_spill] sm:$0xff] %v9178_v56  ;;  %v9184_v43 = vmul.f32 %v7158_v17, %v9040_v12  ;;  %v7159_v13 = vld [vmem:[#allocation2 + $0x5c0] sm:$0xff]  ;;  %v7253_v56 = vld [vmem:[#allocation2 + $0x188] sm:$0xff] }
 0x40d   :  { %11894 = vst [vmem:[#allocation34_spill] sm:$0xff] %v9181_v9  ;;  %v9187_v25 = vmul.f32 %v7159_v13, %v9040_v12  ;;  %v7160_v21 = vld [vmem:[#allocation2 + $0x5e0] sm:$0xff]  ;;  %v7252_v9 = vld [vmem:[#allocation2 + $0x168] sm:$0xff] }
 0x40e   :  { %11895 = vst [vmem:[#allocation35_spill] sm:$0xff] %v9184_v43  ;;  %v9190_v26 = vmul.f32 %v7160_v21, %v9040_v12  ;;  %v7161_v37 = vld [vmem:[#allocation2 + $0x600] sm:$0xff]  ;;  %v7251_v43 = vld [vmem:[#allocation2 + $0x148] sm:$0xff] }
 0x40f   :  { %11896 = vst [vmem:[#allocation36_spill] sm:$0xff] %v9187_v25  ;;  %v9193_v39 = vmul.f32 %v7161_v37, %v9040_v12  ;;  %v7162_v45 = vld [vmem:[#allocation2 + $0x620] sm:$0xff]  ;;  %v7250_v25 = vld [vmem:[#allocation2 + $0x128] sm:$0xff] }
 0x410   :  { %11897 = vst [vmem:[#allocation37_spill] sm:$0xff] %v9190_v26  ;;  %v9196_v53 = vmul.f32 %v7162_v45, %v9040_v12  ;;  %v7163_v57 = vld [vmem:[#allocation2 + $0x640] sm:$0xff]  ;;  %v7249_v26 = vld [vmem:[#allocation2 + $0x108] sm:$0xff] }
 0x411   :  { %11898 = vst [vmem:[#allocation38_spill] sm:$0xff] %v9193_v39  ;;  %v9199_v62 = vmul.f32 %v7163_v57, %v9040_v12  ;;  %v7164_v2 = vld [vmem:[#allocation2 + $0x660] sm:$0xff]  ;;  %v7248_v39 = vld [vmem:[#allocation2 + $0xe8] sm:$0xff] }
 0x412   :  { %11899 = vst [vmem:[#allocation39_spill] sm:$0xff] %v9196_v53  ;;  %v9202_v32 = vmul.f32 %v7164_v2, %v9040_v12  ;;  %v7165_v6 = vld [vmem:[#allocation2 + $0x680] sm:$0xff]  ;;  %v7257_v55 = vld [vmem:[#allocation2 + $0x208] sm:$0xff] }
 0x413   :  { %11900 = vst [vmem:[#allocation40_spill] sm:$0xff] %v9199_v62  ;;  %v9205_v17 = vmul.f32 %v7165_v6, %v9040_v12  ;;  %v7166_v13 = vld [vmem:[#allocation2 + $0x6a0] sm:$0xff]  ;;  %v7259_v44 = vld [vmem:[#allocation2 + $0x248] sm:$0xff] }
 0x414   :  { %11901 = vst [vmem:[#allocation41_spill] sm:$0xff] %v9202_v32  ;;  %v9208_v21 = vmul.f32 %v7166_v13, %v9040_v12  ;;  %v7167_v37 = vld [vmem:[#allocation2 + $0x6c0] sm:$0xff]  ;;  %v7261_v33 = vld [vmem:[#allocation2 + $0x288] sm:$0xff] }
 0x415   :  { %11902 = vst [vmem:[#allocation42_spill] sm:$0xff] %v9205_v17  ;;  %v9211_v45 = vmul.f32 %v7167_v37, %v9040_v12  ;;  %v7168_v53 = vld [vmem:[#allocation2 + $0x6e0] sm:$0xff]  ;;  %v7263_v51 = vld [vmem:[#allocation2 + $0x2c8] sm:$0xff] }
 0x416   :  { %11903 = vst [vmem:[#allocation43_spill] sm:$0xff] %v9208_v21  ;;  %v9214_v57 = vmul.f32 %v7168_v53, %v9040_v12  ;;  %v7169_v62 = vld [vmem:[#allocation2 + $0x700] sm:$0xff]  ;;  %v7265_v60 = vld [vmem:[#allocation2 + $0x308] sm:$0xff] }
 0x417   :  { %11904 = vst [vmem:[#allocation44_spill] sm:$0xff] %v9211_v45  ;;  %v9217_v2 = vmul.f32 %v7169_v62, %v9040_v12  ;;  %v7170_v32 = vld [vmem:[#allocation2 + $0x720] sm:$0xff]  ;;  %v7267_v11 = vld [vmem:[#allocation2 + $0x348] sm:$0xff] }
 0x418   :  { %11905 = vst [vmem:[#allocation45_spill] sm:$0xff] %v9214_v57  ;;  %v9220_v6 = vmul.f32 %v7170_v32, %v9040_v12  ;;  %v7171_v17 = vld [vmem:[#allocation2 + $0x740] sm:$0xff]  ;;  %v7269_v4 = vld [vmem:[#allocation2 + $0x388] sm:$0xff] }
 0x419   :  { %11906 = vst [vmem:[#allocation46_spill] sm:$0xff] %v9217_v2  ;;  %v9223_v13 = vmul.f32 %v7171_v17, %v9040_v12  ;;  %v7172_v21 = vld [vmem:[#allocation2 + $0x760] sm:$0xff]  ;;  %v7271_v31 = vld [vmem:[#allocation2 + $0x3c8] sm:$0xff] }
 0x41a   :  { %11907 = vst [vmem:[#allocation47_spill] sm:$0xff] %v9220_v6  ;;  %v9226_v37 = vmul.f32 %v7172_v21, %v9040_v12  ;;  %v7173_v45 = vld [vmem:[#allocation2 + $0x780] sm:$0xff] }
 0x41b   :  { %11908 = vst [vmem:[#allocation48_spill] sm:$0xff] %v9223_v13  ;;  %v9229_v53 = vmul.f32 %v7173_v45, %v9040_v12  ;;  %v7174_v57 = vld [vmem:[#allocation2 + $0x7a0] sm:$0xff] }
 0x41c   :  { %11909 = vst [vmem:[#allocation49_spill] sm:$0xff] %v9226_v37  ;;  %v9232_v62 = vmul.f32 %v7174_v57, %v9040_v12  ;;  %v7175_v2 = vld [vmem:[#allocation2 + $0x7c0] sm:$0xff] }
 0x41d   :  { %11910 = vst [vmem:[#allocation50_spill] sm:$0xff] %v9229_v53  ;;  %v9235_v32 = vmul.f32 %v7175_v2, %v9040_v12  ;;  %v7176_v6 = vld [vmem:[#allocation2 + $0x7e0] sm:$0xff] }
 0x41e   :  { %11911 = vst [vmem:[#allocation51_spill] sm:$0xff] %v9232_v62  ;;  %v9238_v17 = vmul.f32 %v7176_v6, %v9040_v12  ;;  %v7177_v13 = vld [vmem:[#allocation2 + $0x800] sm:$0xff] }
 0x41f   :  { %11912 = vst [vmem:[#allocation52_spill] sm:$0xff] %v9235_v32  ;;  %v9241_v21 = vmul.f32 %v7177_v13, %v9040_v12  ;;  %v7178_v37 = vld [vmem:[#allocation2 + $0x820] sm:$0xff] }
 0x420   :  { %11913 = vst [vmem:[#allocation53_spill] sm:$0xff] %v9238_v17  ;;  %v9244_v45 = vmul.f32 %v7178_v37, %v9040_v12  ;;  %v7179_v53 = vld [vmem:[#allocation2 + $0x840] sm:$0xff] }
 0x421   :  { %11914 = vst [vmem:[#allocation54_spill] sm:$0xff] %v9241_v21  ;;  %v9247_v57 = vmul.f32 %v7179_v53, %v9040_v12  ;;  %v7180_v62 = vld [vmem:[#allocation2 + $0x860] sm:$0xff] }
 0x422   :  { %11915 = vst [vmem:[#allocation55_spill] sm:$0xff] %v9244_v45  ;;  %v9250_v2 = vmul.f32 %v7180_v62, %v9040_v12  ;;  %v7181_v32 = vld [vmem:[#allocation2 + $0x880] sm:$0xff] }
 0x423   :  { %11916 = vst [vmem:[#allocation56_spill] sm:$0xff] %v9247_v57  ;;  %v9253_v6 = vmul.f32 %v7181_v32, %v9040_v12  ;;  %v7182_v17 = vld [vmem:[#allocation2 + $0x8a0] sm:$0xff] }
 0x424   :  { %11917 = vst [vmem:[#allocation57_spill] sm:$0xff] %v9250_v2  ;;  %v9256_v13 = vmul.f32 %v7182_v17, %v9040_v12  ;;  %v7183_v21 = vld [vmem:[#allocation2 + $0x8c0] sm:$0xff] }
 0x425   :  { %11918 = vst [vmem:[#allocation58_spill] sm:$0xff] %v9253_v6  ;;  %v9259_v37 = vmul.f32 %v7183_v21, %v9040_v12  ;;  %v7184_v45 = vld [vmem:[#allocation2 + $0x8e0] sm:$0xff] }
 0x426   :  { %11919 = vst [vmem:[#allocation59_spill] sm:$0xff] %v9256_v13  ;;  %v9262_v53 = vmul.f32 %v7184_v45, %v9040_v12  ;;  %v7185_v57 = vld [vmem:[#allocation2 + $0x900] sm:$0xff] }
 0x427   :  { %11920 = vst [vmem:[#allocation60_spill] sm:$0xff] %v9259_v37  ;;  %v9265_v62 = vmul.f32 %v7185_v57, %v9040_v12  ;;  %v7186_v2 = vld [vmem:[#allocation2 + $0x920] sm:$0xff] }
 0x428   :  { %11921 = vst [vmem:[#allocation61_spill] sm:$0xff] %v9262_v53  ;;  %v9268_v32 = vmul.f32 %v7186_v2, %v9040_v12  ;;  %v7187_v6 = vld [vmem:[#allocation2 + $0x940] sm:$0xff] }
 0x429   :  { %11922 = vst [vmem:[#allocation62_spill] sm:$0xff] %v9265_v62  ;;  %v9271_v17 = vmul.f32 %v7187_v6, %v9040_v12  ;;  %v7188_v13 = vld [vmem:[#allocation2 + $0x960] sm:$0xff] }
 0x42a   :  { %11923 = vst [vmem:[#allocation63_spill] sm:$0xff] %v9268_v32  ;;  %v9274_v21 = vmul.f32 %v7188_v13, %v9040_v12  ;;  %v7189_v37 = vld [vmem:[#allocation2 + $0x980] sm:$0xff] }
 0x42b   :  { %11924 = vst [vmem:[#allocation64_spill] sm:$0xff] %v9271_v17  ;;  %v9277_v45 = vmul.f32 %v7189_v37, %v9040_v12  ;;  %v7190_v53 = vld [vmem:[#allocation2 + $0x9a0] sm:$0xff] }
 0x42c   :  { %11925 = vst [vmem:[#allocation65_spill] sm:$0xff] %v9274_v21  ;;  %v9280_v57 = vmul.f32 %v7190_v53, %v9040_v12  ;;  %v7191_v62 = vld [vmem:[#allocation2 + $0x9c0] sm:$0xff] }
 0x42d   :  { %11926 = vst [vmem:[#allocation66_spill] sm:$0xff] %v9277_v45  ;;  %v9283_v2 = vmul.f32 %v7191_v62, %v9040_v12  ;;  %v7192_v32 = vld [vmem:[#allocation2 + $0x9e0] sm:$0xff] }
 0x42e   :  { %11927 = vst [vmem:[#allocation67_spill] sm:$0xff] %v9280_v57  ;;  %v9286_v6 = vmul.f32 %v7192_v32, %v9040_v12  ;;  %v7193_v17 = vld [vmem:[#allocation2 + $0xa00] sm:$0xff] }
 0x42f   :  { %11928 = vst [vmem:[#allocation68_spill] sm:$0xff] %v9283_v2  ;;  %v9289_v13 = vmul.f32 %v7193_v17, %v9040_v12  ;;  %v7194_v21 = vld [vmem:[#allocation2 + $0xa20] sm:$0xff] }
 0x430   :  { %11929 = vst [vmem:[#allocation69_spill] sm:$0xff] %v9286_v6  ;;  %v9292_v37 = vmul.f32 %v7194_v21, %v9040_v12  ;;  %v7195_v45 = vld [vmem:[#allocation2 + $0xa40] sm:$0xff] }
 0x431   :  { %11930 = vst [vmem:[#allocation70_spill] sm:$0xff] %v9289_v13  ;;  %v9295_v53 = vmul.f32 %v7195_v45, %v9040_v12  ;;  %v7196_v57 = vld [vmem:[#allocation2 + $0xa60] sm:$0xff] }
 0x432   :  { %11931 = vst [vmem:[#allocation71_spill] sm:$0xff] %v9292_v37  ;;  %v9298_v62 = vmul.f32 %v7196_v57, %v9040_v12  ;;  %v7197_v2 = vld [vmem:[#allocation2 + $0xa80] sm:$0xff] }
 0x433   :  { %11932 = vst [vmem:[#allocation72_spill] sm:$0xff] %v9295_v53  ;;  %v9301_v32 = vmul.f32 %v7197_v2, %v9040_v12  ;;  %v7198_v6 = vld [vmem:[#allocation2 + $0xaa0] sm:$0xff] }
 0x434   :  { %11933 = vst [vmem:[#allocation73_spill] sm:$0xff] %v9298_v62  ;;  %v9304_v17 = vmul.f32 %v7198_v6, %v9040_v12  ;;  %v7199_v13 = vld [vmem:[#allocation2 + $0xac0] sm:$0xff] }
 0x435   :  { %11934 = vst [vmem:[#allocation74_spill] sm:$0xff] %v9301_v32  ;;  %v9307_v21 = vmul.f32 %v7199_v13, %v9040_v12  ;;  %v7200_v37 = vld [vmem:[#allocation2 + $0xae0] sm:$0xff] }
 0x436   :  { %11935 = vst [vmem:[#allocation75_spill] sm:$0xff] %v9304_v17  ;;  %v9310_v45 = vmul.f32 %v7200_v37, %v9040_v12  ;;  %v7201_v53 = vld [vmem:[#allocation2 + $0xb00] sm:$0xff] }
 0x437   :  { %11936 = vst [vmem:[#allocation76_spill] sm:$0xff] %v9307_v21  ;;  %v9313_v57 = vmul.f32 %v7201_v53, %v9040_v12  ;;  %v7202_v62 = vld [vmem:[#allocation2 + $0xb20] sm:$0xff] }
 0x438   :  { %11937 = vst [vmem:[#allocation77_spill] sm:$0xff] %v9310_v45  ;;  %v9316_v2 = vmul.f32 %v7202_v62, %v9040_v12  ;;  %v7203_v32 = vld [vmem:[#allocation2 + $0xb40] sm:$0xff] }
 0x439   :  { %11938 = vst [vmem:[#allocation78_spill] sm:$0xff] %v9313_v57  ;;  %v9319_v6 = vmul.f32 %v7203_v32, %v9040_v12  ;;  %v7204_v17 = vld [vmem:[#allocation2 + $0xb60] sm:$0xff] }
 0x43a   :  { %11939 = vst [vmem:[#allocation79_spill] sm:$0xff] %v9316_v2  ;;  %v9322_v13 = vmul.f32 %v7204_v17, %v9040_v12  ;;  %v7205_v21 = vld [vmem:[#allocation2 + $0xb80] sm:$0xff] }
 0x43b   :  { %11940 = vst [vmem:[#allocation80_spill] sm:$0xff] %v9319_v6  ;;  %v9325_v37 = vmul.f32 %v7205_v21, %v9040_v12  ;;  %v7206_v45 = vld [vmem:[#allocation2 + $0xba0] sm:$0xff] }
 0x43c   :  { %11941 = vst [vmem:[#allocation81_spill] sm:$0xff] %v9322_v13  ;;  %v9328_v53 = vmul.f32 %v7206_v45, %v9040_v12  ;;  %v7207_v57 = vld [vmem:[#allocation2 + $0xbc0] sm:$0xff] }
 0x43d   :  { %11942 = vst [vmem:[#allocation82_spill] sm:$0xff] %v9325_v37  ;;  %v9331_v62 = vmul.f32 %v7207_v57, %v9040_v12  ;;  %v7208_v2 = vld [vmem:[#allocation2 + $0xbe0] sm:$0xff] }
 0x43e   :  { %11943 = vst [vmem:[#allocation83_spill] sm:$0xff] %v9328_v53  ;;  %v9334_v32 = vmul.f32 %v7208_v2, %v9040_v12  ;;  %v7209_v6 = vld [vmem:[#allocation2 + $0xc00] sm:$0xff] }
 0x43f   :  { %11944 = vst [vmem:[#allocation84_spill] sm:$0xff] %v9331_v62  ;;  %v9337_v17 = vmul.f32 %v7209_v6, %v9040_v12  ;;  %v7210_v13 = vld [vmem:[#allocation2 + $0xc20] sm:$0xff] }
 0x440   :  { %11945 = vst [vmem:[#allocation85_spill] sm:$0xff] %v9334_v32  ;;  %v9340_v21 = vmul.f32 %v7210_v13, %v9040_v12  ;;  %v7211_v37 = vld [vmem:[#allocation2 + $0xc40] sm:$0xff] }
 0x441   :  { %11946 = vst [vmem:[#allocation86_spill] sm:$0xff] %v9337_v17  ;;  %v9343_v45 = vmul.f32 %v7211_v37, %v9040_v12  ;;  %v7212_v53 = vld [vmem:[#allocation2 + $0xc60] sm:$0xff] }
 0x442   :  { %11947 = vst [vmem:[#allocation87_spill] sm:$0xff] %v9340_v21  ;;  %v9346_v57 = vmul.f32 %v7212_v53, %v9040_v12  ;;  %v7213_v62 = vld [vmem:[#allocation2 + $0xc80] sm:$0xff] }
 0x443   :  { %11948 = vst [vmem:[#allocation88_spill] sm:$0xff] %v9343_v45  ;;  %v9349_v2 = vmul.f32 %v7213_v62, %v9040_v12  ;;  %v7214_v32 = vld [vmem:[#allocation2 + $0xca0] sm:$0xff] }
 0x444   :  { %11949 = vst [vmem:[#allocation89_spill] sm:$0xff] %v9346_v57  ;;  %v9352_v6 = vmul.f32 %v7214_v32, %v9040_v12  ;;  %v7215_v17 = vld [vmem:[#allocation2 + $0xcc0] sm:$0xff] }
 0x445   :  { %11950 = vst [vmem:[#allocation90_spill] sm:$0xff] %v9349_v2  ;;  %v9355_v13 = vmul.f32 %v7215_v17, %v9040_v12  ;;  %v7216_v21 = vld [vmem:[#allocation2 + $0xce0] sm:$0xff] }
 0x446   :  { %11951 = vst [vmem:[#allocation91_spill] sm:$0xff] %v9352_v6  ;;  %v9358_v37 = vmul.f32 %v7216_v21, %v9040_v12  ;;  %v7217_v45 = vld [vmem:[#allocation2 + $0xd00] sm:$0xff] }
 0x447   :  { %11952 = vst [vmem:[#allocation92_spill] sm:$0xff] %v9355_v13  ;;  %v9361_v53 = vmul.f32 %v7217_v45, %v9040_v12  ;;  %v7218_v57 = vld [vmem:[#allocation2 + $0xd20] sm:$0xff] }
 0x448   :  { %11953 = vst [vmem:[#allocation93_spill] sm:$0xff] %v9358_v37  ;;  %v9364_v62 = vmul.f32 %v7218_v57, %v9040_v12  ;;  %v7219_v2 = vld [vmem:[#allocation2 + $0xd40] sm:$0xff] }
 0x449   :  { %11954 = vst [vmem:[#allocation94_spill] sm:$0xff] %v9361_v53  ;;  %v9367_v32 = vmul.f32 %v7219_v2, %v9040_v12  ;;  %v7220_v6 = vld [vmem:[#allocation2 + $0xd60] sm:$0xff] }
 0x44a   :  { %11955 = vst [vmem:[#allocation95_spill] sm:$0xff] %v9364_v62  ;;  %v9370_v17 = vmul.f32 %v7220_v6, %v9040_v12  ;;  %v7221_v13 = vld [vmem:[#allocation2 + $0xd80] sm:$0xff] }
 0x44b   :  { %11956 = vst [vmem:[#allocation96_spill] sm:$0xff] %v9367_v32  ;;  %v9373_v21 = vmul.f32 %v7221_v13, %v9040_v12  ;;  %v7222_v37 = vld [vmem:[#allocation2 + $0xda0] sm:$0xff] }
 0x44c   :  { %11957 = vst [vmem:[#allocation97_spill] sm:$0xff] %v9370_v17  ;;  %v9376_v45 = vmul.f32 %v7222_v37, %v9040_v12  ;;  %v7223_v53 = vld [vmem:[#allocation2 + $0xdc0] sm:$0xff] }
 0x44d   :  { %11958 = vst [vmem:[#allocation98_spill] sm:$0xff] %v9373_v21  ;;  %v9379_v57 = vmul.f32 %v7223_v53, %v9040_v12  ;;  %v7224_v62 = vld [vmem:[#allocation2 + $0xde0] sm:$0xff] }
 0x44e   :  { %11959 = vst [vmem:[#allocation99_spill] sm:$0xff] %v9376_v45  ;;  %v9382_v2 = vmul.f32 %v7224_v62, %v9040_v12  ;;  %v7225_v32 = vld [vmem:[#allocation2 + $0xe00] sm:$0xff] }
 0x44f   :  { %11960 = vst [vmem:[#allocation100_spill] sm:$0xff] %v9379_v57  ;;  %v9385_v6 = vmul.f32 %v7225_v32, %v9040_v12  ;;  %v7226_v17 = vld [vmem:[#allocation2 + $0xe20] sm:$0xff] }
 0x450   :  { %11961 = vst [vmem:[#allocation101_spill] sm:$0xff] %v9382_v2  ;;  %v9388_v13 = vmul.f32 %v7226_v17, %v9040_v12  ;;  %v7227_v21 = vld [vmem:[#allocation2 + $0xe40] sm:$0xff] }
 0x451   :  { %11962 = vst [vmem:[#allocation102_spill] sm:$0xff] %v9385_v6  ;;  %v9391_v37 = vmul.f32 %v7227_v21, %v9040_v12  ;;  %v7228_v45 = vld [vmem:[#allocation2 + $0xe60] sm:$0xff] }
 0x452   :  { %11963 = vst [vmem:[#allocation103_spill] sm:$0xff] %v9388_v13  ;;  %v9394_v53 = vmul.f32 %v7228_v45, %v9040_v12  ;;  %v7229_v57 = vld [vmem:[#allocation2 + $0xe80] sm:$0xff] }
 0x453   :  { %11964 = vst [vmem:[#allocation104_spill] sm:$0xff] %v9391_v37  ;;  %v9397_v62 = vmul.f32 %v7229_v57, %v9040_v12  ;;  %v7230_v2 = vld [vmem:[#allocation2 + $0xea0] sm:$0xff] }
 0x454   :  { %11965 = vst [vmem:[#allocation105_spill] sm:$0xff] %v9394_v53  ;;  %v9400_v32 = vmul.f32 %v7230_v2, %v9040_v12  ;;  %v7231_v6 = vld [vmem:[#allocation2 + $0xec0] sm:$0xff] }
 0x455   :  { %11966 = vst [vmem:[#allocation106_spill] sm:$0xff] %v9397_v62  ;;  %v9403_v17 = vmul.f32 %v7231_v6, %v9040_v12  ;;  %v7232_v13 = vld [vmem:[#allocation2 + $0xee0] sm:$0xff] }
 0x456   :  { %11967 = vst [vmem:[#allocation107_spill] sm:$0xff] %v9400_v32  ;;  %v9406_v21 = vmul.f32 %v7232_v13, %v9040_v12  ;;  %v7233_v37 = vld [vmem:[#allocation2 + $0xf00] sm:$0xff] }
 0x457   :  { %11968 = vst [vmem:[#allocation108_spill] sm:$0xff] %v9403_v17  ;;  %v9409_v45 = vmul.f32 %v7233_v37, %v9040_v12  ;;  %v7234_v53 = vld [vmem:[#allocation2 + $0xf20] sm:$0xff] }
 0x458   :  { %11969 = vst [vmem:[#allocation109_spill] sm:$0xff] %v9406_v21  ;;  %v9412_v57 = vmul.f32 %v7234_v53, %v9040_v12  ;;  %v7235_v62 = vld [vmem:[#allocation2 + $0xf40] sm:$0xff] }
 0x459   :  { %11970 = vst [vmem:[#allocation110_spill] sm:$0xff] %v9409_v45  ;;  %v9415_v2 = vmul.f32 %v7235_v62, %v9040_v12  ;;  %v7236_v32 = vld [vmem:[#allocation2 + $0xf60] sm:$0xff] }
 0x45a   :  { %11971 = vst [vmem:[#allocation111_spill] sm:$0xff] %v9412_v57  ;;  %v9418_v6 = vmul.f32 %v7236_v32, %v9040_v12  ;;  %v7237_v17 = vld [vmem:[#allocation2 + $0xf80] sm:$0xff] }
 0x45b   :  { %11972 = vst [vmem:[#allocation112_spill] sm:$0xff] %v9415_v2  ;;  %v9421_v13 = vmul.f32 %v7237_v17, %v9040_v12  ;;  %v7238_v21 = vld [vmem:[#allocation2 + $0xfa0] sm:$0xff]  ;;  %v7241_v2 = vld [vmem:[#allocation2 + $0x8] sm:$0xff] }
 0x45c   :  { %11973 = vst [vmem:[#allocation113_spill] sm:$0xff] %v9418_v6  ;;  %v9424_v37 = vmul.f32 %v7238_v21, %v9040_v12  ;;  %v7239_v45 = vld [vmem:[#allocation2 + $0xfc0] sm:$0xff]  ;;  %v9433_v32 = vmul.f32 %v7241_v2, %v9042_v14  ;;  %v7242_v6 = vld [vmem:[#allocation2 + $0x28] sm:$0xff] }
 0x45d   :  { %11974 = vst [vmem:[#allocation114_spill] sm:$0xff] %v9421_v13  ;;  %v9427_v53 = vmul.f32 %v7239_v45, %v9040_v12  ;;  %v7240_v57 = vld [vmem:[#allocation2 + $0xfe0] sm:$0xff]  ;;  %v9436_v17 = vmul.f32 %v7242_v6, %v9042_v14  ;;  %v7243_v13 = vld [vmem:[#allocation2 + $0x48] sm:$0xff] }
 0x45e   :  { %11975 = vst [vmem:[#allocation115_spill] sm:$0xff] %v9424_v37  ;;  %v9430_v62 = vmul.f32 %v7240_v57, %v9040_v12  ;;  %v9439_v21 = vmul.f32 %v7243_v13, %v9042_v14  ;;  %v7244_v37 = vld [vmem:[#allocation2 + $0x68] sm:$0xff]  ;;  %v9454_v13 = vmul.f32 %v7248_v39, %v9042_v14  ;;  %v9469_v39 = vmul.f32 %v7253_v56, %v9042_v14 }
 0x45f   :  { %11976 = vst [vmem:[#allocation116_spill] sm:$0xff] %v9427_v53  ;;  %v9442_v45 = vmul.f32 %v7244_v37, %v9042_v14  ;;  %v7245_v53 = vld [vmem:[#allocation2 + $0x88] sm:$0xff]  ;;  %v9457_v37 = vmul.f32 %v7249_v26, %v9042_v14  ;;  %v9472_v26 = vmul.f32 %v7254_v22, %v9042_v14  ;;  %v9484_v56 = vmul.f32 %v7258_v46, %v9042_v14 }
 0x460   :  { %11977 = vst [vmem:[#allocation117_spill] sm:$0xff] %v9430_v62  ;;  %v9445_v12 = vmul.f32 %v7245_v53, %v9042_v14  ;;  %v7246_v57 = vld [vmem:[#allocation2 + $0xa8] sm:$0xff]  ;;  %v9460_v53 = vmul.f32 %v7250_v25, %v9042_v14  ;;  %v9475_v25 = vmul.f32 %v7255_v63, %v9042_v14  ;;  %v9487_v22 = vmul.f32 %v7259_v44, %v9042_v14 }
 0x461   :  { %v9448_v2 = vmul.f32 %v7246_v57, %v9042_v14  ;;  %v7247_v62 = vld [vmem:[#allocation2 + $0xc8] sm:$0xff]  ;;  %v9463_v57 = vmul.f32 %v7251_v43, %v9042_v14  ;;  %v9478_v43 = vmul.f32 %v7256_v59, %v9042_v14  ;;  %v9490_v63 = vmul.f32 %v7260_v10, %v9042_v14 }
 0x462   :  { %v9451_v6 = vmul.f32 %v7247_v62, %v9042_v14  ;;  %v9466_v62 = vmul.f32 %v7252_v9, %v9042_v14  ;;  %v9481_v9 = vmul.f32 %v7257_v55, %v9042_v14  ;;  %v9493_v59 = vmul.f32 %v7261_v33, %v9042_v14 }
 0x463   :  { %v9496_v55 = vmul.f32 %v7262_v19, %v9042_v14  ;;  %v9499_v46 = vmul.f32 %v7263_v51, %v9042_v14  ;;  %v9502_v44 = vmul.f32 %v7264_v20, %v9042_v14  ;;  %v9505_v10 = vmul.f32 %v7265_v60, %v9042_v14 }
 0x464   :  { %v9508_v33 = vmul.f32 %v7266_v36, %v9042_v14  ;;  %v9511_v19 = vmul.f32 %v7267_v11, %v9042_v14  ;;  %v9514_v51 = vmul.f32 %v7268_v8, %v9042_v14  ;;  %v9517_v20 = vmul.f32 %v7269_v4, %v9042_v14 }
 0x465   :  { %v9520_v60 = vmul.f32 %v7270_v52, %v9042_v14  ;;  %v9523_v36 = vmul.f32 %v7271_v31, %v9042_v14 }
 0x466   :  { %11978 = vst [vmem:[#allocation118_spill] sm:$0xff] %v9508_v33  ;;  %11979 = vst [vmem:[#allocation119_spill] sm:$0xff] %v9511_v19  ;;  %v7272_v33 = vld [vmem:[#allocation2 + $0x3e8] sm:$0xff] }
 0x467   :  { %11980 = vst [vmem:[#allocation120_spill] sm:$0xff] %v9514_v51  ;;  %11981 = vst [vmem:[#allocation121_spill] sm:$0xff] %v9517_v20  ;;  %v9526_v11 = vmul.f32 %v7272_v33, %v9042_v14  ;;  %v7273_v19 = vld [vmem:[#allocation2 + $0x408] sm:$0xff] }
 0x468   :  { %11982 = vst [vmem:[#allocation122_spill] sm:$0xff] %v9520_v60  ;;  %11983 = vst [vmem:[#allocation123_spill] sm:$0xff] %v9523_v36  ;;  %v9529_v8 = vmul.f32 %v7273_v19, %v9042_v14  ;;  %v7274_v51 = vld [vmem:[#allocation2 + $0x428] sm:$0xff] }
 0x469   :  { %11984 = vst [vmem:[#allocation124_spill] sm:$0xff] %v9526_v11  ;;  %v9532_v4 = vmul.f32 %v7274_v51, %v9042_v14  ;;  %v7275_v20 = vld [vmem:[#allocation2 + $0x448] sm:$0xff] }
 0x46a   :  { %11985 = vst [vmem:[#allocation125_spill] sm:$0xff] %v9529_v8  ;;  %v9535_v52 = vmul.f32 %v7275_v20, %v9042_v14  ;;  %v7276_v60 = vld [vmem:[#allocation2 + $0x468] sm:$0xff] }
 0x46b   :  { %11986 = vst [vmem:[#allocation126_spill] sm:$0xff] %v9532_v4  ;;  %v9538_v31 = vmul.f32 %v7276_v60, %v9042_v14  ;;  %v7277_v36 = vld [vmem:[#allocation2 + $0x488] sm:$0xff] }
 0x46c   :  { %11987 = vst [vmem:[#allocation127_spill] sm:$0xff] %v9535_v52  ;;  %v9541_v33 = vmul.f32 %v7277_v36, %v9042_v14  ;;  %v7278_v11 = vld [vmem:[#allocation2 + $0x4a8] sm:$0xff] }
 0x46d   :  { %11988 = vst [vmem:[#allocation128_spill] sm:$0xff] %v9538_v31  ;;  %v9544_v19 = vmul.f32 %v7278_v11, %v9042_v14  ;;  %v7279_v8 = vld [vmem:[#allocation2 + $0x4c8] sm:$0xff] }
 0x46e   :  { %11989 = vst [vmem:[#allocation129_spill] sm:$0xff] %v9541_v33  ;;  %v9547_v51 = vmul.f32 %v7279_v8, %v9042_v14  ;;  %v7280_v4 = vld [vmem:[#allocation2 + $0x4e8] sm:$0xff] }
 0x46f   :  { %11990 = vst [vmem:[#allocation130_spill] sm:$0xff] %v9544_v19  ;;  %v9550_v20 = vmul.f32 %v7280_v4, %v9042_v14  ;;  %v7281_v52 = vld [vmem:[#allocation2 + $0x508] sm:$0xff] }
 0x470   :  { %11991 = vst [vmem:[#allocation131_spill] sm:$0xff] %v9547_v51  ;;  %v9553_v60 = vmul.f32 %v7281_v52, %v9042_v14  ;;  %v7282_v31 = vld [vmem:[#allocation2 + $0x528] sm:$0xff] }
 0x471   :  { %11992 = vst [vmem:[#allocation132_spill] sm:$0xff] %v9550_v20  ;;  %v9556_v36 = vmul.f32 %v7282_v31, %v9042_v14  ;;  %v7283_v33 = vld [vmem:[#allocation2 + $0x548] sm:$0xff] }
 0x472   :  { %11993 = vst [vmem:[#allocation133_spill] sm:$0xff] %v9553_v60  ;;  %v9559_v11 = vmul.f32 %v7283_v33, %v9042_v14  ;;  %v7284_v19 = vld [vmem:[#allocation2 + $0x568] sm:$0xff] }
 0x473   :  { %11994 = vst [vmem:[#allocation134_spill] sm:$0xff] %v9556_v36  ;;  %v9562_v8 = vmul.f32 %v7284_v19, %v9042_v14  ;;  %v7285_v51 = vld [vmem:[#allocation2 + $0x588] sm:$0xff] }
 0x474   :  { %11995 = vst [vmem:[#allocation135_spill] sm:$0xff] %v9559_v11  ;;  %v9565_v4 = vmul.f32 %v7285_v51, %v9042_v14  ;;  %v7286_v20 = vld [vmem:[#allocation2 + $0x5a8] sm:$0xff] }
 0x475   :  { %11996 = vst [vmem:[#allocation136_spill] sm:$0xff] %v9562_v8  ;;  %v9568_v52 = vmul.f32 %v7286_v20, %v9042_v14  ;;  %v7287_v60 = vld [vmem:[#allocation2 + $0x5c8] sm:$0xff] }
 0x476   :  { %11997 = vst [vmem:[#allocation137_spill] sm:$0xff] %v9565_v4  ;;  %v9571_v31 = vmul.f32 %v7287_v60, %v9042_v14  ;;  %v7288_v36 = vld [vmem:[#allocation2 + $0x5e8] sm:$0xff] }
 0x477   :  { %11998 = vst [vmem:[#allocation138_spill] sm:$0xff] %v9568_v52  ;;  %v9574_v33 = vmul.f32 %v7288_v36, %v9042_v14  ;;  %v7289_v11 = vld [vmem:[#allocation2 + $0x608] sm:$0xff] }
 0x478   :  { %11999 = vst [vmem:[#allocation139_spill] sm:$0xff] %v9571_v31  ;;  %v9577_v19 = vmul.f32 %v7289_v11, %v9042_v14  ;;  %v7290_v8 = vld [vmem:[#allocation2 + $0x628] sm:$0xff] }
 0x479   :  { %12000 = vst [vmem:[#allocation140_spill] sm:$0xff] %v9574_v33  ;;  %v9580_v51 = vmul.f32 %v7290_v8, %v9042_v14  ;;  %v7291_v4 = vld [vmem:[#allocation2 + $0x648] sm:$0xff] }
 0x47a   :  { %12001 = vst [vmem:[#allocation141_spill] sm:$0xff] %v9577_v19  ;;  %v9583_v20 = vmul.f32 %v7291_v4, %v9042_v14  ;;  %v7292_v52 = vld [vmem:[#allocation2 + $0x668] sm:$0xff] }
 0x47b   :  { %12002 = vst [vmem:[#allocation142_spill] sm:$0xff] %v9580_v51  ;;  %v9586_v60 = vmul.f32 %v7292_v52, %v9042_v14  ;;  %v7293_v31 = vld [vmem:[#allocation2 + $0x688] sm:$0xff] }
 0x47c   :  { %12003 = vst [vmem:[#allocation143_spill] sm:$0xff] %v9583_v20  ;;  %v9589_v36 = vmul.f32 %v7293_v31, %v9042_v14  ;;  %v7294_v33 = vld [vmem:[#allocation2 + $0x6a8] sm:$0xff] }
 0x47d   :  { %12004 = vst [vmem:[#allocation144_spill] sm:$0xff] %v9586_v60  ;;  %v9592_v11 = vmul.f32 %v7294_v33, %v9042_v14  ;;  %v7295_v19 = vld [vmem:[#allocation2 + $0x6c8] sm:$0xff] }
 0x47e   :  { %12005 = vst [vmem:[#allocation145_spill] sm:$0xff] %v9589_v36  ;;  %v9595_v8 = vmul.f32 %v7295_v19, %v9042_v14  ;;  %v7296_v51 = vld [vmem:[#allocation2 + $0x6e8] sm:$0xff] }
 0x47f   :  { %12006 = vst [vmem:[#allocation146_spill] sm:$0xff] %v9592_v11  ;;  %v9598_v4 = vmul.f32 %v7296_v51, %v9042_v14  ;;  %v7297_v20 = vld [vmem:[#allocation2 + $0x708] sm:$0xff] }
 0x480   :  { %12007 = vst [vmem:[#allocation147_spill] sm:$0xff] %v9595_v8  ;;  %v9601_v52 = vmul.f32 %v7297_v20, %v9042_v14  ;;  %v7298_v60 = vld [vmem:[#allocation2 + $0x728] sm:$0xff] }
 0x481   :  { %12008 = vst [vmem:[#allocation148_spill] sm:$0xff] %v9598_v4  ;;  %v9604_v31 = vmul.f32 %v7298_v60, %v9042_v14  ;;  %v7299_v36 = vld [vmem:[#allocation2 + $0x748] sm:$0xff] }
 0x482   :  { %12009 = vst [vmem:[#allocation149_spill] sm:$0xff] %v9601_v52  ;;  %v9607_v33 = vmul.f32 %v7299_v36, %v9042_v14  ;;  %v7300_v11 = vld [vmem:[#allocation2 + $0x768] sm:$0xff] }
 0x483   :  { %12010 = vst [vmem:[#allocation150_spill] sm:$0xff] %v9604_v31  ;;  %v9610_v19 = vmul.f32 %v7300_v11, %v9042_v14  ;;  %v7301_v8 = vld [vmem:[#allocation2 + $0x788] sm:$0xff] }
 0x484   :  { %12011 = vst [vmem:[#allocation151_spill] sm:$0xff] %v9607_v33  ;;  %v9613_v51 = vmul.f32 %v7301_v8, %v9042_v14  ;;  %v7302_v4 = vld [vmem:[#allocation2 + $0x7a8] sm:$0xff] }
 0x485   :  { %12012 = vst [vmem:[#allocation152_spill] sm:$0xff] %v9610_v19  ;;  %v9616_v20 = vmul.f32 %v7302_v4, %v9042_v14  ;;  %v7303_v52 = vld [vmem:[#allocation2 + $0x7c8] sm:$0xff] }
 0x486   :  { %12013 = vst [vmem:[#allocation153_spill] sm:$0xff] %v9613_v51  ;;  %v9619_v60 = vmul.f32 %v7303_v52, %v9042_v14  ;;  %v7304_v31 = vld [vmem:[#allocation2 + $0x7e8] sm:$0xff] }
 0x487   :  { %12014 = vst [vmem:[#allocation154_spill] sm:$0xff] %v9616_v20  ;;  %v9622_v36 = vmul.f32 %v7304_v31, %v9042_v14  ;;  %v7305_v33 = vld [vmem:[#allocation2 + $0x808] sm:$0xff] }
 0x488   :  { %12015 = vst [vmem:[#allocation155_spill] sm:$0xff] %v9619_v60  ;;  %v9625_v11 = vmul.f32 %v7305_v33, %v9042_v14  ;;  %v7306_v19 = vld [vmem:[#allocation2 + $0x828] sm:$0xff] }
 0x489   :  { %12016 = vst [vmem:[#allocation156_spill] sm:$0xff] %v9622_v36  ;;  %v9628_v8 = vmul.f32 %v7306_v19, %v9042_v14  ;;  %v7307_v51 = vld [vmem:[#allocation2 + $0x848] sm:$0xff] }
 0x48a   :  { %12017 = vst [vmem:[#allocation157_spill] sm:$0xff] %v9625_v11  ;;  %v9631_v4 = vmul.f32 %v7307_v51, %v9042_v14  ;;  %v7308_v20 = vld [vmem:[#allocation2 + $0x868] sm:$0xff] }
 0x48b   :  { %12018 = vst [vmem:[#allocation158_spill] sm:$0xff] %v9628_v8  ;;  %v9634_v52 = vmul.f32 %v7308_v20, %v9042_v14  ;;  %v7309_v60 = vld [vmem:[#allocation2 + $0x888] sm:$0xff] }
 0x48c   :  { %12019 = vst [vmem:[#allocation159_spill] sm:$0xff] %v9631_v4  ;;  %v9637_v31 = vmul.f32 %v7309_v60, %v9042_v14  ;;  %v7310_v36 = vld [vmem:[#allocation2 + $0x8a8] sm:$0xff] }
 0x48d   :  { %12020 = vst [vmem:[#allocation160_spill] sm:$0xff] %v9634_v52  ;;  %v9640_v33 = vmul.f32 %v7310_v36, %v9042_v14  ;;  %v7311_v11 = vld [vmem:[#allocation2 + $0x8c8] sm:$0xff] }
 0x48e   :  { %12021 = vst [vmem:[#allocation161_spill] sm:$0xff] %v9637_v31  ;;  %v9643_v19 = vmul.f32 %v7311_v11, %v9042_v14  ;;  %v7312_v8 = vld [vmem:[#allocation2 + $0x8e8] sm:$0xff] }
 0x48f   :  { %12022 = vst [vmem:[#allocation162_spill] sm:$0xff] %v9640_v33  ;;  %v9646_v51 = vmul.f32 %v7312_v8, %v9042_v14  ;;  %v7313_v4 = vld [vmem:[#allocation2 + $0x908] sm:$0xff] }
 0x490   :  { %12023 = vst [vmem:[#allocation163_spill] sm:$0xff] %v9643_v19  ;;  %v9649_v20 = vmul.f32 %v7313_v4, %v9042_v14  ;;  %v7314_v52 = vld [vmem:[#allocation2 + $0x928] sm:$0xff] }
 0x491   :  { %12024 = vst [vmem:[#allocation164_spill] sm:$0xff] %v9646_v51  ;;  %v9652_v60 = vmul.f32 %v7314_v52, %v9042_v14  ;;  %v7315_v31 = vld [vmem:[#allocation2 + $0x948] sm:$0xff] }
 0x492   :  { %12025 = vst [vmem:[#allocation165_spill] sm:$0xff] %v9649_v20  ;;  %v9655_v36 = vmul.f32 %v7315_v31, %v9042_v14  ;;  %v7316_v33 = vld [vmem:[#allocation2 + $0x968] sm:$0xff] }
 0x493   :  { %12026 = vst [vmem:[#allocation166_spill] sm:$0xff] %v9652_v60  ;;  %v9658_v11 = vmul.f32 %v7316_v33, %v9042_v14  ;;  %v7317_v19 = vld [vmem:[#allocation2 + $0x988] sm:$0xff] }
 0x494   :  { %12027 = vst [vmem:[#allocation167_spill] sm:$0xff] %v9655_v36  ;;  %v9661_v8 = vmul.f32 %v7317_v19, %v9042_v14  ;;  %v7318_v51 = vld [vmem:[#allocation2 + $0x9a8] sm:$0xff] }
 0x495   :  { %12028 = vst [vmem:[#allocation168_spill] sm:$0xff] %v9658_v11  ;;  %v9664_v4 = vmul.f32 %v7318_v51, %v9042_v14  ;;  %v7319_v20 = vld [vmem:[#allocation2 + $0x9c8] sm:$0xff] }
 0x496   :  { %12029 = vst [vmem:[#allocation169_spill] sm:$0xff] %v9661_v8  ;;  %v9667_v52 = vmul.f32 %v7319_v20, %v9042_v14  ;;  %v7320_v60 = vld [vmem:[#allocation2 + $0x9e8] sm:$0xff] }
 0x497   :  { %12030 = vst [vmem:[#allocation170_spill] sm:$0xff] %v9664_v4  ;;  %v9670_v31 = vmul.f32 %v7320_v60, %v9042_v14  ;;  %v7321_v36 = vld [vmem:[#allocation2 + $0xa08] sm:$0xff] }
 0x498   :  { %12031 = vst [vmem:[#allocation171_spill] sm:$0xff] %v9667_v52  ;;  %v9673_v33 = vmul.f32 %v7321_v36, %v9042_v14  ;;  %v7322_v11 = vld [vmem:[#allocation2 + $0xa28] sm:$0xff] }
 0x499   :  { %12032 = vst [vmem:[#allocation172_spill] sm:$0xff] %v9670_v31  ;;  %v9676_v19 = vmul.f32 %v7322_v11, %v9042_v14  ;;  %v7323_v8 = vld [vmem:[#allocation2 + $0xa48] sm:$0xff] }
 0x49a   :  { %12033 = vst [vmem:[#allocation173_spill] sm:$0xff] %v9673_v33  ;;  %v9679_v51 = vmul.f32 %v7323_v8, %v9042_v14  ;;  %v7324_v4 = vld [vmem:[#allocation2 + $0xa68] sm:$0xff] }
 0x49b   :  { %12034 = vst [vmem:[#allocation174_spill] sm:$0xff] %v9676_v19  ;;  %v9682_v20 = vmul.f32 %v7324_v4, %v9042_v14  ;;  %v7325_v52 = vld [vmem:[#allocation2 + $0xa88] sm:$0xff] }
 0x49c   :  { %12035 = vst [vmem:[#allocation175_spill] sm:$0xff] %v9679_v51  ;;  %v9685_v60 = vmul.f32 %v7325_v52, %v9042_v14  ;;  %v7326_v31 = vld [vmem:[#allocation2 + $0xaa8] sm:$0xff] }
 0x49d   :  { %12036 = vst [vmem:[#allocation176_spill] sm:$0xff] %v9682_v20  ;;  %v9688_v36 = vmul.f32 %v7326_v31, %v9042_v14  ;;  %v7327_v33 = vld [vmem:[#allocation2 + $0xac8] sm:$0xff] }
 0x49e   :  { %12037 = vst [vmem:[#allocation177_spill] sm:$0xff] %v9685_v60  ;;  %v9691_v11 = vmul.f32 %v7327_v33, %v9042_v14  ;;  %v7328_v19 = vld [vmem:[#allocation2 + $0xae8] sm:$0xff] }
 0x49f   :  { %12038 = vst [vmem:[#allocation178_spill] sm:$0xff] %v9688_v36  ;;  %v9694_v8 = vmul.f32 %v7328_v19, %v9042_v14  ;;  %v7329_v51 = vld [vmem:[#allocation2 + $0xb08] sm:$0xff] }
 0x4a0   :  { %12039 = vst [vmem:[#allocation179_spill] sm:$0xff] %v9691_v11  ;;  %v9697_v4 = vmul.f32 %v7329_v51, %v9042_v14  ;;  %v7330_v20 = vld [vmem:[#allocation2 + $0xb28] sm:$0xff] }
 0x4a1   :  { %12040 = vst [vmem:[#allocation180_spill] sm:$0xff] %v9694_v8  ;;  %v9700_v52 = vmul.f32 %v7330_v20, %v9042_v14  ;;  %v7331_v60 = vld [vmem:[#allocation2 + $0xb48] sm:$0xff] }
 0x4a2   :  { %12041 = vst [vmem:[#allocation181_spill] sm:$0xff] %v9697_v4  ;;  %v9703_v31 = vmul.f32 %v7331_v60, %v9042_v14  ;;  %v7332_v36 = vld [vmem:[#allocation2 + $0xb68] sm:$0xff] }
 0x4a3   :  { %12042 = vst [vmem:[#allocation182_spill] sm:$0xff] %v9700_v52  ;;  %v9706_v33 = vmul.f32 %v7332_v36, %v9042_v14  ;;  %v7333_v11 = vld [vmem:[#allocation2 + $0xb88] sm:$0xff] }
 0x4a4   :  { %12043 = vst [vmem:[#allocation183_spill] sm:$0xff] %v9703_v31  ;;  %v9709_v19 = vmul.f32 %v7333_v11, %v9042_v14  ;;  %v7334_v8 = vld [vmem:[#allocation2 + $0xba8] sm:$0xff] }
 0x4a5   :  { %12044 = vst [vmem:[#allocation184_spill] sm:$0xff] %v9706_v33  ;;  %v9712_v51 = vmul.f32 %v7334_v8, %v9042_v14  ;;  %v7335_v4 = vld [vmem:[#allocation2 + $0xbc8] sm:$0xff] }
 0x4a6   :  { %12045 = vst [vmem:[#allocation185_spill] sm:$0xff] %v9709_v19  ;;  %v9715_v20 = vmul.f32 %v7335_v4, %v9042_v14  ;;  %v7336_v52 = vld [vmem:[#allocation2 + $0xbe8] sm:$0xff] }
 0x4a7   :  { %12046 = vst [vmem:[#allocation186_spill] sm:$0xff] %v9712_v51  ;;  %v9718_v60 = vmul.f32 %v7336_v52, %v9042_v14  ;;  %v7337_v31 = vld [vmem:[#allocation2 + $0xc08] sm:$0xff] }
 0x4a8   :  { %12047 = vst [vmem:[#allocation187_spill] sm:$0xff] %v9715_v20  ;;  %v9721_v36 = vmul.f32 %v7337_v31, %v9042_v14  ;;  %v7338_v33 = vld [vmem:[#allocation2 + $0xc28] sm:$0xff] }
 0x4a9   :  { %12048 = vst [vmem:[#allocation188_spill] sm:$0xff] %v9718_v60  ;;  %v9724_v11 = vmul.f32 %v7338_v33, %v9042_v14  ;;  %v7339_v19 = vld [vmem:[#allocation2 + $0xc48] sm:$0xff] }
 0x4aa   :  { %12049 = vst [vmem:[#allocation189_spill] sm:$0xff] %v9721_v36  ;;  %v9727_v8 = vmul.f32 %v7339_v19, %v9042_v14  ;;  %v7340_v51 = vld [vmem:[#allocation2 + $0xc68] sm:$0xff] }
 0x4ab   :  { %12050 = vst [vmem:[#allocation190_spill] sm:$0xff] %v9724_v11  ;;  %v9730_v4 = vmul.f32 %v7340_v51, %v9042_v14  ;;  %v7341_v20 = vld [vmem:[#allocation2 + $0xc88] sm:$0xff] }
 0x4ac   :  { %12051 = vst [vmem:[#allocation191_spill] sm:$0xff] %v9727_v8  ;;  %v9733_v52 = vmul.f32 %v7341_v20, %v9042_v14  ;;  %v7342_v60 = vld [vmem:[#allocation2 + $0xca8] sm:$0xff] }
 0x4ad   :  { %12052 = vst [vmem:[#allocation192_spill] sm:$0xff] %v9730_v4  ;;  %v9736_v31 = vmul.f32 %v7342_v60, %v9042_v14  ;;  %v7343_v36 = vld [vmem:[#allocation2 + $0xcc8] sm:$0xff] }
 0x4ae   :  { %12053 = vst [vmem:[#allocation193_spill] sm:$0xff] %v9733_v52  ;;  %v9739_v33 = vmul.f32 %v7343_v36, %v9042_v14  ;;  %v7344_v11 = vld [vmem:[#allocation2 + $0xce8] sm:$0xff] }
 0x4af   :  { %12054 = vst [vmem:[#allocation194_spill] sm:$0xff] %v9736_v31  ;;  %v9742_v19 = vmul.f32 %v7344_v11, %v9042_v14  ;;  %v7345_v8 = vld [vmem:[#allocation2 + $0xd08] sm:$0xff] }
 0x4b0   :  { %12055 = vst [vmem:[#allocation195_spill] sm:$0xff] %v9739_v33  ;;  %v9745_v51 = vmul.f32 %v7345_v8, %v9042_v14  ;;  %v7346_v4 = vld [vmem:[#allocation2 + $0xd28] sm:$0xff] }
 0x4b1   :  { %12056 = vst [vmem:[#allocation196_spill] sm:$0xff] %v9742_v19  ;;  %v9748_v20 = vmul.f32 %v7346_v4, %v9042_v14  ;;  %v7347_v52 = vld [vmem:[#allocation2 + $0xd48] sm:$0xff] }
 0x4b2   :  { %12057 = vst [vmem:[#allocation197_spill] sm:$0xff] %v9745_v51  ;;  %v9751_v60 = vmul.f32 %v7347_v52, %v9042_v14  ;;  %v7348_v31 = vld [vmem:[#allocation2 + $0xd68] sm:$0xff] }
 0x4b3   :  { %12058 = vst [vmem:[#allocation198_spill] sm:$0xff] %v9748_v20  ;;  %v9754_v36 = vmul.f32 %v7348_v31, %v9042_v14  ;;  %v7349_v33 = vld [vmem:[#allocation2 + $0xd88] sm:$0xff] }
 0x4b4   :  { %12059 = vst [vmem:[#allocation199_spill] sm:$0xff] %v9751_v60  ;;  %v9757_v11 = vmul.f32 %v7349_v33, %v9042_v14  ;;  %v7350_v19 = vld [vmem:[#allocation2 + $0xda8] sm:$0xff] }
 0x4b5   :  { %12060 = vst [vmem:[#allocation200_spill] sm:$0xff] %v9754_v36  ;;  %v9760_v8 = vmul.f32 %v7350_v19, %v9042_v14  ;;  %v7351_v51 = vld [vmem:[#allocation2 + $0xdc8] sm:$0xff] }
 0x4b6   :  { %12061 = vst [vmem:[#allocation201_spill] sm:$0xff] %v9757_v11  ;;  %v9763_v4 = vmul.f32 %v7351_v51, %v9042_v14  ;;  %v7352_v20 = vld [vmem:[#allocation2 + $0xde8] sm:$0xff] }
 0x4b7   :  { %12062 = vst [vmem:[#allocation202_spill] sm:$0xff] %v9760_v8  ;;  %v9766_v52 = vmul.f32 %v7352_v20, %v9042_v14  ;;  %v7353_v60 = vld [vmem:[#allocation2 + $0xe08] sm:$0xff] }
 0x4b8   :  { %12063 = vst [vmem:[#allocation203_spill] sm:$0xff] %v9763_v4  ;;  %v9769_v31 = vmul.f32 %v7353_v60, %v9042_v14  ;;  %v7354_v36 = vld [vmem:[#allocation2 + $0xe28] sm:$0xff] }
 0x4b9   :  { %12064 = vst [vmem:[#allocation204_spill] sm:$0xff] %v9766_v52  ;;  %v9772_v33 = vmul.f32 %v7354_v36, %v9042_v14  ;;  %v7355_v11 = vld [vmem:[#allocation2 + $0xe48] sm:$0xff] }
 0x4ba   :  { %12065 = vst [vmem:[#allocation205_spill] sm:$0xff] %v9769_v31  ;;  %v9775_v19 = vmul.f32 %v7355_v11, %v9042_v14  ;;  %v7356_v8 = vld [vmem:[#allocation2 + $0xe68] sm:$0xff] }
 0x4bb   :  { %12066 = vst [vmem:[#allocation206_spill] sm:$0xff] %v9772_v33  ;;  %v9778_v51 = vmul.f32 %v7356_v8, %v9042_v14  ;;  %v7357_v4 = vld [vmem:[#allocation2 + $0xe88] sm:$0xff] }
 0x4bc   :  { %12067 = vst [vmem:[#allocation207_spill] sm:$0xff] %v9775_v19  ;;  %v9781_v20 = vmul.f32 %v7357_v4, %v9042_v14  ;;  %v7358_v52 = vld [vmem:[#allocation2 + $0xea8] sm:$0xff] }
 0x4bd   :  { %12068 = vst [vmem:[#allocation208_spill] sm:$0xff] %v9778_v51  ;;  %v9784_v60 = vmul.f32 %v7358_v52, %v9042_v14  ;;  %v7359_v31 = vld [vmem:[#allocation2 + $0xec8] sm:$0xff] }
 0x4be   :  { %12069 = vst [vmem:[#allocation209_spill] sm:$0xff] %v9781_v20  ;;  %v9787_v36 = vmul.f32 %v7359_v31, %v9042_v14  ;;  %v7360_v33 = vld [vmem:[#allocation2 + $0xee8] sm:$0xff] }
 0x4bf   :  { %12070 = vst [vmem:[#allocation210_spill] sm:$0xff] %v9784_v60  ;;  %v9790_v11 = vmul.f32 %v7360_v33, %v9042_v14  ;;  %v7361_v19 = vld [vmem:[#allocation2 + $0xf08] sm:$0xff] }
 0x4c0   :  { %12071 = vst [vmem:[#allocation211_spill] sm:$0xff] %v9787_v36  ;;  %v9793_v8 = vmul.f32 %v7361_v19, %v9042_v14  ;;  %v7362_v51 = vld [vmem:[#allocation2 + $0xf28] sm:$0xff] }
 0x4c1   :  { %12072 = vst [vmem:[#allocation212_spill] sm:$0xff] %v9790_v11  ;;  %v9796_v4 = vmul.f32 %v7362_v51, %v9042_v14  ;;  %v7363_v20 = vld [vmem:[#allocation2 + $0xf48] sm:$0xff] }
 0x4c2   :  { %12073 = vst [vmem:[#allocation213_spill] sm:$0xff] %v9793_v8  ;;  %v9799_v52 = vmul.f32 %v7363_v20, %v9042_v14  ;;  %v7364_v60 = vld [vmem:[#allocation2 + $0xf68] sm:$0xff] }
 0x4c3   :  { %12074 = vst [vmem:[#allocation214_spill] sm:$0xff] %v9796_v4  ;;  %v9802_v31 = vmul.f32 %v7364_v60, %v9042_v14  ;;  %v7365_v36 = vld [vmem:[#allocation2 + $0xf88] sm:$0xff] }
 0x4c4   :  { %12075 = vst [vmem:[#allocation215_spill] sm:$0xff] %v9799_v52  ;;  %v9805_v33 = vmul.f32 %v7365_v36, %v9042_v14  ;;  %v7366_v11 = vld [vmem:[#allocation2 + $0xfa8] sm:$0xff]  ;;  %v7369_v52 = vld [vmem:[#allocation2 + $0x10] sm:$0xff] }
 0x4c5   :  { %12076 = vst [vmem:[#allocation216_spill] sm:$0xff] %v9802_v31  ;;  %v9808_v19 = vmul.f32 %v7366_v11, %v9042_v14  ;;  %v7367_v8 = vld [vmem:[#allocation2 + $0xfc8] sm:$0xff]  ;;  %v9817_v60 = vmul.f32 %v7369_v52, %v9044_v15  ;;  %v7370_v31 = vld [vmem:[#allocation2 + $0x30] sm:$0xff] }
 0x4c6   :  { %12077 = vst [vmem:[#allocation217_spill] sm:$0xff] %v9805_v33  ;;  %v9811_v51 = vmul.f32 %v7367_v8, %v9042_v14  ;;  %v7368_v4 = vld [vmem:[#allocation2 + $0xfe8] sm:$0xff]  ;;  %v9820_v36 = vmul.f32 %v7370_v31, %v9044_v15  ;;  %v7371_v33 = vld [vmem:[#allocation2 + $0x50] sm:$0xff] }
 0x4c7   :  { %12078 = vst [vmem:[#allocation218_spill] sm:$0xff] %v9808_v19  ;;  %v9814_v20 = vmul.f32 %v7368_v4, %v9042_v14  ;;  %12080 = vst [vmem:[#allocation220_spill] sm:$0xff] %v9817_v60  ;;  %v9823_v11 = vmul.f32 %v7371_v33, %v9044_v15  ;;  %v7372_v19 = vld [vmem:[#allocation2 + $0x70] sm:$0xff] }
 0x4c8   :  { %12079 = vst [vmem:[#allocation219_spill] sm:$0xff] %v9811_v51  ;;  %12081 = vst [vmem:[#allocation221_spill] sm:$0xff] %v9820_v36  ;;  %v9826_v8 = vmul.f32 %v7372_v19, %v9044_v15  ;;  %v7373_v51 = vld [vmem:[#allocation2 + $0x90] sm:$0xff] }
 0x4c9   :  { %12082 = vst [vmem:[#allocation222_spill] sm:$0xff] %v9823_v11  ;;  %v9829_v14 = vmul.f32 %v7373_v51, %v9044_v15  ;;  %v7374_v4 = vld [vmem:[#allocation2 + $0xb0] sm:$0xff] }
 0x4ca   :  { %12083 = vst [vmem:[#allocation223_spill] sm:$0xff] %v9826_v8  ;;  %v9832_v52 = vmul.f32 %v7374_v4, %v9044_v15  ;;  %v7375_v60 = vld [vmem:[#allocation2 + $0xd0] sm:$0xff] }
 0x4cb   :  { %12084 = vst [vmem:[#allocation224_spill] sm:$0xff] %v9829_v14  ;;  %v9835_v31 = vmul.f32 %v7375_v60, %v9044_v15  ;;  %v7376_v36 = vld [vmem:[#allocation2 + $0xf0] sm:$0xff] }
 0x4cc   :  { %12085 = vst [vmem:[#allocation225_spill] sm:$0xff] %v9832_v52  ;;  %v9838_v33 = vmul.f32 %v7376_v36, %v9044_v15  ;;  %v7377_v11 = vld [vmem:[#allocation2 + $0x110] sm:$0xff] }
 0x4cd   :  { %12086 = vst [vmem:[#allocation226_spill] sm:$0xff] %v9835_v31  ;;  %v9841_v19 = vmul.f32 %v7377_v11, %v9044_v15  ;;  %v7378_v8 = vld [vmem:[#allocation2 + $0x130] sm:$0xff] }
 0x4ce   :  { %12087 = vst [vmem:[#allocation227_spill] sm:$0xff] %v9838_v33  ;;  %v9844_v51 = vmul.f32 %v7378_v8, %v9044_v15  ;;  %v7379_v14 = vld [vmem:[#allocation2 + $0x150] sm:$0xff] }
 0x4cf   :  { %12088 = vst [vmem:[#allocation228_spill] sm:$0xff] %v9841_v19  ;;  %v9847_v4 = vmul.f32 %v7379_v14, %v9044_v15  ;;  %v7380_v52 = vld [vmem:[#allocation2 + $0x170] sm:$0xff] }
 0x4d0   :  { %12089 = vst [vmem:[#allocation229_spill] sm:$0xff] %v9844_v51  ;;  %v9850_v60 = vmul.f32 %v7380_v52, %v9044_v15  ;;  %v7381_v31 = vld [vmem:[#allocation2 + $0x190] sm:$0xff] }
 0x4d1   :  { %12090 = vst [vmem:[#allocation230_spill] sm:$0xff] %v9847_v4  ;;  %v9853_v36 = vmul.f32 %v7381_v31, %v9044_v15  ;;  %v7382_v33 = vld [vmem:[#allocation2 + $0x1b0] sm:$0xff] }
 0x4d2   :  { %12091 = vst [vmem:[#allocation231_spill] sm:$0xff] %v9850_v60  ;;  %v9856_v11 = vmul.f32 %v7382_v33, %v9044_v15  ;;  %v7383_v19 = vld [vmem:[#allocation2 + $0x1d0] sm:$0xff] }
 0x4d3   :  { %12092 = vst [vmem:[#allocation232_spill] sm:$0xff] %v9853_v36  ;;  %v9859_v8 = vmul.f32 %v7383_v19, %v9044_v15  ;;  %v7384_v51 = vld [vmem:[#allocation2 + $0x1f0] sm:$0xff] }
 0x4d4   :  { %12093 = vst [vmem:[#allocation233_spill] sm:$0xff] %v9856_v11  ;;  %v9862_v14 = vmul.f32 %v7384_v51, %v9044_v15  ;;  %v7385_v4 = vld [vmem:[#allocation2 + $0x210] sm:$0xff] }
 0x4d5   :  { %12094 = vst [vmem:[#allocation234_spill] sm:$0xff] %v9859_v8  ;;  %v9865_v52 = vmul.f32 %v7385_v4, %v9044_v15  ;;  %v7386_v60 = vld [vmem:[#allocation2 + $0x230] sm:$0xff] }
 0x4d6   :  { %12095 = vst [vmem:[#allocation235_spill] sm:$0xff] %v9862_v14  ;;  %v9868_v31 = vmul.f32 %v7386_v60, %v9044_v15  ;;  %v7387_v36 = vld [vmem:[#allocation2 + $0x250] sm:$0xff] }
 0x4d7   :  { %12096 = vst [vmem:[#allocation236_spill] sm:$0xff] %v9865_v52  ;;  %v9871_v33 = vmul.f32 %v7387_v36, %v9044_v15  ;;  %v7388_v11 = vld [vmem:[#allocation2 + $0x270] sm:$0xff] }
 0x4d8   :  { %12097 = vst [vmem:[#allocation237_spill] sm:$0xff] %v9868_v31  ;;  %v9874_v19 = vmul.f32 %v7388_v11, %v9044_v15  ;;  %v7389_v8 = vld [vmem:[#allocation2 + $0x290] sm:$0xff] }
 0x4d9   :  { %12098 = vst [vmem:[#allocation238_spill] sm:$0xff] %v9871_v33  ;;  %v9877_v51 = vmul.f32 %v7389_v8, %v9044_v15  ;;  %v7390_v14 = vld [vmem:[#allocation2 + $0x2b0] sm:$0xff] }
 0x4da   :  { %12099 = vst [vmem:[#allocation239_spill] sm:$0xff] %v9874_v19  ;;  %v9880_v4 = vmul.f32 %v7390_v14, %v9044_v15  ;;  %v7391_v52 = vld [vmem:[#allocation2 + $0x2d0] sm:$0xff] }
 0x4db   :  { %12100 = vst [vmem:[#allocation240_spill] sm:$0xff] %v9877_v51  ;;  %v9883_v60 = vmul.f32 %v7391_v52, %v9044_v15  ;;  %v7392_v31 = vld [vmem:[#allocation2 + $0x2f0] sm:$0xff] }
 0x4dc   :  { %12101 = vst [vmem:[#allocation241_spill] sm:$0xff] %v9880_v4  ;;  %v9886_v36 = vmul.f32 %v7392_v31, %v9044_v15  ;;  %v7393_v33 = vld [vmem:[#allocation2 + $0x310] sm:$0xff] }
 0x4dd   :  { %12102 = vst [vmem:[#allocation242_spill] sm:$0xff] %v9883_v60  ;;  %v9889_v11 = vmul.f32 %v7393_v33, %v9044_v15  ;;  %v7394_v19 = vld [vmem:[#allocation2 + $0x330] sm:$0xff] }
 0x4de   :  { %12103 = vst [vmem:[#allocation243_spill] sm:$0xff] %v9886_v36  ;;  %v9892_v8 = vmul.f32 %v7394_v19, %v9044_v15  ;;  %v7395_v51 = vld [vmem:[#allocation2 + $0x350] sm:$0xff] }
 0x4df   :  { %12104 = vst [vmem:[#allocation244_spill] sm:$0xff] %v9889_v11  ;;  %v9895_v14 = vmul.f32 %v7395_v51, %v9044_v15  ;;  %v7396_v4 = vld [vmem:[#allocation2 + $0x370] sm:$0xff] }
 0x4e0   :  { %12105 = vst [vmem:[#allocation245_spill] sm:$0xff] %v9892_v8  ;;  %v9898_v52 = vmul.f32 %v7396_v4, %v9044_v15  ;;  %v7397_v60 = vld [vmem:[#allocation2 + $0x390] sm:$0xff] }
 0x4e1   :  { %12106 = vst [vmem:[#allocation246_spill] sm:$0xff] %v9895_v14  ;;  %v9901_v31 = vmul.f32 %v7397_v60, %v9044_v15  ;;  %v7398_v36 = vld [vmem:[#allocation2 + $0x3b0] sm:$0xff] }
 0x4e2   :  { %12107 = vst [vmem:[#allocation247_spill] sm:$0xff] %v9898_v52  ;;  %v9904_v33 = vmul.f32 %v7398_v36, %v9044_v15  ;;  %v7399_v11 = vld [vmem:[#allocation2 + $0x3d0] sm:$0xff] }
 0x4e3   :  { %12108 = vst [vmem:[#allocation248_spill] sm:$0xff] %v9901_v31  ;;  %v9907_v19 = vmul.f32 %v7399_v11, %v9044_v15  ;;  %v7400_v8 = vld [vmem:[#allocation2 + $0x3f0] sm:$0xff] }
 0x4e4   :  { %12109 = vst [vmem:[#allocation249_spill] sm:$0xff] %v9904_v33  ;;  %v9910_v51 = vmul.f32 %v7400_v8, %v9044_v15  ;;  %v7401_v14 = vld [vmem:[#allocation2 + $0x410] sm:$0xff] }
 0x4e5   :  { %12110 = vst [vmem:[#allocation250_spill] sm:$0xff] %v9907_v19  ;;  %v9913_v4 = vmul.f32 %v7401_v14, %v9044_v15  ;;  %v7402_v52 = vld [vmem:[#allocation2 + $0x430] sm:$0xff] }
 0x4e6   :  { %12111 = vst [vmem:[#allocation251_spill] sm:$0xff] %v9910_v51  ;;  %v9916_v60 = vmul.f32 %v7402_v52, %v9044_v15  ;;  %v7403_v31 = vld [vmem:[#allocation2 + $0x450] sm:$0xff] }
 0x4e7   :  { %12112 = vst [vmem:[#allocation252_spill] sm:$0xff] %v9913_v4  ;;  %v9919_v36 = vmul.f32 %v7403_v31, %v9044_v15  ;;  %v7404_v33 = vld [vmem:[#allocation2 + $0x470] sm:$0xff] }
 0x4e8   :  { %12113 = vst [vmem:[#allocation253_spill] sm:$0xff] %v9916_v60  ;;  %v9922_v11 = vmul.f32 %v7404_v33, %v9044_v15  ;;  %v7405_v19 = vld [vmem:[#allocation2 + $0x490] sm:$0xff] }
 0x4e9   :  { %12114 = vst [vmem:[#allocation254_spill] sm:$0xff] %v9919_v36  ;;  %v9925_v8 = vmul.f32 %v7405_v19, %v9044_v15  ;;  %v7406_v51 = vld [vmem:[#allocation2 + $0x4b0] sm:$0xff] }
 0x4ea   :  { %12115 = vst [vmem:[#allocation255_spill] sm:$0xff] %v9922_v11  ;;  %v9928_v14 = vmul.f32 %v7406_v51, %v9044_v15  ;;  %v7407_v4 = vld [vmem:[#allocation2 + $0x4d0] sm:$0xff] }
 0x4eb   :  { %12116 = vst [vmem:[#allocation256_spill] sm:$0xff] %v9925_v8  ;;  %v9931_v52 = vmul.f32 %v7407_v4, %v9044_v15  ;;  %v7408_v60 = vld [vmem:[#allocation2 + $0x4f0] sm:$0xff] }
 0x4ec   :  { %12117 = vst [vmem:[#allocation257_spill] sm:$0xff] %v9928_v14  ;;  %v9934_v31 = vmul.f32 %v7408_v60, %v9044_v15  ;;  %v7409_v36 = vld [vmem:[#allocation2 + $0x510] sm:$0xff] }
 0x4ed   :  { %12118 = vst [vmem:[#allocation258_spill] sm:$0xff] %v9931_v52  ;;  %v9937_v33 = vmul.f32 %v7409_v36, %v9044_v15  ;;  %v7410_v11 = vld [vmem:[#allocation2 + $0x530] sm:$0xff] }
 0x4ee   :  { %12119 = vst [vmem:[#allocation259_spill] sm:$0xff] %v9934_v31  ;;  %v9940_v19 = vmul.f32 %v7410_v11, %v9044_v15  ;;  %v7411_v8 = vld [vmem:[#allocation2 + $0x550] sm:$0xff] }
 0x4ef   :  { %12120 = vst [vmem:[#allocation260_spill] sm:$0xff] %v9937_v33  ;;  %v9943_v51 = vmul.f32 %v7411_v8, %v9044_v15  ;;  %v7412_v14 = vld [vmem:[#allocation2 + $0x570] sm:$0xff] }
 0x4f0   :  { %12121 = vst [vmem:[#allocation261_spill] sm:$0xff] %v9940_v19  ;;  %v9946_v4 = vmul.f32 %v7412_v14, %v9044_v15  ;;  %v7413_v52 = vld [vmem:[#allocation2 + $0x590] sm:$0xff] }
 0x4f1   :  { %12122 = vst [vmem:[#allocation262_spill] sm:$0xff] %v9943_v51  ;;  %v9949_v60 = vmul.f32 %v7413_v52, %v9044_v15  ;;  %v7414_v31 = vld [vmem:[#allocation2 + $0x5b0] sm:$0xff] }
 0x4f2   :  { %12123 = vst [vmem:[#allocation263_spill] sm:$0xff] %v9946_v4  ;;  %v9952_v36 = vmul.f32 %v7414_v31, %v9044_v15  ;;  %v7415_v33 = vld [vmem:[#allocation2 + $0x5d0] sm:$0xff] }
 0x4f3   :  { %12124 = vst [vmem:[#allocation264_spill] sm:$0xff] %v9949_v60  ;;  %v9955_v11 = vmul.f32 %v7415_v33, %v9044_v15  ;;  %v7416_v19 = vld [vmem:[#allocation2 + $0x5f0] sm:$0xff] }
 0x4f4   :  { %12125 = vst [vmem:[#allocation265_spill] sm:$0xff] %v9952_v36  ;;  %v9958_v8 = vmul.f32 %v7416_v19, %v9044_v15  ;;  %v7417_v51 = vld [vmem:[#allocation2 + $0x610] sm:$0xff] }
 0x4f5   :  { %12126 = vst [vmem:[#allocation266_spill] sm:$0xff] %v9955_v11  ;;  %v9961_v14 = vmul.f32 %v7417_v51, %v9044_v15  ;;  %v7418_v4 = vld [vmem:[#allocation2 + $0x630] sm:$0xff] }
 0x4f6   :  { %12127 = vst [vmem:[#allocation267_spill] sm:$0xff] %v9958_v8  ;;  %v9964_v52 = vmul.f32 %v7418_v4, %v9044_v15  ;;  %v7419_v60 = vld [vmem:[#allocation2 + $0x650] sm:$0xff] }
 0x4f7   :  { %12128 = vst [vmem:[#allocation268_spill] sm:$0xff] %v9961_v14  ;;  %v9967_v31 = vmul.f32 %v7419_v60, %v9044_v15  ;;  %v7420_v36 = vld [vmem:[#allocation2 + $0x670] sm:$0xff] }
 0x4f8   :  { %12129 = vst [vmem:[#allocation269_spill] sm:$0xff] %v9964_v52  ;;  %v9970_v33 = vmul.f32 %v7420_v36, %v9044_v15  ;;  %v7421_v11 = vld [vmem:[#allocation2 + $0x690] sm:$0xff] }
 0x4f9   :  { %12130 = vst [vmem:[#allocation270_spill] sm:$0xff] %v9967_v31  ;;  %v9973_v19 = vmul.f32 %v7421_v11, %v9044_v15  ;;  %v7422_v8 = vld [vmem:[#allocation2 + $0x6b0] sm:$0xff] }
 0x4fa   :  { %12131 = vst [vmem:[#allocation271_spill] sm:$0xff] %v9970_v33  ;;  %v9976_v51 = vmul.f32 %v7422_v8, %v9044_v15  ;;  %v7423_v14 = vld [vmem:[#allocation2 + $0x6d0] sm:$0xff] }
 0x4fb   :  { %12132 = vst [vmem:[#allocation272_spill] sm:$0xff] %v9973_v19  ;;  %v9979_v4 = vmul.f32 %v7423_v14, %v9044_v15  ;;  %v7424_v52 = vld [vmem:[#allocation2 + $0x6f0] sm:$0xff] }
 0x4fc   :  { %12133 = vst [vmem:[#allocation273_spill] sm:$0xff] %v9976_v51  ;;  %v9982_v60 = vmul.f32 %v7424_v52, %v9044_v15  ;;  %v7425_v31 = vld [vmem:[#allocation2 + $0x710] sm:$0xff] }
 0x4fd   :  { %12134 = vst [vmem:[#allocation274_spill] sm:$0xff] %v9979_v4  ;;  %v9985_v36 = vmul.f32 %v7425_v31, %v9044_v15  ;;  %v7426_v33 = vld [vmem:[#allocation2 + $0x730] sm:$0xff] }
 0x4fe   :  { %12135 = vst [vmem:[#allocation275_spill] sm:$0xff] %v9982_v60  ;;  %v9988_v11 = vmul.f32 %v7426_v33, %v9044_v15  ;;  %v7427_v19 = vld [vmem:[#allocation2 + $0x750] sm:$0xff] }
 0x4ff   :  { %12136 = vst [vmem:[#allocation276_spill] sm:$0xff] %v9985_v36  ;;  %v9991_v8 = vmul.f32 %v7427_v19, %v9044_v15  ;;  %v7428_v51 = vld [vmem:[#allocation2 + $0x770] sm:$0xff] }
 0x500   :  { %12137 = vst [vmem:[#allocation277_spill] sm:$0xff] %v9988_v11  ;;  %v9994_v14 = vmul.f32 %v7428_v51, %v9044_v15  ;;  %v7429_v4 = vld [vmem:[#allocation2 + $0x790] sm:$0xff] }
 0x501   :  { %12138 = vst [vmem:[#allocation278_spill] sm:$0xff] %v9991_v8  ;;  %v9997_v52 = vmul.f32 %v7429_v4, %v9044_v15  ;;  %v7430_v60 = vld [vmem:[#allocation2 + $0x7b0] sm:$0xff] }
 0x502   :  { %12139 = vst [vmem:[#allocation279_spill] sm:$0xff] %v9994_v14  ;;  %v10000_v31 = vmul.f32 %v7430_v60, %v9044_v15  ;;  %v7431_v36 = vld [vmem:[#allocation2 + $0x7d0] sm:$0xff] }
 0x503   :  { %12140 = vst [vmem:[#allocation280_spill] sm:$0xff] %v9997_v52  ;;  %v10003_v33 = vmul.f32 %v7431_v36, %v9044_v15  ;;  %v7432_v11 = vld [vmem:[#allocation2 + $0x7f0] sm:$0xff] }
 0x504   :  { %12141 = vst [vmem:[#allocation281_spill] sm:$0xff] %v10000_v31  ;;  %v10006_v19 = vmul.f32 %v7432_v11, %v9044_v15  ;;  %v7433_v8 = vld [vmem:[#allocation2 + $0x810] sm:$0xff] }
 0x505   :  { %12142 = vst [vmem:[#allocation282_spill] sm:$0xff] %v10003_v33  ;;  %v10009_v51 = vmul.f32 %v7433_v8, %v9044_v15  ;;  %v7434_v14 = vld [vmem:[#allocation2 + $0x830] sm:$0xff] }
 0x506   :  { %12143 = vst [vmem:[#allocation283_spill] sm:$0xff] %v10006_v19  ;;  %v10012_v4 = vmul.f32 %v7434_v14, %v9044_v15  ;;  %v7435_v52 = vld [vmem:[#allocation2 + $0x850] sm:$0xff] }
 0x507   :  { %12144 = vst [vmem:[#allocation284_spill] sm:$0xff] %v10009_v51  ;;  %v10015_v60 = vmul.f32 %v7435_v52, %v9044_v15  ;;  %v7436_v31 = vld [vmem:[#allocation2 + $0x870] sm:$0xff] }
 0x508   :  { %12145 = vst [vmem:[#allocation285_spill] sm:$0xff] %v10012_v4  ;;  %v10018_v36 = vmul.f32 %v7436_v31, %v9044_v15  ;;  %v7437_v33 = vld [vmem:[#allocation2 + $0x890] sm:$0xff] }
 0x509   :  { %12146 = vst [vmem:[#allocation286_spill] sm:$0xff] %v10015_v60  ;;  %v10021_v11 = vmul.f32 %v7437_v33, %v9044_v15  ;;  %v7438_v19 = vld [vmem:[#allocation2 + $0x8b0] sm:$0xff] }
 0x50a   :  { %12147 = vst [vmem:[#allocation287_spill] sm:$0xff] %v10018_v36  ;;  %v10024_v8 = vmul.f32 %v7438_v19, %v9044_v15  ;;  %v7439_v51 = vld [vmem:[#allocation2 + $0x8d0] sm:$0xff] }
 0x50b   :  { %12148 = vst [vmem:[#allocation288_spill] sm:$0xff] %v10021_v11  ;;  %v10027_v14 = vmul.f32 %v7439_v51, %v9044_v15  ;;  %v7440_v4 = vld [vmem:[#allocation2 + $0x8f0] sm:$0xff] }
 0x50c   :  { %12149 = vst [vmem:[#allocation289_spill] sm:$0xff] %v10024_v8  ;;  %v10030_v52 = vmul.f32 %v7440_v4, %v9044_v15  ;;  %v7441_v60 = vld [vmem:[#allocation2 + $0x910] sm:$0xff] }
 0x50d   :  { %12150 = vst [vmem:[#allocation290_spill] sm:$0xff] %v10027_v14  ;;  %v10033_v31 = vmul.f32 %v7441_v60, %v9044_v15  ;;  %v7442_v36 = vld [vmem:[#allocation2 + $0x930] sm:$0xff] }
 0x50e   :  { %12151 = vst [vmem:[#allocation291_spill] sm:$0xff] %v10030_v52  ;;  %v10036_v33 = vmul.f32 %v7442_v36, %v9044_v15  ;;  %v7443_v11 = vld [vmem:[#allocation2 + $0x950] sm:$0xff] }
 0x50f   :  { %12152 = vst [vmem:[#allocation292_spill] sm:$0xff] %v10033_v31  ;;  %v10039_v19 = vmul.f32 %v7443_v11, %v9044_v15  ;;  %v7444_v8 = vld [vmem:[#allocation2 + $0x970] sm:$0xff] }
 0x510   :  { %12153 = vst [vmem:[#allocation293_spill] sm:$0xff] %v10036_v33  ;;  %v10042_v51 = vmul.f32 %v7444_v8, %v9044_v15  ;;  %v7445_v14 = vld [vmem:[#allocation2 + $0x990] sm:$0xff] }
 0x511   :  { %12154 = vst [vmem:[#allocation294_spill] sm:$0xff] %v10039_v19  ;;  %v10045_v4 = vmul.f32 %v7445_v14, %v9044_v15  ;;  %v7446_v52 = vld [vmem:[#allocation2 + $0x9b0] sm:$0xff] }
 0x512   :  { %12155 = vst [vmem:[#allocation295_spill] sm:$0xff] %v10042_v51  ;;  %v10048_v60 = vmul.f32 %v7446_v52, %v9044_v15  ;;  %v7447_v31 = vld [vmem:[#allocation2 + $0x9d0] sm:$0xff] }
 0x513   :  { %12156 = vst [vmem:[#allocation296_spill] sm:$0xff] %v10045_v4  ;;  %v10051_v36 = vmul.f32 %v7447_v31, %v9044_v15  ;;  %v7448_v33 = vld [vmem:[#allocation2 + $0x9f0] sm:$0xff] }
 0x514   :  { %12157 = vst [vmem:[#allocation297_spill] sm:$0xff] %v10048_v60  ;;  %v10054_v11 = vmul.f32 %v7448_v33, %v9044_v15  ;;  %v7449_v19 = vld [vmem:[#allocation2 + $0xa10] sm:$0xff] }
 0x515   :  { %12158 = vst [vmem:[#allocation298_spill] sm:$0xff] %v10051_v36  ;;  %v10057_v8 = vmul.f32 %v7449_v19, %v9044_v15  ;;  %v7450_v51 = vld [vmem:[#allocation2 + $0xa30] sm:$0xff] }
 0x516   :  { %12159 = vst [vmem:[#allocation299_spill] sm:$0xff] %v10054_v11  ;;  %v10060_v14 = vmul.f32 %v7450_v51, %v9044_v15  ;;  %v7451_v4 = vld [vmem:[#allocation2 + $0xa50] sm:$0xff] }
 0x517   :  { %12160 = vst [vmem:[#allocation300_spill] sm:$0xff] %v10057_v8  ;;  %v10063_v52 = vmul.f32 %v7451_v4, %v9044_v15  ;;  %v7452_v60 = vld [vmem:[#allocation2 + $0xa70] sm:$0xff] }
 0x518   :  { %12161 = vst [vmem:[#allocation301_spill] sm:$0xff] %v10060_v14  ;;  %v10066_v31 = vmul.f32 %v7452_v60, %v9044_v15  ;;  %v7453_v36 = vld [vmem:[#allocation2 + $0xa90] sm:$0xff] }
 0x519   :  { %12162 = vst [vmem:[#allocation302_spill] sm:$0xff] %v10063_v52  ;;  %v10069_v33 = vmul.f32 %v7453_v36, %v9044_v15  ;;  %v7454_v11 = vld [vmem:[#allocation2 + $0xab0] sm:$0xff] }
 0x51a   :  { %12163 = vst [vmem:[#allocation303_spill] sm:$0xff] %v10066_v31  ;;  %v10072_v19 = vmul.f32 %v7454_v11, %v9044_v15  ;;  %v7455_v8 = vld [vmem:[#allocation2 + $0xad0] sm:$0xff] }
 0x51b   :  { %12164 = vst [vmem:[#allocation304_spill] sm:$0xff] %v10069_v33  ;;  %v10075_v51 = vmul.f32 %v7455_v8, %v9044_v15  ;;  %v7456_v14 = vld [vmem:[#allocation2 + $0xaf0] sm:$0xff] }
 0x51c   :  { %12165 = vst [vmem:[#allocation305_spill] sm:$0xff] %v10072_v19  ;;  %v10078_v4 = vmul.f32 %v7456_v14, %v9044_v15  ;;  %v7457_v52 = vld [vmem:[#allocation2 + $0xb10] sm:$0xff] }
 0x51d   :  { %12166 = vst [vmem:[#allocation306_spill] sm:$0xff] %v10075_v51  ;;  %v10081_v60 = vmul.f32 %v7457_v52, %v9044_v15  ;;  %v7458_v31 = vld [vmem:[#allocation2 + $0xb30] sm:$0xff] }
 0x51e   :  { %12167 = vst [vmem:[#allocation307_spill] sm:$0xff] %v10078_v4  ;;  %v10084_v36 = vmul.f32 %v7458_v31, %v9044_v15  ;;  %v7459_v33 = vld [vmem:[#allocation2 + $0xb50] sm:$0xff] }
 0x51f   :  { %12168 = vst [vmem:[#allocation308_spill] sm:$0xff] %v10081_v60  ;;  %v10087_v11 = vmul.f32 %v7459_v33, %v9044_v15  ;;  %v7460_v19 = vld [vmem:[#allocation2 + $0xb70] sm:$0xff] }
 0x520   :  { %12169 = vst [vmem:[#allocation309_spill] sm:$0xff] %v10084_v36  ;;  %v10090_v8 = vmul.f32 %v7460_v19, %v9044_v15  ;;  %v7461_v51 = vld [vmem:[#allocation2 + $0xb90] sm:$0xff] }
 0x521   :  { %12170 = vst [vmem:[#allocation310_spill] sm:$0xff] %v10087_v11  ;;  %v10093_v14 = vmul.f32 %v7461_v51, %v9044_v15  ;;  %v7462_v4 = vld [vmem:[#allocation2 + $0xbb0] sm:$0xff] }
 0x522   :  { %12171 = vst [vmem:[#allocation311_spill] sm:$0xff] %v10090_v8  ;;  %v10096_v52 = vmul.f32 %v7462_v4, %v9044_v15  ;;  %v7463_v60 = vld [vmem:[#allocation2 + $0xbd0] sm:$0xff] }
 0x523   :  { %12172 = vst [vmem:[#allocation312_spill] sm:$0xff] %v10093_v14  ;;  %v10099_v31 = vmul.f32 %v7463_v60, %v9044_v15  ;;  %v7464_v36 = vld [vmem:[#allocation2 + $0xbf0] sm:$0xff] }
 0x524   :  { %12173 = vst [vmem:[#allocation313_spill] sm:$0xff] %v10096_v52  ;;  %v10102_v33 = vmul.f32 %v7464_v36, %v9044_v15  ;;  %v7465_v11 = vld [vmem:[#allocation2 + $0xc10] sm:$0xff] }
 0x525   :  { %12174 = vst [vmem:[#allocation314_spill] sm:$0xff] %v10099_v31  ;;  %v10105_v19 = vmul.f32 %v7465_v11, %v9044_v15  ;;  %v7466_v8 = vld [vmem:[#allocation2 + $0xc30] sm:$0xff] }
 0x526   :  { %12175 = vst [vmem:[#allocation315_spill] sm:$0xff] %v10102_v33  ;;  %v10108_v51 = vmul.f32 %v7466_v8, %v9044_v15  ;;  %v7467_v14 = vld [vmem:[#allocation2 + $0xc50] sm:$0xff] }
 0x527   :  { %12176 = vst [vmem:[#allocation316_spill] sm:$0xff] %v10105_v19  ;;  %v10111_v4 = vmul.f32 %v7467_v14, %v9044_v15  ;;  %v7468_v52 = vld [vmem:[#allocation2 + $0xc70] sm:$0xff] }
 0x528   :  { %12177 = vst [vmem:[#allocation317_spill] sm:$0xff] %v10108_v51  ;;  %v10114_v60 = vmul.f32 %v7468_v52, %v9044_v15  ;;  %v7469_v31 = vld [vmem:[#allocation2 + $0xc90] sm:$0xff] }
 0x529   :  { %12178 = vst [vmem:[#allocation318_spill] sm:$0xff] %v10111_v4  ;;  %v10117_v36 = vmul.f32 %v7469_v31, %v9044_v15  ;;  %v7470_v33 = vld [vmem:[#allocation2 + $0xcb0] sm:$0xff] }
 0x52a   :  { %12179 = vst [vmem:[#allocation319_spill] sm:$0xff] %v10114_v60  ;;  %v10120_v11 = vmul.f32 %v7470_v33, %v9044_v15  ;;  %v7471_v19 = vld [vmem:[#allocation2 + $0xcd0] sm:$0xff] }
 0x52b   :  { %12180 = vst [vmem:[#allocation320_spill] sm:$0xff] %v10117_v36  ;;  %v10123_v8 = vmul.f32 %v7471_v19, %v9044_v15  ;;  %v7472_v51 = vld [vmem:[#allocation2 + $0xcf0] sm:$0xff] }
 0x52c   :  { %12181 = vst [vmem:[#allocation321_spill] sm:$0xff] %v10120_v11  ;;  %v10126_v14 = vmul.f32 %v7472_v51, %v9044_v15  ;;  %v7473_v4 = vld [vmem:[#allocation2 + $0xd10] sm:$0xff] }
 0x52d   :  { %12182 = vst [vmem:[#allocation322_spill] sm:$0xff] %v10123_v8  ;;  %v10129_v52 = vmul.f32 %v7473_v4, %v9044_v15  ;;  %v7474_v60 = vld [vmem:[#allocation2 + $0xd30] sm:$0xff] }
 0x52e   :  { %12183 = vst [vmem:[#allocation323_spill] sm:$0xff] %v10126_v14  ;;  %v10132_v31 = vmul.f32 %v7474_v60, %v9044_v15  ;;  %v7475_v36 = vld [vmem:[#allocation2 + $0xd50] sm:$0xff] }
 0x52f   :  { %12184 = vst [vmem:[#allocation324_spill] sm:$0xff] %v10129_v52  ;;  %v10135_v33 = vmul.f32 %v7475_v36, %v9044_v15  ;;  %v7476_v11 = vld [vmem:[#allocation2 + $0xd70] sm:$0xff] }
 0x530   :  { %12185 = vst [vmem:[#allocation325_spill] sm:$0xff] %v10132_v31  ;;  %v10138_v19 = vmul.f32 %v7476_v11, %v9044_v15  ;;  %v7477_v8 = vld [vmem:[#allocation2 + $0xd90] sm:$0xff] }
 0x531   :  { %12186 = vst [vmem:[#allocation326_spill] sm:$0xff] %v10135_v33  ;;  %v10141_v51 = vmul.f32 %v7477_v8, %v9044_v15  ;;  %v7478_v14 = vld [vmem:[#allocation2 + $0xdb0] sm:$0xff] }
 0x532   :  { %12187 = vst [vmem:[#allocation327_spill] sm:$0xff] %v10138_v19  ;;  %v10144_v4 = vmul.f32 %v7478_v14, %v9044_v15  ;;  %v7479_v52 = vld [vmem:[#allocation2 + $0xdd0] sm:$0xff] }
 0x533   :  { %12188 = vst [vmem:[#allocation328_spill] sm:$0xff] %v10141_v51  ;;  %v10147_v60 = vmul.f32 %v7479_v52, %v9044_v15  ;;  %v7480_v31 = vld [vmem:[#allocation2 + $0xdf0] sm:$0xff] }
 0x534   :  { %12189 = vst [vmem:[#allocation329_spill] sm:$0xff] %v10144_v4  ;;  %v10150_v36 = vmul.f32 %v7480_v31, %v9044_v15  ;;  %v7481_v33 = vld [vmem:[#allocation2 + $0xe10] sm:$0xff] }
 0x535   :  { %12190 = vst [vmem:[#allocation330_spill] sm:$0xff] %v10147_v60  ;;  %v10153_v11 = vmul.f32 %v7481_v33, %v9044_v15  ;;  %v7482_v19 = vld [vmem:[#allocation2 + $0xe30] sm:$0xff] }
 0x536   :  { %12191 = vst [vmem:[#allocation331_spill] sm:$0xff] %v10150_v36  ;;  %v10156_v8 = vmul.f32 %v7482_v19, %v9044_v15  ;;  %v7483_v51 = vld [vmem:[#allocation2 + $0xe50] sm:$0xff] }
 0x537   :  { %12192 = vst [vmem:[#allocation332_spill] sm:$0xff] %v10153_v11  ;;  %v10159_v14 = vmul.f32 %v7483_v51, %v9044_v15  ;;  %v7484_v4 = vld [vmem:[#allocation2 + $0xe70] sm:$0xff] }
 0x538   :  { %12193 = vst [vmem:[#allocation333_spill] sm:$0xff] %v10156_v8  ;;  %v10162_v52 = vmul.f32 %v7484_v4, %v9044_v15  ;;  %v7485_v60 = vld [vmem:[#allocation2 + $0xe90] sm:$0xff] }
 0x539   :  { %12194 = vst [vmem:[#allocation334_spill] sm:$0xff] %v10159_v14  ;;  %v10165_v31 = vmul.f32 %v7485_v60, %v9044_v15  ;;  %v7486_v36 = vld [vmem:[#allocation2 + $0xeb0] sm:$0xff] }
 0x53a   :  { %12195 = vst [vmem:[#allocation335_spill] sm:$0xff] %v10162_v52  ;;  %v10168_v33 = vmul.f32 %v7486_v36, %v9044_v15  ;;  %v7487_v11 = vld [vmem:[#allocation2 + $0xed0] sm:$0xff] }
 0x53b   :  { %12196 = vst [vmem:[#allocation336_spill] sm:$0xff] %v10165_v31  ;;  %v10171_v19 = vmul.f32 %v7487_v11, %v9044_v15  ;;  %v7488_v8 = vld [vmem:[#allocation2 + $0xef0] sm:$0xff] }
 0x53c   :  { %12197 = vst [vmem:[#allocation337_spill] sm:$0xff] %v10168_v33  ;;  %v10174_v51 = vmul.f32 %v7488_v8, %v9044_v15  ;;  %v7489_v14 = vld [vmem:[#allocation2 + $0xf10] sm:$0xff] }
 0x53d   :  { %12198 = vst [vmem:[#allocation338_spill] sm:$0xff] %v10171_v19  ;;  %v10177_v4 = vmul.f32 %v7489_v14, %v9044_v15  ;;  %v7490_v52 = vld [vmem:[#allocation2 + $0xf30] sm:$0xff] }
 0x53e   :  { %12199 = vst [vmem:[#allocation339_spill] sm:$0xff] %v10174_v51  ;;  %v10180_v60 = vmul.f32 %v7490_v52, %v9044_v15  ;;  %v7491_v31 = vld [vmem:[#allocation2 + $0xf50] sm:$0xff] }
 0x53f   :  { %12200 = vst [vmem:[#allocation340_spill] sm:$0xff] %v10177_v4  ;;  %v10183_v36 = vmul.f32 %v7491_v31, %v9044_v15  ;;  %v7492_v33 = vld [vmem:[#allocation2 + $0xf70] sm:$0xff] }
 0x540   :  { %12201 = vst [vmem:[#allocation341_spill] sm:$0xff] %v10180_v60  ;;  %v10186_v11 = vmul.f32 %v7492_v33, %v9044_v15  ;;  %v7493_v19 = vld [vmem:[#allocation2 + $0xf90] sm:$0xff] }
 0x541   :  { %12202 = vst [vmem:[#allocation342_spill] sm:$0xff] %v10183_v36  ;;  %v10189_v8 = vmul.f32 %v7493_v19, %v9044_v15  ;;  %v7494_v51 = vld [vmem:[#allocation2 + $0xfb0] sm:$0xff]  ;;  %v7497_v36 = vld [vmem:[#allocation2 + $0x18] sm:$0xff] }
 0x542   :  { %12203 = vst [vmem:[#allocation343_spill] sm:$0xff] %v10186_v11  ;;  %v10192_v14 = vmul.f32 %v7494_v51, %v9044_v15  ;;  %v7495_v4 = vld [vmem:[#allocation2 + $0xfd0] sm:$0xff]  ;;  %v10201_v33 = vmul.f32 %v7497_v36, %v9046_v16  ;;  %v7498_v11 = vld [vmem:[#allocation2 + $0x38] sm:$0xff] }
 0x543   :  { %12204 = vst [vmem:[#allocation344_spill] sm:$0xff] %v10189_v8  ;;  %v10195_v52 = vmul.f32 %v7495_v4, %v9044_v15  ;;  %v7496_v60 = vld [vmem:[#allocation2 + $0xff0] sm:$0xff]  ;;  %v10204_v19 = vmul.f32 %v7498_v11, %v9046_v16  ;;  %v7499_v8 = vld [vmem:[#allocation2 + $0x58] sm:$0xff] }
 0x544   :  { %12205 = vst [vmem:[#allocation345_spill] sm:$0xff] %v10192_v14  ;;  %v10198_v31 = vmul.f32 %v7496_v60, %v9044_v15  ;;  %12208 = vst [vmem:[#allocation348_spill] sm:$0xff] %v10201_v33  ;;  %v10207_v51 = vmul.f32 %v7499_v8, %v9046_v16  ;;  %v7500_v14 = vld [vmem:[#allocation2 + $0x78] sm:$0xff] }
 0x545   :  { %12206 = vst [vmem:[#allocation346_spill] sm:$0xff] %v10195_v52  ;;  %12209 = vst [vmem:[#allocation349_spill] sm:$0xff] %v10204_v19  ;;  %v10210_v4 = vmul.f32 %v7500_v14, %v9046_v16  ;;  %v7501_v52 = vld [vmem:[#allocation2 + $0x98] sm:$0xff] }
 0x546   :  { %12207 = vst [vmem:[#allocation347_spill] sm:$0xff] %v10198_v31  ;;  %12210 = vst [vmem:[#allocation350_spill] sm:$0xff] %v10207_v51  ;;  %v10213_v15 = vmul.f32 %v7501_v52, %v9046_v16  ;;  %v7502_v60 = vld [vmem:[#allocation2 + $0xb8] sm:$0xff]  ;;  %v12394_v31 = vld [vmem:[#allocation144_spill] sm:$0xff] }
 0x547   :  { %12211 = vst [vmem:[#allocation351_spill] sm:$0xff] %v10210_v4  ;;  %v10216_v36 = vmul.f32 %v7502_v60, %v9046_v16  ;;  %v7503_v33 = vld [vmem:[#allocation2 + $0xd8] sm:$0xff] }
 0x548   :  { %12212 = vst [vmem:[#allocation352_spill] sm:$0xff] %v10213_v15  ;;  %v10219_v11 = vmul.f32 %v7503_v33, %v9046_v16  ;;  %v7504_v19 = vld [vmem:[#allocation2 + $0xf8] sm:$0xff] }
 0x549   :  { %12213 = vst [vmem:[#allocation353_spill] sm:$0xff] %v10216_v36  ;;  %v10222_v8 = vmul.f32 %v7504_v19, %v9046_v16  ;;  %v7505_v51 = vld [vmem:[#allocation2 + $0x118] sm:$0xff] }
 0x54a   :  { %12214 = vst [vmem:[#allocation354_spill] sm:$0xff] %v10219_v11  ;;  %v10225_v14 = vmul.f32 %v7505_v51, %v9046_v16  ;;  %v7506_v4 = vld [vmem:[#allocation2 + $0x138] sm:$0xff] }
 0x54b   :  { %12215 = vst [vmem:[#allocation355_spill] sm:$0xff] %v10222_v8  ;;  %v10228_v52 = vmul.f32 %v7506_v4, %v9046_v16  ;;  %v7507_v15 = vld [vmem:[#allocation2 + $0x158] sm:$0xff] }
 0x54c   :  { %12216 = vst [vmem:[#allocation356_spill] sm:$0xff] %v10225_v14  ;;  %v10231_v60 = vmul.f32 %v7507_v15, %v9046_v16  ;;  %v7508_v36 = vld [vmem:[#allocation2 + $0x178] sm:$0xff] }
 0x54d   :  { %12217 = vst [vmem:[#allocation357_spill] sm:$0xff] %v10228_v52  ;;  %v10234_v33 = vmul.f32 %v7508_v36, %v9046_v16  ;;  %v7509_v11 = vld [vmem:[#allocation2 + $0x198] sm:$0xff] }
 0x54e   :  { %12218 = vst [vmem:[#allocation358_spill] sm:$0xff] %v10231_v60  ;;  %v10237_v19 = vmul.f32 %v7509_v11, %v9046_v16  ;;  %v7510_v8 = vld [vmem:[#allocation2 + $0x1b8] sm:$0xff] }
 0x54f   :  { %12219 = vst [vmem:[#allocation359_spill] sm:$0xff] %v10234_v33  ;;  %v10240_v51 = vmul.f32 %v7510_v8, %v9046_v16  ;;  %v7511_v14 = vld [vmem:[#allocation2 + $0x1d8] sm:$0xff] }
 0x550   :  { %12220 = vst [vmem:[#allocation360_spill] sm:$0xff] %v10237_v19  ;;  %v10243_v4 = vmul.f32 %v7511_v14, %v9046_v16  ;;  %v7512_v52 = vld [vmem:[#allocation2 + $0x1f8] sm:$0xff] }
 0x551   :  { %12221 = vst [vmem:[#allocation361_spill] sm:$0xff] %v10240_v51  ;;  %v10246_v15 = vmul.f32 %v7512_v52, %v9046_v16  ;;  %v7513_v60 = vld [vmem:[#allocation2 + $0x218] sm:$0xff] }
 0x552   :  { %12222 = vst [vmem:[#allocation362_spill] sm:$0xff] %v10243_v4  ;;  %v10249_v36 = vmul.f32 %v7513_v60, %v9046_v16  ;;  %v7514_v33 = vld [vmem:[#allocation2 + $0x238] sm:$0xff] }
 0x553   :  { %12223 = vst [vmem:[#allocation363_spill] sm:$0xff] %v10246_v15  ;;  %v10252_v11 = vmul.f32 %v7514_v33, %v9046_v16  ;;  %v7515_v19 = vld [vmem:[#allocation2 + $0x258] sm:$0xff] }
 0x554   :  { %12224 = vst [vmem:[#allocation364_spill] sm:$0xff] %v10249_v36  ;;  %v10255_v8 = vmul.f32 %v7515_v19, %v9046_v16  ;;  %v7516_v51 = vld [vmem:[#allocation2 + $0x278] sm:$0xff] }
 0x555   :  { %12225 = vst [vmem:[#allocation365_spill] sm:$0xff] %v10252_v11  ;;  %v10258_v14 = vmul.f32 %v7516_v51, %v9046_v16  ;;  %v7517_v4 = vld [vmem:[#allocation2 + $0x298] sm:$0xff] }
 0x556   :  { %12226 = vst [vmem:[#allocation366_spill] sm:$0xff] %v10255_v8  ;;  %v10261_v52 = vmul.f32 %v7517_v4, %v9046_v16  ;;  %v7518_v15 = vld [vmem:[#allocation2 + $0x2b8] sm:$0xff] }
 0x557   :  { %12227 = vst [vmem:[#allocation367_spill] sm:$0xff] %v10258_v14  ;;  %v10264_v60 = vmul.f32 %v7518_v15, %v9046_v16  ;;  %v7519_v36 = vld [vmem:[#allocation2 + $0x2d8] sm:$0xff] }
 0x558   :  { %12228 = vst [vmem:[#allocation368_spill] sm:$0xff] %v10261_v52  ;;  %v10267_v33 = vmul.f32 %v7519_v36, %v9046_v16  ;;  %v7520_v11 = vld [vmem:[#allocation2 + $0x2f8] sm:$0xff] }
 0x559   :  { %12229 = vst [vmem:[#allocation369_spill] sm:$0xff] %v10264_v60  ;;  %v10270_v19 = vmul.f32 %v7520_v11, %v9046_v16  ;;  %v7521_v8 = vld [vmem:[#allocation2 + $0x318] sm:$0xff] }
 0x55a   :  { %12230 = vst [vmem:[#allocation370_spill] sm:$0xff] %v10267_v33  ;;  %v10273_v51 = vmul.f32 %v7521_v8, %v9046_v16  ;;  %v7522_v14 = vld [vmem:[#allocation2 + $0x338] sm:$0xff] }
 0x55b   :  { %12231 = vst [vmem:[#allocation371_spill] sm:$0xff] %v10270_v19  ;;  %v10276_v4 = vmul.f32 %v7522_v14, %v9046_v16  ;;  %v7523_v52 = vld [vmem:[#allocation2 + $0x358] sm:$0xff] }
 0x55c   :  { %12232 = vst [vmem:[#allocation372_spill] sm:$0xff] %v10273_v51  ;;  %v10279_v15 = vmul.f32 %v7523_v52, %v9046_v16  ;;  %v7524_v60 = vld [vmem:[#allocation2 + $0x378] sm:$0xff] }
 0x55d   :  { %12233 = vst [vmem:[#allocation373_spill] sm:$0xff] %v10276_v4  ;;  %v10282_v36 = vmul.f32 %v7524_v60, %v9046_v16  ;;  %v7525_v33 = vld [vmem:[#allocation2 + $0x398] sm:$0xff] }
 0x55e   :  { %12234 = vst [vmem:[#allocation374_spill] sm:$0xff] %v10279_v15  ;;  %v10285_v11 = vmul.f32 %v7525_v33, %v9046_v16  ;;  %v7526_v19 = vld [vmem:[#allocation2 + $0x3b8] sm:$0xff] }
 0x55f   :  { %12235 = vst [vmem:[#allocation375_spill] sm:$0xff] %v10282_v36  ;;  %v10288_v8 = vmul.f32 %v7526_v19, %v9046_v16  ;;  %v7527_v51 = vld [vmem:[#allocation2 + $0x3d8] sm:$0xff] }
 0x560   :  { %12236 = vst [vmem:[#allocation376_spill] sm:$0xff] %v10285_v11  ;;  %v10291_v14 = vmul.f32 %v7527_v51, %v9046_v16  ;;  %v7528_v4 = vld [vmem:[#allocation2 + $0x3f8] sm:$0xff] }
 0x561   :  { %12237 = vst [vmem:[#allocation377_spill] sm:$0xff] %v10288_v8  ;;  %v10294_v52 = vmul.f32 %v7528_v4, %v9046_v16  ;;  %v7529_v15 = vld [vmem:[#allocation2 + $0x418] sm:$0xff] }
 0x562   :  { %12238 = vst [vmem:[#allocation378_spill] sm:$0xff] %v10291_v14  ;;  %v10297_v60 = vmul.f32 %v7529_v15, %v9046_v16  ;;  %v7530_v36 = vld [vmem:[#allocation2 + $0x438] sm:$0xff] }
 0x563   :  { %12239 = vst [vmem:[#allocation379_spill] sm:$0xff] %v10294_v52  ;;  %v10300_v33 = vmul.f32 %v7530_v36, %v9046_v16  ;;  %v7531_v11 = vld [vmem:[#allocation2 + $0x458] sm:$0xff] }
 0x564   :  { %12240 = vst [vmem:[#allocation380_spill] sm:$0xff] %v10297_v60  ;;  %v10303_v19 = vmul.f32 %v7531_v11, %v9046_v16  ;;  %v7532_v8 = vld [vmem:[#allocation2 + $0x478] sm:$0xff] }
 0x565   :  { %12241 = vst [vmem:[#allocation381_spill] sm:$0xff] %v10300_v33  ;;  %v10306_v51 = vmul.f32 %v7532_v8, %v9046_v16  ;;  %v7533_v14 = vld [vmem:[#allocation2 + $0x498] sm:$0xff] }
 0x566   :  { %12242 = vst [vmem:[#allocation382_spill] sm:$0xff] %v10303_v19  ;;  %v10309_v4 = vmul.f32 %v7533_v14, %v9046_v16  ;;  %v7534_v52 = vld [vmem:[#allocation2 + $0x4b8] sm:$0xff] }
 0x567   :  { %12243 = vst [vmem:[#allocation383_spill] sm:$0xff] %v10306_v51  ;;  %v10312_v15 = vmul.f32 %v7534_v52, %v9046_v16  ;;  %v7535_v60 = vld [vmem:[#allocation2 + $0x4d8] sm:$0xff] }
 0x568   :  { %12244 = vst [vmem:[#allocation384_spill] sm:$0xff] %v10309_v4  ;;  %v10315_v36 = vmul.f32 %v7535_v60, %v9046_v16  ;;  %v7536_v33 = vld [vmem:[#allocation2 + $0x4f8] sm:$0xff] }
 0x569   :  { %12245 = vst [vmem:[#allocation385_spill] sm:$0xff] %v10312_v15  ;;  %v10318_v11 = vmul.f32 %v7536_v33, %v9046_v16  ;;  %v7537_v19 = vld [vmem:[#allocation2 + $0x518] sm:$0xff] }
 0x56a   :  { %12246 = vst [vmem:[#allocation386_spill] sm:$0xff] %v10315_v36  ;;  %v10321_v8 = vmul.f32 %v7537_v19, %v9046_v16  ;;  %v7538_v51 = vld [vmem:[#allocation2 + $0x538] sm:$0xff] }
 0x56b   :  { %12247 = vst [vmem:[#allocation387_spill] sm:$0xff] %v10318_v11  ;;  %v10324_v14 = vmul.f32 %v7538_v51, %v9046_v16  ;;  %v7539_v4 = vld [vmem:[#allocation2 + $0x558] sm:$0xff] }
 0x56c   :  { %12248 = vst [vmem:[#allocation388_spill] sm:$0xff] %v10321_v8  ;;  %v10327_v52 = vmul.f32 %v7539_v4, %v9046_v16  ;;  %v7540_v15 = vld [vmem:[#allocation2 + $0x578] sm:$0xff] }
 0x56d   :  { %12249 = vst [vmem:[#allocation389_spill] sm:$0xff] %v10324_v14  ;;  %v10330_v60 = vmul.f32 %v7540_v15, %v9046_v16  ;;  %v7541_v36 = vld [vmem:[#allocation2 + $0x598] sm:$0xff] }
 0x56e   :  { %12250 = vst [vmem:[#allocation390_spill] sm:$0xff] %v10327_v52  ;;  %v10333_v33 = vmul.f32 %v7541_v36, %v9046_v16  ;;  %v7542_v11 = vld [vmem:[#allocation2 + $0x5b8] sm:$0xff] }
 0x56f   :  { %12251 = vst [vmem:[#allocation391_spill] sm:$0xff] %v10330_v60  ;;  %v10336_v19 = vmul.f32 %v7542_v11, %v9046_v16  ;;  %v7543_v8 = vld [vmem:[#allocation2 + $0x5d8] sm:$0xff] }
 0x570   :  { %12252 = vst [vmem:[#allocation392_spill] sm:$0xff] %v10333_v33  ;;  %v10339_v51 = vmul.f32 %v7543_v8, %v9046_v16  ;;  %v7544_v14 = vld [vmem:[#allocation2 + $0x5f8] sm:$0xff] }
 0x571   :  { %12253 = vst [vmem:[#allocation393_spill] sm:$0xff] %v10336_v19  ;;  %v10342_v4 = vmul.f32 %v7544_v14, %v9046_v16  ;;  %v7545_v52 = vld [vmem:[#allocation2 + $0x618] sm:$0xff] }
 0x572   :  { %12254 = vst [vmem:[#allocation394_spill] sm:$0xff] %v10339_v51  ;;  %v10345_v15 = vmul.f32 %v7545_v52, %v9046_v16  ;;  %v7546_v60 = vld [vmem:[#allocation2 + $0x638] sm:$0xff] }
 0x573   :  { %12255 = vst [vmem:[#allocation395_spill] sm:$0xff] %v10342_v4  ;;  %v10348_v36 = vmul.f32 %v7546_v60, %v9046_v16  ;;  %v7547_v33 = vld [vmem:[#allocation2 + $0x658] sm:$0xff] }
 0x574   :  { %12256 = vst [vmem:[#allocation396_spill] sm:$0xff] %v10345_v15  ;;  %v10351_v11 = vmul.f32 %v7547_v33, %v9046_v16  ;;  %v7548_v19 = vld [vmem:[#allocation2 + $0x678] sm:$0xff] }
 0x575   :  { %12257 = vst [vmem:[#allocation397_spill] sm:$0xff] %v10348_v36  ;;  %v10354_v8 = vmul.f32 %v7548_v19, %v9046_v16  ;;  %v7549_v51 = vld [vmem:[#allocation2 + $0x698] sm:$0xff] }
 0x576   :  { %12258 = vst [vmem:[#allocation398_spill] sm:$0xff] %v10351_v11  ;;  %v10357_v14 = vmul.f32 %v7549_v51, %v9046_v16  ;;  %v7550_v4 = vld [vmem:[#allocation2 + $0x6b8] sm:$0xff] }
 0x577   :  { %12259 = vst [vmem:[#allocation399_spill] sm:$0xff] %v10354_v8  ;;  %v10360_v52 = vmul.f32 %v7550_v4, %v9046_v16  ;;  %v7551_v15 = vld [vmem:[#allocation2 + $0x6d8] sm:$0xff] }
 0x578   :  { %12260 = vst [vmem:[#allocation400_spill] sm:$0xff] %v10357_v14  ;;  %v10363_v60 = vmul.f32 %v7551_v15, %v9046_v16  ;;  %v7552_v36 = vld [vmem:[#allocation2 + $0x6f8] sm:$0xff] }
 0x579   :  { %12261 = vst [vmem:[#allocation401_spill] sm:$0xff] %v10360_v52  ;;  %v10366_v33 = vmul.f32 %v7552_v36, %v9046_v16  ;;  %v7553_v11 = vld [vmem:[#allocation2 + $0x718] sm:$0xff] }
 0x57a   :  { %12262 = vst [vmem:[#allocation402_spill] sm:$0xff] %v10363_v60  ;;  %v10369_v19 = vmul.f32 %v7553_v11, %v9046_v16  ;;  %v7554_v8 = vld [vmem:[#allocation2 + $0x738] sm:$0xff] }
 0x57b   :  { %12263 = vst [vmem:[#allocation403_spill] sm:$0xff] %v10366_v33  ;;  %v10372_v51 = vmul.f32 %v7554_v8, %v9046_v16  ;;  %v7555_v14 = vld [vmem:[#allocation2 + $0x758] sm:$0xff] }
 0x57c   :  { %12264 = vst [vmem:[#allocation404_spill] sm:$0xff] %v10369_v19  ;;  %v10375_v4 = vmul.f32 %v7555_v14, %v9046_v16  ;;  %v7556_v52 = vld [vmem:[#allocation2 + $0x778] sm:$0xff] }
 0x57d   :  { %12265 = vst [vmem:[#allocation405_spill] sm:$0xff] %v10372_v51  ;;  %v10378_v15 = vmul.f32 %v7556_v52, %v9046_v16  ;;  %v7557_v60 = vld [vmem:[#allocation2 + $0x798] sm:$0xff] }
 0x57e   :  { %12266 = vst [vmem:[#allocation406_spill] sm:$0xff] %v10375_v4  ;;  %v10381_v36 = vmul.f32 %v7557_v60, %v9046_v16  ;;  %v7558_v33 = vld [vmem:[#allocation2 + $0x7b8] sm:$0xff] }
 0x57f   :  { %12267 = vst [vmem:[#allocation407_spill] sm:$0xff] %v10378_v15  ;;  %v10384_v11 = vmul.f32 %v7558_v33, %v9046_v16  ;;  %v7559_v19 = vld [vmem:[#allocation2 + $0x7d8] sm:$0xff] }
 0x580   :  { %12268 = vst [vmem:[#allocation408_spill] sm:$0xff] %v10381_v36  ;;  %v10387_v8 = vmul.f32 %v7559_v19, %v9046_v16  ;;  %v7560_v51 = vld [vmem:[#allocation2 + $0x7f8] sm:$0xff] }
 0x581   :  { %12269 = vst [vmem:[#allocation409_spill] sm:$0xff] %v10384_v11  ;;  %v10390_v14 = vmul.f32 %v7560_v51, %v9046_v16  ;;  %v7561_v4 = vld [vmem:[#allocation2 + $0x818] sm:$0xff] }
 0x582   :  { %12270 = vst [vmem:[#allocation410_spill] sm:$0xff] %v10387_v8  ;;  %v10393_v52 = vmul.f32 %v7561_v4, %v9046_v16  ;;  %v7562_v15 = vld [vmem:[#allocation2 + $0x838] sm:$0xff] }
 0x583   :  { %12271 = vst [vmem:[#allocation411_spill] sm:$0xff] %v10390_v14  ;;  %v10396_v60 = vmul.f32 %v7562_v15, %v9046_v16  ;;  %v7563_v36 = vld [vmem:[#allocation2 + $0x858] sm:$0xff] }
 0x584   :  { %12272 = vst [vmem:[#allocation412_spill] sm:$0xff] %v10393_v52  ;;  %v10399_v33 = vmul.f32 %v7563_v36, %v9046_v16  ;;  %v7564_v11 = vld [vmem:[#allocation2 + $0x878] sm:$0xff] }
 0x585   :  { %12273 = vst [vmem:[#allocation413_spill] sm:$0xff] %v10396_v60  ;;  %v10402_v19 = vmul.f32 %v7564_v11, %v9046_v16  ;;  %v7565_v8 = vld [vmem:[#allocation2 + $0x898] sm:$0xff] }
 0x586   :  { %12274 = vst [vmem:[#allocation414_spill] sm:$0xff] %v10399_v33  ;;  %v10405_v51 = vmul.f32 %v7565_v8, %v9046_v16  ;;  %v7566_v14 = vld [vmem:[#allocation2 + $0x8b8] sm:$0xff] }
 0x587   :  { %12275 = vst [vmem:[#allocation415_spill] sm:$0xff] %v10402_v19  ;;  %v10408_v4 = vmul.f32 %v7566_v14, %v9046_v16  ;;  %v7567_v52 = vld [vmem:[#allocation2 + $0x8d8] sm:$0xff] }
 0x588   :  { %12276 = vst [vmem:[#allocation416_spill] sm:$0xff] %v10405_v51  ;;  %v10411_v15 = vmul.f32 %v7567_v52, %v9046_v16  ;;  %v7568_v60 = vld [vmem:[#allocation2 + $0x8f8] sm:$0xff] }
 0x589   :  { %12277 = vst [vmem:[#allocation417_spill] sm:$0xff] %v10408_v4  ;;  %v10414_v36 = vmul.f32 %v7568_v60, %v9046_v16  ;;  %v7569_v33 = vld [vmem:[#allocation2 + $0x918] sm:$0xff] }
 0x58a   :  { %12278 = vst [vmem:[#allocation418_spill] sm:$0xff] %v10411_v15  ;;  %v10417_v11 = vmul.f32 %v7569_v33, %v9046_v16  ;;  %v7570_v19 = vld [vmem:[#allocation2 + $0x938] sm:$0xff] }
 0x58b   :  { %12279 = vst [vmem:[#allocation419_spill] sm:$0xff] %v10414_v36  ;;  %v10420_v8 = vmul.f32 %v7570_v19, %v9046_v16  ;;  %v7571_v51 = vld [vmem:[#allocation2 + $0x958] sm:$0xff] }
 0x58c   :  { %12280 = vst [vmem:[#allocation420_spill] sm:$0xff] %v10417_v11  ;;  %v10423_v14 = vmul.f32 %v7571_v51, %v9046_v16  ;;  %v7572_v4 = vld [vmem:[#allocation2 + $0x978] sm:$0xff] }
 0x58d   :  { %12281 = vst [vmem:[#allocation421_spill] sm:$0xff] %v10420_v8  ;;  %v10426_v52 = vmul.f32 %v7572_v4, %v9046_v16  ;;  %v7573_v15 = vld [vmem:[#allocation2 + $0x998] sm:$0xff] }
 0x58e   :  { %12282 = vst [vmem:[#allocation422_spill] sm:$0xff] %v10423_v14  ;;  %v10429_v60 = vmul.f32 %v7573_v15, %v9046_v16  ;;  %v7574_v36 = vld [vmem:[#allocation2 + $0x9b8] sm:$0xff] }
 0x58f   :  { %12283 = vst [vmem:[#allocation423_spill] sm:$0xff] %v10426_v52  ;;  %v10432_v33 = vmul.f32 %v7574_v36, %v9046_v16  ;;  %v7575_v11 = vld [vmem:[#allocation2 + $0x9d8] sm:$0xff] }
 0x590   :  { %12284 = vst [vmem:[#allocation424_spill] sm:$0xff] %v10429_v60  ;;  %v10435_v19 = vmul.f32 %v7575_v11, %v9046_v16  ;;  %v7576_v8 = vld [vmem:[#allocation2 + $0x9f8] sm:$0xff] }
 0x591   :  { %12285 = vst [vmem:[#allocation425_spill] sm:$0xff] %v10432_v33  ;;  %v10438_v51 = vmul.f32 %v7576_v8, %v9046_v16  ;;  %v7577_v14 = vld [vmem:[#allocation2 + $0xa18] sm:$0xff] }
 0x592   :  { %12286 = vst [vmem:[#allocation426_spill] sm:$0xff] %v10435_v19  ;;  %v10441_v4 = vmul.f32 %v7577_v14, %v9046_v16  ;;  %v7578_v52 = vld [vmem:[#allocation2 + $0xa38] sm:$0xff] }
 0x593   :  { %12287 = vst [vmem:[#allocation427_spill] sm:$0xff] %v10438_v51  ;;  %v10444_v15 = vmul.f32 %v7578_v52, %v9046_v16  ;;  %v7579_v60 = vld [vmem:[#allocation2 + $0xa58] sm:$0xff] }
 0x594   :  { %12288 = vst [vmem:[#allocation428_spill] sm:$0xff] %v10441_v4  ;;  %v10447_v36 = vmul.f32 %v7579_v60, %v9046_v16  ;;  %v7580_v33 = vld [vmem:[#allocation2 + $0xa78] sm:$0xff] }
 0x595   :  { %12289 = vst [vmem:[#allocation429_spill] sm:$0xff] %v10444_v15  ;;  %v10450_v11 = vmul.f32 %v7580_v33, %v9046_v16  ;;  %v7581_v19 = vld [vmem:[#allocation2 + $0xa98] sm:$0xff] }
 0x596   :  { %12290 = vst [vmem:[#allocation430_spill] sm:$0xff] %v10447_v36  ;;  %v10453_v8 = vmul.f32 %v7581_v19, %v9046_v16  ;;  %v7582_v51 = vld [vmem:[#allocation2 + $0xab8] sm:$0xff] }
 0x597   :  { %12291 = vst [vmem:[#allocation431_spill] sm:$0xff] %v10450_v11  ;;  %v10456_v14 = vmul.f32 %v7582_v51, %v9046_v16  ;;  %v7583_v4 = vld [vmem:[#allocation2 + $0xad8] sm:$0xff] }
 0x598   :  { %12292 = vst [vmem:[#allocation432_spill] sm:$0xff] %v10453_v8  ;;  %v10459_v52 = vmul.f32 %v7583_v4, %v9046_v16  ;;  %v7584_v15 = vld [vmem:[#allocation2 + $0xaf8] sm:$0xff] }
 0x599   :  { %12293 = vst [vmem:[#allocation433_spill] sm:$0xff] %v10456_v14  ;;  %v10462_v60 = vmul.f32 %v7584_v15, %v9046_v16  ;;  %v7585_v36 = vld [vmem:[#allocation2 + $0xb18] sm:$0xff] }
 0x59a   :  { %12294 = vst [vmem:[#allocation434_spill] sm:$0xff] %v10459_v52  ;;  %v10465_v33 = vmul.f32 %v7585_v36, %v9046_v16  ;;  %v7586_v11 = vld [vmem:[#allocation2 + $0xb38] sm:$0xff] }
 0x59b   :  { %12295 = vst [vmem:[#allocation435_spill] sm:$0xff] %v10462_v60  ;;  %v10468_v19 = vmul.f32 %v7586_v11, %v9046_v16  ;;  %v7587_v8 = vld [vmem:[#allocation2 + $0xb58] sm:$0xff] }
 0x59c   :  { %12296 = vst [vmem:[#allocation436_spill] sm:$0xff] %v10465_v33  ;;  %v10471_v51 = vmul.f32 %v7587_v8, %v9046_v16  ;;  %v7588_v14 = vld [vmem:[#allocation2 + $0xb78] sm:$0xff] }
 0x59d   :  { %12297 = vst [vmem:[#allocation437_spill] sm:$0xff] %v10468_v19  ;;  %v10474_v4 = vmul.f32 %v7588_v14, %v9046_v16  ;;  %v7589_v52 = vld [vmem:[#allocation2 + $0xb98] sm:$0xff] }
 0x59e   :  { %12298 = vst [vmem:[#allocation438_spill] sm:$0xff] %v10471_v51  ;;  %v10477_v15 = vmul.f32 %v7589_v52, %v9046_v16  ;;  %v7590_v60 = vld [vmem:[#allocation2 + $0xbb8] sm:$0xff] }
 0x59f   :  { %12299 = vst [vmem:[#allocation439_spill] sm:$0xff] %v10474_v4  ;;  %v10480_v36 = vmul.f32 %v7590_v60, %v9046_v16  ;;  %v7591_v33 = vld [vmem:[#allocation2 + $0xbd8] sm:$0xff] }
 0x5a0   :  { %12300 = vst [vmem:[#allocation440_spill] sm:$0xff] %v10477_v15  ;;  %v10483_v11 = vmul.f32 %v7591_v33, %v9046_v16  ;;  %v7592_v19 = vld [vmem:[#allocation2 + $0xbf8] sm:$0xff] }
 0x5a1   :  { %12301 = vst [vmem:[#allocation441_spill] sm:$0xff] %v10480_v36  ;;  %v10486_v8 = vmul.f32 %v7592_v19, %v9046_v16  ;;  %v7593_v51 = vld [vmem:[#allocation2 + $0xc18] sm:$0xff] }
 0x5a2   :  { %12302 = vst [vmem:[#allocation442_spill] sm:$0xff] %v10483_v11  ;;  %v10489_v14 = vmul.f32 %v7593_v51, %v9046_v16  ;;  %v7594_v4 = vld [vmem:[#allocation2 + $0xc38] sm:$0xff] }
 0x5a3   :  { %12303 = vst [vmem:[#allocation443_spill] sm:$0xff] %v10486_v8  ;;  %v10492_v52 = vmul.f32 %v7594_v4, %v9046_v16  ;;  %v7595_v15 = vld [vmem:[#allocation2 + $0xc58] sm:$0xff] }
 0x5a4   :  { %12304 = vst [vmem:[#allocation444_spill] sm:$0xff] %v10489_v14  ;;  %v10495_v60 = vmul.f32 %v7595_v15, %v9046_v16  ;;  %v7596_v36 = vld [vmem:[#allocation2 + $0xc78] sm:$0xff] }
 0x5a5   :  { %12305 = vst [vmem:[#allocation445_spill] sm:$0xff] %v10492_v52  ;;  %v10498_v33 = vmul.f32 %v7596_v36, %v9046_v16  ;;  %v7597_v11 = vld [vmem:[#allocation2 + $0xc98] sm:$0xff] }
 0x5a6   :  { %12306 = vst [vmem:[#allocation446_spill] sm:$0xff] %v10495_v60  ;;  %v10501_v19 = vmul.f32 %v7597_v11, %v9046_v16  ;;  %v7598_v8 = vld [vmem:[#allocation2 + $0xcb8] sm:$0xff] }
 0x5a7   :  { %12307 = vst [vmem:[#allocation447_spill] sm:$0xff] %v10498_v33  ;;  %v10504_v51 = vmul.f32 %v7598_v8, %v9046_v16  ;;  %v7599_v14 = vld [vmem:[#allocation2 + $0xcd8] sm:$0xff] }
 0x5a8   :  { %12308 = vst [vmem:[#allocation448_spill] sm:$0xff] %v10501_v19  ;;  %v10507_v4 = vmul.f32 %v7599_v14, %v9046_v16  ;;  %v7600_v52 = vld [vmem:[#allocation2 + $0xcf8] sm:$0xff] }
 0x5a9   :  { %12309 = vst [vmem:[#allocation449_spill] sm:$0xff] %v10504_v51  ;;  %v10510_v15 = vmul.f32 %v7600_v52, %v9046_v16  ;;  %v7601_v60 = vld [vmem:[#allocation2 + $0xd18] sm:$0xff] }
 0x5aa   :  { %12310 = vst [vmem:[#allocation450_spill] sm:$0xff] %v10507_v4  ;;  %v10513_v36 = vmul.f32 %v7601_v60, %v9046_v16  ;;  %v7602_v33 = vld [vmem:[#allocation2 + $0xd38] sm:$0xff] }
 0x5ab   :  { %12311 = vst [vmem:[#allocation451_spill] sm:$0xff] %v10510_v15  ;;  %v10516_v11 = vmul.f32 %v7602_v33, %v9046_v16  ;;  %v7603_v19 = vld [vmem:[#allocation2 + $0xd58] sm:$0xff] }
 0x5ac   :  { %12312 = vst [vmem:[#allocation452_spill] sm:$0xff] %v10513_v36  ;;  %v10519_v8 = vmul.f32 %v7603_v19, %v9046_v16  ;;  %v7604_v51 = vld [vmem:[#allocation2 + $0xd78] sm:$0xff] }
 0x5ad   :  { %12313 = vst [vmem:[#allocation453_spill] sm:$0xff] %v10516_v11  ;;  %v10522_v14 = vmul.f32 %v7604_v51, %v9046_v16  ;;  %v7605_v4 = vld [vmem:[#allocation2 + $0xd98] sm:$0xff] }
 0x5ae   :  { %12314 = vst [vmem:[#allocation454_spill] sm:$0xff] %v10519_v8  ;;  %v10525_v52 = vmul.f32 %v7605_v4, %v9046_v16  ;;  %v7606_v15 = vld [vmem:[#allocation2 + $0xdb8] sm:$0xff] }
 0x5af   :  { %12315 = vst [vmem:[#allocation455_spill] sm:$0xff] %v10522_v14  ;;  %v10528_v60 = vmul.f32 %v7606_v15, %v9046_v16  ;;  %v7607_v36 = vld [vmem:[#allocation2 + $0xdd8] sm:$0xff] }
 0x5b0   :  { %12316 = vst [vmem:[#allocation456_spill] sm:$0xff] %v10525_v52  ;;  %v10531_v33 = vmul.f32 %v7607_v36, %v9046_v16  ;;  %v7608_v11 = vld [vmem:[#allocation2 + $0xdf8] sm:$0xff] }
 0x5b1   :  { %12317 = vst [vmem:[#allocation457_spill] sm:$0xff] %v10528_v60  ;;  %v10534_v19 = vmul.f32 %v7608_v11, %v9046_v16  ;;  %v7609_v8 = vld [vmem:[#allocation2 + $0xe18] sm:$0xff] }
 0x5b2   :  { %12318 = vst [vmem:[#allocation458_spill] sm:$0xff] %v10531_v33  ;;  %v10537_v51 = vmul.f32 %v7609_v8, %v9046_v16  ;;  %v7610_v14 = vld [vmem:[#allocation2 + $0xe38] sm:$0xff] }
 0x5b3   :  { %12319 = vst [vmem:[#allocation459_spill] sm:$0xff] %v10534_v19  ;;  %v10540_v4 = vmul.f32 %v7610_v14, %v9046_v16  ;;  %v7611_v52 = vld [vmem:[#allocation2 + $0xe58] sm:$0xff] }
 0x5b4   :  { %12320 = vst [vmem:[#allocation460_spill] sm:$0xff] %v10537_v51  ;;  %v10543_v15 = vmul.f32 %v7611_v52, %v9046_v16  ;;  %v7612_v60 = vld [vmem:[#allocation2 + $0xe78] sm:$0xff] }
 0x5b5   :  { %12321 = vst [vmem:[#allocation461_spill] sm:$0xff] %v10540_v4  ;;  %v10546_v36 = vmul.f32 %v7612_v60, %v9046_v16  ;;  %v7613_v33 = vld [vmem:[#allocation2 + $0xe98] sm:$0xff] }
 0x5b6   :  { %12322 = vst [vmem:[#allocation462_spill] sm:$0xff] %v10543_v15  ;;  %v10549_v11 = vmul.f32 %v7613_v33, %v9046_v16  ;;  %v7614_v19 = vld [vmem:[#allocation2 + $0xeb8] sm:$0xff] }
 0x5b7   :  { %12323 = vst [vmem:[#allocation463_spill] sm:$0xff] %v10546_v36  ;;  %v10552_v8 = vmul.f32 %v7614_v19, %v9046_v16  ;;  %v7615_v51 = vld [vmem:[#allocation2 + $0xed8] sm:$0xff] }
 0x5b8   :  { %12324 = vst [vmem:[#allocation464_spill] sm:$0xff] %v10549_v11  ;;  %v10555_v14 = vmul.f32 %v7615_v51, %v9046_v16  ;;  %v7616_v4 = vld [vmem:[#allocation2 + $0xef8] sm:$0xff] }
 0x5b9   :  { %12325 = vst [vmem:[#allocation465_spill] sm:$0xff] %v10552_v8  ;;  %v10558_v52 = vmul.f32 %v7616_v4, %v9046_v16  ;;  %v7617_v15 = vld [vmem:[#allocation2 + $0xf18] sm:$0xff] }
 0x5ba   :  { %12326 = vst [vmem:[#allocation466_spill] sm:$0xff] %v10555_v14  ;;  %v10561_v60 = vmul.f32 %v7617_v15, %v9046_v16  ;;  %v7618_v36 = vld [vmem:[#allocation2 + $0xf38] sm:$0xff] }
 0x5bb   :  { %12327 = vst [vmem:[#allocation467_spill] sm:$0xff] %v10558_v52  ;;  %v10564_v33 = vmul.f32 %v7618_v36, %v9046_v16  ;;  %v7619_v11 = vld [vmem:[#allocation2 + $0xf58] sm:$0xff] }
 0x5bc   :  { %12328 = vst [vmem:[#allocation468_spill] sm:$0xff] %v10561_v60  ;;  %v10567_v19 = vmul.f32 %v7619_v11, %v9046_v16  ;;  %v7620_v8 = vld [vmem:[#allocation2 + $0xf78] sm:$0xff] }
 0x5bd   :  { %12329 = vst [vmem:[#allocation469_spill] sm:$0xff] %v10564_v33  ;;  %v10570_v51 = vmul.f32 %v7620_v8, %v9046_v16  ;;  %v7621_v14 = vld [vmem:[#allocation2 + $0xf98] sm:$0xff]  ;;  %v10586_v8 = vadd.f32 %v9433_v32, %v9049_v40  ;;  %v10606_v40 = vadd.f32 %v9448_v2, %v9064_v24  ;;  %v10626_v24 = vadd.f32 %v9463_v57, %v9079_v23  ;;  %v12336_v32 = vld [vmem:[#allocation15_spill] sm:$0xff]  ;;  %v12341_v2 = vld [vmem:[#allocation120_spill] sm:$0xff] }
 0x5be   :  { %12330 = vst [vmem:[#allocation470_spill] sm:$0xff] %v10567_v19  ;;  %v10573_v4 = vmul.f32 %v7621_v14, %v9046_v16  ;;  %v7622_v52 = vld [vmem:[#allocation2 + $0xfb8] sm:$0xff]  ;;  %v10590_v14 = vadd.f32 %v9436_v17, %v9052_v41  ;;  %v10610_v41 = vadd.f32 %v9451_v6, %v9067_v50  ;;  %v10630_v50 = vadd.f32 %v9466_v62, %v9082_v35  ;;  %v12346_v57 = vld [vmem:[#allocation20_spill] sm:$0xff]  ;;  %v12347_v62 = vld [vmem:[#allocation123_spill] sm:$0xff] }
 0x5bf   :  { %12331 = vst [vmem:[#allocation471_spill] sm:$0xff] %v10570_v51  ;;  %v10576_v15 = vmul.f32 %v7622_v52, %v9046_v16  ;;  %v7623_v60 = vld [vmem:[#allocation2 + $0xfd8] sm:$0xff]  ;;  %v10594_v52 = vadd.f32 %v9439_v21, %v9055_v48  ;;  %v10614_v48 = vadd.f32 %v9454_v13, %v9070_v3  ;;  %v10634_v3 = vadd.f32 %v9469_v39, %v9085_v38  ;;  %v12338_v21 = vld [vmem:[#allocation16_spill] sm:$0xff]  ;;  %v12391_v19 = vld [vmem:[#allocation143_spill] sm:$0xff] }
 0x5c0   :  { %12332 = vst [vmem:[#allocation472_spill] sm:$0xff] %v10573_v4  ;;  %v10579_v36 = vmul.f32 %v7623_v60, %v9046_v16  ;;  %v7624_v33 = vld [vmem:[#allocation2 + $0xff8] sm:$0xff]  ;;  %v10598_v60 = vadd.f32 %v9442_v45, %v9058_v1  ;;  %v10618_v1 = vadd.f32 %v9457_v37, %v9073_v27  ;;  %v10638_v27 = vadd.f32 %v9472_v26, %v9088_v30  ;;  %v12339_v45 = vld [vmem:[#allocation119_spill] sm:$0xff] }
 0x5c1   :  { %12333 = vst [vmem:[#allocation473_spill] sm:$0xff] %v10576_v15  ;;  %v10582_v11 = vmul.f32 %v7624_v33, %v9046_v16  ;;  %v10602_v16 = vadd.f32 %v9445_v12, %v9061_v18  ;;  %v10622_v18 = vadd.f32 %v9460_v53, %v9076_v28  ;;  %v10642_v28 = vadd.f32 %v9475_v25, %v9091_v29  ;;  %v12337_v17 = vld [vmem:[#allocation118_spill] sm:$0xff]  ;;  %v12340_v12 = vld [vmem:[#allocation17_spill] sm:$0xff]  ;;  %v12344_v37 = vld [vmem:[#allocation19_spill] sm:$0xff] }
 0x5c2   :  { %12334 = vst [vmem:[#allocation474_spill] sm:$0xff] %v10579_v36  ;;  %v10646_v23 = vadd.f32 %v9478_v43, %v9094_v7  ;;  %v10650_v35 = vadd.f32 %v9481_v9, %v9097_v42  ;;  %v10654_v38 = vadd.f32 %v9484_v56, %v9100_v49  ;;  %v10658_v30 = vadd.f32 %v9487_v22, %v9103_v54  ;;  %v12342_v6 = vld [vmem:[#allocation18_spill] sm:$0xff]  ;;  %v12343_v13 = vld [vmem:[#allocation121_spill] sm:$0xff]  ;;  %v12349_v25 = vld [vmem:[#allocation124_spill] sm:$0xff] }
 0x5c3   :  { %12335 = vst [vmem:[#allocation475_spill] sm:$0xff] %v10582_v11  ;;  %v10662_v29 = vadd.f32 %v9490_v63, %v9106_v47  ;;  %v10666_v7 = vadd.f32 %v9493_v59, %v9109_v58  ;;  %v10670_v42 = vadd.f32 %v9496_v55, %v9112_v61  ;;  %v10674_v49 = vadd.f32 %v9499_v46, %v9115_v34  ;;  %v12345_v53 = vld [vmem:[#allocation122_spill] sm:$0xff]  ;;  %v12348_v26 = vld [vmem:[#allocation21_spill] sm:$0xff]  ;;  %v12352_v63 = vld [vmem:[#allocation23_spill] sm:$0xff] }
 0x5c4   :  { %v10678_v54 = vadd.f32 %v9502_v44, %v9118_v0  ;;  %v10682_v47 = vadd.f32 %v9505_v10, %v9121_v5  ;;  %v10686_v58 = vadd.f32 %v12337_v17, %v12336_v32  ;;  %v10690_v61 = vadd.f32 %v12339_v45, %v12338_v21  ;;  %v12350_v9 = vld [vmem:[#allocation22_spill] sm:$0xff]  ;;  %v12351_v56 = vld [vmem:[#allocation125_spill] sm:$0xff]  ;;  %v12354_v46 = vld [vmem:[#allocation24_spill] sm:$0xff] }
 0x5c5   :  { %v10694_v34 = vadd.f32 %v12341_v2, %v12340_v12  ;;  %v10698_v0 = vadd.f32 %v12343_v13, %v12342_v6  ;;  %v10702_v5 = vadd.f32 %v12345_v53, %v12344_v37  ;;  %v10706_v39 = vadd.f32 %v12347_v62, %v12346_v57  ;;  %v12353_v59 = vld [vmem:[#allocation126_spill] sm:$0xff]  ;;  %v12355_v44 = vld [vmem:[#allocation127_spill] sm:$0xff]  ;;  %v12356_v33 = vld [vmem:[#allocation25_spill] sm:$0xff] }
 0x5c6   :  { %v10710_v43 = vadd.f32 %v12349_v25, %v12348_v26  ;;  %v10714_v22 = vadd.f32 %v12351_v56, %v12350_v9  ;;  %v10718_v55 = vadd.f32 %v12353_v59, %v12352_v63  ;;  %v10722_v10 = vadd.f32 %v12355_v44, %v12354_v46  ;;  %v12357_v32 = vld [vmem:[#allocation128_spill] sm:$0xff]  ;;  %v12358_v21 = vld [vmem:[#allocation26_spill] sm:$0xff]  ;;  %v12359_v45 = vld [vmem:[#allocation129_spill] sm:$0xff] }
 0x5c7   :  { %v10726_v17 = vadd.f32 %v12357_v32, %v12356_v33  ;;  %v10730_v12 = vadd.f32 %v12359_v45, %v12358_v21  ;;  %v12360_v2 = vld [vmem:[#allocation27_spill] sm:$0xff]  ;;  %v12361_v6 = vld [vmem:[#allocation130_spill] sm:$0xff]  ;;  %v12362_v37 = vld [vmem:[#allocation28_spill] sm:$0xff] }
 0x5c8   :  { %v10734_v13 = vadd.f32 %v12361_v6, %v12360_v2  ;;  %v12363_v53 = vld [vmem:[#allocation131_spill] sm:$0xff]  ;;  %v12364_v62 = vld [vmem:[#allocation29_spill] sm:$0xff]  ;;  %v12365_v26 = vld [vmem:[#allocation132_spill] sm:$0xff] }
 0x5c9   :  { %v10738_v57 = vadd.f32 %v12363_v53, %v12362_v37  ;;  %v10742_v25 = vadd.f32 %v12365_v26, %v12364_v62  ;;  %v12366_v9 = vld [vmem:[#allocation30_spill] sm:$0xff]  ;;  %v12367_v56 = vld [vmem:[#allocation133_spill] sm:$0xff]  ;;  %v12368_v59 = vld [vmem:[#allocation31_spill] sm:$0xff] }
 0x5ca   :  { %v10746_v63 = vadd.f32 %v12367_v56, %v12366_v9  ;;  %v12369_v46 = vld [vmem:[#allocation134_spill] sm:$0xff]  ;;  %v12370_v33 = vld [vmem:[#allocation32_spill] sm:$0xff]  ;;  %v12371_v32 = vld [vmem:[#allocation135_spill] sm:$0xff] }
 0x5cb   :  { %v10750_v44 = vadd.f32 %v12369_v46, %v12368_v59  ;;  %v10754_v21 = vadd.f32 %v12371_v32, %v12370_v33  ;;  %v12372_v45 = vld [vmem:[#allocation33_spill] sm:$0xff]  ;;  %v12373_v2 = vld [vmem:[#allocation136_spill] sm:$0xff]  ;;  %v12374_v37 = vld [vmem:[#allocation34_spill] sm:$0xff] }
 0x5cc   :  { %v10758_v6 = vadd.f32 %v12373_v2, %v12372_v45  ;;  %v12375_v53 = vld [vmem:[#allocation137_spill] sm:$0xff]  ;;  %v12376_v26 = vld [vmem:[#allocation35_spill] sm:$0xff]  ;;  %v12377_v11 = vld [vmem:[#allocation138_spill] sm:$0xff] }
 0x5cd   :  { %v10762_v62 = vadd.f32 %v12375_v53, %v12374_v37  ;;  %v10766_v9 = vadd.f32 %v12377_v11, %v12376_v26  ;;  %v12378_v56 = vld [vmem:[#allocation36_spill] sm:$0xff]  ;;  %v12379_v36 = vld [vmem:[#allocation139_spill] sm:$0xff]  ;;  %v12381_v46 = vld [vmem:[#allocation37_spill] sm:$0xff] }
 0x5ce   :  { %v10770_v59 = vadd.f32 %v12379_v36, %v12378_v56  ;;  %v12382_v15 = vld [vmem:[#allocation140_spill] sm:$0xff]  ;;  %v12384_v32 = vld [vmem:[#allocation38_spill] sm:$0xff]  ;;  %v12385_v4 = vld [vmem:[#allocation141_spill] sm:$0xff] }
 0x5cf   :  { %v10774_v33 = vadd.f32 %v12382_v15, %v12381_v46  ;;  %v10778_v45 = vadd.f32 %v12385_v4, %v12384_v32  ;;  %v12387_v2 = vld [vmem:[#allocation39_spill] sm:$0xff]  ;;  %v12388_v51 = vld [vmem:[#allocation142_spill] sm:$0xff]  ;;  %v12390_v53 = vld [vmem:[#allocation40_spill] sm:$0xff] }
 0x5d0   :  { %12380 = vst [vmem:[#allocation15_spill] sm:$0xff] %v10770_v59  ;;  %v10782_v37 = vadd.f32 %v12388_v51, %v12387_v2  ;;  %v10786_v11 = vadd.f32 %v12391_v19, %v12390_v53  ;;  %v12393_v26 = vld [vmem:[#allocation41_spill] sm:$0xff]  ;;  %v12396_v56 = vld [vmem:[#allocation42_spill] sm:$0xff]  ;;  %v12399_v46 = vld [vmem:[#allocation43_spill] sm:$0xff] }
 0x5d1   :  { %12383 = vst [vmem:[#allocation118_spill] sm:$0xff] %v10774_v33  ;;  %12386 = vst [vmem:[#allocation16_spill] sm:$0xff] %v10778_v45  ;;  %v10790_v36 = vadd.f32 %v12394_v31, %v12393_v26  ;;  %v12397_v59 = vld [vmem:[#allocation145_spill] sm:$0xff]  ;;  %v12400_v33 = vld [vmem:[#allocation146_spill] sm:$0xff] }
 0x5d2   :  { %12389 = vst [vmem:[#allocation119_spill] sm:$0xff] %v10782_v37  ;;  %12392 = vst [vmem:[#allocation17_spill] sm:$0xff] %v10786_v11  ;;  %v10794_v15 = vadd.f32 %v12397_v59, %v12396_v56  ;;  %v10798_v4 = vadd.f32 %v12400_v33, %v12399_v46  ;;  %v12402_v32 = vld [vmem:[#allocation44_spill] sm:$0xff]  ;;  %v12403_v45 = vld [vmem:[#allocation147_spill] sm:$0xff] }
 0x5d3   :  { %12395 = vst [vmem:[#allocation120_spill] sm:$0xff] %v10790_v36  ;;  %v10802_v51 = vadd.f32 %v12403_v45, %v12402_v32  ;;  %v12405_v2 = vld [vmem:[#allocation45_spill] sm:$0xff]  ;;  %v12406_v37 = vld [vmem:[#allocation148_spill] sm:$0xff]  ;;  %v12408_v53 = vld [vmem:[#allocation46_spill] sm:$0xff] }
 0x5d4   :  { %12398 = vst [vmem:[#allocation18_spill] sm:$0xff] %v10794_v15  ;;  %12401 = vst [vmem:[#allocation121_spill] sm:$0xff] %v10798_v4  ;;  %v10806_v19 = vadd.f32 %v12406_v37, %v12405_v2  ;;  %v12409_v11 = vld [vmem:[#allocation149_spill] sm:$0xff]  ;;  %v12411_v26 = vld [vmem:[#allocation47_spill] sm:$0xff] }
 0x5d5   :  { %12404 = vst [vmem:[#allocation19_spill] sm:$0xff] %v10802_v51  ;;  %v10810_v31 = vadd.f32 %v12409_v11, %v12408_v53  ;;  %v12412_v36 = vld [vmem:[#allocation150_spill] sm:$0xff]  ;;  %v12414_v56 = vld [vmem:[#allocation48_spill] sm:$0xff]  ;;  %v12415_v15 = vld [vmem:[#allocation151_spill] sm:$0xff] }
 0x5d6   :  { %12407 = vst [vmem:[#allocation122_spill] sm:$0xff] %v10806_v19  ;;  %v10814_v59 = vadd.f32 %v12412_v36, %v12411_v26  ;;  %v10818_v33 = vadd.f32 %v12415_v15, %v12414_v56  ;;  %v12417_v46 = vld [vmem:[#allocation49_spill] sm:$0xff]  ;;  %v12418_v4 = vld [vmem:[#allocation152_spill] sm:$0xff]  ;;  %v12420_v32 = vld [vmem:[#allocation50_spill] sm:$0xff] }
 0x5d7   :  { %12410 = vst [vmem:[#allocation20_spill] sm:$0xff] %v10810_v31  ;;  %v10822_v45 = vadd.f32 %v12418_v4, %v12417_v46  ;;  %v12421_v51 = vld [vmem:[#allocation153_spill] sm:$0xff]  ;;  %v12423_v2 = vld [vmem:[#allocation51_spill] sm:$0xff]  ;;  %v12424_v19 = vld [vmem:[#allocation154_spill] sm:$0xff] }
 0x5d8   :  { %12413 = vst [vmem:[#allocation123_spill] sm:$0xff] %v10814_v59  ;;  %12416 = vst [vmem:[#allocation21_spill] sm:$0xff] %v10818_v33  ;;  %v10826_v37 = vadd.f32 %v12421_v51, %v12420_v32  ;;  %v10830_v11 = vadd.f32 %v12424_v19, %v12423_v2  ;;  %v12426_v53 = vld [vmem:[#allocation52_spill] sm:$0xff]  ;;  %v12427_v31 = vld [vmem:[#allocation155_spill] sm:$0xff] }
 0x5d9   :  { %12419 = vst [vmem:[#allocation124_spill] sm:$0xff] %v10822_v45  ;;  %v10834_v36 = vadd.f32 %v12427_v31, %v12426_v53  ;;  %v12429_v26 = vld [vmem:[#allocation53_spill] sm:$0xff]  ;;  %v12430_v59 = vld [vmem:[#allocation156_spill] sm:$0xff]  ;;  %v12432_v56 = vld [vmem:[#allocation54_spill] sm:$0xff] }
 0x5da   :  { %12422 = vst [vmem:[#allocation22_spill] sm:$0xff] %v10826_v37  ;;  %12425 = vst [vmem:[#allocation125_spill] sm:$0xff] %v10830_v11  ;;  %v10838_v15 = vadd.f32 %v12430_v59, %v12429_v26  ;;  %v12433_v33 = vld [vmem:[#allocation157_spill] sm:$0xff]  ;;  %v12435_v46 = vld [vmem:[#allocation55_spill] sm:$0xff] }
 0x5db   :  { %12428 = vst [vmem:[#allocation23_spill] sm:$0xff] %v10834_v36  ;;  %v10842_v4 = vadd.f32 %v12433_v33, %v12432_v56  ;;  %v12436_v45 = vld [vmem:[#allocation158_spill] sm:$0xff]  ;;  %v12438_v32 = vld [vmem:[#allocation56_spill] sm:$0xff]  ;;  %v12439_v37 = vld [vmem:[#allocation159_spill] sm:$0xff] }
 0x5dc   :  { %12431 = vst [vmem:[#allocation126_spill] sm:$0xff] %v10838_v15  ;;  %v10846_v51 = vadd.f32 %v12436_v45, %v12435_v46  ;;  %v10850_v19 = vadd.f32 %v12439_v37, %v12438_v32  ;;  %v12441_v2 = vld [vmem:[#allocation57_spill] sm:$0xff]  ;;  %v12442_v11 = vld [vmem:[#allocation160_spill] sm:$0xff]  ;;  %v12444_v53 = vld [vmem:[#allocation58_spill] sm:$0xff] }
 0x5dd   :  { %12434 = vst [vmem:[#allocation24_spill] sm:$0xff] %v10842_v4  ;;  %v10854_v31 = vadd.f32 %v12442_v11, %v12441_v2  ;;  %v12445_v36 = vld [vmem:[#allocation161_spill] sm:$0xff]  ;;  %v12447_v26 = vld [vmem:[#allocation59_spill] sm:$0xff]  ;;  %v12448_v15 = vld [vmem:[#allocation162_spill] sm:$0xff] }
 0x5de   :  { %12437 = vst [vmem:[#allocation127_spill] sm:$0xff] %v10846_v51  ;;  %12440 = vst [vmem:[#allocation25_spill] sm:$0xff] %v10850_v19  ;;  %v10858_v59 = vadd.f32 %v12445_v36, %v12444_v53  ;;  %v10862_v33 = vadd.f32 %v12448_v15, %v12447_v26  ;;  %v12450_v56 = vld [vmem:[#allocation60_spill] sm:$0xff]  ;;  %v12451_v4 = vld [vmem:[#allocation163_spill] sm:$0xff] }
 0x5df   :  { %12443 = vst [vmem:[#allocation128_spill] sm:$0xff] %v10854_v31  ;;  %v10866_v45 = vadd.f32 %v12451_v4, %v12450_v56  ;;  %v12453_v46 = vld [vmem:[#allocation61_spill] sm:$0xff]  ;;  %v12454_v51 = vld [vmem:[#allocation164_spill] sm:$0xff]  ;;  %v12456_v32 = vld [vmem:[#allocation62_spill] sm:$0xff] }
 0x5e0   :  { %12446 = vst [vmem:[#allocation26_spill] sm:$0xff] %v10858_v59  ;;  %12449 = vst [vmem:[#allocation129_spill] sm:$0xff] %v10862_v33  ;;  %v10870_v37 = vadd.f32 %v12454_v51, %v12453_v46  ;;  %v12457_v19 = vld [vmem:[#allocation165_spill] sm:$0xff]  ;;  %v12459_v2 = vld [vmem:[#allocation63_spill] sm:$0xff] }
 0x5e1   :  { %12452 = vst [vmem:[#allocation27_spill] sm:$0xff] %v10866_v45  ;;  %v10874_v11 = vadd.f32 %v12457_v19, %v12456_v32  ;;  %v12460_v31 = vld [vmem:[#allocation166_spill] sm:$0xff]  ;;  %v12462_v53 = vld [vmem:[#allocation64_spill] sm:$0xff]  ;;  %v12463_v59 = vld [vmem:[#allocation167_spill] sm:$0xff] }
 0x5e2   :  { %12455 = vst [vmem:[#allocation130_spill] sm:$0xff] %v10870_v37  ;;  %v10878_v36 = vadd.f32 %v12460_v31, %v12459_v2  ;;  %v10882_v15 = vadd.f32 %v12463_v59, %v12462_v53  ;;  %v12465_v26 = vld [vmem:[#allocation65_spill] sm:$0xff]  ;;  %v12466_v33 = vld [vmem:[#allocation168_spill] sm:$0xff]  ;;  %v12468_v56 = vld [vmem:[#allocation66_spill] sm:$0xff] }
 0x5e3   :  { %12458 = vst [vmem:[#allocation28_spill] sm:$0xff] %v10874_v11  ;;  %v10886_v4 = vadd.f32 %v12466_v33, %v12465_v26  ;;  %v12469_v45 = vld [vmem:[#allocation169_spill] sm:$0xff]  ;;  %v12471_v46 = vld [vmem:[#allocation67_spill] sm:$0xff]  ;;  %v12472_v37 = vld [vmem:[#allocation170_spill] sm:$0xff] }
 0x5e4   :  { %12461 = vst [vmem:[#allocation131_spill] sm:$0xff] %v10878_v36  ;;  %12464 = vst [vmem:[#allocation29_spill] sm:$0xff] %v10882_v15  ;;  %v10890_v51 = vadd.f32 %v12469_v45, %v12468_v56  ;;  %v10894_v19 = vadd.f32 %v12472_v37, %v12471_v46  ;;  %v12474_v32 = vld [vmem:[#allocation68_spill] sm:$0xff]  ;;  %v12475_v11 = vld [vmem:[#allocation171_spill] sm:$0xff] }
 0x5e5   :  { %12467 = vst [vmem:[#allocation132_spill] sm:$0xff] %v10886_v4  ;;  %v10898_v31 = vadd.f32 %v12475_v11, %v12474_v32  ;;  %v12477_v2 = vld [vmem:[#allocation69_spill] sm:$0xff]  ;;  %v12478_v36 = vld [vmem:[#allocation172_spill] sm:$0xff]  ;;  %v12480_v53 = vld [vmem:[#allocation70_spill] sm:$0xff] }
 0x5e6   :  { %12470 = vst [vmem:[#allocation30_spill] sm:$0xff] %v10890_v51  ;;  %12473 = vst [vmem:[#allocation133_spill] sm:$0xff] %v10894_v19  ;;  %v10902_v59 = vadd.f32 %v12478_v36, %v12477_v2  ;;  %v12481_v15 = vld [vmem:[#allocation173_spill] sm:$0xff]  ;;  %v12483_v26 = vld [vmem:[#allocation71_spill] sm:$0xff] }
 0x5e7   :  { %12476 = vst [vmem:[#allocation31_spill] sm:$0xff] %v10898_v31  ;;  %v10906_v33 = vadd.f32 %v12481_v15, %v12480_v53  ;;  %v12484_v4 = vld [vmem:[#allocation174_spill] sm:$0xff]  ;;  %v12486_v56 = vld [vmem:[#allocation72_spill] sm:$0xff]  ;;  %v12487_v51 = vld [vmem:[#allocation175_spill] sm:$0xff] }
 0x5e8   :  { %12479 = vst [vmem:[#allocation134_spill] sm:$0xff] %v10902_v59  ;;  %v10910_v45 = vadd.f32 %v12484_v4, %v12483_v26  ;;  %v10914_v37 = vadd.f32 %v12487_v51, %v12486_v56  ;;  %v12489_v46 = vld [vmem:[#allocation73_spill] sm:$0xff]  ;;  %v12490_v19 = vld [vmem:[#allocation176_spill] sm:$0xff]  ;;  %v12492_v32 = vld [vmem:[#allocation74_spill] sm:$0xff] }
 0x5e9   :  { %12482 = vst [vmem:[#allocation32_spill] sm:$0xff] %v10906_v33  ;;  %v10918_v11 = vadd.f32 %v12490_v19, %v12489_v46  ;;  %v12493_v31 = vld [vmem:[#allocation177_spill] sm:$0xff]  ;;  %v12495_v2 = vld [vmem:[#allocation75_spill] sm:$0xff]  ;;  %v12496_v59 = vld [vmem:[#allocation178_spill] sm:$0xff] }
 0x5ea   :  { %12485 = vst [vmem:[#allocation135_spill] sm:$0xff] %v10910_v45  ;;  %12488 = vst [vmem:[#allocation33_spill] sm:$0xff] %v10914_v37  ;;  %v10922_v36 = vadd.f32 %v12493_v31, %v12492_v32  ;;  %v10926_v15 = vadd.f32 %v12496_v59, %v12495_v2  ;;  %v12498_v53 = vld [vmem:[#allocation76_spill] sm:$0xff]  ;;  %v12499_v33 = vld [vmem:[#allocation179_spill] sm:$0xff] }
 0x5eb   :  { %12491 = vst [vmem:[#allocation136_spill] sm:$0xff] %v10918_v11  ;;  %v10930_v4 = vadd.f32 %v12499_v33, %v12498_v53  ;;  %v12501_v26 = vld [vmem:[#allocation77_spill] sm:$0xff]  ;;  %v12502_v45 = vld [vmem:[#allocation180_spill] sm:$0xff]  ;;  %v12504_v56 = vld [vmem:[#allocation78_spill] sm:$0xff] }
 0x5ec   :  { %12494 = vst [vmem:[#allocation34_spill] sm:$0xff] %v10922_v36  ;;  %12497 = vst [vmem:[#allocation137_spill] sm:$0xff] %v10926_v15  ;;  %v10934_v51 = vadd.f32 %v12502_v45, %v12501_v26  ;;  %v12505_v37 = vld [vmem:[#allocation181_spill] sm:$0xff]  ;;  %v12507_v46 = vld [vmem:[#allocation79_spill] sm:$0xff] }
 0x5ed   :  { %12500 = vst [vmem:[#allocation35_spill] sm:$0xff] %v10930_v4  ;;  %v10938_v19 = vadd.f32 %v12505_v37, %v12504_v56  ;;  %v12508_v11 = vld [vmem:[#allocation182_spill] sm:$0xff]  ;;  %v12510_v32 = vld [vmem:[#allocation80_spill] sm:$0xff]  ;;  %v12511_v36 = vld [vmem:[#allocation183_spill] sm:$0xff] }
 0x5ee   :  { %12503 = vst [vmem:[#allocation138_spill] sm:$0xff] %v10934_v51  ;;  %v10942_v31 = vadd.f32 %v12508_v11, %v12507_v46  ;;  %v10946_v59 = vadd.f32 %v12511_v36, %v12510_v32  ;;  %v12513_v2 = vld [vmem:[#allocation81_spill] sm:$0xff]  ;;  %v12514_v15 = vld [vmem:[#allocation184_spill] sm:$0xff]  ;;  %v12516_v53 = vld [vmem:[#allocation82_spill] sm:$0xff] }
 0x5ef   :  { %12506 = vst [vmem:[#allocation36_spill] sm:$0xff] %v10938_v19  ;;  %v10950_v33 = vadd.f32 %v12514_v15, %v12513_v2  ;;  %v12517_v4 = vld [vmem:[#allocation185_spill] sm:$0xff]  ;;  %v12519_v26 = vld [vmem:[#allocation83_spill] sm:$0xff]  ;;  %v12520_v51 = vld [vmem:[#allocation186_spill] sm:$0xff] }
 0x5f0   :  { %12509 = vst [vmem:[#allocation139_spill] sm:$0xff] %v10942_v31  ;;  %12512 = vst [vmem:[#allocation37_spill] sm:$0xff] %v10946_v59  ;;  %v10954_v45 = vadd.f32 %v12517_v4, %v12516_v53  ;;  %v10958_v37 = vadd.f32 %v12520_v51, %v12519_v26  ;;  %v12522_v56 = vld [vmem:[#allocation84_spill] sm:$0xff]  ;;  %v12523_v19 = vld [vmem:[#allocation187_spill] sm:$0xff] }
 0x5f1   :  { %12515 = vst [vmem:[#allocation140_spill] sm:$0xff] %v10950_v33  ;;  %v10962_v11 = vadd.f32 %v12523_v19, %v12522_v56  ;;  %v12525_v46 = vld [vmem:[#allocation85_spill] sm:$0xff]  ;;  %v12526_v31 = vld [vmem:[#allocation188_spill] sm:$0xff]  ;;  %v12528_v32 = vld [vmem:[#allocation86_spill] sm:$0xff] }
 0x5f2   :  { %12518 = vst [vmem:[#allocation38_spill] sm:$0xff] %v10954_v45  ;;  %12521 = vst [vmem:[#allocation141_spill] sm:$0xff] %v10958_v37  ;;  %v10966_v36 = vadd.f32 %v12526_v31, %v12525_v46  ;;  %v12529_v59 = vld [vmem:[#allocation189_spill] sm:$0xff]  ;;  %v12531_v2 = vld [vmem:[#allocation87_spill] sm:$0xff] }
 0x5f3   :  { %12524 = vst [vmem:[#allocation39_spill] sm:$0xff] %v10962_v11  ;;  %v10970_v15 = vadd.f32 %v12529_v59, %v12528_v32  ;;  %v12532_v33 = vld [vmem:[#allocation190_spill] sm:$0xff]  ;;  %v12534_v53 = vld [vmem:[#allocation88_spill] sm:$0xff]  ;;  %v12535_v45 = vld [vmem:[#allocation191_spill] sm:$0xff] }
 0x5f4   :  { %12527 = vst [vmem:[#allocation142_spill] sm:$0xff] %v10966_v36  ;;  %v10974_v4 = vadd.f32 %v12532_v33, %v12531_v2  ;;  %v10978_v51 = vadd.f32 %v12535_v45, %v12534_v53  ;;  %v12537_v26 = vld [vmem:[#allocation89_spill] sm:$0xff]  ;;  %v12538_v37 = vld [vmem:[#allocation192_spill] sm:$0xff]  ;;  %v12540_v56 = vld [vmem:[#allocation90_spill] sm:$0xff] }
 0x5f5   :  { %12530 = vst [vmem:[#allocation40_spill] sm:$0xff] %v10970_v15  ;;  %v10982_v19 = vadd.f32 %v12538_v37, %v12537_v26  ;;  %v12541_v11 = vld [vmem:[#allocation193_spill] sm:$0xff]  ;;  %v12543_v46 = vld [vmem:[#allocation91_spill] sm:$0xff]  ;;  %v12544_v36 = vld [vmem:[#allocation194_spill] sm:$0xff] }
 0x5f6   :  { %12533 = vst [vmem:[#allocation143_spill] sm:$0xff] %v10974_v4  ;;  %12536 = vst [vmem:[#allocation41_spill] sm:$0xff] %v10978_v51  ;;  %v10986_v31 = vadd.f32 %v12541_v11, %v12540_v56  ;;  %v10990_v59 = vadd.f32 %v12544_v36, %v12543_v46  ;;  %v12546_v32 = vld [vmem:[#allocation92_spill] sm:$0xff]  ;;  %v12547_v15 = vld [vmem:[#allocation195_spill] sm:$0xff] }
 0x5f7   :  { %12539 = vst [vmem:[#allocation144_spill] sm:$0xff] %v10982_v19  ;;  %v10994_v33 = vadd.f32 %v12547_v15, %v12546_v32  ;;  %v12549_v2 = vld [vmem:[#allocation93_spill] sm:$0xff]  ;;  %v12550_v4 = vld [vmem:[#allocation196_spill] sm:$0xff]  ;;  %v12552_v53 = vld [vmem:[#allocation94_spill] sm:$0xff] }
 0x5f8   :  { %12542 = vst [vmem:[#allocation42_spill] sm:$0xff] %v10986_v31  ;;  %12545 = vst [vmem:[#allocation145_spill] sm:$0xff] %v10990_v59  ;;  %v10998_v45 = vadd.f32 %v12550_v4, %v12549_v2  ;;  %v12553_v51 = vld [vmem:[#allocation197_spill] sm:$0xff]  ;;  %v12555_v26 = vld [vmem:[#allocation95_spill] sm:$0xff] }
 0x5f9   :  { %12548 = vst [vmem:[#allocation43_spill] sm:$0xff] %v10994_v33  ;;  %v11002_v37 = vadd.f32 %v12553_v51, %v12552_v53  ;;  %v12556_v19 = vld [vmem:[#allocation198_spill] sm:$0xff]  ;;  %v12558_v56 = vld [vmem:[#allocation96_spill] sm:$0xff]  ;;  %v12559_v31 = vld [vmem:[#allocation199_spill] sm:$0xff] }
 0x5fa   :  { %12551 = vst [vmem:[#allocation146_spill] sm:$0xff] %v10998_v45  ;;  %v11006_v11 = vadd.f32 %v12556_v19, %v12555_v26  ;;  %v11010_v36 = vadd.f32 %v12559_v31, %v12558_v56  ;;  %v12561_v46 = vld [vmem:[#allocation97_spill] sm:$0xff]  ;;  %v12562_v59 = vld [vmem:[#allocation200_spill] sm:$0xff]  ;;  %v12564_v32 = vld [vmem:[#allocation98_spill] sm:$0xff] }
 0x5fb   :  { %12554 = vst [vmem:[#allocation44_spill] sm:$0xff] %v11002_v37  ;;  %v11014_v15 = vadd.f32 %v12562_v59, %v12561_v46  ;;  %v12565_v33 = vld [vmem:[#allocation201_spill] sm:$0xff]  ;;  %v12567_v2 = vld [vmem:[#allocation99_spill] sm:$0xff]  ;;  %v12568_v45 = vld [vmem:[#allocation202_spill] sm:$0xff] }
 0x5fc   :  { %12557 = vst [vmem:[#allocation147_spill] sm:$0xff] %v11006_v11  ;;  %12560 = vst [vmem:[#allocation45_spill] sm:$0xff] %v11010_v36  ;;  %v11018_v4 = vadd.f32 %v12565_v33, %v12564_v32  ;;  %v11022_v51 = vadd.f32 %v12568_v45, %v12567_v2  ;;  %v12570_v53 = vld [vmem:[#allocation100_spill] sm:$0xff]  ;;  %v12571_v37 = vld [vmem:[#allocation203_spill] sm:$0xff] }
 0x5fd   :  { %12563 = vst [vmem:[#allocation148_spill] sm:$0xff] %v11014_v15  ;;  %v11026_v19 = vadd.f32 %v12571_v37, %v12570_v53  ;;  %v12573_v26 = vld [vmem:[#allocation101_spill] sm:$0xff]  ;;  %v12574_v11 = vld [vmem:[#allocation204_spill] sm:$0xff]  ;;  %v12576_v56 = vld [vmem:[#allocation102_spill] sm:$0xff] }
 0x5fe   :  { %12566 = vst [vmem:[#allocation46_spill] sm:$0xff] %v11018_v4  ;;  %12569 = vst [vmem:[#allocation149_spill] sm:$0xff] %v11022_v51  ;;  %v11030_v31 = vadd.f32 %v12574_v11, %v12573_v26  ;;  %v12577_v36 = vld [vmem:[#allocation205_spill] sm:$0xff]  ;;  %v12579_v46 = vld [vmem:[#allocation103_spill] sm:$0xff] }
 0x5ff   :  { %12572 = vst [vmem:[#allocation47_spill] sm:$0xff] %v11026_v19  ;;  %v11034_v59 = vadd.f32 %v12577_v36, %v12576_v56  ;;  %v12580_v15 = vld [vmem:[#allocation206_spill] sm:$0xff]  ;;  %v12582_v32 = vld [vmem:[#allocation104_spill] sm:$0xff]  ;;  %v12583_v4 = vld [vmem:[#allocation207_spill] sm:$0xff] }
 0x600   :  { %12575 = vst [vmem:[#allocation150_spill] sm:$0xff] %v11030_v31  ;;  %v11038_v33 = vadd.f32 %v12580_v15, %v12579_v46  ;;  %v11042_v45 = vadd.f32 %v12583_v4, %v12582_v32  ;;  %v12585_v2 = vld [vmem:[#allocation105_spill] sm:$0xff]  ;;  %v12586_v51 = vld [vmem:[#allocation208_spill] sm:$0xff]  ;;  %v12588_v53 = vld [vmem:[#allocation106_spill] sm:$0xff] }
 0x601   :  { %12578 = vst [vmem:[#allocation48_spill] sm:$0xff] %v11034_v59  ;;  %v11046_v37 = vadd.f32 %v12586_v51, %v12585_v2  ;;  %v12589_v19 = vld [vmem:[#allocation209_spill] sm:$0xff]  ;;  %v12591_v26 = vld [vmem:[#allocation107_spill] sm:$0xff]  ;;  %v12592_v31 = vld [vmem:[#allocation210_spill] sm:$0xff] }
 0x602   :  { %12581 = vst [vmem:[#allocation151_spill] sm:$0xff] %v11038_v33  ;;  %12584 = vst [vmem:[#allocation49_spill] sm:$0xff] %v11042_v45  ;;  %v11050_v11 = vadd.f32 %v12589_v19, %v12588_v53  ;;  %v11054_v36 = vadd.f32 %v12592_v31, %v12591_v26  ;;  %v12594_v56 = vld [vmem:[#allocation108_spill] sm:$0xff]  ;;  %v12595_v59 = vld [vmem:[#allocation211_spill] sm:$0xff] }
 0x603   :  { %12587 = vst [vmem:[#allocation152_spill] sm:$0xff] %v11046_v37  ;;  %v11058_v15 = vadd.f32 %v12595_v59, %v12594_v56  ;;  %v12597_v46 = vld [vmem:[#allocation109_spill] sm:$0xff]  ;;  %v12598_v33 = vld [vmem:[#allocation212_spill] sm:$0xff]  ;;  %v12600_v32 = vld [vmem:[#allocation110_spill] sm:$0xff] }
 0x604   :  { %12590 = vst [vmem:[#allocation50_spill] sm:$0xff] %v11050_v11  ;;  %12593 = vst [vmem:[#allocation153_spill] sm:$0xff] %v11054_v36  ;;  %v11062_v4 = vadd.f32 %v12598_v33, %v12597_v46  ;;  %v12601_v45 = vld [vmem:[#allocation213_spill] sm:$0xff]  ;;  %v12603_v2 = vld [vmem:[#allocation111_spill] sm:$0xff] }
 0x605   :  { %12596 = vst [vmem:[#allocation51_spill] sm:$0xff] %v11058_v15  ;;  %v11066_v51 = vadd.f32 %v12601_v45, %v12600_v32  ;;  %v12604_v37 = vld [vmem:[#allocation214_spill] sm:$0xff]  ;;  %v12605_v53 = vld [vmem:[#allocation112_spill] sm:$0xff]  ;;  %v12606_v11 = vld [vmem:[#allocation215_spill] sm:$0xff] }
 0x606   :  { %12599 = vst [vmem:[#allocation154_spill] sm:$0xff] %v11062_v4  ;;  %v11070_v19 = vadd.f32 %v12604_v37, %v12603_v2  ;;  %v11074_v31 = vadd.f32 %v12606_v11, %v12605_v53  ;;  %v12607_v26 = vld [vmem:[#allocation113_spill] sm:$0xff]  ;;  %v12608_v36 = vld [vmem:[#allocation216_spill] sm:$0xff]  ;;  %v12609_v56 = vld [vmem:[#allocation114_spill] sm:$0xff] }
 0x607   :  { %12602 = vst [vmem:[#allocation52_spill] sm:$0xff] %v11066_v51  ;;  %v11078_v59 = vadd.f32 %v12608_v36, %v12607_v26  ;;  %v12610_v15 = vld [vmem:[#allocation217_spill] sm:$0xff]  ;;  %v12611_v46 = vld [vmem:[#allocation115_spill] sm:$0xff]  ;;  %v12612_v4 = vld [vmem:[#allocation218_spill] sm:$0xff] }
 0x608   :  { %v11082_v33 = vadd.f32 %v12610_v15, %v12609_v56  ;;  %v11086_v45 = vadd.f32 %v12612_v4, %v12611_v46  ;;  %v12613_v32 = vld [vmem:[#allocation116_spill] sm:$0xff]  ;;  %v12614_v51 = vld [vmem:[#allocation219_spill] sm:$0xff]  ;;  %v12615_v2 = vld [vmem:[#allocation117_spill] sm:$0xff] }
 0x609   :  { %v11090_v37 = vadd.f32 %v12614_v51, %v12613_v32  ;;  %v11094_v11 = vadd.f32 %v9814_v20, %v12615_v2  ;;  %v12616_v53 = vld [vmem:[#allocation220_spill] sm:$0xff]  ;;  %v12617_v26 = vld [vmem:[#allocation221_spill] sm:$0xff]  ;;  %v12618_v56 = vld [vmem:[#allocation222_spill] sm:$0xff] }
 0x60a   :  { %v11098_v36 = vadd.f32 %v12616_v53, %v10586_v8  ;;  %v11102_v15 = vadd.f32 %v12617_v26, %v10590_v14  ;;  %v11106_v4 = vadd.f32 %v12618_v56, %v10594_v52  ;;  %v12619_v46 = vld [vmem:[#allocation223_spill] sm:$0xff]  ;;  %v12620_v32 = vld [vmem:[#allocation224_spill] sm:$0xff]  ;;  %v12621_v2 = vld [vmem:[#allocation225_spill] sm:$0xff] }
 0x60b   :  { %v11110_v51 = vadd.f32 %v12619_v46, %v10598_v60  ;;  %v11114_v20 = vadd.f32 %v12620_v32, %v10602_v16  ;;  %v11118_v8 = vadd.f32 %v12621_v2, %v10606_v40  ;;  %v12622_v53 = vld [vmem:[#allocation226_spill] sm:$0xff]  ;;  %v12623_v26 = vld [vmem:[#allocation227_spill] sm:$0xff]  ;;  %v12624_v56 = vld [vmem:[#allocation228_spill] sm:$0xff] }
 0x60c   :  { %v11122_v14 = vadd.f32 %v12622_v53, %v10610_v41  ;;  %v11126_v52 = vadd.f32 %v12623_v26, %v10614_v48  ;;  %v11130_v60 = vadd.f32 %v12624_v56, %v10618_v1  ;;  %v12625_v46 = vld [vmem:[#allocation229_spill] sm:$0xff]  ;;  %v12626_v32 = vld [vmem:[#allocation230_spill] sm:$0xff]  ;;  %v12627_v2 = vld [vmem:[#allocation231_spill] sm:$0xff] }
 0x60d   :  { %v11134_v16 = vadd.f32 %v12625_v46, %v10622_v18  ;;  %v11138_v40 = vadd.f32 %v12626_v32, %v10626_v24  ;;  %v11142_v41 = vadd.f32 %v12627_v2, %v10630_v50  ;;  %v12628_v53 = vld [vmem:[#allocation232_spill] sm:$0xff]  ;;  %v12629_v26 = vld [vmem:[#allocation233_spill] sm:$0xff]  ;;  %v12630_v56 = vld [vmem:[#allocation234_spill] sm:$0xff] }
 0x60e   :  { %v11146_v48 = vadd.f32 %v12628_v53, %v10634_v3  ;;  %v11150_v1 = vadd.f32 %v12629_v26, %v10638_v27  ;;  %v11154_v18 = vadd.f32 %v12630_v56, %v10642_v28  ;;  %v12631_v46 = vld [vmem:[#allocation235_spill] sm:$0xff]  ;;  %v12632_v32 = vld [vmem:[#allocation236_spill] sm:$0xff]  ;;  %v12633_v2 = vld [vmem:[#allocation237_spill] sm:$0xff] }
 0x60f   :  { %v11158_v24 = vadd.f32 %v12631_v46, %v10646_v23  ;;  %v11162_v50 = vadd.f32 %v12632_v32, %v10650_v35  ;;  %v11166_v3 = vadd.f32 %v12633_v2, %v10654_v38  ;;  %v12634_v53 = vld [vmem:[#allocation238_spill] sm:$0xff]  ;;  %v12635_v26 = vld [vmem:[#allocation239_spill] sm:$0xff]  ;;  %v12636_v56 = vld [vmem:[#allocation240_spill] sm:$0xff] }
 0x610   :  { %v11170_v27 = vadd.f32 %v12634_v53, %v10658_v30  ;;  %v11174_v28 = vadd.f32 %v12635_v26, %v10662_v29  ;;  %v11178_v23 = vadd.f32 %v12636_v56, %v10666_v7  ;;  %v12637_v46 = vld [vmem:[#allocation241_spill] sm:$0xff]  ;;  %v12638_v32 = vld [vmem:[#allocation242_spill] sm:$0xff]  ;;  %v12639_v2 = vld [vmem:[#allocation243_spill] sm:$0xff] }
 0x611   :  { %v11182_v35 = vadd.f32 %v12637_v46, %v10670_v42  ;;  %v11186_v38 = vadd.f32 %v12638_v32, %v10674_v49  ;;  %v11190_v30 = vadd.f32 %v12639_v2, %v10678_v54  ;;  %v12640_v53 = vld [vmem:[#allocation244_spill] sm:$0xff]  ;;  %v12641_v26 = vld [vmem:[#allocation245_spill] sm:$0xff]  ;;  %v12642_v56 = vld [vmem:[#allocation246_spill] sm:$0xff] }
 0x612   :  { %v11194_v29 = vadd.f32 %v12640_v53, %v10682_v47  ;;  %v11198_v7 = vadd.f32 %v12641_v26, %v10686_v58  ;;  %v11202_v42 = vadd.f32 %v12642_v56, %v10690_v61  ;;  %v12643_v46 = vld [vmem:[#allocation247_spill] sm:$0xff]  ;;  %v12644_v32 = vld [vmem:[#allocation248_spill] sm:$0xff]  ;;  %v12645_v2 = vld [vmem:[#allocation249_spill] sm:$0xff] }
 0x613   :  { %v11206_v49 = vadd.f32 %v12643_v46, %v10694_v34  ;;  %v11210_v54 = vadd.f32 %v12644_v32, %v10698_v0  ;;  %v11214_v47 = vadd.f32 %v12645_v2, %v10702_v5  ;;  %v12646_v53 = vld [vmem:[#allocation250_spill] sm:$0xff]  ;;  %v12647_v26 = vld [vmem:[#allocation251_spill] sm:$0xff]  ;;  %v12648_v56 = vld [vmem:[#allocation252_spill] sm:$0xff] }
 0x614   :  { %v11218_v58 = vadd.f32 %v12646_v53, %v10706_v39  ;;  %v11222_v61 = vadd.f32 %v12647_v26, %v10710_v43  ;;  %v11226_v34 = vadd.f32 %v12648_v56, %v10714_v22  ;;  %v12649_v46 = vld [vmem:[#allocation253_spill] sm:$0xff]  ;;  %v12650_v32 = vld [vmem:[#allocation254_spill] sm:$0xff]  ;;  %v12651_v2 = vld [vmem:[#allocation255_spill] sm:$0xff] }
 0x615   :  { %v11230_v0 = vadd.f32 %v12649_v46, %v10718_v55  ;;  %v11234_v5 = vadd.f32 %v12650_v32, %v10722_v10  ;;  %v11238_v39 = vadd.f32 %v12651_v2, %v10726_v17  ;;  %v12652_v53 = vld [vmem:[#allocation256_spill] sm:$0xff]  ;;  %v12653_v26 = vld [vmem:[#allocation257_spill] sm:$0xff]  ;;  %v12654_v56 = vld [vmem:[#allocation258_spill] sm:$0xff] }
 0x616   :  { %v11242_v43 = vadd.f32 %v12652_v53, %v10730_v12  ;;  %v11246_v22 = vadd.f32 %v12653_v26, %v10734_v13  ;;  %v11250_v55 = vadd.f32 %v12654_v56, %v10738_v57  ;;  %v12655_v46 = vld [vmem:[#allocation259_spill] sm:$0xff]  ;;  %v12656_v32 = vld [vmem:[#allocation260_spill] sm:$0xff]  ;;  %v12658_v2 = vld [vmem:[#allocation261_spill] sm:$0xff] }
 0x617   :  { %v11254_v10 = vadd.f32 %v12655_v46, %v10742_v25  ;;  %v11258_v17 = vadd.f32 %v12656_v32, %v10746_v63  ;;  %v11262_v12 = vadd.f32 %v12658_v2, %v10750_v44  ;;  %v12660_v53 = vld [vmem:[#allocation262_spill] sm:$0xff]  ;;  %v12662_v26 = vld [vmem:[#allocation263_spill] sm:$0xff]  ;;  %v12664_v56 = vld [vmem:[#allocation264_spill] sm:$0xff] }
 0x618   :  { %v11266_v13 = vadd.f32 %v12660_v53, %v10754_v21  ;;  %v11270_v57 = vadd.f32 %v12662_v26, %v10758_v6  ;;  %v11274_v25 = vadd.f32 %v12664_v56, %v10762_v62  ;;  %v12666_v46 = vld [vmem:[#allocation265_spill] sm:$0xff]  ;;  %v12668_v32 = vld [vmem:[#allocation15_spill] sm:$0xff]  ;;  %v12671_v2 = vld [vmem:[#allocation118_spill] sm:$0xff] }
 0x619   :  { %12657 = vst [vmem:[#allocation155_spill] sm:$0xff] %v11258_v17  ;;  %12659 = vst [vmem:[#allocation53_spill] sm:$0xff] %v11262_v12  ;;  %v11278_v63 = vadd.f32 %v12666_v46, %v10766_v9  ;;  %v12669_v17 = vld [vmem:[#allocation266_spill] sm:$0xff]  ;;  %v12672_v12 = vld [vmem:[#allocation267_spill] sm:$0xff] }
 0x61a   :  { %12661 = vst [vmem:[#allocation156_spill] sm:$0xff] %v11266_v13  ;;  %12663 = vst [vmem:[#allocation54_spill] sm:$0xff] %v11270_v57  ;;  %v11282_v44 = vadd.f32 %v12669_v17, %v12668_v32  ;;  %v11286_v21 = vadd.f32 %v12672_v12, %v12671_v2  ;;  %v12674_v53 = vld [vmem:[#allocation16_spill] sm:$0xff]  ;;  %v12677_v26 = vld [vmem:[#allocation119_spill] sm:$0xff] }
 0x61b   :  { %12665 = vst [vmem:[#allocation157_spill] sm:$0xff] %v11274_v25  ;;  %12667 = vst [vmem:[#allocation55_spill] sm:$0xff] %v11278_v63  ;;  %v12675_v13 = vld [vmem:[#allocation268_spill] sm:$0xff]  ;;  %v12678_v57 = vld [vmem:[#allocation269_spill] sm:$0xff] }
 0x61c   :  { %12670 = vst [vmem:[#allocation158_spill] sm:$0xff] %v11282_v44  ;;  %12673 = vst [vmem:[#allocation56_spill] sm:$0xff] %v11286_v21  ;;  %v11290_v6 = vadd.f32 %v12675_v13, %v12674_v53  ;;  %v11294_v62 = vadd.f32 %v12678_v57, %v12677_v26  ;;  %v12680_v56 = vld [vmem:[#allocation17_spill] sm:$0xff]  ;;  %v12681_v25 = vld [vmem:[#allocation270_spill] sm:$0xff] }
 0x61d   :  { %v11298_v9 = vadd.f32 %v12681_v25, %v12680_v56  ;;  %v12683_v46 = vld [vmem:[#allocation120_spill] sm:$0xff]  ;;  %v12684_v63 = vld [vmem:[#allocation271_spill] sm:$0xff]  ;;  %v12686_v32 = vld [vmem:[#allocation18_spill] sm:$0xff] }
 0x61e   :  { %12676 = vst [vmem:[#allocation159_spill] sm:$0xff] %v11290_v6  ;;  %12679 = vst [vmem:[#allocation57_spill] sm:$0xff] %v11294_v62  ;;  %v11302_v17 = vadd.f32 %v12684_v63, %v12683_v46  ;;  %v12687_v44 = vld [vmem:[#allocation272_spill] sm:$0xff]  ;;  %v12689_v2 = vld [vmem:[#allocation121_spill] sm:$0xff] }
 0x61f   :  { %12682 = vst [vmem:[#allocation160_spill] sm:$0xff] %v11298_v9  ;;  %v11306_v12 = vadd.f32 %v12687_v44, %v12686_v32  ;;  %v12690_v21 = vld [vmem:[#allocation273_spill] sm:$0xff]  ;;  %v12692_v53 = vld [vmem:[#allocation19_spill] sm:$0xff]  ;;  %v12693_v6 = vld [vmem:[#allocation274_spill] sm:$0xff] }
 0x620   :  { %12685 = vst [vmem:[#allocation58_spill] sm:$0xff] %v11302_v17  ;;  %v11310_v13 = vadd.f32 %v12690_v21, %v12689_v2  ;;  %v11314_v57 = vadd.f32 %v12693_v6, %v12692_v53  ;;  %v12695_v26 = vld [vmem:[#allocation122_spill] sm:$0xff]  ;;  %v12696_v62 = vld [vmem:[#allocation275_spill] sm:$0xff]  ;;  %v12698_v56 = vld [vmem:[#allocation20_spill] sm:$0xff] }
 0x621   :  { %12688 = vst [vmem:[#allocation161_spill] sm:$0xff] %v11306_v12  ;;  %v11318_v25 = vadd.f32 %v12696_v62, %v12695_v26  ;;  %v12699_v9 = vld [vmem:[#allocation276_spill] sm:$0xff]  ;;  %v12701_v46 = vld [vmem:[#allocation123_spill] sm:$0xff]  ;;  %v12702_v17 = vld [vmem:[#allocation277_spill] sm:$0xff] }
 0x622   :  { %12691 = vst [vmem:[#allocation59_spill] sm:$0xff] %v11310_v13  ;;  %12694 = vst [vmem:[#allocation162_spill] sm:$0xff] %v11314_v57  ;;  %v11322_v63 = vadd.f32 %v12699_v9, %v12698_v56  ;;  %v11326_v44 = vadd.f32 %v12702_v17, %v12701_v46  ;;  %v12704_v32 = vld [vmem:[#allocation21_spill] sm:$0xff]  ;;  %v12705_v12 = vld [vmem:[#allocation278_spill] sm:$0xff] }
 0x623   :  { %12697 = vst [vmem:[#allocation60_spill] sm:$0xff] %v11318_v25  ;;  %v11330_v21 = vadd.f32 %v12705_v12, %v12704_v32  ;;  %v12707_v2 = vld [vmem:[#allocation124_spill] sm:$0xff]  ;;  %v12708_v13 = vld [vmem:[#allocation279_spill] sm:$0xff]  ;;  %v12710_v53 = vld [vmem:[#allocation22_spill] sm:$0xff] }
 0x624   :  { %12700 = vst [vmem:[#allocation163_spill] sm:$0xff] %v11322_v63  ;;  %12703 = vst [vmem:[#allocation61_spill] sm:$0xff] %v11326_v44  ;;  %v11334_v6 = vadd.f32 %v12708_v13, %v12707_v2  ;;  %v12711_v57 = vld [vmem:[#allocation280_spill] sm:$0xff]  ;;  %v12713_v26 = vld [vmem:[#allocation125_spill] sm:$0xff] }
 0x625   :  { %12706 = vst [vmem:[#allocation164_spill] sm:$0xff] %v11330_v21  ;;  %v11338_v62 = vadd.f32 %v12711_v57, %v12710_v53  ;;  %v12714_v25 = vld [vmem:[#allocation281_spill] sm:$0xff]  ;;  %v12716_v56 = vld [vmem:[#allocation23_spill] sm:$0xff]  ;;  %v12717_v63 = vld [vmem:[#allocation282_spill] sm:$0xff] }
 0x626   :  { %12709 = vst [vmem:[#allocation62_spill] sm:$0xff] %v11334_v6  ;;  %v11342_v9 = vadd.f32 %v12714_v25, %v12713_v26  ;;  %v11346_v17 = vadd.f32 %v12717_v63, %v12716_v56  ;;  %v12719_v46 = vld [vmem:[#allocation126_spill] sm:$0xff]  ;;  %v12720_v44 = vld [vmem:[#allocation283_spill] sm:$0xff]  ;;  %v12722_v32 = vld [vmem:[#allocation24_spill] sm:$0xff] }
 0x627   :  { %12712 = vst [vmem:[#allocation165_spill] sm:$0xff] %v11338_v62  ;;  %v11350_v12 = vadd.f32 %v12720_v44, %v12719_v46  ;;  %v12723_v21 = vld [vmem:[#allocation284_spill] sm:$0xff]  ;;  %v12725_v2 = vld [vmem:[#allocation127_spill] sm:$0xff]  ;;  %v12726_v6 = vld [vmem:[#allocation285_spill] sm:$0xff] }
 0x628   :  { %12715 = vst [vmem:[#allocation63_spill] sm:$0xff] %v11342_v9  ;;  %12718 = vst [vmem:[#allocation166_spill] sm:$0xff] %v11346_v17  ;;  %v11354_v13 = vadd.f32 %v12723_v21, %v12722_v32  ;;  %v11358_v57 = vadd.f32 %v12726_v6, %v12725_v2  ;;  %v12728_v53 = vld [vmem:[#allocation25_spill] sm:$0xff]  ;;  %v12729_v62 = vld [vmem:[#allocation286_spill] sm:$0xff] }
 0x629   :  { %12721 = vst [vmem:[#allocation64_spill] sm:$0xff] %v11350_v12  ;;  %v11362_v25 = vadd.f32 %v12729_v62, %v12728_v53  ;;  %v12731_v26 = vld [vmem:[#allocation128_spill] sm:$0xff]  ;;  %v12732_v9 = vld [vmem:[#allocation287_spill] sm:$0xff]  ;;  %v12734_v56 = vld [vmem:[#allocation26_spill] sm:$0xff] }
 0x62a   :  { %12724 = vst [vmem:[#allocation167_spill] sm:$0xff] %v11354_v13  ;;  %12727 = vst [vmem:[#allocation65_spill] sm:$0xff] %v11358_v57  ;;  %v11366_v63 = vadd.f32 %v12732_v9, %v12731_v26  ;;  %v12735_v17 = vld [vmem:[#allocation288_spill] sm:$0xff]  ;;  %v12737_v46 = vld [vmem:[#allocation129_spill] sm:$0xff] }
 0x62b   :  { %12730 = vst [vmem:[#allocation168_spill] sm:$0xff] %v11362_v25  ;;  %v11370_v44 = vadd.f32 %v12735_v17, %v12734_v56  ;;  %v12738_v12 = vld [vmem:[#allocation289_spill] sm:$0xff]  ;;  %v12740_v32 = vld [vmem:[#allocation27_spill] sm:$0xff]  ;;  %v12741_v13 = vld [vmem:[#allocation290_spill] sm:$0xff] }
 0x62c   :  { %12733 = vst [vmem:[#allocation66_spill] sm:$0xff] %v11366_v63  ;;  %v11374_v21 = vadd.f32 %v12738_v12, %v12737_v46  ;;  %v11378_v6 = vadd.f32 %v12741_v13, %v12740_v32  ;;  %v12743_v2 = vld [vmem:[#allocation130_spill] sm:$0xff]  ;;  %v12744_v57 = vld [vmem:[#allocation291_spill] sm:$0xff]  ;;  %v12746_v53 = vld [vmem:[#allocation28_spill] sm:$0xff] }
 0x62d   :  { %12736 = vst [vmem:[#allocation169_spill] sm:$0xff] %v11370_v44  ;;  %v11382_v62 = vadd.f32 %v12744_v57, %v12743_v2  ;;  %v12747_v25 = vld [vmem:[#allocation292_spill] sm:$0xff]  ;;  %v12749_v26 = vld [vmem:[#allocation131_spill] sm:$0xff]  ;;  %v12750_v63 = vld [vmem:[#allocation293_spill] sm:$0xff] }
 0x62e   :  { %12739 = vst [vmem:[#allocation67_spill] sm:$0xff] %v11374_v21  ;;  %12742 = vst [vmem:[#allocation170_spill] sm:$0xff] %v11378_v6  ;;  %v11386_v9 = vadd.f32 %v12747_v25, %v12746_v53  ;;  %v11390_v17 = vadd.f32 %v12750_v63, %v12749_v26  ;;  %v12752_v56 = vld [vmem:[#allocation29_spill] sm:$0xff]  ;;  %v12753_v44 = vld [vmem:[#allocation294_spill] sm:$0xff] }
 0x62f   :  { %12745 = vst [vmem:[#allocation68_spill] sm:$0xff] %v11382_v62  ;;  %v11394_v12 = vadd.f32 %v12753_v44, %v12752_v56  ;;  %v12755_v46 = vld [vmem:[#allocation132_spill] sm:$0xff]  ;;  %v12756_v21 = vld [vmem:[#allocation295_spill] sm:$0xff]  ;;  %v12758_v32 = vld [vmem:[#allocation30_spill] sm:$0xff] }
 0x630   :  { %12748 = vst [vmem:[#allocation171_spill] sm:$0xff] %v11386_v9  ;;  %12751 = vst [vmem:[#allocation69_spill] sm:$0xff] %v11390_v17  ;;  %v11398_v13 = vadd.f32 %v12756_v21, %v12755_v46  ;;  %v12759_v6 = vld [vmem:[#allocation296_spill] sm:$0xff]  ;;  %v12761_v2 = vld [vmem:[#allocation133_spill] sm:$0xff] }
 0x631   :  { %12754 = vst [vmem:[#allocation172_spill] sm:$0xff] %v11394_v12  ;;  %v11402_v57 = vadd.f32 %v12759_v6, %v12758_v32  ;;  %v12762_v62 = vld [vmem:[#allocation297_spill] sm:$0xff]  ;;  %v12764_v53 = vld [vmem:[#allocation31_spill] sm:$0xff]  ;;  %v12765_v9 = vld [vmem:[#allocation298_spill] sm:$0xff] }
 0x632   :  { %12757 = vst [vmem:[#allocation70_spill] sm:$0xff] %v11398_v13  ;;  %v11406_v25 = vadd.f32 %v12762_v62, %v12761_v2  ;;  %v11410_v63 = vadd.f32 %v12765_v9, %v12764_v53  ;;  %v12767_v26 = vld [vmem:[#allocation134_spill] sm:$0xff]  ;;  %v12768_v17 = vld [vmem:[#allocation299_spill] sm:$0xff]  ;;  %v12770_v56 = vld [vmem:[#allocation32_spill] sm:$0xff] }
 0x633   :  { %12760 = vst [vmem:[#allocation173_spill] sm:$0xff] %v11402_v57  ;;  %v11414_v44 = vadd.f32 %v12768_v17, %v12767_v26  ;;  %v12771_v12 = vld [vmem:[#allocation300_spill] sm:$0xff]  ;;  %v12773_v46 = vld [vmem:[#allocation135_spill] sm:$0xff]  ;;  %v12774_v13 = vld [vmem:[#allocation301_spill] sm:$0xff] }
 0x634   :  { %12763 = vst [vmem:[#allocation71_spill] sm:$0xff] %v11406_v25  ;;  %12766 = vst [vmem:[#allocation174_spill] sm:$0xff] %v11410_v63  ;;  %v11418_v21 = vadd.f32 %v12771_v12, %v12770_v56  ;;  %v11422_v6 = vadd.f32 %v12774_v13, %v12773_v46  ;;  %v12776_v32 = vld [vmem:[#allocation33_spill] sm:$0xff]  ;;  %v12777_v57 = vld [vmem:[#allocation302_spill] sm:$0xff] }
 0x635   :  { %12769 = vst [vmem:[#allocation72_spill] sm:$0xff] %v11414_v44  ;;  %v11426_v62 = vadd.f32 %v12777_v57, %v12776_v32  ;;  %v12779_v2 = vld [vmem:[#allocation136_spill] sm:$0xff]  ;;  %v12780_v25 = vld [vmem:[#allocation303_spill] sm:$0xff]  ;;  %v12782_v53 = vld [vmem:[#allocation34_spill] sm:$0xff] }
 0x636   :  { %12772 = vst [vmem:[#allocation175_spill] sm:$0xff] %v11418_v21  ;;  %12775 = vst [vmem:[#allocation73_spill] sm:$0xff] %v11422_v6  ;;  %v11430_v9 = vadd.f32 %v12780_v25, %v12779_v2  ;;  %v12783_v63 = vld [vmem:[#allocation304_spill] sm:$0xff]  ;;  %v12785_v26 = vld [vmem:[#allocation137_spill] sm:$0xff] }
 0x637   :  { %12778 = vst [vmem:[#allocation176_spill] sm:$0xff] %v11426_v62  ;;  %v11434_v17 = vadd.f32 %v12783_v63, %v12782_v53  ;;  %v12786_v44 = vld [vmem:[#allocation305_spill] sm:$0xff]  ;;  %v12788_v56 = vld [vmem:[#allocation35_spill] sm:$0xff]  ;;  %v12789_v21 = vld [vmem:[#allocation306_spill] sm:$0xff] }
 0x638   :  { %12781 = vst [vmem:[#allocation74_spill] sm:$0xff] %v11430_v9  ;;  %v11438_v12 = vadd.f32 %v12786_v44, %v12785_v26  ;;  %v11442_v13 = vadd.f32 %v12789_v21, %v12788_v56  ;;  %v12791_v46 = vld [vmem:[#allocation138_spill] sm:$0xff]  ;;  %v12792_v6 = vld [vmem:[#allocation307_spill] sm:$0xff]  ;;  %v12794_v32 = vld [vmem:[#allocation36_spill] sm:$0xff] }
 0x639   :  { %12784 = vst [vmem:[#allocation177_spill] sm:$0xff] %v11434_v17  ;;  %v11446_v57 = vadd.f32 %v12792_v6, %v12791_v46  ;;  %v12795_v62 = vld [vmem:[#allocation308_spill] sm:$0xff]  ;;  %v12797_v2 = vld [vmem:[#allocation139_spill] sm:$0xff]  ;;  %v12798_v9 = vld [vmem:[#allocation309_spill] sm:$0xff] }
 0x63a   :  { %12787 = vst [vmem:[#allocation75_spill] sm:$0xff] %v11438_v12  ;;  %12790 = vst [vmem:[#allocation178_spill] sm:$0xff] %v11442_v13  ;;  %v11450_v25 = vadd.f32 %v12795_v62, %v12794_v32  ;;  %v11454_v63 = vadd.f32 %v12798_v9, %v12797_v2  ;;  %v12800_v53 = vld [vmem:[#allocation37_spill] sm:$0xff]  ;;  %v12801_v17 = vld [vmem:[#allocation310_spill] sm:$0xff] }
 0x63b   :  { %12793 = vst [vmem:[#allocation76_spill] sm:$0xff] %v11446_v57  ;;  %v11458_v44 = vadd.f32 %v12801_v17, %v12800_v53  ;;  %v12803_v26 = vld [vmem:[#allocation140_spill] sm:$0xff]  ;;  %v12804_v12 = vld [vmem:[#allocation311_spill] sm:$0xff]  ;;  %v12806_v56 = vld [vmem:[#allocation38_spill] sm:$0xff] }
 0x63c   :  { %12796 = vst [vmem:[#allocation179_spill] sm:$0xff] %v11450_v25  ;;  %12799 = vst [vmem:[#allocation77_spill] sm:$0xff] %v11454_v63  ;;  %v11462_v21 = vadd.f32 %v12804_v12, %v12803_v26  ;;  %v12807_v13 = vld [vmem:[#allocation312_spill] sm:$0xff]  ;;  %v12809_v46 = vld [vmem:[#allocation141_spill] sm:$0xff] }
 0x63d   :  { %12802 = vst [vmem:[#allocation180_spill] sm:$0xff] %v11458_v44  ;;  %v11466_v6 = vadd.f32 %v12807_v13, %v12806_v56  ;;  %v12810_v57 = vld [vmem:[#allocation313_spill] sm:$0xff]  ;;  %v12812_v32 = vld [vmem:[#allocation39_spill] sm:$0xff]  ;;  %v12813_v25 = vld [vmem:[#allocation314_spill] sm:$0xff] }
 0x63e   :  { %12805 = vst [vmem:[#allocation78_spill] sm:$0xff] %v11462_v21  ;;  %v11470_v62 = vadd.f32 %v12810_v57, %v12809_v46  ;;  %v11474_v9 = vadd.f32 %v12813_v25, %v12812_v32  ;;  %v12815_v2 = vld [vmem:[#allocation142_spill] sm:$0xff]  ;;  %v12816_v63 = vld [vmem:[#allocation315_spill] sm:$0xff]  ;;  %v12818_v53 = vld [vmem:[#allocation40_spill] sm:$0xff] }
 0x63f   :  { %12808 = vst [vmem:[#allocation181_spill] sm:$0xff] %v11466_v6  ;;  %v11478_v17 = vadd.f32 %v12816_v63, %v12815_v2  ;;  %v12819_v44 = vld [vmem:[#allocation316_spill] sm:$0xff]  ;;  %v12821_v26 = vld [vmem:[#allocation143_spill] sm:$0xff]  ;;  %v12822_v21 = vld [vmem:[#allocation317_spill] sm:$0xff] }
 0x640   :  { %12811 = vst [vmem:[#allocation79_spill] sm:$0xff] %v11470_v62  ;;  %12814 = vst [vmem:[#allocation182_spill] sm:$0xff] %v11474_v9  ;;  %v11482_v12 = vadd.f32 %v12819_v44, %v12818_v53  ;;  %v11486_v13 = vadd.f32 %v12822_v21, %v12821_v26  ;;  %v12824_v56 = vld [vmem:[#allocation41_spill] sm:$0xff]  ;;  %v12825_v6 = vld [vmem:[#allocation318_spill] sm:$0xff] }
 0x641   :  { %12817 = vst [vmem:[#allocation80_spill] sm:$0xff] %v11478_v17  ;;  %v11490_v57 = vadd.f32 %v12825_v6, %v12824_v56  ;;  %v12827_v46 = vld [vmem:[#allocation144_spill] sm:$0xff]  ;;  %v12828_v62 = vld [vmem:[#allocation319_spill] sm:$0xff]  ;;  %v12830_v32 = vld [vmem:[#allocation42_spill] sm:$0xff] }
 0x642   :  { %12820 = vst [vmem:[#allocation183_spill] sm:$0xff] %v11482_v12  ;;  %12823 = vst [vmem:[#allocation81_spill] sm:$0xff] %v11486_v13  ;;  %v11494_v25 = vadd.f32 %v12828_v62, %v12827_v46  ;;  %v12831_v9 = vld [vmem:[#allocation320_spill] sm:$0xff]  ;;  %v12833_v2 = vld [vmem:[#allocation145_spill] sm:$0xff] }
 0x643   :  { %12826 = vst [vmem:[#allocation184_spill] sm:$0xff] %v11490_v57  ;;  %v11498_v63 = vadd.f32 %v12831_v9, %v12830_v32  ;;  %v12834_v17 = vld [vmem:[#allocation321_spill] sm:$0xff]  ;;  %v12836_v53 = vld [vmem:[#allocation43_spill] sm:$0xff]  ;;  %v12837_v12 = vld [vmem:[#allocation322_spill] sm:$0xff] }
 0x644   :  { %12829 = vst [vmem:[#allocation82_spill] sm:$0xff] %v11494_v25  ;;  %v11502_v44 = vadd.f32 %v12834_v17, %v12833_v2  ;;  %v11506_v21 = vadd.f32 %v12837_v12, %v12836_v53  ;;  %v12839_v26 = vld [vmem:[#allocation146_spill] sm:$0xff]  ;;  %v12840_v13 = vld [vmem:[#allocation323_spill] sm:$0xff]  ;;  %v12842_v56 = vld [vmem:[#allocation44_spill] sm:$0xff] }
 0x645   :  { %12832 = vst [vmem:[#allocation185_spill] sm:$0xff] %v11498_v63  ;;  %v11510_v6 = vadd.f32 %v12840_v13, %v12839_v26  ;;  %v12843_v57 = vld [vmem:[#allocation324_spill] sm:$0xff]  ;;  %v12845_v46 = vld [vmem:[#allocation147_spill] sm:$0xff]  ;;  %v12846_v25 = vld [vmem:[#allocation325_spill] sm:$0xff] }
 0x646   :  { %12835 = vst [vmem:[#allocation83_spill] sm:$0xff] %v11502_v44  ;;  %12838 = vst [vmem:[#allocation186_spill] sm:$0xff] %v11506_v21  ;;  %v11514_v62 = vadd.f32 %v12843_v57, %v12842_v56  ;;  %v11518_v9 = vadd.f32 %v12846_v25, %v12845_v46  ;;  %v12848_v32 = vld [vmem:[#allocation45_spill] sm:$0xff]  ;;  %v12849_v63 = vld [vmem:[#allocation326_spill] sm:$0xff] }
 0x647   :  { %12841 = vst [vmem:[#allocation84_spill] sm:$0xff] %v11510_v6  ;;  %v11522_v17 = vadd.f32 %v12849_v63, %v12848_v32  ;;  %v12851_v2 = vld [vmem:[#allocation148_spill] sm:$0xff]  ;;  %v12852_v44 = vld [vmem:[#allocation327_spill] sm:$0xff]  ;;  %v12854_v53 = vld [vmem:[#allocation46_spill] sm:$0xff] }
 0x648   :  { %12844 = vst [vmem:[#allocation187_spill] sm:$0xff] %v11514_v62  ;;  %12847 = vst [vmem:[#allocation85_spill] sm:$0xff] %v11518_v9  ;;  %v11526_v12 = vadd.f32 %v12852_v44, %v12851_v2  ;;  %v12855_v21 = vld [vmem:[#allocation328_spill] sm:$0xff]  ;;  %v12857_v26 = vld [vmem:[#allocation149_spill] sm:$0xff] }
 0x649   :  { %12850 = vst [vmem:[#allocation188_spill] sm:$0xff] %v11522_v17  ;;  %v11530_v13 = vadd.f32 %v12855_v21, %v12854_v53  ;;  %v12858_v6 = vld [vmem:[#allocation329_spill] sm:$0xff]  ;;  %v12860_v56 = vld [vmem:[#allocation47_spill] sm:$0xff]  ;;  %v12861_v62 = vld [vmem:[#allocation330_spill] sm:$0xff] }
 0x64a   :  { %12853 = vst [vmem:[#allocation86_spill] sm:$0xff] %v11526_v12  ;;  %v11534_v57 = vadd.f32 %v12858_v6, %v12857_v26  ;;  %v11538_v25 = vadd.f32 %v12861_v62, %v12860_v56  ;;  %v12863_v46 = vld [vmem:[#allocation150_spill] sm:$0xff]  ;;  %v12864_v9 = vld [vmem:[#allocation331_spill] sm:$0xff]  ;;  %v12866_v32 = vld [vmem:[#allocation48_spill] sm:$0xff] }
 0x64b   :  { %12856 = vst [vmem:[#allocation189_spill] sm:$0xff] %v11530_v13  ;;  %v11542_v63 = vadd.f32 %v12864_v9, %v12863_v46  ;;  %v12867_v17 = vld [vmem:[#allocation332_spill] sm:$0xff]  ;;  %v12869_v2 = vld [vmem:[#allocation151_spill] sm:$0xff]  ;;  %v12870_v12 = vld [vmem:[#allocation333_spill] sm:$0xff] }
 0x64c   :  { %12859 = vst [vmem:[#allocation87_spill] sm:$0xff] %v11534_v57  ;;  %12862 = vst [vmem:[#allocation190_spill] sm:$0xff] %v11538_v25  ;;  %v11546_v44 = vadd.f32 %v12867_v17, %v12866_v32  ;;  %v11550_v21 = vadd.f32 %v12870_v12, %v12869_v2  ;;  %v12872_v53 = vld [vmem:[#allocation49_spill] sm:$0xff]  ;;  %v12873_v13 = vld [vmem:[#allocation334_spill] sm:$0xff] }
 0x64d   :  { %12865 = vst [vmem:[#allocation88_spill] sm:$0xff] %v11542_v63  ;;  %v11554_v6 = vadd.f32 %v12873_v13, %v12872_v53  ;;  %v12875_v26 = vld [vmem:[#allocation152_spill] sm:$0xff]  ;;  %v12876_v57 = vld [vmem:[#allocation335_spill] sm:$0xff]  ;;  %v12877_v56 = vld [vmem:[#allocation50_spill] sm:$0xff] }
 0x64e   :  { %12868 = vst [vmem:[#allocation191_spill] sm:$0xff] %v11546_v44  ;;  %12871 = vst [vmem:[#allocation89_spill] sm:$0xff] %v11550_v21  ;;  %v11558_v62 = vadd.f32 %v12876_v57, %v12875_v26  ;;  %v12878_v25 = vld [vmem:[#allocation336_spill] sm:$0xff]  ;;  %v12879_v46 = vld [vmem:[#allocation153_spill] sm:$0xff] }
 0x64f   :  { %12874 = vst [vmem:[#allocation192_spill] sm:$0xff] %v11554_v6  ;;  %v11562_v9 = vadd.f32 %v12878_v25, %v12877_v56  ;;  %v12880_v63 = vld [vmem:[#allocation337_spill] sm:$0xff]  ;;  %v12881_v32 = vld [vmem:[#allocation51_spill] sm:$0xff]  ;;  %v12882_v44 = vld [vmem:[#allocation338_spill] sm:$0xff] }
 0x650   :  { %v11566_v17 = vadd.f32 %v12880_v63, %v12879_v46  ;;  %v11570_v12 = vadd.f32 %v12882_v44, %v12881_v32  ;;  %v12883_v2 = vld [vmem:[#allocation154_spill] sm:$0xff]  ;;  %v12884_v21 = vld [vmem:[#allocation339_spill] sm:$0xff]  ;;  %v12885_v53 = vld [vmem:[#allocation52_spill] sm:$0xff] }
 0x651   :  { %v11574_v13 = vadd.f32 %v12884_v21, %v12883_v2  ;;  %v12886_v6 = vld [vmem:[#allocation340_spill] sm:$0xff]  ;;  %v12887_v26 = vld [vmem:[#allocation341_spill] sm:$0xff]  ;;  %v12888_v56 = vld [vmem:[#allocation342_spill] sm:$0xff] }
 0x652   :  { %v11578_v57 = vadd.f32 %v12886_v6, %v12885_v53  ;;  %v11582_v25 = vadd.f32 %v12887_v26, %v11070_v19  ;;  %v11586_v63 = vadd.f32 %v12888_v56, %v11074_v31  ;;  %v12889_v46 = vld [vmem:[#allocation343_spill] sm:$0xff]  ;;  %v12891_v32 = vld [vmem:[#allocation344_spill] sm:$0xff]  ;;  %v12892_v2 = vld [vmem:[#allocation345_spill] sm:$0xff] }
 0x653   :  { %v11590_v44 = vadd.f32 %v12889_v46, %v11078_v59  ;;  %v11594_v21 = vadd.f32 %v12891_v32, %v11082_v33  ;;  %v11598_v6 = vadd.f32 %v12892_v2, %v11086_v45  ;;  %v12894_v53 = vld [vmem:[#allocation346_spill] sm:$0xff]  ;;  %v12896_v26 = vld [vmem:[#allocation347_spill] sm:$0xff]  ;;  %v12897_v56 = vld [vmem:[#allocation348_spill] sm:$0xff] }
 0x654   :  { %v11602_v19 = vadd.f32 %v12894_v53, %v11090_v37  ;;  %v11606_v31 = vadd.f32 %v12896_v26, %v11094_v11  ;;  %v4923_v59 = vadd.f32 %v12897_v56, %v11098_v36  ;;  %v12898_v46 = vld [vmem:[#allocation349_spill] sm:$0xff]  ;;  %v12899_v33 = vld [vmem:[#allocation350_spill] sm:$0xff]  ;;  %v12900_v45 = vld [vmem:[#allocation351_spill] sm:$0xff] }
 0x655   :  { %12890 = vst [vmem:[#allocation90_spill] sm:$0xff] %v11590_v44  ;;  %12893 = vst [vmem:[#allocation193_spill] sm:$0xff] %v11598_v6  ;;  %v4924_v44 = vadd.f32 %v12898_v46, %v11102_v15  ;;  %v4925_v32 = vadd.f32 %v12899_v33, %v11106_v4  ;;  %v4926_v2 = vadd.f32 %v12900_v45, %v11110_v51  ;;  %v12901_v6 = vld [vmem:[#allocation352_spill] sm:$0xff]  ;;  %v12902_v53 = vld [vmem:[#allocation353_spill] sm:$0xff] }
 0x656   :  { %12895 = vst [vmem:[#allocation91_spill] sm:$0xff] %v11602_v19  ;;  %v4927_v37 = vadd.f32 %v12901_v6, %v11114_v20  ;;  %v4928_v19 = vadd.f32 %v12902_v53, %v11118_v8  ;;  %v12903_v11 = vld [vmem:[#allocation354_spill] sm:$0xff]  ;;  %v12904_v36 = vld [vmem:[#allocation355_spill] sm:$0xff]  ;;  %v12905_v15 = vld [vmem:[#allocation356_spill] sm:$0xff] }
 0x657   :  { %v4929_v26 = vadd.f32 %v12903_v11, %v11122_v14  ;;  %v4930_v56 = vadd.f32 %v12904_v36, %v11126_v52  ;;  %v4931_v46 = vadd.f32 %v12905_v15, %v11130_v60  ;;  %v12906_v4 = vld [vmem:[#allocation357_spill] sm:$0xff]  ;;  %v12907_v51 = vld [vmem:[#allocation358_spill] sm:$0xff]  ;;  %v12908_v20 = vld [vmem:[#allocation359_spill] sm:$0xff]  ;;  %5051 = vst [vmem:[#allocation10] sm:$0xff] %v4923_v59 }
 0x658   :  { %v4932_v33 = vadd.f32 %v12906_v4, %v11134_v16  ;;  %v4933_v45 = vadd.f32 %v12907_v51, %v11138_v40  ;;  %v4934_v6 = vadd.f32 %v12908_v20, %v11142_v41  ;;  %5052 = vst [vmem:[#allocation10 + $0x8] sm:$0xff] %v4924_v44  ;;  %5053 = vst [vmem:[#allocation10 + $0x10] sm:$0xff] %v4925_v32  ;;  %v12909_v8 = vld [vmem:[#allocation360_spill] sm:$0xff]  ;;  %v12910_v52 = vld [vmem:[#allocation361_spill] sm:$0xff] }
 0x659   :  { %5054 = vst [vmem:[#allocation10 + $0x18] sm:$0xff] %v4926_v2  ;;  %v4935_v14 = vadd.f32 %v12909_v8, %v11146_v48  ;;  %v4936_v53 = vadd.f32 %v12910_v52, %v11150_v1  ;;  %v12911_v60 = vld [vmem:[#allocation362_spill] sm:$0xff]  ;;  %v12912_v16 = vld [vmem:[#allocation363_spill] sm:$0xff]  ;;  %5055 = vst [vmem:[#allocation10 + $0x20] sm:$0xff] %v4927_v37 }
 0x65a   :  { %v4937_v11 = vadd.f32 %v12911_v60, %v11154_v18  ;;  %v4938_v36 = vadd.f32 %v12912_v16, %v11158_v24  ;;  %5056 = vst [vmem:[#allocation10 + $0x28] sm:$0xff] %v4928_v19  ;;  %5057 = vst [vmem:[#allocation10 + $0x30] sm:$0xff] %v4929_v26  ;;  %v12913_v40 = vld [vmem:[#allocation364_spill] sm:$0xff]  ;;  %v12914_v44 = vld [vmem:[#allocation365_spill] sm:$0xff] }
 0x65b   :  { %5058 = vst [vmem:[#allocation10 + $0x38] sm:$0xff] %v4930_v56  ;;  %v4939_v41 = vadd.f32 %v12913_v40, %v11162_v50  ;;  %v4940_v59 = vadd.f32 %v12914_v44, %v11166_v3  ;;  %v12915_v48 = vld [vmem:[#allocation366_spill] sm:$0xff]  ;;  %v12916_v1 = vld [vmem:[#allocation367_spill] sm:$0xff]  ;;  %5059 = vst [vmem:[#allocation10 + $0x40] sm:$0xff] %v4931_v46 }
 0x65c   :  { %v4941_v32 = vadd.f32 %v12915_v48, %v11170_v27  ;;  %v4942_v2 = vadd.f32 %v12916_v1, %v11174_v28  ;;  %5060 = vst [vmem:[#allocation10 + $0x48] sm:$0xff] %v4932_v33  ;;  %5061 = vst [vmem:[#allocation10 + $0x50] sm:$0xff] %v4933_v45  ;;  %v12917_v18 = vld [vmem:[#allocation368_spill] sm:$0xff]  ;;  %v12918_v19 = vld [vmem:[#allocation369_spill] sm:$0xff] }
 0x65d   :  { %5062 = vst [vmem:[#allocation10 + $0x58] sm:$0xff] %v4934_v6  ;;  %v4943_v24 = vadd.f32 %v12917_v18, %v11178_v23  ;;  %v4944_v37 = vadd.f32 %v12918_v19, %v11182_v35  ;;  %v12919_v50 = vld [vmem:[#allocation370_spill] sm:$0xff]  ;;  %v12920_v3 = vld [vmem:[#allocation371_spill] sm:$0xff]  ;;  %5063 = vst [vmem:[#allocation10 + $0x60] sm:$0xff] %v4935_v14 }
 0x65e   :  { %v4945_v26 = vadd.f32 %v12919_v50, %v11186_v38  ;;  %v4946_v56 = vadd.f32 %v12920_v3, %v11190_v30  ;;  %5064 = vst [vmem:[#allocation10 + $0x68] sm:$0xff] %v4936_v53  ;;  %5065 = vst [vmem:[#allocation10 + $0x70] sm:$0xff] %v4937_v11  ;;  %v12921_v27 = vld [vmem:[#allocation372_spill] sm:$0xff]  ;;  %v12922_v15 = vld [vmem:[#allocation373_spill] sm:$0xff] }
 0x65f   :  { %5066 = vst [vmem:[#allocation10 + $0x78] sm:$0xff] %v4938_v36  ;;  %v4947_v28 = vadd.f32 %v12921_v27, %v11194_v29  ;;  %v4948_v46 = vadd.f32 %v12922_v15, %v11198_v7  ;;  %v12923_v23 = vld [vmem:[#allocation374_spill] sm:$0xff]  ;;  %v12924_v35 = vld [vmem:[#allocation375_spill] sm:$0xff]  ;;  %5067 = vst [vmem:[#allocation10 + $0x80] sm:$0xff] %v4939_v41 }
 0x660   :  { %v4949_v4 = vadd.f32 %v12923_v23, %v11202_v42  ;;  %v4950_v33 = vadd.f32 %v12924_v35, %v11206_v49  ;;  %5068 = vst [vmem:[#allocation10 + $0x88] sm:$0xff] %v4940_v59  ;;  %5069 = vst [vmem:[#allocation10 + $0x90] sm:$0xff] %v4941_v32  ;;  %v12925_v38 = vld [vmem:[#allocation376_spill] sm:$0xff]  ;;  %v12926_v51 = vld [vmem:[#allocation377_spill] sm:$0xff] }
 0x661   :  { %5070 = vst [vmem:[#allocation10 + $0x98] sm:$0xff] %v4942_v2  ;;  %v4951_v30 = vadd.f32 %v12925_v38, %v11210_v54  ;;  %v4952_v45 = vadd.f32 %v12926_v51, %v11214_v47  ;;  %v12927_v29 = vld [vmem:[#allocation378_spill] sm:$0xff]  ;;  %v12928_v7 = vld [vmem:[#allocation379_spill] sm:$0xff]  ;;  %5071 = vst [vmem:[#allocation10 + $0xa0] sm:$0xff] %v4943_v24 }
 0x662   :  { %v4953_v20 = vadd.f32 %v12927_v29, %v11218_v58  ;;  %v4954_v6 = vadd.f32 %v12928_v7, %v11222_v61  ;;  %5072 = vst [vmem:[#allocation10 + $0xa8] sm:$0xff] %v4944_v37  ;;  %5073 = vst [vmem:[#allocation10 + $0xb0] sm:$0xff] %v4945_v26  ;;  %v12929_v42 = vld [vmem:[#allocation380_spill] sm:$0xff]  ;;  %v12930_v8 = vld [vmem:[#allocation381_spill] sm:$0xff] }
 0x663   :  { %5074 = vst [vmem:[#allocation10 + $0xb8] sm:$0xff] %v4946_v56  ;;  %v4955_v49 = vadd.f32 %v12929_v42, %v11226_v34  ;;  %v4956_v14 = vadd.f32 %v12930_v8, %v11230_v0  ;;  %v12931_v54 = vld [vmem:[#allocation382_spill] sm:$0xff]  ;;  %v12932_v47 = vld [vmem:[#allocation383_spill] sm:$0xff]  ;;  %5075 = vst [vmem:[#allocation10 + $0xc0] sm:$0xff] %v4947_v28 }
 0x664   :  { %v4957_v52 = vadd.f32 %v12931_v54, %v11234_v5  ;;  %v4958_v53 = vadd.f32 %v12932_v47, %v11238_v39  ;;  %5076 = vst [vmem:[#allocation10 + $0xc8] sm:$0xff] %v4948_v46  ;;  %5077 = vst [vmem:[#allocation10 + $0xd0] sm:$0xff] %v4949_v4  ;;  %v12933_v58 = vld [vmem:[#allocation384_spill] sm:$0xff]  ;;  %v12934_v60 = vld [vmem:[#allocation385_spill] sm:$0xff] }
 0x665   :  { %5078 = vst [vmem:[#allocation10 + $0xd8] sm:$0xff] %v4950_v33  ;;  %v4959_v61 = vadd.f32 %v12933_v58, %v11242_v43  ;;  %v4960_v11 = vadd.f32 %v12934_v60, %v11246_v22  ;;  %v12935_v34 = vld [vmem:[#allocation386_spill] sm:$0xff]  ;;  %v12936_v0 = vld [vmem:[#allocation387_spill] sm:$0xff]  ;;  %5079 = vst [vmem:[#allocation10 + $0xe0] sm:$0xff] %v4951_v30 }
 0x666   :  { %v4961_v16 = vadd.f32 %v12935_v34, %v11250_v55  ;;  %v4962_v36 = vadd.f32 %v12936_v0, %v11254_v10  ;;  %5080 = vst [vmem:[#allocation10 + $0xe8] sm:$0xff] %v4952_v45  ;;  %5081 = vst [vmem:[#allocation10 + $0xf0] sm:$0xff] %v4953_v20  ;;  %v12937_v5 = vld [vmem:[#allocation155_spill] sm:$0xff]  ;;  %v12938_v39 = vld [vmem:[#allocation388_spill] sm:$0xff] }
 0x667   :  { %5082 = vst [vmem:[#allocation10 + $0xf8] sm:$0xff] %v4954_v6  ;;  %v4963_v40 = vadd.f32 %v12938_v39, %v12937_v5  ;;  %v12939_v41 = vld [vmem:[#allocation53_spill] sm:$0xff]  ;;  %v12941_v43 = vld [vmem:[#allocation156_spill] sm:$0xff]  ;;  %v12942_v48 = vld [vmem:[#allocation390_spill] sm:$0xff] }
 0x668   :  { %v12940_v44 = vld [vmem:[#allocation389_spill] sm:$0xff]  ;;  %v4965_v32 = vadd.f32 %v12942_v48, %v12941_v43  ;;  %v12943_v22 = vld [vmem:[#allocation54_spill] sm:$0xff]  ;;  %v12944_v1 = vld [vmem:[#allocation391_spill] sm:$0xff]  ;;  %5083 = vst [vmem:[#allocation10 + $0x100] sm:$0xff] %v4955_v49 }
 0x669   :  { %v4964_v59 = vadd.f32 %v12940_v44, %v12939_v41  ;;  %v4966_v2 = vadd.f32 %v12944_v1, %v12943_v22  ;;  %5084 = vst [vmem:[#allocation10 + $0x108] sm:$0xff] %v4956_v14  ;;  %5085 = vst [vmem:[#allocation10 + $0x110] sm:$0xff] %v4957_v52  ;;  %v12945_v55 = vld [vmem:[#allocation157_spill] sm:$0xff]  ;;  %v12946_v10 = vld [vmem:[#allocation392_spill] sm:$0xff] }
 0x66a   :  { %5086 = vst [vmem:[#allocation10 + $0x118] sm:$0xff] %v4958_v53  ;;  %v4967_v18 = vadd.f32 %v12946_v10, %v12945_v55  ;;  %v12947_v24 = vld [vmem:[#allocation55_spill] sm:$0xff]  ;;  %v12948_v19 = vld [vmem:[#allocation393_spill] sm:$0xff]  ;;  %v12949_v50 = vld [vmem:[#allocation158_spill] sm:$0xff] }
 0x66b   :  { %v4968_v37 = vadd.f32 %v12948_v19, %v12947_v24  ;;  %v12950_v26 = vld [vmem:[#allocation394_spill] sm:$0xff]  ;;  %v12951_v56 = vld [vmem:[#allocation56_spill] sm:$0xff]  ;;  %v12952_v27 = vld [vmem:[#allocation395_spill] sm:$0xff]  ;;  %5087 = vst [vmem:[#allocation10 + $0x120] sm:$0xff] %v4959_v61 }
 0x66c   :  { %v4969_v3 = vadd.f32 %v12950_v26, %v12949_v50  ;;  %v4970_v28 = vadd.f32 %v12952_v27, %v12951_v56  ;;  %5088 = vst [vmem:[#allocation10 + $0x128] sm:$0xff] %v4960_v11  ;;  %5089 = vst [vmem:[#allocation10 + $0x130] sm:$0xff] %v4961_v16  ;;  %v12953_v15 = vld [vmem:[#allocation159_spill] sm:$0xff]  ;;  %v12954_v46 = vld [vmem:[#allocation396_spill] sm:$0xff] }
 0x66d   :  { %5090 = vst [vmem:[#allocation10 + $0x138] sm:$0xff] %v4962_v36  ;;  %v4971_v23 = vadd.f32 %v12954_v46, %v12953_v15  ;;  %v12955_v4 = vld [vmem:[#allocation57_spill] sm:$0xff]  ;;  %v12957_v38 = vld [vmem:[#allocation160_spill] sm:$0xff]  ;;  %v12958_v30 = vld [vmem:[#allocation398_spill] sm:$0xff] }
 0x66e   :  { %v12956_v35 = vld [vmem:[#allocation397_spill] sm:$0xff]  ;;  %v4973_v51 = vadd.f32 %v12958_v30, %v12957_v38  ;;  %v12959_v45 = vld [vmem:[#allocation58_spill] sm:$0xff]  ;;  %v12960_v29 = vld [vmem:[#allocation399_spill] sm:$0xff]  ;;  %5091 = vst [vmem:[#allocation10 + $0x140] sm:$0xff] %v4963_v40 }
 0x66f   :  { %v4972_v33 = vadd.f32 %v12956_v35, %v12955_v4  ;;  %v4974_v20 = vadd.f32 %v12960_v29, %v12959_v45  ;;  %5092 = vst [vmem:[#allocation10 + $0x148] sm:$0xff] %v4964_v59  ;;  %5093 = vst [vmem:[#allocation10 + $0x150] sm:$0xff] %v4965_v32  ;;  %v12961_v7 = vld [vmem:[#allocation161_spill] sm:$0xff]  ;;  %v12962_v6 = vld [vmem:[#allocation400_spill] sm:$0xff] }
 0x670   :  { %5094 = vst [vmem:[#allocation10 + $0x158] sm:$0xff] %v4966_v2  ;;  %v4975_v42 = vadd.f32 %v12962_v6, %v12961_v7  ;;  %v12963_v49 = vld [vmem:[#allocation59_spill] sm:$0xff]  ;;  %v12964_v8 = vld [vmem:[#allocation401_spill] sm:$0xff]  ;;  %v12965_v54 = vld [vmem:[#allocation162_spill] sm:$0xff] }
 0x671   :  { %v4976_v14 = vadd.f32 %v12964_v8, %v12963_v49  ;;  %v12966_v52 = vld [vmem:[#allocation402_spill] sm:$0xff]  ;;  %v12967_v53 = vld [vmem:[#allocation60_spill] sm:$0xff]  ;;  %v12968_v58 = vld [vmem:[#allocation403_spill] sm:$0xff]  ;;  %5095 = vst [vmem:[#allocation10 + $0x160] sm:$0xff] %v4967_v18 }
 0x672   :  { %v4977_v47 = vadd.f32 %v12966_v52, %v12965_v54  ;;  %v4978_v61 = vadd.f32 %v12968_v58, %v12967_v53  ;;  %5096 = vst [vmem:[#allocation10 + $0x168] sm:$0xff] %v4968_v37  ;;  %5097 = vst [vmem:[#allocation10 + $0x170] sm:$0xff] %v4969_v3  ;;  %v12969_v60 = vld [vmem:[#allocation163_spill] sm:$0xff]  ;;  %v12970_v11 = vld [vmem:[#allocation404_spill] sm:$0xff] }
 0x673   :  { %5098 = vst [vmem:[#allocation10 + $0x178] sm:$0xff] %v4970_v28  ;;  %v4979_v34 = vadd.f32 %v12970_v11, %v12969_v60  ;;  %v12971_v16 = vld [vmem:[#allocation61_spill] sm:$0xff]  ;;  %v12973_v5 = vld [vmem:[#allocation164_spill] sm:$0xff]  ;;  %v12974_v39 = vld [vmem:[#allocation406_spill] sm:$0xff] }
 0x674   :  { %v12972_v0 = vld [vmem:[#allocation405_spill] sm:$0xff]  ;;  %v4981_v40 = vadd.f32 %v12974_v39, %v12973_v5  ;;  %v12975_v41 = vld [vmem:[#allocation62_spill] sm:$0xff]  ;;  %v12976_v44 = vld [vmem:[#allocation407_spill] sm:$0xff]  ;;  %5099 = vst [vmem:[#allocation10 + $0x180] sm:$0xff] %v4971_v23 }
 0x675   :  { %v4980_v36 = vadd.f32 %v12972_v0, %v12971_v16  ;;  %v4982_v59 = vadd.f32 %v12976_v44, %v12975_v41  ;;  %5100 = vst [vmem:[#allocation10 + $0x188] sm:$0xff] %v4972_v33  ;;  %5101 = vst [vmem:[#allocation10 + $0x190] sm:$0xff] %v4973_v51  ;;  %v12977_v43 = vld [vmem:[#allocation165_spill] sm:$0xff]  ;;  %v12978_v48 = vld [vmem:[#allocation408_spill] sm:$0xff] }
 0x676   :  { %5102 = vst [vmem:[#allocation10 + $0x198] sm:$0xff] %v4974_v20  ;;  %v4983_v32 = vadd.f32 %v12978_v48, %v12977_v43  ;;  %v12979_v22 = vld [vmem:[#allocation63_spill] sm:$0xff]  ;;  %v12980_v1 = vld [vmem:[#allocation409_spill] sm:$0xff]  ;;  %v12981_v55 = vld [vmem:[#allocation166_spill] sm:$0xff] }
 0x677   :  { %v4984_v2 = vadd.f32 %v12980_v1, %v12979_v22  ;;  %v12982_v10 = vld [vmem:[#allocation410_spill] sm:$0xff]  ;;  %v12983_v24 = vld [vmem:[#allocation64_spill] sm:$0xff]  ;;  %v12984_v19 = vld [vmem:[#allocation411_spill] sm:$0xff]  ;;  %5103 = vst [vmem:[#allocation10 + $0x1a0] sm:$0xff] %v4975_v42 }
 0x678   :  { %v4985_v18 = vadd.f32 %v12982_v10, %v12981_v55  ;;  %v4986_v37 = vadd.f32 %v12984_v19, %v12983_v24  ;;  %5104 = vst [vmem:[#allocation10 + $0x1a8] sm:$0xff] %v4976_v14  ;;  %5105 = vst [vmem:[#allocation10 + $0x1b0] sm:$0xff] %v4977_v47  ;;  %v12985_v50 = vld [vmem:[#allocation167_spill] sm:$0xff]  ;;  %v12986_v26 = vld [vmem:[#allocation412_spill] sm:$0xff] }
 0x679   :  { %5106 = vst [vmem:[#allocation10 + $0x1b8] sm:$0xff] %v4978_v61  ;;  %v4987_v3 = vadd.f32 %v12986_v26, %v12985_v50  ;;  %v12987_v56 = vld [vmem:[#allocation65_spill] sm:$0xff]  ;;  %v12989_v15 = vld [vmem:[#allocation168_spill] sm:$0xff]  ;;  %v12990_v46 = vld [vmem:[#allocation414_spill] sm:$0xff] }
 0x67a   :  { %v12988_v27 = vld [vmem:[#allocation413_spill] sm:$0xff]  ;;  %v4989_v23 = vadd.f32 %v12990_v46, %v12989_v15  ;;  %v12991_v4 = vld [vmem:[#allocation66_spill] sm:$0xff]  ;;  %v12992_v35 = vld [vmem:[#allocation415_spill] sm:$0xff]  ;;  %5107 = vst [vmem:[#allocation10 + $0x1c0] sm:$0xff] %v4979_v34 }
 0x67b   :  { %v4988_v28 = vadd.f32 %v12988_v27, %v12987_v56  ;;  %v4990_v33 = vadd.f32 %v12992_v35, %v12991_v4  ;;  %5108 = vst [vmem:[#allocation10 + $0x1c8] sm:$0xff] %v4980_v36  ;;  %5109 = vst [vmem:[#allocation10 + $0x1d0] sm:$0xff] %v4981_v40  ;;  %v12993_v38 = vld [vmem:[#allocation169_spill] sm:$0xff]  ;;  %v12994_v30 = vld [vmem:[#allocation416_spill] sm:$0xff] }
 0x67c   :  { %5110 = vst [vmem:[#allocation10 + $0x1d8] sm:$0xff] %v4982_v59  ;;  %v4991_v51 = vadd.f32 %v12994_v30, %v12993_v38  ;;  %v12995_v45 = vld [vmem:[#allocation67_spill] sm:$0xff]  ;;  %v12996_v29 = vld [vmem:[#allocation417_spill] sm:$0xff]  ;;  %v12997_v7 = vld [vmem:[#allocation170_spill] sm:$0xff] }
 0x67d   :  { %v4992_v20 = vadd.f32 %v12996_v29, %v12995_v45  ;;  %v12998_v6 = vld [vmem:[#allocation418_spill] sm:$0xff]  ;;  %v12999_v49 = vld [vmem:[#allocation68_spill] sm:$0xff]  ;;  %v13000_v8 = vld [vmem:[#allocation419_spill] sm:$0xff]  ;;  %5111 = vst [vmem:[#allocation10 + $0x1e0] sm:$0xff] %v4983_v32 }
 0x67e   :  { %v4993_v42 = vadd.f32 %v12998_v6, %v12997_v7  ;;  %v4994_v14 = vadd.f32 %v13000_v8, %v12999_v49  ;;  %5112 = vst [vmem:[#allocation10 + $0x1e8] sm:$0xff] %v4984_v2  ;;  %5113 = vst [vmem:[#allocation10 + $0x1f0] sm:$0xff] %v4985_v18  ;;  %v13001_v54 = vld [vmem:[#allocation171_spill] sm:$0xff]  ;;  %v13002_v52 = vld [vmem:[#allocation420_spill] sm:$0xff] }
 0x67f   :  { %5114 = vst [vmem:[#allocation10 + $0x1f8] sm:$0xff] %v4986_v37  ;;  %v4995_v47 = vadd.f32 %v13002_v52, %v13001_v54  ;;  %v13003_v53 = vld [vmem:[#allocation69_spill] sm:$0xff]  ;;  %v13005_v60 = vld [vmem:[#allocation172_spill] sm:$0xff]  ;;  %v13006_v11 = vld [vmem:[#allocation422_spill] sm:$0xff] }
 0x680   :  { %v13004_v58 = vld [vmem:[#allocation421_spill] sm:$0xff]  ;;  %v4997_v34 = vadd.f32 %v13006_v11, %v13005_v60  ;;  %v13007_v16 = vld [vmem:[#allocation70_spill] sm:$0xff]  ;;  %v13008_v0 = vld [vmem:[#allocation423_spill] sm:$0xff]  ;;  %5115 = vst [vmem:[#allocation10 + $0x200] sm:$0xff] %v4987_v3 }
 0x681   :  { %v4996_v61 = vadd.f32 %v13004_v58, %v13003_v53  ;;  %v4998_v36 = vadd.f32 %v13008_v0, %v13007_v16  ;;  %5116 = vst [vmem:[#allocation10 + $0x208] sm:$0xff] %v4988_v28  ;;  %5117 = vst [vmem:[#allocation10 + $0x210] sm:$0xff] %v4989_v23  ;;  %v13009_v5 = vld [vmem:[#allocation173_spill] sm:$0xff]  ;;  %v13010_v39 = vld [vmem:[#allocation424_spill] sm:$0xff] }
 0x682   :  { %5118 = vst [vmem:[#allocation10 + $0x218] sm:$0xff] %v4990_v33  ;;  %v4999_v40 = vadd.f32 %v13010_v39, %v13009_v5  ;;  %v13011_v41 = vld [vmem:[#allocation71_spill] sm:$0xff]  ;;  %v13012_v44 = vld [vmem:[#allocation425_spill] sm:$0xff]  ;;  %v13013_v43 = vld [vmem:[#allocation174_spill] sm:$0xff] }
 0x683   :  { %v5000_v59 = vadd.f32 %v13012_v44, %v13011_v41  ;;  %v13014_v48 = vld [vmem:[#allocation426_spill] sm:$0xff]  ;;  %v13015_v22 = vld [vmem:[#allocation72_spill] sm:$0xff]  ;;  %v13016_v1 = vld [vmem:[#allocation427_spill] sm:$0xff]  ;;  %5119 = vst [vmem:[#allocation10 + $0x220] sm:$0xff] %v4991_v51 }
 0x684   :  { %v5001_v32 = vadd.f32 %v13014_v48, %v13013_v43  ;;  %v5002_v2 = vadd.f32 %v13016_v1, %v13015_v22  ;;  %5120 = vst [vmem:[#allocation10 + $0x228] sm:$0xff] %v4992_v20  ;;  %5121 = vst [vmem:[#allocation10 + $0x230] sm:$0xff] %v4993_v42  ;;  %v13017_v55 = vld [vmem:[#allocation175_spill] sm:$0xff]  ;;  %v13018_v10 = vld [vmem:[#allocation428_spill] sm:$0xff] }
 0x685   :  { %5122 = vst [vmem:[#allocation10 + $0x238] sm:$0xff] %v4994_v14  ;;  %v5003_v18 = vadd.f32 %v13018_v10, %v13017_v55  ;;  %v13019_v24 = vld [vmem:[#allocation73_spill] sm:$0xff]  ;;  %v13021_v50 = vld [vmem:[#allocation176_spill] sm:$0xff]  ;;  %v13022_v26 = vld [vmem:[#allocation430_spill] sm:$0xff] }
 0x686   :  { %v13020_v19 = vld [vmem:[#allocation429_spill] sm:$0xff]  ;;  %v5005_v3 = vadd.f32 %v13022_v26, %v13021_v50  ;;  %v13023_v56 = vld [vmem:[#allocation74_spill] sm:$0xff]  ;;  %v13024_v27 = vld [vmem:[#allocation431_spill] sm:$0xff]  ;;  %5123 = vst [vmem:[#allocation10 + $0x240] sm:$0xff] %v4995_v47 }
 0x687   :  { %v5004_v37 = vadd.f32 %v13020_v19, %v13019_v24  ;;  %v5006_v28 = vadd.f32 %v13024_v27, %v13023_v56  ;;  %5124 = vst [vmem:[#allocation10 + $0x248] sm:$0xff] %v4996_v61  ;;  %5125 = vst [vmem:[#allocation10 + $0x250] sm:$0xff] %v4997_v34  ;;  %v13025_v15 = vld [vmem:[#allocation177_spill] sm:$0xff]  ;;  %v13026_v46 = vld [vmem:[#allocation432_spill] sm:$0xff] }
 0x688   :  { %5126 = vst [vmem:[#allocation10 + $0x258] sm:$0xff] %v4998_v36  ;;  %v5007_v23 = vadd.f32 %v13026_v46, %v13025_v15  ;;  %v13027_v4 = vld [vmem:[#allocation75_spill] sm:$0xff]  ;;  %v13028_v35 = vld [vmem:[#allocation433_spill] sm:$0xff]  ;;  %v13029_v38 = vld [vmem:[#allocation178_spill] sm:$0xff] }
 0x689   :  { %v5008_v33 = vadd.f32 %v13028_v35, %v13027_v4  ;;  %v13030_v30 = vld [vmem:[#allocation434_spill] sm:$0xff]  ;;  %v13031_v45 = vld [vmem:[#allocation76_spill] sm:$0xff]  ;;  %v13032_v29 = vld [vmem:[#allocation435_spill] sm:$0xff]  ;;  %5127 = vst [vmem:[#allocation10 + $0x260] sm:$0xff] %v4999_v40 }
 0x68a   :  { %v5009_v51 = vadd.f32 %v13030_v30, %v13029_v38  ;;  %v5010_v20 = vadd.f32 %v13032_v29, %v13031_v45  ;;  %5128 = vst [vmem:[#allocation10 + $0x268] sm:$0xff] %v5000_v59  ;;  %5129 = vst [vmem:[#allocation10 + $0x270] sm:$0xff] %v5001_v32  ;;  %v13033_v7 = vld [vmem:[#allocation179_spill] sm:$0xff]  ;;  %v13034_v6 = vld [vmem:[#allocation436_spill] sm:$0xff] }
 0x68b   :  { %5130 = vst [vmem:[#allocation10 + $0x278] sm:$0xff] %v5002_v2  ;;  %v5011_v42 = vadd.f32 %v13034_v6, %v13033_v7  ;;  %v13035_v49 = vld [vmem:[#allocation77_spill] sm:$0xff]  ;;  %v13037_v54 = vld [vmem:[#allocation180_spill] sm:$0xff]  ;;  %v13038_v52 = vld [vmem:[#allocation438_spill] sm:$0xff] }
 0x68c   :  { %v13036_v8 = vld [vmem:[#allocation437_spill] sm:$0xff]  ;;  %v5013_v47 = vadd.f32 %v13038_v52, %v13037_v54  ;;  %v13039_v53 = vld [vmem:[#allocation78_spill] sm:$0xff]  ;;  %v13040_v58 = vld [vmem:[#allocation439_spill] sm:$0xff]  ;;  %5131 = vst [vmem:[#allocation10 + $0x280] sm:$0xff] %v5003_v18 }
 0x68d   :  { %v5012_v14 = vadd.f32 %v13036_v8, %v13035_v49  ;;  %v5014_v61 = vadd.f32 %v13040_v58, %v13039_v53  ;;  %5132 = vst [vmem:[#allocation10 + $0x288] sm:$0xff] %v5004_v37  ;;  %5133 = vst [vmem:[#allocation10 + $0x290] sm:$0xff] %v5005_v3  ;;  %v13041_v60 = vld [vmem:[#allocation181_spill] sm:$0xff]  ;;  %v13042_v11 = vld [vmem:[#allocation440_spill] sm:$0xff] }
 0x68e   :  { %5134 = vst [vmem:[#allocation10 + $0x298] sm:$0xff] %v5006_v28  ;;  %v5015_v34 = vadd.f32 %v13042_v11, %v13041_v60  ;;  %v13043_v16 = vld [vmem:[#allocation79_spill] sm:$0xff]  ;;  %v13044_v0 = vld [vmem:[#allocation441_spill] sm:$0xff]  ;;  %v13045_v5 = vld [vmem:[#allocation182_spill] sm:$0xff] }
 0x68f   :  { %v5016_v36 = vadd.f32 %v13044_v0, %v13043_v16  ;;  %v13046_v39 = vld [vmem:[#allocation442_spill] sm:$0xff]  ;;  %v13047_v41 = vld [vmem:[#allocation80_spill] sm:$0xff]  ;;  %v13048_v44 = vld [vmem:[#allocation443_spill] sm:$0xff]  ;;  %5135 = vst [vmem:[#allocation10 + $0x2a0] sm:$0xff] %v5007_v23 }
 0x690   :  { %v5017_v40 = vadd.f32 %v13046_v39, %v13045_v5  ;;  %v5018_v59 = vadd.f32 %v13048_v44, %v13047_v41  ;;  %5136 = vst [vmem:[#allocation10 + $0x2a8] sm:$0xff] %v5008_v33  ;;  %5137 = vst [vmem:[#allocation10 + $0x2b0] sm:$0xff] %v5009_v51  ;;  %v13049_v43 = vld [vmem:[#allocation183_spill] sm:$0xff]  ;;  %v13050_v48 = vld [vmem:[#allocation444_spill] sm:$0xff] }
 0x691   :  { %5138 = vst [vmem:[#allocation10 + $0x2b8] sm:$0xff] %v5010_v20  ;;  %v5019_v32 = vadd.f32 %v13050_v48, %v13049_v43  ;;  %v13051_v22 = vld [vmem:[#allocation81_spill] sm:$0xff]  ;;  %v13053_v55 = vld [vmem:[#allocation184_spill] sm:$0xff]  ;;  %v13054_v10 = vld [vmem:[#allocation446_spill] sm:$0xff] }
 0x692   :  { %v13052_v1 = vld [vmem:[#allocation445_spill] sm:$0xff]  ;;  %v5021_v18 = vadd.f32 %v13054_v10, %v13053_v55  ;;  %v13055_v24 = vld [vmem:[#allocation82_spill] sm:$0xff]  ;;  %v13056_v19 = vld [vmem:[#allocation447_spill] sm:$0xff]  ;;  %5139 = vst [vmem:[#allocation10 + $0x2c0] sm:$0xff] %v5011_v42 }
 0x693   :  { %v5020_v2 = vadd.f32 %v13052_v1, %v13051_v22  ;;  %v5022_v37 = vadd.f32 %v13056_v19, %v13055_v24  ;;  %5140 = vst [vmem:[#allocation10 + $0x2c8] sm:$0xff] %v5012_v14  ;;  %5141 = vst [vmem:[#allocation10 + $0x2d0] sm:$0xff] %v5013_v47  ;;  %v13057_v50 = vld [vmem:[#allocation185_spill] sm:$0xff]  ;;  %v13058_v26 = vld [vmem:[#allocation448_spill] sm:$0xff] }
 0x694   :  { %5142 = vst [vmem:[#allocation10 + $0x2d8] sm:$0xff] %v5014_v61  ;;  %v5023_v3 = vadd.f32 %v13058_v26, %v13057_v50  ;;  %v13059_v56 = vld [vmem:[#allocation83_spill] sm:$0xff]  ;;  %v13060_v27 = vld [vmem:[#allocation449_spill] sm:$0xff]  ;;  %v13061_v15 = vld [vmem:[#allocation186_spill] sm:$0xff] }
 0x695   :  { %v5024_v28 = vadd.f32 %v13060_v27, %v13059_v56  ;;  %v13062_v46 = vld [vmem:[#allocation450_spill] sm:$0xff]  ;;  %v13063_v4 = vld [vmem:[#allocation84_spill] sm:$0xff]  ;;  %v13064_v35 = vld [vmem:[#allocation451_spill] sm:$0xff]  ;;  %5143 = vst [vmem:[#allocation10 + $0x2e0] sm:$0xff] %v5015_v34 }
 0x696   :  { %v5025_v23 = vadd.f32 %v13062_v46, %v13061_v15  ;;  %v5026_v33 = vadd.f32 %v13064_v35, %v13063_v4  ;;  %5144 = vst [vmem:[#allocation10 + $0x2e8] sm:$0xff] %v5016_v36  ;;  %5145 = vst [vmem:[#allocation10 + $0x2f0] sm:$0xff] %v5017_v40  ;;  %v13065_v38 = vld [vmem:[#allocation187_spill] sm:$0xff]  ;;  %v13066_v30 = vld [vmem:[#allocation452_spill] sm:$0xff] }
 0x697   :  { %5146 = vst [vmem:[#allocation10 + $0x2f8] sm:$0xff] %v5018_v59  ;;  %v5027_v51 = vadd.f32 %v13066_v30, %v13065_v38  ;;  %v13067_v45 = vld [vmem:[#allocation85_spill] sm:$0xff]  ;;  %v13069_v7 = vld [vmem:[#allocation188_spill] sm:$0xff]  ;;  %v13070_v6 = vld [vmem:[#allocation454_spill] sm:$0xff] }
 0x698   :  { %v13068_v29 = vld [vmem:[#allocation453_spill] sm:$0xff]  ;;  %v5029_v42 = vadd.f32 %v13070_v6, %v13069_v7  ;;  %v13071_v49 = vld [vmem:[#allocation86_spill] sm:$0xff]  ;;  %v13072_v8 = vld [vmem:[#allocation455_spill] sm:$0xff]  ;;  %5147 = vst [vmem:[#allocation10 + $0x300] sm:$0xff] %v5019_v32 }
 0x699   :  { %v5028_v20 = vadd.f32 %v13068_v29, %v13067_v45  ;;  %v5030_v14 = vadd.f32 %v13072_v8, %v13071_v49  ;;  %5148 = vst [vmem:[#allocation10 + $0x308] sm:$0xff] %v5020_v2  ;;  %5149 = vst [vmem:[#allocation10 + $0x310] sm:$0xff] %v5021_v18  ;;  %v13073_v54 = vld [vmem:[#allocation189_spill] sm:$0xff]  ;;  %v13074_v52 = vld [vmem:[#allocation456_spill] sm:$0xff] }
 0x69a   :  { %5150 = vst [vmem:[#allocation10 + $0x318] sm:$0xff] %v5022_v37  ;;  %v5031_v47 = vadd.f32 %v13074_v52, %v13073_v54  ;;  %v13075_v53 = vld [vmem:[#allocation87_spill] sm:$0xff]  ;;  %v13076_v58 = vld [vmem:[#allocation457_spill] sm:$0xff]  ;;  %v13077_v60 = vld [vmem:[#allocation190_spill] sm:$0xff] }
 0x69b   :  { %v5032_v61 = vadd.f32 %v13076_v58, %v13075_v53  ;;  %v13078_v11 = vld [vmem:[#allocation458_spill] sm:$0xff]  ;;  %v13079_v16 = vld [vmem:[#allocation88_spill] sm:$0xff]  ;;  %v13080_v0 = vld [vmem:[#allocation459_spill] sm:$0xff]  ;;  %5151 = vst [vmem:[#allocation10 + $0x320] sm:$0xff] %v5023_v3 }
 0x69c   :  { %v5033_v34 = vadd.f32 %v13078_v11, %v13077_v60  ;;  %v5034_v36 = vadd.f32 %v13080_v0, %v13079_v16  ;;  %5152 = vst [vmem:[#allocation10 + $0x328] sm:$0xff] %v5024_v28  ;;  %5153 = vst [vmem:[#allocation10 + $0x330] sm:$0xff] %v5025_v23  ;;  %v13081_v5 = vld [vmem:[#allocation191_spill] sm:$0xff]  ;;  %v13082_v39 = vld [vmem:[#allocation460_spill] sm:$0xff] }
 0x69d   :  { %5154 = vst [vmem:[#allocation10 + $0x338] sm:$0xff] %v5026_v33  ;;  %v5035_v40 = vadd.f32 %v13082_v39, %v13081_v5  ;;  %v13083_v41 = vld [vmem:[#allocation89_spill] sm:$0xff]  ;;  %v13085_v43 = vld [vmem:[#allocation192_spill] sm:$0xff]  ;;  %v13086_v48 = vld [vmem:[#allocation462_spill] sm:$0xff] }
 0x69e   :  { %v13084_v44 = vld [vmem:[#allocation461_spill] sm:$0xff]  ;;  %v5037_v32 = vadd.f32 %v13086_v48, %v13085_v43  ;;  %v13087_v22 = vld [vmem:[#allocation463_spill] sm:$0xff]  ;;  %5155 = vst [vmem:[#allocation10 + $0x340] sm:$0xff] %v5027_v51  ;;  %5156 = vst [vmem:[#allocation10 + $0x348] sm:$0xff] %v5028_v20 }
 0x69f   :  { %v5036_v59 = vadd.f32 %v13084_v44, %v13083_v41  ;;  %v5038_v1 = vadd.f32 %v13087_v22, %v11558_v62  ;;  %5157 = vst [vmem:[#allocation10 + $0x350] sm:$0xff] %v5029_v42  ;;  %5158 = vst [vmem:[#allocation10 + $0x358] sm:$0xff] %v5030_v14  ;;  %v13088_v2 = vld [vmem:[#allocation464_spill] sm:$0xff]  ;;  %v13089_v10 = vld [vmem:[#allocation465_spill] sm:$0xff] }
 0x6a0   :  { %v5039_v55 = vadd.f32 %v13088_v2, %v11562_v9  ;;  %v5040_v18 = vadd.f32 %v13089_v10, %v11566_v17  ;;  %v13090_v24 = vld [vmem:[#allocation466_spill] sm:$0xff]  ;;  %v13091_v37 = vld [vmem:[#allocation467_spill] sm:$0xff]  ;;  %5159 = vst [vmem:[#allocation10 + $0x360] sm:$0xff] %v5031_v47  ;;  %5160 = vst [vmem:[#allocation10 + $0x368] sm:$0xff] %v5032_v61 }
 0x6a1   :  { %v5041_v19 = vadd.f32 %v13090_v24, %v11570_v12  ;;  %v5042_v50 = vadd.f32 %v13091_v37, %v11574_v13  ;;  %5161 = vst [vmem:[#allocation10 + $0x370] sm:$0xff] %v5033_v34  ;;  %5162 = vst [vmem:[#allocation10 + $0x378] sm:$0xff] %v5034_v36  ;;  %v13092_v62 = vld [vmem:[#allocation468_spill] sm:$0xff]  ;;  %v13093_v3 = vld [vmem:[#allocation469_spill] sm:$0xff] }
 0x6a2   :  { %v5043_v26 = vadd.f32 %v13092_v62, %v11578_v57  ;;  %v5044_v56 = vadd.f32 %v13093_v3, %v11582_v25  ;;  %v13094_v9 = vld [vmem:[#allocation470_spill] sm:$0xff]  ;;  %v13096_v28 = vld [vmem:[#allocation471_spill] sm:$0xff]  ;;  %5163 = vst [vmem:[#allocation10 + $0x380] sm:$0xff] %v5035_v40  ;;  %5164 = vst [vmem:[#allocation10 + $0x388] sm:$0xff] %v5036_v59 }
 0x6a3   :  { %v5045_v27 = vadd.f32 %v13094_v9, %v11586_v63  ;;  %v13095_v17 = vld [vmem:[#allocation90_spill] sm:$0xff]  ;;  %5165 = vst [vmem:[#allocation10 + $0x390] sm:$0xff] %v5037_v32  ;;  %5166 = vst [vmem:[#allocation10 + $0x398] sm:$0xff] %v5038_v1  ;;  %v13097_v12 = vld [vmem:[#allocation472_spill] sm:$0xff] }
 0x6a4   :  { %v5046_v15 = vadd.f32 %v13096_v28, %v13095_v17  ;;  %v5047_v13 = vadd.f32 %v13097_v12, %v11594_v21  ;;  %v13098_v46 = vld [vmem:[#allocation193_spill] sm:$0xff]  ;;  %v13100_v57 = vld [vmem:[#allocation91_spill] sm:$0xff]  ;;  %v13101_v35 = vld [vmem:[#allocation474_spill] sm:$0xff]  ;;  %5167 = vst [vmem:[#allocation10 + $0x3a0] sm:$0xff] %v5039_v55 }
 0x6a5   :  { %v13099_v23 = vld [vmem:[#allocation473_spill] sm:$0xff]  ;;  %v5049_v33 = vadd.f32 %v13101_v35, %v13100_v57  ;;  %v13102_v25 = vld [vmem:[#allocation475_spill] sm:$0xff]  ;;  %5168 = vst [vmem:[#allocation10 + $0x3a8] sm:$0xff] %v5040_v18  ;;  %5169 = vst [vmem:[#allocation10 + $0x3b0] sm:$0xff] %v5041_v19 }
 0x6a6   :  { %v5048_v4 = vadd.f32 %v13099_v23, %v13098_v46  ;;  %v5050_v38 = vadd.f32 %v13102_v25, %v11606_v31  ;;  %5170 = vst [vmem:[#allocation10 + $0x3b8] sm:$0xff] %v5042_v50  ;;  %5171 = vst [vmem:[#allocation10 + $0x3c0] sm:$0xff] %v5043_v26 }
 0x6a7   :  { %5172 = vst [vmem:[#allocation10 + $0x3c8] sm:$0xff] %v5044_v56  ;;  %5173 = vst [vmem:[#allocation10 + $0x3d0] sm:$0xff] %v5045_v27 }
 0x6a8   :  { %5174 = vst [vmem:[#allocation10 + $0x3d8] sm:$0xff] %v5046_v15  ;;  %5175 = vst [vmem:[#allocation10 + $0x3e0] sm:$0xff] %v5047_v13 }
 0x6a9   :  { %5176 = vst [vmem:[#allocation10 + $0x3e8] sm:$0xff] %v5048_v4  ;;  %5177 = vst [vmem:[#allocation10 + $0x3f0] sm:$0xff] %v5049_v33 }
 0x6aa   :  { %5178 = vst [vmem:[#allocation10 + $0x3f8] sm:$0xff] %v5050_v38 }
 0x6ab   :  { %7716 = shalt.err (!%p7713_p10)
}
 0x6ac   :  { %5190 = dma.vmem_to_hbm [thread:$0]  %s5185_s3, 16384, %s11874_s4, [#allocation4], %s7734_s18, %s7734_s18, %s7735_s19  }
 0x6ad   :  { %7731 = dma.done.wait [#allocation4], 16384  }
 0x6ae   :  { %7732 = vsyncadd [#allocation4], 4294950912 }
 0x6af   :  { %5194 = vsyncpa [#allocation3], 1 }
 0x6b0   :  { %5195 = vsyncpa [#allocation6], 1 }
 0x6b1   :  { %5196 = vsyncpa [#allocation9], 1 }
 0x6b2   :  { %5197 = vsyncpa [#allocation4], 1 }

</bundles_post_ra>
